<compile_context>
chip_gen: v7x
topology: tpu7x:2x2x1
jax: 0.10.0
libtpu: 0.0.40
codegen_flags: <defaults>
</compile_context>

<pallas_src>
import functools

import jax
import jax.numpy as jnp
from jax.experimental import pallas as pl
from jax.experimental.pallas import tpu as pltpu

NUM_CLASSES = 12
NUM_LAYERS = 10
BP = 8            # padded batch (sublane width)
OUTP = 128        # padded logits lane width


# ----------------------------------------------------------------------------
# Single fused kernel: 10 LSTM layers + MLP head, everything VMEM-resident.
# ----------------------------------------------------------------------------
def _fused_kernel(x_ref, wih0_ref, wih_ref, whh_ref, b_ref,
                  w1_ref, b1_ref, w2_ref, b2_ref, w3_ref, b3_ref,
                  out_ref, proj_a, proj_b, *, T, H, num_layers):
    """Refs (gate order inside the 4H=128 lane block is [i | f | o | g]):
      x_ref:    (T*BP, FP)       f32  time-major, batch/feature padded input
      wih0_ref: (FP, 4H)         bf16 layer-0 input weights
      wih_ref:  (L-1, H, 4H)     bf16 layer>=1 input weights (no K padding)
      whh_ref:  (L, H, 4H)       bf16 recurrent weights (no K padding)
      b_ref:    (L, 1, 4H)       f32  combined b_ih + b_hh
      w1/b1, w2/b2, w3/b3             MLP head (w* bf16, b* f32, fc_final padded)
      out_ref:  (BP, OUTP)       f32  lane-dense padded logits
      proj_a/b: (T*BP, 4H)       f32  double-buffered input-projection scratch
    """
    GH = 4 * H
    bf16 = jnp.bfloat16

    # Hoisted lane constants (JAX does not CSE broadcasts -> build once).
    lane = jax.lax.broadcasted_iota(jnp.int32, (BP, GH), 1)
    tanh_lanes = lane >= 3 * H                      # g gate lanes use raw tanh
    pre = jnp.where(tanh_lanes, jnp.float32(1.0), jnp.float32(0.5))
    post_b = jnp.where(tanh_lanes, jnp.float32(0.0), jnp.float32(0.5))
    # sigmoid(x) = 0.5 * (1 + tanh(x/2))  ->  act = tanh(gates*pre) * pre + post_b

    def run_layer(layer, src_ref, dst_ref):
        is_last = layer == num_layers - 1
        whh = whh_ref[layer]                        # (H, 4H) bf16
        if not is_last:
            wih_next = wih_ref[layer]               # layer+1 input weights
            b_next = b_ref[layer + 1]               # (1, 4H) f32
        h = jnp.zeros((BP, H), jnp.float32)
        c = jnp.zeros((BP, H), jnp.float32)
        # Fully unrolled time loop: T is small & static -> aligned static slices,
        # and the scheduler sees the whole recurrence.
        for t in range(T):
            gates = (src_ref[t * BP:(t + 1) * BP, :] +
                     jnp.dot(h.astype(bf16), whh,
                             preferred_element_type=jnp.float32))
            act = jnp.tanh(gates * pre) * pre + post_b      # one EUP pass
            i_g = act[:, 0 * H:1 * H]
            f_g = act[:, 1 * H:2 * H]
            o_g = act[:, 2 * H:3 * H]
            g_g = act[:, 3 * H:4 * H]
            c = f_g * c + i_g * g_g
            h = o_g * jnp.tanh(c)
            if not is_last:
                # Next layer's input projection, interleaved (off critical path).
                dst_ref[t * BP:(t + 1) * BP, :] = (
                    jnp.dot(h.astype(bf16), wih_next,
                            preferred_element_type=jnp.float32) + b_next)
        return h

    # Layer 0: hoisted input projection (bias folded in).
    proj_a[...] = (jnp.dot(x_ref[...].astype(bf16), wih0_ref[...],
                           preferred_element_type=jnp.float32) + b_ref[0])

    src, dst = proj_a, proj_b
    h_last = None
    for layer in range(num_layers):
        h_last = run_layer(layer, src, dst)
        src, dst = dst, src

    # MLP head on the resident h_last (dropouts are identity in eval mode).
    z = jnp.maximum(h_last, 0.0)
    z = jnp.maximum(
        jnp.dot(z.astype(bf16), w1_ref[...],
                preferred_element_type=jnp.float32) + b1_ref[...], 0.0)
    z = jnp.maximum(
        jnp.dot(z.astype(bf16), w2_ref[...],
                preferred_element_type=jnp.float32) + b2_ref[...], 0.0)
    z = (jnp.dot(z.astype(bf16), w3_ref[...],
                 preferred_element_type=jnp.float32) + b3_ref[...])
    out_ref[...] = z.astype(out_ref.dtype)


# ----------------------------------------------------------------------------
# Wrapper: pad batch to 8 sublanes, run the single fused kernel, un-pad.
# ----------------------------------------------------------------------------
def lstm_for_best_forward(x, packed):
    B, T, F = x.shape
    (wih0, wih_rest, whh, bias, w1, b1, w2, b2, w3, b3) = packed
    L, H, GH = whh.shape
    FP = wih0.shape[0]
    assert B <= BP and F <= FP

    x_tm = jnp.transpose(x, (1, 0, 2)).astype(jnp.float32)        # (T, B, F)
    x_pad = jnp.zeros((T, BP, FP), jnp.float32).at[:, :B, :F].set(x_tm)
    x_flat = x_pad.reshape(T * BP, FP)

    kernel = functools.partial(_fused_kernel, T=T, H=H, num_layers=L)
    out_pad = pl.pallas_call(
        kernel,
        out_shape=jax.ShapeDtypeStruct((BP, OUTP), jnp.float32),
        scratch_shapes=[
            pltpu.VMEM((T * BP, GH), jnp.float32),    # proj buffer A
            pltpu.VMEM((T * BP, GH), jnp.float32),    # proj buffer B
        ],
    )(x_flat, wih0, wih_rest, whh, bias, w1, b1, w2, b2, w3, b3)
    return out_pad[:B, :NUM_CLASSES]


# ----------------------------------------------------------------------------
# Parameter construction (mirrors torch nn.LSTM / nn.Linear shapes & init)
# ----------------------------------------------------------------------------
def init_params(key, num_features, hidden_units, num_layers=NUM_LAYERS,
                num_classes=NUM_CLASSES):
    raw = {"lstm": [], "fc": None}
    k_l = float(1.0 / (hidden_units ** 0.5))
    for layer in range(num_layers):
        d_in = num_features if layer == 0 else hidden_units
        key, k1, k2, k3, k4 = jax.random.split(key, 5)
        w_ih = jax.random.uniform(k1, (4 * hidden_units, d_in),
                                  minval=-k_l, maxval=k_l, dtype=jnp.float32)
        w_hh = jax.random.uniform(k2, (4 * hidden_units, hidden_units),
                                  minval=-k_l, maxval=k_l, dtype=jnp.float32)
        b_ih = jax.random.uniform(k3, (4 * hidden_units,),
                                  minval=-k_l, maxval=k_l, dtype=jnp.float32)
        b_hh = jax.random.uniform(k4, (4 * hidden_units,),
                                  minval=-k_l, maxval=k_l, dtype=jnp.float32)
        raw["lstm"].append((w_ih, w_hh, b_ih, b_hh))

    def linear(key, fan_in, fan_out):
        k = float(1.0 / (fan_in ** 0.5))
        k1, k2 = jax.random.split(key)
        w = jax.random.uniform(k1, (fan_out, fan_in),
                               minval=-k, maxval=k, dtype=jnp.float32)
        b = jax.random.uniform(k2, (fan_out,),
                               minval=-k, maxval=k, dtype=jnp.float32)
        return w, b

    key, kf1, kf2, kf3 = jax.random.split(key, 4)
    raw["fc"] = (*linear(kf1, hidden_units, 256),
                 *linear(kf2, 256, 128),
                 *linear(kf3, 128, num_classes))
    return raw


def _reorder_gate_cols(w_t, H):
    """(D, 4H) torch gate order [i|f|g|o] -> kernel order [i|f|o|g]."""
    return jnp.concatenate([w_t[:, 0:H], w_t[:, H:2 * H],
                            w_t[:, 3 * H:4 * H], w_t[:, 2 * H:3 * H]], axis=1)


def pack_params(raw, hidden_units):
    """Padded / transposed / bf16 weight layout for the fused kernel.

    Correctness note (from the perf review): with 4*H == 128 there is no longer
    any intra-gate lane padding. The only zero padding left is fc_final's output
    columns / bias lanes and the batch/feature padding of x -- none of it feeds
    back into the recurrence, so no nonzero-padding leak is possible.
    """
    H = hidden_units
    bf = jnp.bfloat16
    lstm = raw["lstm"]
    F = lstm[0][0].shape[1]
    FP = max(8, F)

    wih0_t = _reorder_gate_cols(lstm[0][0].T.astype(jnp.float32), H)   # (F, 4H)
    wih0 = jnp.zeros((FP, 4 * H), jnp.float32).at[:F, :].set(wih0_t).astype(bf)
    wih_rest = jnp.stack([
        _reorder_gate_cols(w_ih.T.astype(jnp.float32), H)
        for (w_ih, _, _, _) in lstm[1:]]).astype(bf)                   # (L-1,H,4H)
    whh = jnp.stack([
        _reorder_gate_cols(w_hh.T.astype(jnp.float32), H)
        for (_, w_hh, _, _) in lstm]).astype(bf)                       # (L,H,4H)
    bias = jnp.stack([
        _reorder_gate_cols((b_ih + b_hh).reshape(1, -1).astype(jnp.float32), H)
        for (_, _, b_ih, b_hh) in lstm])                               # (L,1,4H) f32

    W1, b1, W2, b2, W3, b3 = raw["fc"]
    w1 = W1.T.astype(jnp.float32).astype(bf)                           # (H, 256)
    w2 = W2.T.astype(jnp.float32).astype(bf)                           # (256, 128)
    nc = W3.shape[0]
    w3 = (jnp.zeros((W3.shape[1], OUTP), jnp.float32)
          .at[:, :nc].set(W3.T.astype(jnp.float32)).astype(bf))        # (128, 128)
    b3p = jnp.zeros((1, OUTP), jnp.float32).at[0, :nc].set(b3)
    return (wih0, wih_rest, whh, bias,
            w1, b1.reshape(1, -1).astype(jnp.float32),
            w2, b2.reshape(1, -1).astype(jnp.float32),
            w3, b3p)


# ----------------------------------------------------------------------------
# Pure-JAX reference (un-padded) mirroring the kernel's bf16-operand /
# f32-accumulation numerics, for validation.
# ----------------------------------------------------------------------------
def reference_forward(x, raw):
    bf = jnp.bfloat16

    def mm(a, b):
        return jnp.dot(a.astype(bf), b.astype(bf),
                       preferred_element_type=jnp.float32)

    seq = jnp.transpose(x, (1, 0, 2)).astype(jnp.float32)      # (T, B, F)
    T, B = seq.shape[0], seq.shape[1]
    for (w_ih, w_hh, b_ih, b_hh) in raw["lstm"]:
        H = w_hh.shape[1]
        bias = (b_ih + b_hh).astype(jnp.float32)
        h = jnp.zeros((B, H), jnp.float32)
        c = jnp.zeros((B, H), jnp.float32)
        outs = []
        for t in range(T):
            gates = mm(seq[t], w_ih.T) + mm(h, w_hh.T) + bias
            i = jax.nn.sigmoid(gates[:, 0 * H:1 * H])
            f = jax.nn.sigmoid(gates[:, 1 * H:2 * H])
            g = jnp.tanh(gates[:, 2 * H:3 * H])
            o = jax.nn.sigmoid(gates[:, 3 * H:4 * H])
            c = f * c + i * g
            h = o * jnp.tanh(c)
            outs.append(h)
        seq = jnp.stack(outs)
    h_last = seq[-1]
    W1, b1, W2, b2, W3, b3 = raw["fc"]
    z = jnp.maximum(h_last, 0.0)
    z = jnp.maximum(mm(z, W1.T) + b1, 0.0)
    z = jnp.maximum(mm(z, W2.T) + b2, 0.0)
    return mm(z, W3.T) + b3


if __name__ == "__main__":
    # Shapes implied by the module: batch=2, seq_length=8, num_features=4,
    # hidden_units=32, num_layers=10 (fixed), num_classes=12 (fixed).
    B, T, F, H = 2, 8, 4, 32

    key = jax.random.PRNGKey(0)
    key, kx = jax.random.split(key)
    x = jax.random.normal(kx, (B, T, F), dtype=jnp.float32)

    raw = init_params(key, num_features=F, hidden_units=H)
    packed = pack_params(raw, hidden_units=H)

    fwd = jax.jit(lstm_for_best_forward)
    out = jax.block_until_ready(fwd(x, packed))
    assert out.shape == (B, NUM_CLASSES), out.shape

    ref = jax.block_until_ready(jax.jit(reference_forward)(x, raw))
    err = float(jnp.max(jnp.abs(out - ref)))
    assert jnp.allclose(out, ref, atol=2e-2, rtol=2e-2), f"max_abs_err={err}"

    print("KERNEL_OK")
</pallas_src>

<mosaic_0001>
module attributes {stable_mosaic.version = 11 : i64} {
  func.func @_fused_kernel(%arg0: memref<64x8xf32, #tpu.memory_space<vmem>>, %arg1: memref<8x128xbf16, #tpu.memory_space<vmem>>, %arg2: memref<9x32x128xbf16, #tpu.memory_space<vmem>>, %arg3: memref<10x32x128xbf16, #tpu.memory_space<vmem>>, %arg4: memref<10x1x128xf32, #tpu.memory_space<vmem>>, %arg5: memref<32x256xbf16, #tpu.memory_space<vmem>>, %arg6: memref<1x256xf32, #tpu.memory_space<vmem>>, %arg7: memref<256x128xbf16, #tpu.memory_space<vmem>>, %arg8: memref<1x128xf32, #tpu.memory_space<vmem>>, %arg9: memref<128x128xbf16, #tpu.memory_space<vmem>>, %arg10: memref<1x128xf32, #tpu.memory_space<vmem>>, %arg11: memref<8x128xf32, #tpu.memory_space<vmem>>, %arg12: memref<64x128xf32, #tpu.memory_space<vmem>>, %arg13: memref<64x128xf32, #tpu.memory_space<vmem>>) attributes {dimension_semantics = [], scalar_prefetch = 0 : i64, scratch_operands = 2 : i64, tpu.core_type = #tpu.core_type<tc>} {
    %0 = tpu.iota {dimensions = array<i32: 1>} : vector<8x128xi32>
    %c96_i32 = arith.constant 96 : i32
    %1 = vector.broadcast %c96_i32 : i32 to vector<8x128xi32>
    %2 = arith.cmpi sge, %0, %1 : vector<8x128xi32>
    %cst = arith.constant 1.000000e+00 : f32
    %cst_0 = arith.constant 5.000000e-01 : f32
    %3 = vector.broadcast %cst : f32 to vector<8x128xf32>
    %4 = vector.broadcast %cst_0 : f32 to vector<8x128xf32>
    %5 = arith.select %2, %3, %4 : vector<8x128xi1>, vector<8x128xf32>
    %cst_1 = arith.constant 0.000000e+00 : f32
    %cst_2 = arith.constant 5.000000e-01 : f32
    %6 = vector.broadcast %cst_1 : f32 to vector<8x128xf32>
    %7 = vector.broadcast %cst_2 : f32 to vector<8x128xf32>
    %8 = arith.select %2, %6, %7 : vector<8x128xi1>, vector<8x128xf32>
    %c0 = arith.constant 0 : index
    %c0_3 = arith.constant 0 : index
    %9 = vector.load %arg0[%c0, %c0_3] : memref<64x8xf32, #tpu.memory_space<vmem>>, vector<64x8xf32>
    %10 = arith.truncf %9 : vector<64x8xf32> to vector<64x8xbf16>
    %c0_4 = arith.constant 0 : index
    %c0_5 = arith.constant 0 : index
    %11 = vector.load %arg1[%c0_4, %c0_5] : memref<8x128xbf16, #tpu.memory_space<vmem>>, vector<8x128xbf16>
    %cst_6 = arith.constant dense<0.000000e+00> : vector<64x128xf32>
    %12 = tpu.matmul %10, %11, %cst_6 {dimension_numbers = #tpu.dot_dimension_numbers<[1], [0], [0], [1], [0, 0, 1, 1], [], []>} : vector<64x8xbf16>, vector<8x128xbf16>, vector<64x128xf32> -> vector<64x128xf32>
    %c0_7 = arith.constant 0 : index
    %c0_8 = arith.constant 0 : index
    %c0_9 = arith.constant 0 : index
    %13 = vector.load %arg4[%c0_7, %c0_8, %c0_9] : memref<10x1x128xf32, #tpu.memory_space<vmem>>, vector<1x1x128xf32>
    %14 = vector.shape_cast %13 : vector<1x1x128xf32> to vector<1x128xf32>
    %15 = vector.broadcast %14 : vector<1x128xf32> to vector<64x128xf32>
    %16 = arith.addf %12, %15 : vector<64x128xf32>
    %c0_10 = arith.constant 0 : index
    %c0_11 = arith.constant 0 : index
    %17 = vector.load %arg12[%c0_10, %c0_11] : memref<64x128xf32, #tpu.memory_space<vmem>>, vector<64x128xf32>
    tpu.vector_store %arg12[%c0_10, %c0_11], %16 {strides = array<i32>} : memref<64x128xf32, #tpu.memory_space<vmem>>, vector<64x128xf32>,
    %c0_12 = arith.constant 0 : index
    %c0_13 = arith.constant 0 : index
    %c0_14 = arith.constant 0 : index
    %18 = vector.load %arg3[%c0_12, %c0_13, %c0_14] : memref<10x32x128xbf16, #tpu.memory_space<vmem>>, vector<1x32x128xbf16>
    %19 = vector.shape_cast %18 : vector<1x32x128xbf16> to vector<32x128xbf16>
    %c0_15 = arith.constant 0 : index
    %c0_16 = arith.constant 0 : index
    %c0_17 = arith.constant 0 : index
    %20 = vector.load %arg2[%c0_15, %c0_16, %c0_17] : memref<9x32x128xbf16, #tpu.memory_space<vmem>>, vector<1x32x128xbf16>
    %21 = vector.shape_cast %20 : vector<1x32x128xbf16> to vector<32x128xbf16>
    %c1 = arith.constant 1 : index
    %c0_18 = arith.constant 0 : index
    %c0_19 = arith.constant 0 : index
    %22 = vector.load %arg4[%c1, %c0_18, %c0_19] : memref<10x1x128xf32, #tpu.memory_space<vmem>>, vector<1x1x128xf32>
    %23 = vector.shape_cast %22 : vector<1x1x128xf32> to vector<1x128xf32>
    %cst_20 = arith.constant 0.000000e+00 : f32
    %24 = vector.broadcast %cst_20 : f32 to vector<8x32xf32>
    %cst_21 = arith.constant 0.000000e+00 : f32
    %25 = vector.broadcast %cst_21 : f32 to vector<8x32xf32>
    %c0_22 = arith.constant 0 : index
    %c0_23 = arith.constant 0 : index
    %26 = vector.load %arg12[%c0_22, %c0_23] : memref<64x128xf32, #tpu.memory_space<vmem>>, vector<8x128xf32>
    %27 = arith.truncf %24 : vector<8x32xf32> to vector<8x32xbf16>
    %cst_24 = arith.constant dense<0.000000e+00> : vector<8x128xf32>
    %28 = tpu.matmul %27, %19, %cst_24 {dimension_numbers = #tpu.dot_dimension_numbers<[1], [0], [0], [1], [0, 0, 1, 1], [], []>} : vector<8x32xbf16>, vector<32x128xbf16>, vector<8x128xf32> -> vector<8x128xf32>
    %29 = arith.addf %26, %28 : vector<8x128xf32>
    %30 = arith.mulf %29, %5 : vector<8x128xf32>
    %31 = math.tanh %30 : vector<8x128xf32>
    %32 = arith.mulf %31, %5 : vector<8x128xf32>
    %33 = arith.addf %32, %8 : vector<8x128xf32>
    %34 = vector.extract_strided_slice %33 {offsets = [0, 0], sizes = [8, 32], strides = [1, 1]} : vector<8x128xf32> to vector<8x32xf32>
    %35 = vector.extract_strided_slice %33 {offsets = [0, 32], sizes = [8, 32], strides = [1, 1]} : vector<8x128xf32> to vector<8x32xf32>
    %36 = vector.extract_strided_slice %33 {offsets = [0, 64], sizes = [8, 32], strides = [1, 1]} : vector<8x128xf32> to vector<8x32xf32>
    %37 = vector.extract_strided_slice %33 {offsets = [0, 96], sizes = [8, 32], strides = [1, 1]} : vector<8x128xf32> to vector<8x32xf32>
    %38 = arith.mulf %35, %25 : vector<8x32xf32>
    %39 = arith.mulf %34, %37 : vector<8x32xf32>
    %40 = arith.addf %38, %39 : vector<8x32xf32>
    %41 = math.tanh %40 : vector<8x32xf32>
    %42 = arith.mulf %36, %41 : vector<8x32xf32>
    %43 = arith.truncf %42 : vector<8x32xf32> to vector<8x32xbf16>
    %cst_25 = arith.constant dense<0.000000e+00> : vector<8x128xf32>
    %44 = tpu.matmul %43, %21, %cst_25 {dimension_numbers = #tpu.dot_dimension_numbers<[1], [0], [0], [1], [0, 0, 1, 1], [], []>} : vector<8x32xbf16>, vector<32x128xbf16>, vector<8x128xf32> -> vector<8x128xf32>
    %45 = vector.broadcast %23 : vector<1x128xf32> to vector<8x128xf32>
    %46 = arith.addf %44, %45 : vector<8x128xf32>
    %c0_26 = arith.constant 0 : index
    %c0_27 = arith.constant 0 : index
    %47 = vector.load %arg13[%c0_26, %c0_27] : memref<64x128xf32, #tpu.memory_space<vmem>>, vector<8x128xf32>
    tpu.vector_store %arg13[%c0_26, %c0_27], %46 {strides = array<i32>} : memref<64x128xf32, #tpu.memory_space<vmem>>, vector<8x128xf32>,
    %c8 = arith.constant 8 : index
    %c0_28 = arith.constant 0 : index
    %48 = vector.load %arg12[%c8, %c0_28] : memref<64x128xf32, #tpu.memory_space<vmem>>, vector<8x128xf32>
    %49 = arith.truncf %42 : vector<8x32xf32> to vector<8x32xbf16>
    %cst_29 = arith.constant dense<0.000000e+00> : vector<8x128xf32>
    %50 = tpu.matmul %49, %19, %cst_29 {dimension_numbers = #tpu.dot_dimension_numbers<[1], [0], [0], [1], [0, 0, 1, 1], [], []>} : vector<8x32xbf16>, vector<32x128xbf16>, vector<8x128xf32> -> vector<8x128xf32>
    %51 = arith.addf %48, %50 : vector<8x128xf32>
    %52 = arith.mulf %51, %5 : vector<8x128xf32>
    %53 = math.tanh %52 : vector<8x128xf32>
    %54 = arith.mulf %53, %5 : vector<8x128xf32>
    %55 = arith.addf %54, %8 : vector<8x128xf32>
    %56 = vector.extract_strided_slice %55 {offsets = [0, 0], sizes = [8, 32], strides = [1, 1]} : vector<8x128xf32> to vector<8x32xf32>
    %57 = vector.extract_strided_slice %55 {offsets = [0, 32], sizes = [8, 32], strides = [1, 1]} : vector<8x128xf32> to vector<8x32xf32>
    %58 = vector.extract_strided_slice %55 {offsets = [0, 64], sizes = [8, 32], strides = [1, 1]} : vector<8x128xf32> to vector<8x32xf32>
    %59 = vector.extract_strided_slice %55 {offsets = [0, 96], sizes = [8, 32], strides = [1, 1]} : vector<8x128xf32> to vector<8x32xf32>
    %60 = arith.mulf %57, %40 : vector<8x32xf32>
    %61 = arith.mulf %56, %59 : vector<8x32xf32>
    %62 = arith.addf %60, %61 : vector<8x32xf32>
    %63 = math.tanh %62 : vector<8x32xf32>
    %64 = arith.mulf %58, %63 : vector<8x32xf32>
    %65 = arith.truncf %64 : vector<8x32xf32> to vector<8x32xbf16>
    %cst_30 = arith.constant dense<0.000000e+00> : vector<8x128xf32>
    %66 = tpu.matmul %65, %21, %cst_30 {dimension_numbers = #tpu.dot_dimension_numbers<[1], [0], [0], [1], [0, 0, 1, 1], [], []>} : vector<8x32xbf16>, vector<32x128xbf16>, vector<8x128xf32> -> vector<8x128xf32>
    %67 = vector.broadcast %23 : vector<1x128xf32> to vector<8x128xf32>
    %68 = arith.addf %66, %67 : vector<8x128xf32>
    %c8_31 = arith.constant 8 : index
    %c0_32 = arith.constant 0 : index
    %69 = vector.load %arg13[%c8_31, %c0_32] : memref<64x128xf32, #tpu.memory_space<vmem>>, vector<8x128xf32>
    tpu.vector_store %arg13[%c8_31, %c0_32], %68 {strides = array<i32>} : memref<64x128xf32, #tpu.memory_space<vmem>>, vector<8x128xf32>,
    %c16 = arith.constant 16 : index
    %c0_33 = arith.constant 0 : index
    %70 = vector.load %arg12[%c16, %c0_33] : memref<64x128xf32, #tpu.memory_space<vmem>>, vector<8x128xf32>
    %71 = arith.truncf %64 : vector<8x32xf32> to vector<8x32xbf16>
    %cst_34 = arith.constant dense<0.000000e+00> : vector<8x128xf32>
    %72 = tpu.matmul %71, %19, %cst_34 {dimension_numbers = #tpu.dot_dimension_numbers<[1], [0], [0], [1], [0, 0, 1, 1], [], []>} : vector<8x32xbf16>, vector<32x128xbf16>, vector<8x128xf32> -> vector<8x128xf32>
    %73 = arith.addf %70, %72 : vector<8x128xf32>
    %74 = arith.mulf %73, %5 : vector<8x128xf32>
    %75 = math.tanh %74 : vector<8x128xf32>
    %76 = arith.mulf %75, %5 : vector<8x128xf32>
    %77 = arith.addf %76, %8 : vector<8x128xf32>
    %78 = vector.extract_strided_slice %77 {offsets = [0, 0], sizes = [8, 32], strides = [1, 1]} : vector<8x128xf32> to vector<8x32xf32>
    %79 = vector.extract_strided_slice %77 {offsets = [0, 32], sizes = [8, 32], strides = [1, 1]} : vector<8x128xf32> to vector<8x32xf32>
    %80 = vector.extract_strided_slice %77 {offsets = [0, 64], sizes = [8, 32], strides = [1, 1]} : vector<8x128xf32> to vector<8x32xf32>
    %81 = vector.extract_strided_slice %77 {offsets = [0, 96], sizes = [8, 32], strides = [1, 1]} : vector<8x128xf32> to vector<8x32xf32>
    %82 = arith.mulf %79, %62 : vector<8x32xf32>
    %83 = arith.mulf %78, %81 : vector<8x32xf32>
    %84 = arith.addf %82, %83 : vector<8x32xf32>
    %85 = math.tanh %84 : vector<8x32xf32>
    %86 = arith.mulf %80, %85 : vector<8x32xf32>
    %87 = arith.truncf %86 : vector<8x32xf32> to vector<8x32xbf16>
    %cst_35 = arith.constant dense<0.000000e+00> : vector<8x128xf32>
    %88 = tpu.matmul %87, %21, %cst_35 {dimension_numbers = #tpu.dot_dimension_numbers<[1], [0], [0], [1], [0, 0, 1, 1], [], []>} : vector<8x32xbf16>, vector<32x128xbf16>, vector<8x128xf32> -> vector<8x128xf32>
    %89 = vector.broadcast %23 : vector<1x128xf32> to vector<8x128xf32>
    %90 = arith.addf %88, %89 : vector<8x128xf32>
    %c16_36 = arith.constant 16 : index
    %c0_37 = arith.constant 0 : index
    %91 = vector.load %arg13[%c16_36, %c0_37] : memref<64x128xf32, #tpu.memory_space<vmem>>, vector<8x128xf32>
    tpu.vector_store %arg13[%c16_36, %c0_37], %90 {strides = array<i32>} : memref<64x128xf32, #tpu.memory_space<vmem>>, vector<8x128xf32>,
    %c24 = arith.constant 24 : index
    %c0_38 = arith.constant 0 : index
    %92 = vector.load %arg12[%c24, %c0_38] : memref<64x128xf32, #tpu.memory_space<vmem>>, vector<8x128xf32>
    %93 = arith.truncf %86 : vector<8x32xf32> to vector<8x32xbf16>
    %cst_39 = arith.constant dense<0.000000e+00> : vector<8x128xf32>
    %94 = tpu.matmul %93, %19, %cst_39 {dimension_numbers = #tpu.dot_dimension_numbers<[1], [0], [0], [1], [0, 0, 1, 1], [], []>} : vector<8x32xbf16>, vector<32x128xbf16>, vector<8x128xf32> -> vector<8x128xf32>
    %95 = arith.addf %92, %94 : vector<8x128xf32>
    %96 = arith.mulf %95, %5 : vector<8x128xf32>
    %97 = math.tanh %96 : vector<8x128xf32>
    %98 = arith.mulf %97, %5 : vector<8x128xf32>
    %99 = arith.addf %98, %8 : vector<8x128xf32>
    %100 = vector.extract_strided_slice %99 {offsets = [0, 0], sizes = [8, 32], strides = [1, 1]} : vector<8x128xf32> to vector<8x32xf32>
    %101 = vector.extract_strided_slice %99 {offsets = [0, 32], sizes = [8, 32], strides = [1, 1]} : vector<8x128xf32> to vector<8x32xf32>
    %102 = vector.extract_strided_slice %99 {offsets = [0, 64], sizes = [8, 32], strides = [1, 1]} : vector<8x128xf32> to vector<8x32xf32>
    %103 = vector.extract_strided_slice %99 {offsets = [0, 96], sizes = [8, 32], strides = [1, 1]} : vector<8x128xf32> to vector<8x32xf32>
    %104 = arith.mulf %101, %84 : vector<8x32xf32>
    %105 = arith.mulf %100, %103 : vector<8x32xf32>
    %106 = arith.addf %104, %105 : vector<8x32xf32>
    %107 = math.tanh %106 : vector<8x32xf32>
    %108 = arith.mulf %102, %107 : vector<8x32xf32>
    %109 = arith.truncf %108 : vector<8x32xf32> to vector<8x32xbf16>
    %cst_40 = arith.constant dense<0.000000e+00> : vector<8x128xf32>
    %110 = tpu.matmul %109, %21, %cst_40 {dimension_numbers = #tpu.dot_dimension_numbers<[1], [0], [0], [1], [0, 0, 1, 1], [], []>} : vector<8x32xbf16>, vector<32x128xbf16>, vector<8x128xf32> -> vector<8x128xf32>
    %111 = vector.broadcast %23 : vector<1x128xf32> to vector<8x128xf32>
    %112 = arith.addf %110, %111 : vector<8x128xf32>
    %c24_41 = arith.constant 24 : index
    %c0_42 = arith.constant 0 : index
    %113 = vector.load %arg13[%c24_41, %c0_42] : memref<64x128xf32, #tpu.memory_space<vmem>>, vector<8x128xf32>
    tpu.vector_store %arg13[%c24_41, %c0_42], %112 {strides = array<i32>} : memref<64x128xf32, #tpu.memory_space<vmem>>, vector<8x128xf32>,
    %c32 = arith.constant 32 : index
    %c0_43 = arith.constant 0 : index
    %114 = vector.load %arg12[%c32, %c0_43] : memref<64x128xf32, #tpu.memory_space<vmem>>, vector<8x128xf32>
    %115 = arith.truncf %108 : vector<8x32xf32> to vector<8x32xbf16>
    %cst_44 = arith.constant dense<0.000000e+00> : vector<8x128xf32>
    %116 = tpu.matmul %115, %19, %cst_44 {dimension_numbers = #tpu.dot_dimension_numbers<[1], [0], [0], [1], [0, 0, 1, 1], [], []>} : vector<8x32xbf16>, vector<32x128xbf16>, vector<8x128xf32> -> vector<8x128xf32>
    %117 = arith.addf %114, %116 : vector<8x128xf32>
    %118 = arith.mulf %117, %5 : vector<8x128xf32>
    %119 = math.tanh %118 : vector<8x128xf32>
    %120 = arith.mulf %119, %5 : vector<8x128xf32>
    %121 = arith.addf %120, %8 : vector<8x128xf32>
    %122 = vector.extract_strided_slice %121 {offsets = [0, 0], sizes = [8, 32], strides = [1, 1]} : vector<8x128xf32> to vector<8x32xf32>
    %123 = vector.extract_strided_slice %121 {offsets = [0, 32], sizes = [8, 32], strides = [1, 1]} : vector<8x128xf32> to vector<8x32xf32>
    %124 = vector.extract_strided_slice %121 {offsets = [0, 64], sizes = [8, 32], strides = [1, 1]} : vector<8x128xf32> to vector<8x32xf32>
    %125 = vector.extract_strided_slice %121 {offsets = [0, 96], sizes = [8, 32], strides = [1, 1]} : vector<8x128xf32> to vector<8x32xf32>
    %126 = arith.mulf %123, %106 : vector<8x32xf32>
    %127 = arith.mulf %122, %125 : vector<8x32xf32>
    %128 = arith.addf %126, %127 : vector<8x32xf32>
    %129 = math.tanh %128 : vector<8x32xf32>
    %130 = arith.mulf %124, %129 : vector<8x32xf32>
    %131 = arith.truncf %130 : vector<8x32xf32> to vector<8x32xbf16>
    %cst_45 = arith.constant dense<0.000000e+00> : vector<8x128xf32>
    %132 = tpu.matmul %131, %21, %cst_45 {dimension_numbers = #tpu.dot_dimension_numbers<[1], [0], [0], [1], [0, 0, 1, 1], [], []>} : vector<8x32xbf16>, vector<32x128xbf16>, vector<8x128xf32> -> vector<8x128xf32>
    %133 = vector.broadcast %23 : vector<1x128xf32> to vector<8x128xf32>
    %134 = arith.addf %132, %133 : vector<8x128xf32>
    %c32_46 = arith.constant 32 : index
    %c0_47 = arith.constant 0 : index
    %135 = vector.load %arg13[%c32_46, %c0_47] : memref<64x128xf32, #tpu.memory_space<vmem>>, vector<8x128xf32>
    tpu.vector_store %arg13[%c32_46, %c0_47], %134 {strides = array<i32>} : memref<64x128xf32, #tpu.memory_space<vmem>>, vector<8x128xf32>,
    %c40 = arith.constant 40 : index
    %c0_48 = arith.constant 0 : index
    %136 = vector.load %arg12[%c40, %c0_48] : memref<64x128xf32, #tpu.memory_space<vmem>>, vector<8x128xf32>
    %137 = arith.truncf %130 : vector<8x32xf32> to vector<8x32xbf16>
    %cst_49 = arith.constant dense<0.000000e+00> : vector<8x128xf32>
    %138 = tpu.matmul %137, %19, %cst_49 {dimension_numbers = #tpu.dot_dimension_numbers<[1], [0], [0], [1], [0, 0, 1, 1], [], []>} : vector<8x32xbf16>, vector<32x128xbf16>, vector<8x128xf32> -> vector<8x128xf32>
    %139 = arith.addf %136, %138 : vector<8x128xf32>
    %140 = arith.mulf %139, %5 : vector<8x128xf32>
    %141 = math.tanh %140 : vector<8x128xf32>
    %142 = arith.mulf %141, %5 : vector<8x128xf32>
    %143 = arith.addf %142, %8 : vector<8x128xf32>
    %144 = vector.extract_strided_slice %143 {offsets = [0, 0], sizes = [8, 32], strides = [1, 1]} : vector<8x128xf32> to vector<8x32xf32>
    %145 = vector.extract_strided_slice %143 {offsets = [0, 32], sizes = [8, 32], strides = [1, 1]} : vector<8x128xf32> to vector<8x32xf32>
    %146 = vector.extract_strided_slice %143 {offsets = [0, 64], sizes = [8, 32], strides = [1, 1]} : vector<8x128xf32> to vector<8x32xf32>
    %147 = vector.extract_strided_slice %143 {offsets = [0, 96], sizes = [8, 32], strides = [1, 1]} : vector<8x128xf32> to vector<8x32xf32>
    %148 = arith.mulf %145, %128 : vector<8x32xf32>
    %149 = arith.mulf %144, %147 : vector<8x32xf32>
    %150 = arith.addf %148, %149 : vector<8x32xf32>
    %151 = math.tanh %150 : vector<8x32xf32>
    %152 = arith.mulf %146, %151 : vector<8x32xf32>
    %153 = arith.truncf %152 : vector<8x32xf32> to vector<8x32xbf16>
    %cst_50 = arith.constant dense<0.000000e+00> : vector<8x128xf32>
    %154 = tpu.matmul %153, %21, %cst_50 {dimension_numbers = #tpu.dot_dimension_numbers<[1], [0], [0], [1], [0, 0, 1, 1], [], []>} : vector<8x32xbf16>, vector<32x128xbf16>, vector<8x128xf32> -> vector<8x128xf32>
    %155 = vector.broadcast %23 : vector<1x128xf32> to vector<8x128xf32>
    %156 = arith.addf %154, %155 : vector<8x128xf32>
    %c40_51 = arith.constant 40 : index
    %c0_52 = arith.constant 0 : index
    %157 = vector.load %arg13[%c40_51, %c0_52] : memref<64x128xf32, #tpu.memory_space<vmem>>, vector<8x128xf32>
    tpu.vector_store %arg13[%c40_51, %c0_52], %156 {strides = array<i32>} : memref<64x128xf32, #tpu.memory_space<vmem>>, vector<8x128xf32>,
    %c48 = arith.constant 48 : index
    %c0_53 = arith.constant 0 : index
    %158 = vector.load %arg12[%c48, %c0_53] : memref<64x128xf32, #tpu.memory_space<vmem>>, vector<8x128xf32>
    %159 = arith.truncf %152 : vector<8x32xf32> to vector<8x32xbf16>
    %cst_54 = arith.constant dense<0.000000e+00> : vector<8x128xf32>
    %160 = tpu.matmul %159, %19, %cst_54 {dimension_numbers = #tpu.dot_dimension_numbers<[1], [0], [0], [1], [0, 0, 1, 1], [], []>} : vector<8x32xbf16>, vector<32x128xbf16>, vector<8x128xf32> -> vector<8x128xf32>
    %161 = arith.addf %158, %160 : vector<8x128xf32>
    %162 = arith.mulf %161, %5 : vector<8x128xf32>
    %163 = math.tanh %162 : vector<8x128xf32>
    %164 = arith.mulf %163, %5 : vector<8x128xf32>
    %165 = arith.addf %164, %8 : vector<8x128xf32>
    %166 = vector.extract_strided_slice %165 {offsets = [0, 0], sizes = [8, 32], strides = [1, 1]} : vector<8x128xf32> to vector<8x32xf32>
    %167 = vector.extract_strided_slice %165 {offsets = [0, 32], sizes = [8, 32], strides = [1, 1]} : vector<8x128xf32> to vector<8x32xf32>
    %168 = vector.extract_strided_slice %165 {offsets = [0, 64], sizes = [8, 32], strides = [1, 1]} : vector<8x128xf32> to vector<8x32xf32>
    %169 = vector.extract_strided_slice %165 {offsets = [0, 96], sizes = [8, 32], strides = [1, 1]} : vector<8x128xf32> to vector<8x32xf32>
    %170 = arith.mulf %167, %150 : vector<8x32xf32>
    %171 = arith.mulf %166, %169 : vector<8x32xf32>
    %172 = arith.addf %170, %171 : vector<8x32xf32>
    %173 = math.tanh %172 : vector<8x32xf32>
    %174 = arith.mulf %168, %173 : vector<8x32xf32>
    %175 = arith.truncf %174 : vector<8x32xf32> to vector<8x32xbf16>
    %cst_55 = arith.constant dense<0.000000e+00> : vector<8x128xf32>
    %176 = tpu.matmul %175, %21, %cst_55 {dimension_numbers = #tpu.dot_dimension_numbers<[1], [0], [0], [1], [0, 0, 1, 1], [], []>} : vector<8x32xbf16>, vector<32x128xbf16>, vector<8x128xf32> -> vector<8x128xf32>
    %177 = vector.broadcast %23 : vector<1x128xf32> to vector<8x128xf32>
    %178 = arith.addf %176, %177 : vector<8x128xf32>
    %c48_56 = arith.constant 48 : index
    %c0_57 = arith.constant 0 : index
    %179 = vector.load %arg13[%c48_56, %c0_57] : memref<64x128xf32, #tpu.memory_space<vmem>>, vector<8x128xf32>
    tpu.vector_store %arg13[%c48_56, %c0_57], %178 {strides = array<i32>} : memref<64x128xf32, #tpu.memory_space<vmem>>, vector<8x128xf32>,
    %c56 = arith.constant 56 : index
    %c0_58 = arith.constant 0 : index
    %180 = vector.load %arg12[%c56, %c0_58] : memref<64x128xf32, #tpu.memory_space<vmem>>, vector<8x128xf32>
    %181 = arith.truncf %174 : vector<8x32xf32> to vector<8x32xbf16>
    %cst_59 = arith.constant dense<0.000000e+00> : vector<8x128xf32>
    %182 = tpu.matmul %181, %19, %cst_59 {dimension_numbers = #tpu.dot_dimension_numbers<[1], [0], [0], [1], [0, 0, 1, 1], [], []>} : vector<8x32xbf16>, vector<32x128xbf16>, vector<8x128xf32> -> vector<8x128xf32>
    %183 = arith.addf %180, %182 : vector<8x128xf32>
    %184 = arith.mulf %183, %5 : vector<8x128xf32>
    %185 = math.tanh %184 : vector<8x128xf32>
    %186 = arith.mulf %185, %5 : vector<8x128xf32>
    %187 = arith.addf %186, %8 : vector<8x128xf32>
    %188 = vector.extract_strided_slice %187 {offsets = [0, 0], sizes = [8, 32], strides = [1, 1]} : vector<8x128xf32> to vector<8x32xf32>
    %189 = vector.extract_strided_slice %187 {offsets = [0, 32], sizes = [8, 32], strides = [1, 1]} : vector<8x128xf32> to vector<8x32xf32>
    %190 = vector.extract_strided_slice %187 {offsets = [0, 64], sizes = [8, 32], strides = [1, 1]} : vector<8x128xf32> to vector<8x32xf32>
    %191 = vector.extract_strided_slice %187 {offsets = [0, 96], sizes = [8, 32], strides = [1, 1]} : vector<8x128xf32> to vector<8x32xf32>
    %192 = arith.mulf %189, %172 : vector<8x32xf32>
    %193 = arith.mulf %188, %191 : vector<8x32xf32>
    %194 = arith.addf %192, %193 : vector<8x32xf32>
    %195 = math.tanh %194 : vector<8x32xf32>
    %196 = arith.mulf %190, %195 : vector<8x32xf32>
    %197 = arith.truncf %196 : vector<8x32xf32> to vector<8x32xbf16>
    %cst_60 = arith.constant dense<0.000000e+00> : vector<8x128xf32>
    %198 = tpu.matmul %197, %21, %cst_60 {dimension_numbers = #tpu.dot_dimension_numbers<[1], [0], [0], [1], [0, 0, 1, 1], [], []>} : vector<8x32xbf16>, vector<32x128xbf16>, vector<8x128xf32> -> vector<8x128xf32>
    %199 = vector.broadcast %23 : vector<1x128xf32> to vector<8x128xf32>
    %200 = arith.addf %198, %199 : vector<8x128xf32>
    %c56_61 = arith.constant 56 : index
    %c0_62 = arith.constant 0 : index
    %201 = vector.load %arg13[%c56_61, %c0_62] : memref<64x128xf32, #tpu.memory_space<vmem>>, vector<8x128xf32>
    tpu.vector_store %arg13[%c56_61, %c0_62], %200 {strides = array<i32>} : memref<64x128xf32, #tpu.memory_space<vmem>>, vector<8x128xf32>,
    %c1_63 = arith.constant 1 : index
    %c0_64 = arith.constant 0 : index
    %c0_65 = arith.constant 0 : index
    %202 = vector.load %arg3[%c1_63, %c0_64, %c0_65] : memref<10x32x128xbf16, #tpu.memory_space<vmem>>, vector<1x32x128xbf16>
    %203 = vector.shape_cast %202 : vector<1x32x128xbf16> to vector<32x128xbf16>
    %c1_66 = arith.constant 1 : index
    %c0_67 = arith.constant 0 : index
    %c0_68 = arith.constant 0 : index
    %204 = vector.load %arg2[%c1_66, %c0_67, %c0_68] : memref<9x32x128xbf16, #tpu.memory_space<vmem>>, vector<1x32x128xbf16>
    %205 = vector.shape_cast %204 : vector<1x32x128xbf16> to vector<32x128xbf16>
    %c2 = arith.constant 2 : index
    %c0_69 = arith.constant 0 : index
    %c0_70 = arith.constant 0 : index
    %206 = vector.load %arg4[%c2, %c0_69, %c0_70] : memref<10x1x128xf32, #tpu.memory_space<vmem>>, vector<1x1x128xf32>
    %207 = vector.shape_cast %206 : vector<1x1x128xf32> to vector<1x128xf32>
    %cst_71 = arith.constant 0.000000e+00 : f32
    %208 = vector.broadcast %cst_71 : f32 to vector<8x32xf32>
    %cst_72 = arith.constant 0.000000e+00 : f32
    %209 = vector.broadcast %cst_72 : f32 to vector<8x32xf32>
    %c0_73 = arith.constant 0 : index
    %c0_74 = arith.constant 0 : index
    %210 = vector.load %arg13[%c0_73, %c0_74] : memref<64x128xf32, #tpu.memory_space<vmem>>, vector<8x128xf32>
    %211 = arith.truncf %208 : vector<8x32xf32> to vector<8x32xbf16>
    %cst_75 = arith.constant dense<0.000000e+00> : vector<8x128xf32>
    %212 = tpu.matmul %211, %203, %cst_75 {dimension_numbers = #tpu.dot_dimension_numbers<[1], [0], [0], [1], [0, 0, 1, 1], [], []>} : vector<8x32xbf16>, vector<32x128xbf16>, vector<8x128xf32> -> vector<8x128xf32>
    %213 = arith.addf %210, %212 : vector<8x128xf32>
    %214 = arith.mulf %213, %5 : vector<8x128xf32>
    %215 = math.tanh %214 : vector<8x128xf32>
    %216 = arith.mulf %215, %5 : vector<8x128xf32>
    %217 = arith.addf %216, %8 : vector<8x128xf32>
    %218 = vector.extract_strided_slice %217 {offsets = [0, 0], sizes = [8, 32], strides = [1, 1]} : vector<8x128xf32> to vector<8x32xf32>
    %219 = vector.extract_strided_slice %217 {offsets = [0, 32], sizes = [8, 32], strides = [1, 1]} : vector<8x128xf32> to vector<8x32xf32>
    %220 = vector.extract_strided_slice %217 {offsets = [0, 64], sizes = [8, 32], strides = [1, 1]} : vector<8x128xf32> to vector<8x32xf32>
    %221 = vector.extract_strided_slice %217 {offsets = [0, 96], sizes = [8, 32], strides = [1, 1]} : vector<8x128xf32> to vector<8x32xf32>
    %222 = arith.mulf %219, %209 : vector<8x32xf32>
    %223 = arith.mulf %218, %221 : vector<8x32xf32>
    %224 = arith.addf %222, %223 : vector<8x32xf32>
    %225 = math.tanh %224 : vector<8x32xf32>
    %226 = arith.mulf %220, %225 : vector<8x32xf32>
    %227 = arith.truncf %226 : vector<8x32xf32> to vector<8x32xbf16>
    %cst_76 = arith.constant dense<0.000000e+00> : vector<8x128xf32>
    %228 = tpu.matmul %227, %205, %cst_76 {dimension_numbers = #tpu.dot_dimension_numbers<[1], [0], [0], [1], [0, 0, 1, 1], [], []>} : vector<8x32xbf16>, vector<32x128xbf16>, vector<8x128xf32> -> vector<8x128xf32>
    %229 = vector.broadcast %207 : vector<1x128xf32> to vector<8x128xf32>
    %230 = arith.addf %228, %229 : vector<8x128xf32>
    %c0_77 = arith.constant 0 : index
    %c0_78 = arith.constant 0 : index
    %231 = vector.load %arg12[%c0_77, %c0_78] : memref<64x128xf32, #tpu.memory_space<vmem>>, vector<8x128xf32>
    tpu.vector_store %arg12[%c0_77, %c0_78], %230 {strides = array<i32>} : memref<64x128xf32, #tpu.memory_space<vmem>>, vector<8x128xf32>,
    %c8_79 = arith.constant 8 : index
    %c0_80 = arith.constant 0 : index
    %232 = vector.load %arg13[%c8_79, %c0_80] : memref<64x128xf32, #tpu.memory_space<vmem>>, vector<8x128xf32>
    %233 = arith.truncf %226 : vector<8x32xf32> to vector<8x32xbf16>
    %cst_81 = arith.constant dense<0.000000e+00> : vector<8x128xf32>
    %234 = tpu.matmul %233, %203, %cst_81 {dimension_numbers = #tpu.dot_dimension_numbers<[1], [0], [0], [1], [0, 0, 1, 1], [], []>} : vector<8x32xbf16>, vector<32x128xbf16>, vector<8x128xf32> -> vector<8x128xf32>
    %235 = arith.addf %232, %234 : vector<8x128xf32>
    %236 = arith.mulf %235, %5 : vector<8x128xf32>
    %237 = math.tanh %236 : vector<8x128xf32>
    %238 = arith.mulf %237, %5 : vector<8x128xf32>
    %239 = arith.addf %238, %8 : vector<8x128xf32>
    %240 = vector.extract_strided_slice %239 {offsets = [0, 0], sizes = [8, 32], strides = [1, 1]} : vector<8x128xf32> to vector<8x32xf32>
    %241 = vector.extract_strided_slice %239 {offsets = [0, 32], sizes = [8, 32], strides = [1, 1]} : vector<8x128xf32> to vector<8x32xf32>
    %242 = vector.extract_strided_slice %239 {offsets = [0, 64], sizes = [8, 32], strides = [1, 1]} : vector<8x128xf32> to vector<8x32xf32>
    %243 = vector.extract_strided_slice %239 {offsets = [0, 96], sizes = [8, 32], strides = [1, 1]} : vector<8x128xf32> to vector<8x32xf32>
    %244 = arith.mulf %241, %224 : vector<8x32xf32>
    %245 = arith.mulf %240, %243 : vector<8x32xf32>
    %246 = arith.addf %244, %245 : vector<8x32xf32>
    %247 = math.tanh %246 : vector<8x32xf32>
    %248 = arith.mulf %242, %247 : vector<8x32xf32>
    %249 = arith.truncf %248 : vector<8x32xf32> to vector<8x32xbf16>
    %cst_82 = arith.constant dense<0.000000e+00> : vector<8x128xf32>
    %250 = tpu.matmul %249, %205, %cst_82 {dimension_numbers = #tpu.dot_dimension_numbers<[1], [0], [0], [1], [0, 0, 1, 1], [], []>} : vector<8x32xbf16>, vector<32x128xbf16>, vector<8x128xf32> -> vector<8x128xf32>
    %251 = vector.broadcast %207 : vector<1x128xf32> to vector<8x128xf32>
    %252 = arith.addf %250, %251 : vector<8x128xf32>
    %c8_83 = arith.constant 8 : index
    %c0_84 = arith.constant 0 : index
    %253 = vector.load %arg12[%c8_83, %c0_84] : memref<64x128xf32, #tpu.memory_space<vmem>>, vector<8x128xf32>
    tpu.vector_store %arg12[%c8_83, %c0_84], %252 {strides = array<i32>} : memref<64x128xf32, #tpu.memory_space<vmem>>, vector<8x128xf32>,
    %c16_85 = arith.constant 16 : index
    %c0_86 = arith.constant 0 : index
    %254 = vector.load %arg13[%c16_85, %c0_86] : memref<64x128xf32, #tpu.memory_space<vmem>>, vector<8x128xf32>
    %255 = arith.truncf %248 : vector<8x32xf32> to vector<8x32xbf16>
    %cst_87 = arith.constant dense<0.000000e+00> : vector<8x128xf32>
    %256 = tpu.matmul %255, %203, %cst_87 {dimension_numbers = #tpu.dot_dimension_numbers<[1], [0], [0], [1], [0, 0, 1, 1], [], []>} : vector<8x32xbf16>, vector<32x128xbf16>, vector<8x128xf32> -> vector<8x128xf32>
    %257 = arith.addf %254, %256 : vector<8x128xf32>
    %258 = arith.mulf %257, %5 : vector<8x128xf32>
    %259 = math.tanh %258 : vector<8x128xf32>
    %260 = arith.mulf %259, %5 : vector<8x128xf32>
    %261 = arith.addf %260, %8 : vector<8x128xf32>
    %262 = vector.extract_strided_slice %261 {offsets = [0, 0], sizes = [8, 32], strides = [1, 1]} : vector<8x128xf32> to vector<8x32xf32>
    %263 = vector.extract_strided_slice %261 {offsets = [0, 32], sizes = [8, 32], strides = [1, 1]} : vector<8x128xf32> to vector<8x32xf32>
    %264 = vector.extract_strided_slice %261 {offsets = [0, 64], sizes = [8, 32], strides = [1, 1]} : vector<8x128xf32> to vector<8x32xf32>
    %265 = vector.extract_strided_slice %261 {offsets = [0, 96], sizes = [8, 32], strides = [1, 1]} : vector<8x128xf32> to vector<8x32xf32>
    %266 = arith.mulf %263, %246 : vector<8x32xf32>
    %267 = arith.mulf %262, %265 : vector<8x32xf32>
    %268 = arith.addf %266, %267 : vector<8x32xf32>
    %269 = math.tanh %268 : vector<8x32xf32>
    %270 = arith.mulf %264, %269 : vector<8x32xf32>
    %271 = arith.truncf %270 : vector<8x32xf32> to vector<8x32xbf16>
    %cst_88 = arith.constant dense<0.000000e+00> : vector<8x128xf32>
    %272 = tpu.matmul %271, %205, %cst_88 {dimension_numbers = #tpu.dot_dimension_numbers<[1], [0], [0], [1], [0, 0, 1, 1], [], []>} : vector<8x32xbf16>, vector<32x128xbf16>, vector<8x128xf32> -> vector<8x128xf32>
    %273 = vector.broadcast %207 : vector<1x128xf32> to vector<8x128xf32>
    %274 = arith.addf %272, %273 : vector<8x128xf32>
    %c16_89 = arith.constant 16 : index
    %c0_90 = arith.constant 0 : index
    %275 = vector.load %arg12[%c16_89, %c0_90] : memref<64x128xf32, #tpu.memory_space<vmem>>, vector<8x128xf32>
    tpu.vector_store %arg12[%c16_89, %c0_90], %274 {strides = array<i32>} : memref<64x128xf32, #tpu.memory_space<vmem>>, vector<8x128xf32>,
    %c24_91 = arith.constant 24 : index
    %c0_92 = arith.constant 0 : index
    %276 = vector.load %arg13[%c24_91, %c0_92] : memref<64x128xf32, #tpu.memory_space<vmem>>, vector<8x128xf32>
    %277 = arith.truncf %270 : vector<8x32xf32> to vector<8x32xbf16>
    %cst_93 = arith.constant dense<0.000000e+00> : vector<8x128xf32>
    %278 = tpu.matmul %277, %203, %cst_93 {dimension_numbers = #tpu.dot_dimension_numbers<[1], [0], [0], [1], [0, 0, 1, 1], [], []>} : vector<8x32xbf16>, vector<32x128xbf16>, vector<8x128xf32> -> vector<8x128xf32>
    %279 = arith.addf %276, %278 : vector<8x128xf32>
    %280 = arith.mulf %279, %5 : vector<8x128xf32>
    %281 = math.tanh %280 : vector<8x128xf32>
    %282 = arith.mulf %281, %5 : vector<8x128xf32>
    %283 = arith.addf %282, %8 : vector<8x128xf32>
    %284 = vector.extract_strided_slice %283 {offsets = [0, 0], sizes = [8, 32], strides = [1, 1]} : vector<8x128xf32> to vector<8x32xf32>
    %285 = vector.extract_strided_slice %283 {offsets = [0, 32], sizes = [8, 32], strides = [1, 1]} : vector<8x128xf32> to vector<8x32xf32>
    %286 = vector.extract_strided_slice %283 {offsets = [0, 64], sizes = [8, 32], strides = [1, 1]} : vector<8x128xf32> to vector<8x32xf32>
    %287 = vector.extract_strided_slice %283 {offsets = [0, 96], sizes = [8, 32], strides = [1, 1]} : vector<8x128xf32> to vector<8x32xf32>
    %288 = arith.mulf %285, %268 : vector<8x32xf32>
    %289 = arith.mulf %284, %287 : vector<8x32xf32>
    %290 = arith.addf %288, %289 : vector<8x32xf32>
    %291 = math.tanh %290 : vector<8x32xf32>
    %292 = arith.mulf %286, %291 : vector<8x32xf32>
    %293 = arith.truncf %292 : vector<8x32xf32> to vector<8x32xbf16>
    %cst_94 = arith.constant dense<0.000000e+00> : vector<8x128xf32>
    %294 = tpu.matmul %293, %205, %cst_94 {dimension_numbers = #tpu.dot_dimension_numbers<[1], [0], [0], [1], [0, 0, 1, 1], [], []>} : vector<8x32xbf16>, vector<32x128xbf16>, vector<8x128xf32> -> vector<8x128xf32>
    %295 = vector.broadcast %207 : vector<1x128xf32> to vector<8x128xf32>
    %296 = arith.addf %294, %295 : vector<8x128xf32>
    %c24_95 = arith.constant 24 : index
    %c0_96 = arith.constant 0 : index
    %297 = vector.load %arg12[%c24_95, %c0_96] : memref<64x128xf32, #tpu.memory_space<vmem>>, vector<8x128xf32>
    tpu.vector_store %arg12[%c24_95, %c0_96], %296 {strides = array<i32>} : memref<64x128xf32, #tpu.memory_space<vmem>>, vector<8x128xf32>,
    %c32_97 = arith.constant 32 : index
    %c0_98 = arith.constant 0 : index
    %298 = vector.load %arg13[%c32_97, %c0_98] : memref<64x128xf32, #tpu.memory_space<vmem>>, vector<8x128xf32>
    %299 = arith.truncf %292 : vector<8x32xf32> to vector<8x32xbf16>
    %cst_99 = arith.constant dense<0.000000e+00> : vector<8x128xf32>
    %300 = tpu.matmul %299, %203, %cst_99 {dimension_numbers = #tpu.dot_dimension_numbers<[1], [0], [0], [1], [0, 0, 1, 1], [], []>} : vector<8x32xbf16>, vector<32x128xbf16>, vector<8x128xf32> -> vector<8x128xf32>
    %301 = arith.addf %298, %300 : vector<8x128xf32>
    %302 = arith.mulf %301, %5 : vector<8x128xf32>
    %303 = math.tanh %302 : vector<8x128xf32>
    %304 = arith.mulf %303, %5 : vector<8x128xf32>
    %305 = arith.addf %304, %8 : vector<8x128xf32>
    %306 = vector.extract_strided_slice %305 {offsets = [0, 0], sizes = [8, 32], strides = [1, 1]} : vector<8x128xf32> to vector<8x32xf32>
    %307 = vector.extract_strided_slice %305 {offsets = [0, 32], sizes = [8, 32], strides = [1, 1]} : vector<8x128xf32> to vector<8x32xf32>
    %308 = vector.extract_strided_slice %305 {offsets = [0, 64], sizes = [8, 32], strides = [1, 1]} : vector<8x128xf32> to vector<8x32xf32>
    %309 = vector.extract_strided_slice %305 {offsets = [0, 96], sizes = [8, 32], strides = [1, 1]} : vector<8x128xf32> to vector<8x32xf32>
    %310 = arith.mulf %307, %290 : vector<8x32xf32>
    %311 = arith.mulf %306, %309 : vector<8x32xf32>
    %312 = arith.addf %310, %311 : vector<8x32xf32>
    %313 = math.tanh %312 : vector<8x32xf32>
    %314 = arith.mulf %308, %313 : vector<8x32xf32>
    %315 = arith.truncf %314 : vector<8x32xf32> to vector<8x32xbf16>
    %cst_100 = arith.constant dense<0.000000e+00> : vector<8x128xf32>
    %316 = tpu.matmul %315, %205, %cst_100 {dimension_numbers = #tpu.dot_dimension_numbers<[1], [0], [0], [1], [0, 0, 1, 1], [], []>} : vector<8x32xbf16>, vector<32x128xbf16>, vector<8x128xf32> -> vector<8x128xf32>
    %317 = vector.broadcast %207 : vector<1x128xf32> to vector<8x128xf32>
    %318 = arith.addf %316, %317 : vector<8x128xf32>
    %c32_101 = arith.constant 32 : index
    %c0_102 = arith.constant 0 : index
    %319 = vector.load %arg12[%c32_101, %c0_102] : memref<64x128xf32, #tpu.memory_space<vmem>>, vector<8x128xf32>
    tpu.vector_store %arg12[%c32_101, %c0_102], %318 {strides = array<i32>} : memref<64x128xf32, #tpu.memory_space<vmem>>, vector<8x128xf32>,
    %c40_103 = arith.constant 40 : index
    %c0_104 = arith.constant 0 : index
    %320 = vector.load %arg13[%c40_103, %c0_104] : memref<64x128xf32, #tpu.memory_space<vmem>>, vector<8x128xf32>
    %321 = arith.truncf %314 : vector<8x32xf32> to vector<8x32xbf16>
    %cst_105 = arith.constant dense<0.000000e+00> : vector<8x128xf32>
    %322 = tpu.matmul %321, %203, %cst_105 {dimension_numbers = #tpu.dot_dimension_numbers<[1], [0], [0], [1], [0, 0, 1, 1], [], []>} : vector<8x32xbf16>, vector<32x128xbf16>, vector<8x128xf32> -> vector<8x128xf32>
    %323 = arith.addf %320, %322 : vector<8x128xf32>
    %324 = arith.mulf %323, %5 : vector<8x128xf32>
    %325 = math.tanh %324 : vector<8x128xf32>
    %326 = arith.mulf %325, %5 : vector<8x128xf32>
    %327 = arith.addf %326, %8 : vector<8x128xf32>
    %328 = vector.extract_strided_slice %327 {offsets = [0, 0], sizes = [8, 32], strides = [1, 1]} : vector<8x128xf32> to vector<8x32xf32>
    %329 = vector.extract_strided_slice %327 {offsets = [0, 32], sizes = [8, 32], strides = [1, 1]} : vector<8x128xf32> to vector<8x32xf32>
    %330 = vector.extract_strided_slice %327 {offsets = [0, 64], sizes = [8, 32], strides = [1, 1]} : vector<8x128xf32> to vector<8x32xf32>
    %331 = vector.extract_strided_slice %327 {offsets = [0, 96], sizes = [8, 32], strides = [1, 1]} : vector<8x128xf32> to vector<8x32xf32>
    %332 = arith.mulf %329, %312 : vector<8x32xf32>
    %333 = arith.mulf %328, %331 : vector<8x32xf32>
    %334 = arith.addf %332, %333 : vector<8x32xf32>
    %335 = math.tanh %334 : vector<8x32xf32>
    %336 = arith.mulf %330, %335 : vector<8x32xf32>
    %337 = arith.truncf %336 : vector<8x32xf32> to vector<8x32xbf16>
    %cst_106 = arith.constant dense<0.000000e+00> : vector<8x128xf32>
    %338 = tpu.matmul %337, %205, %cst_106 {dimension_numbers = #tpu.dot_dimension_numbers<[1], [0], [0], [1], [0, 0, 1, 1], [], []>} : vector<8x32xbf16>, vector<32x128xbf16>, vector<8x128xf32> -> vector<8x128xf32>
    %339 = vector.broadcast %207 : vector<1x128xf32> to vector<8x128xf32>
    %340 = arith.addf %338, %339 : vector<8x128xf32>
    %c40_107 = arith.constant 40 : index
    %c0_108 = arith.constant 0 : index
    %341 = vector.load %arg12[%c40_107, %c0_108] : memref<64x128xf32, #tpu.memory_space<vmem>>, vector<8x128xf32>
    tpu.vector_store %arg12[%c40_107, %c0_108], %340 {strides = array<i32>} : memref<64x128xf32, #tpu.memory_space<vmem>>, vector<8x128xf32>,
    %c48_109 = arith.constant 48 : index
    %c0_110 = arith.constant 0 : index
    %342 = vector.load %arg13[%c48_109, %c0_110] : memref<64x128xf32, #tpu.memory_space<vmem>>, vector<8x128xf32>
    %343 = arith.truncf %336 : vector<8x32xf32> to vector<8x32xbf16>
    %cst_111 = arith.constant dense<0.000000e+00> : vector<8x128xf32>
    %344 = tpu.matmul %343, %203, %cst_111 {dimension_numbers = #tpu.dot_dimension_numbers<[1], [0], [0], [1], [0, 0, 1, 1], [], []>} : vector<8x32xbf16>, vector<32x128xbf16>, vector<8x128xf32> -> vector<8x128xf32>
    %345 = arith.addf %342, %344 : vector<8x128xf32>
    %346 = arith.mulf %345, %5 : vector<8x128xf32>
    %347 = math.tanh %346 : vector<8x128xf32>
    %348 = arith.mulf %347, %5 : vector<8x128xf32>
    %349 = arith.addf %348, %8 : vector<8x128xf32>
    %350 = vector.extract_strided_slice %349 {offsets = [0, 0], sizes = [8, 32], strides = [1, 1]} : vector<8x128xf32> to vector<8x32xf32>
    %351 = vector.extract_strided_slice %349 {offsets = [0, 32], sizes = [8, 32], strides = [1, 1]} : vector<8x128xf32> to vector<8x32xf32>
    %352 = vector.extract_strided_slice %349 {offsets = [0, 64], sizes = [8, 32], strides = [1, 1]} : vector<8x128xf32> to vector<8x32xf32>
    %353 = vector.extract_strided_slice %349 {offsets = [0, 96], sizes = [8, 32], strides = [1, 1]} : vector<8x128xf32> to vector<8x32xf32>
    %354 = arith.mulf %351, %334 : vector<8x32xf32>
    %355 = arith.mulf %350, %353 : vector<8x32xf32>
    %356 = arith.addf %354, %355 : vector<8x32xf32>
    %357 = math.tanh %356 : vector<8x32xf32>
    %358 = arith.mulf %352, %357 : vector<8x32xf32>
    %359 = arith.truncf %358 : vector<8x32xf32> to vector<8x32xbf16>
    %cst_112 = arith.constant dense<0.000000e+00> : vector<8x128xf32>
    %360 = tpu.matmul %359, %205, %cst_112 {dimension_numbers = #tpu.dot_dimension_numbers<[1], [0], [0], [1], [0, 0, 1, 1], [], []>} : vector<8x32xbf16>, vector<32x128xbf16>, vector<8x128xf32> -> vector<8x128xf32>
    %361 = vector.broadcast %207 : vector<1x128xf32> to vector<8x128xf32>
    %362 = arith.addf %360, %361 : vector<8x128xf32>
    %c48_113 = arith.constant 48 : index
    %c0_114 = arith.constant 0 : index
    %363 = vector.load %arg12[%c48_113, %c0_114] : memref<64x128xf32, #tpu.memory_space<vmem>>, vector<8x128xf32>
    tpu.vector_store %arg12[%c48_113, %c0_114], %362 {strides = array<i32>} : memref<64x128xf32, #tpu.memory_space<vmem>>, vector<8x128xf32>,
    %c56_115 = arith.constant 56 : index
    %c0_116 = arith.constant 0 : index
    %364 = vector.load %arg13[%c56_115, %c0_116] : memref<64x128xf32, #tpu.memory_space<vmem>>, vector<8x128xf32>
    %365 = arith.truncf %358 : vector<8x32xf32> to vector<8x32xbf16>
    %cst_117 = arith.constant dense<0.000000e+00> : vector<8x128xf32>
    %366 = tpu.matmul %365, %203, %cst_117 {dimension_numbers = #tpu.dot_dimension_numbers<[1], [0], [0], [1], [0, 0, 1, 1], [], []>} : vector<8x32xbf16>, vector<32x128xbf16>, vector<8x128xf32> -> vector<8x128xf32>
    %367 = arith.addf %364, %366 : vector<8x128xf32>
    %368 = arith.mulf %367, %5 : vector<8x128xf32>
    %369 = math.tanh %368 : vector<8x128xf32>
    %370 = arith.mulf %369, %5 : vector<8x128xf32>
    %371 = arith.addf %370, %8 : vector<8x128xf32>
    %372 = vector.extract_strided_slice %371 {offsets = [0, 0], sizes = [8, 32], strides = [1, 1]} : vector<8x128xf32> to vector<8x32xf32>
    %373 = vector.extract_strided_slice %371 {offsets = [0, 32], sizes = [8, 32], strides = [1, 1]} : vector<8x128xf32> to vector<8x32xf32>
    %374 = vector.extract_strided_slice %371 {offsets = [0, 64], sizes = [8, 32], strides = [1, 1]} : vector<8x128xf32> to vector<8x32xf32>
    %375 = vector.extract_strided_slice %371 {offsets = [0, 96], sizes = [8, 32], strides = [1, 1]} : vector<8x128xf32> to vector<8x32xf32>
    %376 = arith.mulf %373, %356 : vector<8x32xf32>
    %377 = arith.mulf %372, %375 : vector<8x32xf32>
    %378 = arith.addf %376, %377 : vector<8x32xf32>
    %379 = math.tanh %378 : vector<8x32xf32>
    %380 = arith.mulf %374, %379 : vector<8x32xf32>
    %381 = arith.truncf %380 : vector<8x32xf32> to vector<8x32xbf16>
    %cst_118 = arith.constant dense<0.000000e+00> : vector<8x128xf32>
    %382 = tpu.matmul %381, %205, %cst_118 {dimension_numbers = #tpu.dot_dimension_numbers<[1], [0], [0], [1], [0, 0, 1, 1], [], []>} : vector<8x32xbf16>, vector<32x128xbf16>, vector<8x128xf32> -> vector<8x128xf32>
    %383 = vector.broadcast %207 : vector<1x128xf32> to vector<8x128xf32>
    %384 = arith.addf %382, %383 : vector<8x128xf32>
    %c56_119 = arith.constant 56 : index
    %c0_120 = arith.constant 0 : index
    %385 = vector.load %arg12[%c56_119, %c0_120] : memref<64x128xf32, #tpu.memory_space<vmem>>, vector<8x128xf32>
    tpu.vector_store %arg12[%c56_119, %c0_120], %384 {strides = array<i32>} : memref<64x128xf32, #tpu.memory_space<vmem>>, vector<8x128xf32>,
    %c2_121 = arith.constant 2 : index
    %c0_122 = arith.constant 0 : index
    %c0_123 = arith.constant 0 : index
    %386 = vector.load %arg3[%c2_121, %c0_122, %c0_123] : memref<10x32x128xbf16, #tpu.memory_space<vmem>>, vector<1x32x128xbf16>
    %387 = vector.shape_cast %386 : vector<1x32x128xbf16> to vector<32x128xbf16>
    %c2_124 = arith.constant 2 : index
    %c0_125 = arith.constant 0 : index
    %c0_126 = arith.constant 0 : index
    %388 = vector.load %arg2[%c2_124, %c0_125, %c0_126] : memref<9x32x128xbf16, #tpu.memory_space<vmem>>, vector<1x32x128xbf16>
    %389 = vector.shape_cast %388 : vector<1x32x128xbf16> to vector<32x128xbf16>
    %c3 = arith.constant 3 : index
    %c0_127 = arith.constant 0 : index
    %c0_128 = arith.constant 0 : index
    %390 = vector.load %arg4[%c3, %c0_127, %c0_128] : memref<10x1x128xf32, #tpu.memory_space<vmem>>, vector<1x1x128xf32>
    %391 = vector.shape_cast %390 : vector<1x1x128xf32> to vector<1x128xf32>
    %cst_129 = arith.constant 0.000000e+00 : f32
    %392 = vector.broadcast %cst_129 : f32 to vector<8x32xf32>
    %cst_130 = arith.constant 0.000000e+00 : f32
    %393 = vector.broadcast %cst_130 : f32 to vector<8x32xf32>
    %c0_131 = arith.constant 0 : index
    %c0_132 = arith.constant 0 : index
    %394 = vector.load %arg12[%c0_131, %c0_132] : memref<64x128xf32, #tpu.memory_space<vmem>>, vector<8x128xf32>
    %395 = arith.truncf %392 : vector<8x32xf32> to vector<8x32xbf16>
    %cst_133 = arith.constant dense<0.000000e+00> : vector<8x128xf32>
    %396 = tpu.matmul %395, %387, %cst_133 {dimension_numbers = #tpu.dot_dimension_numbers<[1], [0], [0], [1], [0, 0, 1, 1], [], []>} : vector<8x32xbf16>, vector<32x128xbf16>, vector<8x128xf32> -> vector<8x128xf32>
    %397 = arith.addf %394, %396 : vector<8x128xf32>
    %398 = arith.mulf %397, %5 : vector<8x128xf32>
    %399 = math.tanh %398 : vector<8x128xf32>
    %400 = arith.mulf %399, %5 : vector<8x128xf32>
    %401 = arith.addf %400, %8 : vector<8x128xf32>
    %402 = vector.extract_strided_slice %401 {offsets = [0, 0], sizes = [8, 32], strides = [1, 1]} : vector<8x128xf32> to vector<8x32xf32>
    %403 = vector.extract_strided_slice %401 {offsets = [0, 32], sizes = [8, 32], strides = [1, 1]} : vector<8x128xf32> to vector<8x32xf32>
    %404 = vector.extract_strided_slice %401 {offsets = [0, 64], sizes = [8, 32], strides = [1, 1]} : vector<8x128xf32> to vector<8x32xf32>
    %405 = vector.extract_strided_slice %401 {offsets = [0, 96], sizes = [8, 32], strides = [1, 1]} : vector<8x128xf32> to vector<8x32xf32>
    %406 = arith.mulf %403, %393 : vector<8x32xf32>
    %407 = arith.mulf %402, %405 : vector<8x32xf32>
    %408 = arith.addf %406, %407 : vector<8x32xf32>
    %409 = math.tanh %408 : vector<8x32xf32>
    %410 = arith.mulf %404, %409 : vector<8x32xf32>
    %411 = arith.truncf %410 : vector<8x32xf32> to vector<8x32xbf16>
    %cst_134 = arith.constant dense<0.000000e+00> : vector<8x128xf32>
    %412 = tpu.matmul %411, %389, %cst_134 {dimension_numbers = #tpu.dot_dimension_numbers<[1], [0], [0], [1], [0, 0, 1, 1], [], []>} : vector<8x32xbf16>, vector<32x128xbf16>, vector<8x128xf32> -> vector<8x128xf32>
    %413 = vector.broadcast %391 : vector<1x128xf32> to vector<8x128xf32>
    %414 = arith.addf %412, %413 : vector<8x128xf32>
    %c0_135 = arith.constant 0 : index
    %c0_136 = arith.constant 0 : index
    %415 = vector.load %arg13[%c0_135, %c0_136] : memref<64x128xf32, #tpu.memory_space<vmem>>, vector<8x128xf32>
    tpu.vector_store %arg13[%c0_135, %c0_136], %414 {strides = array<i32>} : memref<64x128xf32, #tpu.memory_space<vmem>>, vector<8x128xf32>,
    %c8_137 = arith.constant 8 : index
    %c0_138 = arith.constant 0 : index
    %416 = vector.load %arg12[%c8_137, %c0_138] : memref<64x128xf32, #tpu.memory_space<vmem>>, vector<8x128xf32>
    %417 = arith.truncf %410 : vector<8x32xf32> to vector<8x32xbf16>
    %cst_139 = arith.constant dense<0.000000e+00> : vector<8x128xf32>
    %418 = tpu.matmul %417, %387, %cst_139 {dimension_numbers = #tpu.dot_dimension_numbers<[1], [0], [0], [1], [0, 0, 1, 1], [], []>} : vector<8x32xbf16>, vector<32x128xbf16>, vector<8x128xf32> -> vector<8x128xf32>
    %419 = arith.addf %416, %418 : vector<8x128xf32>
    %420 = arith.mulf %419, %5 : vector<8x128xf32>
    %421 = math.tanh %420 : vector<8x128xf32>
    %422 = arith.mulf %421, %5 : vector<8x128xf32>
    %423 = arith.addf %422, %8 : vector<8x128xf32>
    %424 = vector.extract_strided_slice %423 {offsets = [0, 0], sizes = [8, 32], strides = [1, 1]} : vector<8x128xf32> to vector<8x32xf32>
    %425 = vector.extract_strided_slice %423 {offsets = [0, 32], sizes = [8, 32], strides = [1, 1]} : vector<8x128xf32> to vector<8x32xf32>
    %426 = vector.extract_strided_slice %423 {offsets = [0, 64], sizes = [8, 32], strides = [1, 1]} : vector<8x128xf32> to vector<8x32xf32>
    %427 = vector.extract_strided_slice %423 {offsets = [0, 96], sizes = [8, 32], strides = [1, 1]} : vector<8x128xf32> to vector<8x32xf32>
    %428 = arith.mulf %425, %408 : vector<8x32xf32>
    %429 = arith.mulf %424, %427 : vector<8x32xf32>
    %430 = arith.addf %428, %429 : vector<8x32xf32>
    %431 = math.tanh %430 : vector<8x32xf32>
    %432 = arith.mulf %426, %431 : vector<8x32xf32>
    %433 = arith.truncf %432 : vector<8x32xf32> to vector<8x32xbf16>
    %cst_140 = arith.constant dense<0.000000e+00> : vector<8x128xf32>
    %434 = tpu.matmul %433, %389, %cst_140 {dimension_numbers = #tpu.dot_dimension_numbers<[1], [0], [0], [1], [0, 0, 1, 1], [], []>} : vector<8x32xbf16>, vector<32x128xbf16>, vector<8x128xf32> -> vector<8x128xf32>
    %435 = vector.broadcast %391 : vector<1x128xf32> to vector<8x128xf32>
    %436 = arith.addf %434, %435 : vector<8x128xf32>
    %c8_141 = arith.constant 8 : index
    %c0_142 = arith.constant 0 : index
    %437 = vector.load %arg13[%c8_141, %c0_142] : memref<64x128xf32, #tpu.memory_space<vmem>>, vector<8x128xf32>
    tpu.vector_store %arg13[%c8_141, %c0_142], %436 {strides = array<i32>} : memref<64x128xf32, #tpu.memory_space<vmem>>, vector<8x128xf32>,
    %c16_143 = arith.constant 16 : index
    %c0_144 = arith.constant 0 : index
    %438 = vector.load %arg12[%c16_143, %c0_144] : memref<64x128xf32, #tpu.memory_space<vmem>>, vector<8x128xf32>
    %439 = arith.truncf %432 : vector<8x32xf32> to vector<8x32xbf16>
    %cst_145 = arith.constant dense<0.000000e+00> : vector<8x128xf32>
    %440 = tpu.matmul %439, %387, %cst_145 {dimension_numbers = #tpu.dot_dimension_numbers<[1], [0], [0], [1], [0, 0, 1, 1], [], []>} : vector<8x32xbf16>, vector<32x128xbf16>, vector<8x128xf32> -> vector<8x128xf32>
    %441 = arith.addf %438, %440 : vector<8x128xf32>
    %442 = arith.mulf %441, %5 : vector<8x128xf32>
    %443 = math.tanh %442 : vector<8x128xf32>
    %444 = arith.mulf %443, %5 : vector<8x128xf32>
    %445 = arith.addf %444, %8 : vector<8x128xf32>
    %446 = vector.extract_strided_slice %445 {offsets = [0, 0], sizes = [8, 32], strides = [1, 1]} : vector<8x128xf32> to vector<8x32xf32>
    %447 = vector.extract_strided_slice %445 {offsets = [0, 32], sizes = [8, 32], strides = [1, 1]} : vector<8x128xf32> to vector<8x32xf32>
    %448 = vector.extract_strided_slice %445 {offsets = [0, 64], sizes = [8, 32], strides = [1, 1]} : vector<8x128xf32> to vector<8x32xf32>
    %449 = vector.extract_strided_slice %445 {offsets = [0, 96], sizes = [8, 32], strides = [1, 1]} : vector<8x128xf32> to vector<8x32xf32>
    %450 = arith.mulf %447, %430 : vector<8x32xf32>
    %451 = arith.mulf %446, %449 : vector<8x32xf32>
    %452 = arith.addf %450, %451 : vector<8x32xf32>
    %453 = math.tanh %452 : vector<8x32xf32>
    %454 = arith.mulf %448, %453 : vector<8x32xf32>
    %455 = arith.truncf %454 : vector<8x32xf32> to vector<8x32xbf16>
    %cst_146 = arith.constant dense<0.000000e+00> : vector<8x128xf32>
    %456 = tpu.matmul %455, %389, %cst_146 {dimension_numbers = #tpu.dot_dimension_numbers<[1], [0], [0], [1], [0, 0, 1, 1], [], []>} : vector<8x32xbf16>, vector<32x128xbf16>, vector<8x128xf32> -> vector<8x128xf32>
    %457 = vector.broadcast %391 : vector<1x128xf32> to vector<8x128xf32>
    %458 = arith.addf %456, %457 : vector<8x128xf32>
    %c16_147 = arith.constant 16 : index
    %c0_148 = arith.constant 0 : index
    %459 = vector.load %arg13[%c16_147, %c0_148] : memref<64x128xf32, #tpu.memory_space<vmem>>, vector<8x128xf32>
    tpu.vector_store %arg13[%c16_147, %c0_148], %458 {strides = array<i32>} : memref<64x128xf32, #tpu.memory_space<vmem>>, vector<8x128xf32>,
    %c24_149 = arith.constant 24 : index
    %c0_150 = arith.constant 0 : index
    %460 = vector.load %arg12[%c24_149, %c0_150] : memref<64x128xf32, #tpu.memory_space<vmem>>, vector<8x128xf32>
    %461 = arith.truncf %454 : vector<8x32xf32> to vector<8x32xbf16>
    %cst_151 = arith.constant dense<0.000000e+00> : vector<8x128xf32>
    %462 = tpu.matmul %461, %387, %cst_151 {dimension_numbers = #tpu.dot_dimension_numbers<[1], [0], [0], [1], [0, 0, 1, 1], [], []>} : vector<8x32xbf16>, vector<32x128xbf16>, vector<8x128xf32> -> vector<8x128xf32>
    %463 = arith.addf %460, %462 : vector<8x128xf32>
    %464 = arith.mulf %463, %5 : vector<8x128xf32>
    %465 = math.tanh %464 : vector<8x128xf32>
    %466 = arith.mulf %465, %5 : vector<8x128xf32>
    %467 = arith.addf %466, %8 : vector<8x128xf32>
    %468 = vector.extract_strided_slice %467 {offsets = [0, 0], sizes = [8, 32], strides = [1, 1]} : vector<8x128xf32> to vector<8x32xf32>
    %469 = vector.extract_strided_slice %467 {offsets = [0, 32], sizes = [8, 32], strides = [1, 1]} : vector<8x128xf32> to vector<8x32xf32>
    %470 = vector.extract_strided_slice %467 {offsets = [0, 64], sizes = [8, 32], strides = [1, 1]} : vector<8x128xf32> to vector<8x32xf32>
    %471 = vector.extract_strided_slice %467 {offsets = [0, 96], sizes = [8, 32], strides = [1, 1]} : vector<8x128xf32> to vector<8x32xf32>
    %472 = arith.mulf %469, %452 : vector<8x32xf32>
    %473 = arith.mulf %468, %471 : vector<8x32xf32>
    %474 = arith.addf %472, %473 : vector<8x32xf32>
    %475 = math.tanh %474 : vector<8x32xf32>
    %476 = arith.mulf %470, %475 : vector<8x32xf32>
    %477 = arith.truncf %476 : vector<8x32xf32> to vector<8x32xbf16>
    %cst_152 = arith.constant dense<0.000000e+00> : vector<8x128xf32>
    %478 = tpu.matmul %477, %389, %cst_152 {dimension_numbers = #tpu.dot_dimension_numbers<[1], [0], [0], [1], [0, 0, 1, 1], [], []>} : vector<8x32xbf16>, vector<32x128xbf16>, vector<8x128xf32> -> vector<8x128xf32>
    %479 = vector.broadcast %391 : vector<1x128xf32> to vector<8x128xf32>
    %480 = arith.addf %478, %479 : vector<8x128xf32>
    %c24_153 = arith.constant 24 : index
    %c0_154 = arith.constant 0 : index
    %481 = vector.load %arg13[%c24_153, %c0_154] : memref<64x128xf32, #tpu.memory_space<vmem>>, vector<8x128xf32>
    tpu.vector_store %arg13[%c24_153, %c0_154], %480 {strides = array<i32>} : memref<64x128xf32, #tpu.memory_space<vmem>>, vector<8x128xf32>,
    %c32_155 = arith.constant 32 : index
    %c0_156 = arith.constant 0 : index
    %482 = vector.load %arg12[%c32_155, %c0_156] : memref<64x128xf32, #tpu.memory_space<vmem>>, vector<8x128xf32>
    %483 = arith.truncf %476 : vector<8x32xf32> to vector<8x32xbf16>
    %cst_157 = arith.constant dense<0.000000e+00> : vector<8x128xf32>
    %484 = tpu.matmul %483, %387, %cst_157 {dimension_numbers = #tpu.dot_dimension_numbers<[1], [0], [0], [1], [0, 0, 1, 1], [], []>} : vector<8x32xbf16>, vector<32x128xbf16>, vector<8x128xf32> -> vector<8x128xf32>
    %485 = arith.addf %482, %484 : vector<8x128xf32>
    %486 = arith.mulf %485, %5 : vector<8x128xf32>
    %487 = math.tanh %486 : vector<8x128xf32>
    %488 = arith.mulf %487, %5 : vector<8x128xf32>
    %489 = arith.addf %488, %8 : vector<8x128xf32>
    %490 = vector.extract_strided_slice %489 {offsets = [0, 0], sizes = [8, 32], strides = [1, 1]} : vector<8x128xf32> to vector<8x32xf32>
    %491 = vector.extract_strided_slice %489 {offsets = [0, 32], sizes = [8, 32], strides = [1, 1]} : vector<8x128xf32> to vector<8x32xf32>
    %492 = vector.extract_strided_slice %489 {offsets = [0, 64], sizes = [8, 32], strides = [1, 1]} : vector<8x128xf32> to vector<8x32xf32>
    %493 = vector.extract_strided_slice %489 {offsets = [0, 96], sizes = [8, 32], strides = [1, 1]} : vector<8x128xf32> to vector<8x32xf32>
    %494 = arith.mulf %491, %474 : vector<8x32xf32>
    %495 = arith.mulf %490, %493 : vector<8x32xf32>
    %496 = arith.addf %494, %495 : vector<8x32xf32>
    %497 = math.tanh %496 : vector<8x32xf32>
    %498 = arith.mulf %492, %497 : vector<8x32xf32>
    %499 = arith.truncf %498 : vector<8x32xf32> to vector<8x32xbf16>
    %cst_158 = arith.constant dense<0.000000e+00> : vector<8x128xf32>
    %500 = tpu.matmul %499, %389, %cst_158 {dimension_numbers = #tpu.dot_dimension_numbers<[1], [0], [0], [1], [0, 0, 1, 1], [], []>} : vector<8x32xbf16>, vector<32x128xbf16>, vector<8x128xf32> -> vector<8x128xf32>
    %501 = vector.broadcast %391 : vector<1x128xf32> to vector<8x128xf32>
    %502 = arith.addf %500, %501 : vector<8x128xf32>
    %c32_159 = arith.constant 32 : index
    %c0_160 = arith.constant 0 : index
    %503 = vector.load %arg13[%c32_159, %c0_160] : memref<64x128xf32, #tpu.memory_space<vmem>>, vector<8x128xf32>
    tpu.vector_store %arg13[%c32_159, %c0_160], %502 {strides = array<i32>} : memref<64x128xf32, #tpu.memory_space<vmem>>, vector<8x128xf32>,
    %c40_161 = arith.constant 40 : index
    %c0_162 = arith.constant 0 : index
    %504 = vector.load %arg12[%c40_161, %c0_162] : memref<64x128xf32, #tpu.memory_space<vmem>>, vector<8x128xf32>
    %505 = arith.truncf %498 : vector<8x32xf32> to vector<8x32xbf16>
    %cst_163 = arith.constant dense<0.000000e+00> : vector<8x128xf32>
    %506 = tpu.matmul %505, %387, %cst_163 {dimension_numbers = #tpu.dot_dimension_numbers<[1], [0], [0], [1], [0, 0, 1, 1], [], []>} : vector<8x32xbf16>, vector<32x128xbf16>, vector<8x128xf32> -> vector<8x128xf32>
    %507 = arith.addf %504, %506 : vector<8x128xf32>
    %508 = arith.mulf %507, %5 : vector<8x128xf32>
    %509 = math.tanh %508 : vector<8x128xf32>
    %510 = arith.mulf %509, %5 : vector<8x128xf32>
    %511 = arith.addf %510, %8 : vector<8x128xf32>
    %512 = vector.extract_strided_slice %511 {offsets = [0, 0], sizes = [8, 32], strides = [1, 1]} : vector<8x128xf32> to vector<8x32xf32>
    %513 = vector.extract_strided_slice %511 {offsets = [0, 32], sizes = [8, 32], strides = [1, 1]} : vector<8x128xf32> to vector<8x32xf32>
    %514 = vector.extract_strided_slice %511 {offsets = [0, 64], sizes = [8, 32], strides = [1, 1]} : vector<8x128xf32> to vector<8x32xf32>
    %515 = vector.extract_strided_slice %511 {offsets = [0, 96], sizes = [8, 32], strides = [1, 1]} : vector<8x128xf32> to vector<8x32xf32>
    %516 = arith.mulf %513, %496 : vector<8x32xf32>
    %517 = arith.mulf %512, %515 : vector<8x32xf32>
    %518 = arith.addf %516, %517 : vector<8x32xf32>
    %519 = math.tanh %518 : vector<8x32xf32>
    %520 = arith.mulf %514, %519 : vector<8x32xf32>
    %521 = arith.truncf %520 : vector<8x32xf32> to vector<8x32xbf16>
    %cst_164 = arith.constant dense<0.000000e+00> : vector<8x128xf32>
    %522 = tpu.matmul %521, %389, %cst_164 {dimension_numbers = #tpu.dot_dimension_numbers<[1], [0], [0], [1], [0, 0, 1, 1], [], []>} : vector<8x32xbf16>, vector<32x128xbf16>, vector<8x128xf32> -> vector<8x128xf32>
    %523 = vector.broadcast %391 : vector<1x128xf32> to vector<8x128xf32>
    %524 = arith.addf %522, %523 : vector<8x128xf32>
    %c40_165 = arith.constant 40 : index
    %c0_166 = arith.constant 0 : index
    %525 = vector.load %arg13[%c40_165, %c0_166] : memref<64x128xf32, #tpu.memory_space<vmem>>, vector<8x128xf32>
    tpu.vector_store %arg13[%c40_165, %c0_166], %524 {strides = array<i32>} : memref<64x128xf32, #tpu.memory_space<vmem>>, vector<8x128xf32>,
    %c48_167 = arith.constant 48 : index
    %c0_168 = arith.constant 0 : index
    %526 = vector.load %arg12[%c48_167, %c0_168] : memref<64x128xf32, #tpu.memory_space<vmem>>, vector<8x128xf32>
    %527 = arith.truncf %520 : vector<8x32xf32> to vector<8x32xbf16>
    %cst_169 = arith.constant dense<0.000000e+00> : vector<8x128xf32>
    %528 = tpu.matmul %527, %387, %cst_169 {dimension_numbers = #tpu.dot_dimension_numbers<[1], [0], [0], [1], [0, 0, 1, 1], [], []>} : vector<8x32xbf16>, vector<32x128xbf16>, vector<8x128xf32> -> vector<8x128xf32>
    %529 = arith.addf %526, %528 : vector<8x128xf32>
    %530 = arith.mulf %529, %5 : vector<8x128xf32>
    %531 = math.tanh %530 : vector<8x128xf32>
    %532 = arith.mulf %531, %5 : vector<8x128xf32>
    %533 = arith.addf %532, %8 : vector<8x128xf32>
    %534 = vector.extract_strided_slice %533 {offsets = [0, 0], sizes = [8, 32], strides = [1, 1]} : vector<8x128xf32> to vector<8x32xf32>
    %535 = vector.extract_strided_slice %533 {offsets = [0, 32], sizes = [8, 32], strides = [1, 1]} : vector<8x128xf32> to vector<8x32xf32>
    %536 = vector.extract_strided_slice %533 {offsets = [0, 64], sizes = [8, 32], strides = [1, 1]} : vector<8x128xf32> to vector<8x32xf32>
    %537 = vector.extract_strided_slice %533 {offsets = [0, 96], sizes = [8, 32], strides = [1, 1]} : vector<8x128xf32> to vector<8x32xf32>
    %538 = arith.mulf %535, %518 : vector<8x32xf32>
    %539 = arith.mulf %534, %537 : vector<8x32xf32>
    %540 = arith.addf %538, %539 : vector<8x32xf32>
    %541 = math.tanh %540 : vector<8x32xf32>
    %542 = arith.mulf %536, %541 : vector<8x32xf32>
    %543 = arith.truncf %542 : vector<8x32xf32> to vector<8x32xbf16>
    %cst_170 = arith.constant dense<0.000000e+00> : vector<8x128xf32>
    %544 = tpu.matmul %543, %389, %cst_170 {dimension_numbers = #tpu.dot_dimension_numbers<[1], [0], [0], [1], [0, 0, 1, 1], [], []>} : vector<8x32xbf16>, vector<32x128xbf16>, vector<8x128xf32> -> vector<8x128xf32>
    %545 = vector.broadcast %391 : vector<1x128xf32> to vector<8x128xf32>
    %546 = arith.addf %544, %545 : vector<8x128xf32>
    %c48_171 = arith.constant 48 : index
    %c0_172 = arith.constant 0 : index
    %547 = vector.load %arg13[%c48_171, %c0_172] : memref<64x128xf32, #tpu.memory_space<vmem>>, vector<8x128xf32>
    tpu.vector_store %arg13[%c48_171, %c0_172], %546 {strides = array<i32>} : memref<64x128xf32, #tpu.memory_space<vmem>>, vector<8x128xf32>,
    %c56_173 = arith.constant 56 : index
    %c0_174 = arith.constant 0 : index
    %548 = vector.load %arg12[%c56_173, %c0_174] : memref<64x128xf32, #tpu.memory_space<vmem>>, vector<8x128xf32>
    %549 = arith.truncf %542 : vector<8x32xf32> to vector<8x32xbf16>
    %cst_175 = arith.constant dense<0.000000e+00> : vector<8x128xf32>
    %550 = tpu.matmul %549, %387, %cst_175 {dimension_numbers = #tpu.dot_dimension_numbers<[1], [0], [0], [1], [0, 0, 1, 1], [], []>} : vector<8x32xbf16>, vector<32x128xbf16>, vector<8x128xf32> -> vector<8x128xf32>
    %551 = arith.addf %548, %550 : vector<8x128xf32>
    %552 = arith.mulf %551, %5 : vector<8x128xf32>
    %553 = math.tanh %552 : vector<8x128xf32>
    %554 = arith.mulf %553, %5 : vector<8x128xf32>
    %555 = arith.addf %554, %8 : vector<8x128xf32>
    %556 = vector.extract_strided_slice %555 {offsets = [0, 0], sizes = [8, 32], strides = [1, 1]} : vector<8x128xf32> to vector<8x32xf32>
    %557 = vector.extract_strided_slice %555 {offsets = [0, 32], sizes = [8, 32], strides = [1, 1]} : vector<8x128xf32> to vector<8x32xf32>
    %558 = vector.extract_strided_slice %555 {offsets = [0, 64], sizes = [8, 32], strides = [1, 1]} : vector<8x128xf32> to vector<8x32xf32>
    %559 = vector.extract_strided_slice %555 {offsets = [0, 96], sizes = [8, 32], strides = [1, 1]} : vector<8x128xf32> to vector<8x32xf32>
    %560 = arith.mulf %557, %540 : vector<8x32xf32>
    %561 = arith.mulf %556, %559 : vector<8x32xf32>
    %562 = arith.addf %560, %561 : vector<8x32xf32>
    %563 = math.tanh %562 : vector<8x32xf32>
    %564 = arith.mulf %558, %563 : vector<8x32xf32>
    %565 = arith.truncf %564 : vector<8x32xf32> to vector<8x32xbf16>
    %cst_176 = arith.constant dense<0.000000e+00> : vector<8x128xf32>
    %566 = tpu.matmul %565, %389, %cst_176 {dimension_numbers = #tpu.dot_dimension_numbers<[1], [0], [0], [1], [0, 0, 1, 1], [], []>} : vector<8x32xbf16>, vector<32x128xbf16>, vector<8x128xf32> -> vector<8x128xf32>
    %567 = vector.broadcast %391 : vector<1x128xf32> to vector<8x128xf32>
    %568 = arith.addf %566, %567 : vector<8x128xf32>
    %c56_177 = arith.constant 56 : index
    %c0_178 = arith.constant 0 : index
    %569 = vector.load %arg13[%c56_177, %c0_178] : memref<64x128xf32, #tpu.memory_space<vmem>>, vector<8x128xf32>
    tpu.vector_store %arg13[%c56_177, %c0_178], %568 {strides = array<i32>} : memref<64x128xf32, #tpu.memory_space<vmem>>, vector<8x128xf32>,
    %c3_179 = arith.constant 3 : index
    %c0_180 = arith.constant 0 : index
    %c0_181 = arith.constant 0 : index
    %570 = vector.load %arg3[%c3_179, %c0_180, %c0_181] : memref<10x32x128xbf16, #tpu.memory_space<vmem>>, vector<1x32x128xbf16>
    %571 = vector.shape_cast %570 : vector<1x32x128xbf16> to vector<32x128xbf16>
    %c3_182 = arith.constant 3 : index
    %c0_183 = arith.constant 0 : index
    %c0_184 = arith.constant 0 : index
    %572 = vector.load %arg2[%c3_182, %c0_183, %c0_184] : memref<9x32x128xbf16, #tpu.memory_space<vmem>>, vector<1x32x128xbf16>
    %573 = vector.shape_cast %572 : vector<1x32x128xbf16> to vector<32x128xbf16>
    %c4 = arith.constant 4 : index
    %c0_185 = arith.constant 0 : index
    %c0_186 = arith.constant 0 : index
    %574 = vector.load %arg4[%c4, %c0_185, %c0_186] : memref<10x1x128xf32, #tpu.memory_space<vmem>>, vector<1x1x128xf32>
    %575 = vector.shape_cast %574 : vector<1x1x128xf32> to vector<1x128xf32>
    %cst_187 = arith.constant 0.000000e+00 : f32
    %576 = vector.broadcast %cst_187 : f32 to vector<8x32xf32>
    %cst_188 = arith.constant 0.000000e+00 : f32
    %577 = vector.broadcast %cst_188 : f32 to vector<8x32xf32>
    %c0_189 = arith.constant 0 : index
    %c0_190 = arith.constant 0 : index
    %578 = vector.load %arg13[%c0_189, %c0_190] : memref<64x128xf32, #tpu.memory_space<vmem>>, vector<8x128xf32>
    %579 = arith.truncf %576 : vector<8x32xf32> to vector<8x32xbf16>
    %cst_191 = arith.constant dense<0.000000e+00> : vector<8x128xf32>
    %580 = tpu.matmul %579, %571, %cst_191 {dimension_numbers = #tpu.dot_dimension_numbers<[1], [0], [0], [1], [0, 0, 1, 1], [], []>} : vector<8x32xbf16>, vector<32x128xbf16>, vector<8x128xf32> -> vector<8x128xf32>
    %581 = arith.addf %578, %580 : vector<8x128xf32>
    %582 = arith.mulf %581, %5 : vector<8x128xf32>
    %583 = math.tanh %582 : vector<8x128xf32>
    %584 = arith.mulf %583, %5 : vector<8x128xf32>
    %585 = arith.addf %584, %8 : vector<8x128xf32>
    %586 = vector.extract_strided_slice %585 {offsets = [0, 0], sizes = [8, 32], strides = [1, 1]} : vector<8x128xf32> to vector<8x32xf32>
    %587 = vector.extract_strided_slice %585 {offsets = [0, 32], sizes = [8, 32], strides = [1, 1]} : vector<8x128xf32> to vector<8x32xf32>
    %588 = vector.extract_strided_slice %585 {offsets = [0, 64], sizes = [8, 32], strides = [1, 1]} : vector<8x128xf32> to vector<8x32xf32>
    %589 = vector.extract_strided_slice %585 {offsets = [0, 96], sizes = [8, 32], strides = [1, 1]} : vector<8x128xf32> to vector<8x32xf32>
    %590 = arith.mulf %587, %577 : vector<8x32xf32>
    %591 = arith.mulf %586, %589 : vector<8x32xf32>
    %592 = arith.addf %590, %591 : vector<8x32xf32>
    %593 = math.tanh %592 : vector<8x32xf32>
    %594 = arith.mulf %588, %593 : vector<8x32xf32>
    %595 = arith.truncf %594 : vector<8x32xf32> to vector<8x32xbf16>
    %cst_192 = arith.constant dense<0.000000e+00> : vector<8x128xf32>
    %596 = tpu.matmul %595, %573, %cst_192 {dimension_numbers = #tpu.dot_dimension_numbers<[1], [0], [0], [1], [0, 0, 1, 1], [], []>} : vector<8x32xbf16>, vector<32x128xbf16>, vector<8x128xf32> -> vector<8x128xf32>
    %597 = vector.broadcast %575 : vector<1x128xf32> to vector<8x128xf32>
    %598 = arith.addf %596, %597 : vector<8x128xf32>
    %c0_193 = arith.constant 0 : index
    %c0_194 = arith.constant 0 : index
    %599 = vector.load %arg12[%c0_193, %c0_194] : memref<64x128xf32, #tpu.memory_space<vmem>>, vector<8x128xf32>
    tpu.vector_store %arg12[%c0_193, %c0_194], %598 {strides = array<i32>} : memref<64x128xf32, #tpu.memory_space<vmem>>, vector<8x128xf32>,
    %c8_195 = arith.constant 8 : index
    %c0_196 = arith.constant 0 : index
    %600 = vector.load %arg13[%c8_195, %c0_196] : memref<64x128xf32, #tpu.memory_space<vmem>>, vector<8x128xf32>
    %601 = arith.truncf %594 : vector<8x32xf32> to vector<8x32xbf16>
    %cst_197 = arith.constant dense<0.000000e+00> : vector<8x128xf32>
    %602 = tpu.matmul %601, %571, %cst_197 {dimension_numbers = #tpu.dot_dimension_numbers<[1], [0], [0], [1], [0, 0, 1, 1], [], []>} : vector<8x32xbf16>, vector<32x128xbf16>, vector<8x128xf32> -> vector<8x128xf32>
    %603 = arith.addf %600, %602 : vector<8x128xf32>
    %604 = arith.mulf %603, %5 : vector<8x128xf32>
    %605 = math.tanh %604 : vector<8x128xf32>
    %606 = arith.mulf %605, %5 : vector<8x128xf32>
    %607 = arith.addf %606, %8 : vector<8x128xf32>
    %608 = vector.extract_strided_slice %607 {offsets = [0, 0], sizes = [8, 32], strides = [1, 1]} : vector<8x128xf32> to vector<8x32xf32>
    %609 = vector.extract_strided_slice %607 {offsets = [0, 32], sizes = [8, 32], strides = [1, 1]} : vector<8x128xf32> to vector<8x32xf32>
    %610 = vector.extract_strided_slice %607 {offsets = [0, 64], sizes = [8, 32], strides = [1, 1]} : vector<8x128xf32> to vector<8x32xf32>
    %611 = vector.extract_strided_slice %607 {offsets = [0, 96], sizes = [8, 32], strides = [1, 1]} : vector<8x128xf32> to vector<8x32xf32>
    %612 = arith.mulf %609, %592 : vector<8x32xf32>
    %613 = arith.mulf %608, %611 : vector<8x32xf32>
    %614 = arith.addf %612, %613 : vector<8x32xf32>
    %615 = math.tanh %614 : vector<8x32xf32>
    %616 = arith.mulf %610, %615 : vector<8x32xf32>
    %617 = arith.truncf %616 : vector<8x32xf32> to vector<8x32xbf16>
    %cst_198 = arith.constant dense<0.000000e+00> : vector<8x128xf32>
    %618 = tpu.matmul %617, %573, %cst_198 {dimension_numbers = #tpu.dot_dimension_numbers<[1], [0], [0], [1], [0, 0, 1, 1], [], []>} : vector<8x32xbf16>, vector<32x128xbf16>, vector<8x128xf32> -> vector<8x128xf32>
    %619 = vector.broadcast %575 : vector<1x128xf32> to vector<8x128xf32>
    %620 = arith.addf %618, %619 : vector<8x128xf32>
    %c8_199 = arith.constant 8 : index
    %c0_200 = arith.constant 0 : index
    %621 = vector.load %arg12[%c8_199, %c0_200] : memref<64x128xf32, #tpu.memory_space<vmem>>, vector<8x128xf32>
    tpu.vector_store %arg12[%c8_199, %c0_200], %620 {strides = array<i32>} : memref<64x128xf32, #tpu.memory_space<vmem>>, vector<8x128xf32>,
    %c16_201 = arith.constant 16 : index
    %c0_202 = arith.constant 0 : index
    %622 = vector.load %arg13[%c16_201, %c0_202] : memref<64x128xf32, #tpu.memory_space<vmem>>, vector<8x128xf32>
    %623 = arith.truncf %616 : vector<8x32xf32> to vector<8x32xbf16>
    %cst_203 = arith.constant dense<0.000000e+00> : vector<8x128xf32>
    %624 = tpu.matmul %623, %571, %cst_203 {dimension_numbers = #tpu.dot_dimension_numbers<[1], [0], [0], [1], [0, 0, 1, 1], [], []>} : vector<8x32xbf16>, vector<32x128xbf16>, vector<8x128xf32> -> vector<8x128xf32>
    %625 = arith.addf %622, %624 : vector<8x128xf32>
    %626 = arith.mulf %625, %5 : vector<8x128xf32>
    %627 = math.tanh %626 : vector<8x128xf32>
    %628 = arith.mulf %627, %5 : vector<8x128xf32>
    %629 = arith.addf %628, %8 : vector<8x128xf32>
    %630 = vector.extract_strided_slice %629 {offsets = [0, 0], sizes = [8, 32], strides = [1, 1]} : vector<8x128xf32> to vector<8x32xf32>
    %631 = vector.extract_strided_slice %629 {offsets = [0, 32], sizes = [8, 32], strides = [1, 1]} : vector<8x128xf32> to vector<8x32xf32>
    %632 = vector.extract_strided_slice %629 {offsets = [0, 64], sizes = [8, 32], strides = [1, 1]} : vector<8x128xf32> to vector<8x32xf32>
    %633 = vector.extract_strided_slice %629 {offsets = [0, 96], sizes = [8, 32], strides = [1, 1]} : vector<8x128xf32> to vector<8x32xf32>
    %634 = arith.mulf %631, %614 : vector<8x32xf32>
    %635 = arith.mulf %630, %633 : vector<8x32xf32>
    %636 = arith.addf %634, %635 : vector<8x32xf32>
    %637 = math.tanh %636 : vector<8x32xf32>
    %638 = arith.mulf %632, %637 : vector<8x32xf32>
    %639 = arith.truncf %638 : vector<8x32xf32> to vector<8x32xbf16>
    %cst_204 = arith.constant dense<0.000000e+00> : vector<8x128xf32>
    %640 = tpu.matmul %639, %573, %cst_204 {dimension_numbers = #tpu.dot_dimension_numbers<[1], [0], [0], [1], [0, 0, 1, 1], [], []>} : vector<8x32xbf16>, vector<32x128xbf16>, vector<8x128xf32> -> vector<8x128xf32>
    %641 = vector.broadcast %575 : vector<1x128xf32> to vector<8x128xf32>
    %642 = arith.addf %640, %641 : vector<8x128xf32>
    %c16_205 = arith.constant 16 : index
    %c0_206 = arith.constant 0 : index
    %643 = vector.load %arg12[%c16_205, %c0_206] : memref<64x128xf32, #tpu.memory_space<vmem>>, vector<8x128xf32>
    tpu.vector_store %arg12[%c16_205, %c0_206], %642 {strides = array<i32>} : memref<64x128xf32, #tpu.memory_space<vmem>>, vector<8x128xf32>,
    %c24_207 = arith.constant 24 : index
    %c0_208 = arith.constant 0 : index
    %644 = vector.load %arg13[%c24_207, %c0_208] : memref<64x128xf32, #tpu.memory_space<vmem>>, vector<8x128xf32>
    %645 = arith.truncf %638 : vector<8x32xf32> to vector<8x32xbf16>
    %cst_209 = arith.constant dense<0.000000e+00> : vector<8x128xf32>
    %646 = tpu.matmul %645, %571, %cst_209 {dimension_numbers = #tpu.dot_dimension_numbers<[1], [0], [0], [1], [0, 0, 1, 1], [], []>} : vector<8x32xbf16>, vector<32x128xbf16>, vector<8x128xf32> -> vector<8x128xf32>
    %647 = arith.addf %644, %646 : vector<8x128xf32>
    %648 = arith.mulf %647, %5 : vector<8x128xf32>
    %649 = math.tanh %648 : vector<8x128xf32>
    %650 = arith.mulf %649, %5 : vector<8x128xf32>
    %651 = arith.addf %650, %8 : vector<8x128xf32>
    %652 = vector.extract_strided_slice %651 {offsets = [0, 0], sizes = [8, 32], strides = [1, 1]} : vector<8x128xf32> to vector<8x32xf32>
    %653 = vector.extract_strided_slice %651 {offsets = [0, 32], sizes = [8, 32], strides = [1, 1]} : vector<8x128xf32> to vector<8x32xf32>
    %654 = vector.extract_strided_slice %651 {offsets = [0, 64], sizes = [8, 32], strides = [1, 1]} : vector<8x128xf32> to vector<8x32xf32>
    %655 = vector.extract_strided_slice %651 {offsets = [0, 96], sizes = [8, 32], strides = [1, 1]} : vector<8x128xf32> to vector<8x32xf32>
    %656 = arith.mulf %653, %636 : vector<8x32xf32>
    %657 = arith.mulf %652, %655 : vector<8x32xf32>
    %658 = arith.addf %656, %657 : vector<8x32xf32>
    %659 = math.tanh %658 : vector<8x32xf32>
    %660 = arith.mulf %654, %659 : vector<8x32xf32>
    %661 = arith.truncf %660 : vector<8x32xf32> to vector<8x32xbf16>
    %cst_210 = arith.constant dense<0.000000e+00> : vector<8x128xf32>
    %662 = tpu.matmul %661, %573, %cst_210 {dimension_numbers = #tpu.dot_dimension_numbers<[1], [0], [0], [1], [0, 0, 1, 1], [], []>} : vector<8x32xbf16>, vector<32x128xbf16>, vector<8x128xf32> -> vector<8x128xf32>
    %663 = vector.broadcast %575 : vector<1x128xf32> to vector<8x128xf32>
    %664 = arith.addf %662, %663 : vector<8x128xf32>
    %c24_211 = arith.constant 24 : index
    %c0_212 = arith.constant 0 : index
    %665 = vector.load %arg12[%c24_211, %c0_212] : memref<64x128xf32, #tpu.memory_space<vmem>>, vector<8x128xf32>
    tpu.vector_store %arg12[%c24_211, %c0_212], %664 {strides = array<i32>} : memref<64x128xf32, #tpu.memory_space<vmem>>, vector<8x128xf32>,
    %c32_213 = arith.constant 32 : index
    %c0_214 = arith.constant 0 : index
    %666 = vector.load %arg13[%c32_213, %c0_214] : memref<64x128xf32, #tpu.memory_space<vmem>>, vector<8x128xf32>
    %667 = arith.truncf %660 : vector<8x32xf32> to vector<8x32xbf16>
    %cst_215 = arith.constant dense<0.000000e+00> : vector<8x128xf32>
    %668 = tpu.matmul %667, %571, %cst_215 {dimension_numbers = #tpu.dot_dimension_numbers<[1], [0], [0], [1], [0, 0, 1, 1], [], []>} : vector<8x32xbf16>, vector<32x128xbf16>, vector<8x128xf32> -> vector<8x128xf32>
    %669 = arith.addf %666, %668 : vector<8x128xf32>
    %670 = arith.mulf %669, %5 : vector<8x128xf32>
    %671 = math.tanh %670 : vector<8x128xf32>
    %672 = arith.mulf %671, %5 : vector<8x128xf32>
    %673 = arith.addf %672, %8 : vector<8x128xf32>
    %674 = vector.extract_strided_slice %673 {offsets = [0, 0], sizes = [8, 32], strides = [1, 1]} : vector<8x128xf32> to vector<8x32xf32>
    %675 = vector.extract_strided_slice %673 {offsets = [0, 32], sizes = [8, 32], strides = [1, 1]} : vector<8x128xf32> to vector<8x32xf32>
    %676 = vector.extract_strided_slice %673 {offsets = [0, 64], sizes = [8, 32], strides = [1, 1]} : vector<8x128xf32> to vector<8x32xf32>
    %677 = vector.extract_strided_slice %673 {offsets = [0, 96], sizes = [8, 32], strides = [1, 1]} : vector<8x128xf32> to vector<8x32xf32>
    %678 = arith.mulf %675, %658 : vector<8x32xf32>
    %679 = arith.mulf %674, %677 : vector<8x32xf32>
    %680 = arith.addf %678, %679 : vector<8x32xf32>
    %681 = math.tanh %680 : vector<8x32xf32>
    %682 = arith.mulf %676, %681 : vector<8x32xf32>
    %683 = arith.truncf %682 : vector<8x32xf32> to vector<8x32xbf16>
    %cst_216 = arith.constant dense<0.000000e+00> : vector<8x128xf32>
    %684 = tpu.matmul %683, %573, %cst_216 {dimension_numbers = #tpu.dot_dimension_numbers<[1], [0], [0], [1], [0, 0, 1, 1], [], []>} : vector<8x32xbf16>, vector<32x128xbf16>, vector<8x128xf32> -> vector<8x128xf32>
    %685 = vector.broadcast %575 : vector<1x128xf32> to vector<8x128xf32>
    %686 = arith.addf %684, %685 : vector<8x128xf32>
    %c32_217 = arith.constant 32 : index
    %c0_218 = arith.constant 0 : index
    %687 = vector.load %arg12[%c32_217, %c0_218] : memref<64x128xf32, #tpu.memory_space<vmem>>, vector<8x128xf32>
    tpu.vector_store %arg12[%c32_217, %c0_218], %686 {strides = array<i32>} : memref<64x128xf32, #tpu.memory_space<vmem>>, vector<8x128xf32>,
    %c40_219 = arith.constant 40 : index
    %c0_220 = arith.constant 0 : index
    %688 = vector.load %arg13[%c40_219, %c0_220] : memref<64x128xf32, #tpu.memory_space<vmem>>, vector<8x128xf32>
    %689 = arith.truncf %682 : vector<8x32xf32> to vector<8x32xbf16>
    %cst_221 = arith.constant dense<0.000000e+00> : vector<8x128xf32>
    %690 = tpu.matmul %689, %571, %cst_221 {dimension_numbers = #tpu.dot_dimension_numbers<[1], [0], [0], [1], [0, 0, 1, 1], [], []>} : vector<8x32xbf16>, vector<32x128xbf16>, vector<8x128xf32> -> vector<8x128xf32>
    %691 = arith.addf %688, %690 : vector<8x128xf32>
    %692 = arith.mulf %691, %5 : vector<8x128xf32>
    %693 = math.tanh %692 : vector<8x128xf32>
    %694 = arith.mulf %693, %5 : vector<8x128xf32>
    %695 = arith.addf %694, %8 : vector<8x128xf32>
    %696 = vector.extract_strided_slice %695 {offsets = [0, 0], sizes = [8, 32], strides = [1, 1]} : vector<8x128xf32> to vector<8x32xf32>
    %697 = vector.extract_strided_slice %695 {offsets = [0, 32], sizes = [8, 32], strides = [1, 1]} : vector<8x128xf32> to vector<8x32xf32>
    %698 = vector.extract_strided_slice %695 {offsets = [0, 64], sizes = [8, 32], strides = [1, 1]} : vector<8x128xf32> to vector<8x32xf32>
    %699 = vector.extract_strided_slice %695 {offsets = [0, 96], sizes = [8, 32], strides = [1, 1]} : vector<8x128xf32> to vector<8x32xf32>
    %700 = arith.mulf %697, %680 : vector<8x32xf32>
    %701 = arith.mulf %696, %699 : vector<8x32xf32>
    %702 = arith.addf %700, %701 : vector<8x32xf32>
    %703 = math.tanh %702 : vector<8x32xf32>
    %704 = arith.mulf %698, %703 : vector<8x32xf32>
    %705 = arith.truncf %704 : vector<8x32xf32> to vector<8x32xbf16>
    %cst_222 = arith.constant dense<0.000000e+00> : vector<8x128xf32>
    %706 = tpu.matmul %705, %573, %cst_222 {dimension_numbers = #tpu.dot_dimension_numbers<[1], [0], [0], [1], [0, 0, 1, 1], [], []>} : vector<8x32xbf16>, vector<32x128xbf16>, vector<8x128xf32> -> vector<8x128xf32>
    %707 = vector.broadcast %575 : vector<1x128xf32> to vector<8x128xf32>
    %708 = arith.addf %706, %707 : vector<8x128xf32>
    %c40_223 = arith.constant 40 : index
    %c0_224 = arith.constant 0 : index
    %709 = vector.load %arg12[%c40_223, %c0_224] : memref<64x128xf32, #tpu.memory_space<vmem>>, vector<8x128xf32>
    tpu.vector_store %arg12[%c40_223, %c0_224], %708 {strides = array<i32>} : memref<64x128xf32, #tpu.memory_space<vmem>>, vector<8x128xf32>,
    %c48_225 = arith.constant 48 : index
    %c0_226 = arith.constant 0 : index
    %710 = vector.load %arg13[%c48_225, %c0_226] : memref<64x128xf32, #tpu.memory_space<vmem>>, vector<8x128xf32>
    %711 = arith.truncf %704 : vector<8x32xf32> to vector<8x32xbf16>
    %cst_227 = arith.constant dense<0.000000e+00> : vector<8x128xf32>
    %712 = tpu.matmul %711, %571, %cst_227 {dimension_numbers = #tpu.dot_dimension_numbers<[1], [0], [0], [1], [0, 0, 1, 1], [], []>} : vector<8x32xbf16>, vector<32x128xbf16>, vector<8x128xf32> -> vector<8x128xf32>
    %713 = arith.addf %710, %712 : vector<8x128xf32>
    %714 = arith.mulf %713, %5 : vector<8x128xf32>
    %715 = math.tanh %714 : vector<8x128xf32>
    %716 = arith.mulf %715, %5 : vector<8x128xf32>
    %717 = arith.addf %716, %8 : vector<8x128xf32>
    %718 = vector.extract_strided_slice %717 {offsets = [0, 0], sizes = [8, 32], strides = [1, 1]} : vector<8x128xf32> to vector<8x32xf32>
    %719 = vector.extract_strided_slice %717 {offsets = [0, 32], sizes = [8, 32], strides = [1, 1]} : vector<8x128xf32> to vector<8x32xf32>
    %720 = vector.extract_strided_slice %717 {offsets = [0, 64], sizes = [8, 32], strides = [1, 1]} : vector<8x128xf32> to vector<8x32xf32>
    %721 = vector.extract_strided_slice %717 {offsets = [0, 96], sizes = [8, 32], strides = [1, 1]} : vector<8x128xf32> to vector<8x32xf32>
    %722 = arith.mulf %719, %702 : vector<8x32xf32>
    %723 = arith.mulf %718, %721 : vector<8x32xf32>
    %724 = arith.addf %722, %723 : vector<8x32xf32>
    %725 = math.tanh %724 : vector<8x32xf32>
    %726 = arith.mulf %720, %725 : vector<8x32xf32>
    %727 = arith.truncf %726 : vector<8x32xf32> to vector<8x32xbf16>
    %cst_228 = arith.constant dense<0.000000e+00> : vector<8x128xf32>
    %728 = tpu.matmul %727, %573, %cst_228 {dimension_numbers = #tpu.dot_dimension_numbers<[1], [0], [0], [1], [0, 0, 1, 1], [], []>} : vector<8x32xbf16>, vector<32x128xbf16>, vector<8x128xf32> -> vector<8x128xf32>
    %729 = vector.broadcast %575 : vector<1x128xf32> to vector<8x128xf32>
    %730 = arith.addf %728, %729 : vector<8x128xf32>
    %c48_229 = arith.constant 48 : index
    %c0_230 = arith.constant 0 : index
    %731 = vector.load %arg12[%c48_229, %c0_230] : memref<64x128xf32, #tpu.memory_space<vmem>>, vector<8x128xf32>
    tpu.vector_store %arg12[%c48_229, %c0_230], %730 {strides = array<i32>} : memref<64x128xf32, #tpu.memory_space<vmem>>, vector<8x128xf32>,
    %c56_231 = arith.constant 56 : index
    %c0_232 = arith.constant 0 : index
    %732 = vector.load %arg13[%c56_231, %c0_232] : memref<64x128xf32, #tpu.memory_space<vmem>>, vector<8x128xf32>
    %733 = arith.truncf %726 : vector<8x32xf32> to vector<8x32xbf16>
    %cst_233 = arith.constant dense<0.000000e+00> : vector<8x128xf32>
    %734 = tpu.matmul %733, %571, %cst_233 {dimension_numbers = #tpu.dot_dimension_numbers<[1], [0], [0], [1], [0, 0, 1, 1], [], []>} : vector<8x32xbf16>, vector<32x128xbf16>, vector<8x128xf32> -> vector<8x128xf32>
    %735 = arith.addf %732, %734 : vector<8x128xf32>
    %736 = arith.mulf %735, %5 : vector<8x128xf32>
    %737 = math.tanh %736 : vector<8x128xf32>
    %738 = arith.mulf %737, %5 : vector<8x128xf32>
    %739 = arith.addf %738, %8 : vector<8x128xf32>
    %740 = vector.extract_strided_slice %739 {offsets = [0, 0], sizes = [8, 32], strides = [1, 1]} : vector<8x128xf32> to vector<8x32xf32>
    %741 = vector.extract_strided_slice %739 {offsets = [0, 32], sizes = [8, 32], strides = [1, 1]} : vector<8x128xf32> to vector<8x32xf32>
    %742 = vector.extract_strided_slice %739 {offsets = [0, 64], sizes = [8, 32], strides = [1, 1]} : vector<8x128xf32> to vector<8x32xf32>
    %743 = vector.extract_strided_slice %739 {offsets = [0, 96], sizes = [8, 32], strides = [1, 1]} : vector<8x128xf32> to vector<8x32xf32>
    %744 = arith.mulf %741, %724 : vector<8x32xf32>
    %745 = arith.mulf %740, %743 : vector<8x32xf32>
    %746 = arith.addf %744, %745 : vector<8x32xf32>
    %747 = math.tanh %746 : vector<8x32xf32>
    %748 = arith.mulf %742, %747 : vector<8x32xf32>
    %749 = arith.truncf %748 : vector<8x32xf32> to vector<8x32xbf16>
    %cst_234 = arith.constant dense<0.000000e+00> : vector<8x128xf32>
    %750 = tpu.matmul %749, %573, %cst_234 {dimension_numbers = #tpu.dot_dimension_numbers<[1], [0], [0], [1], [0, 0, 1, 1], [], []>} : vector<8x32xbf16>, vector<32x128xbf16>, vector<8x128xf32> -> vector<8x128xf32>
    %751 = vector.broadcast %575 : vector<1x128xf32> to vector<8x128xf32>
    %752 = arith.addf %750, %751 : vector<8x128xf32>
    %c56_235 = arith.constant 56 : index
    %c0_236 = arith.constant 0 : index
    %753 = vector.load %arg12[%c56_235, %c0_236] : memref<64x128xf32, #tpu.memory_space<vmem>>, vector<8x128xf32>
    tpu.vector_store %arg12[%c56_235, %c0_236], %752 {strides = array<i32>} : memref<64x128xf32, #tpu.memory_space<vmem>>, vector<8x128xf32>,
    %c4_237 = arith.constant 4 : index
    %c0_238 = arith.constant 0 : index
    %c0_239 = arith.constant 0 : index
    %754 = vector.load %arg3[%c4_237, %c0_238, %c0_239] : memref<10x32x128xbf16, #tpu.memory_space<vmem>>, vector<1x32x128xbf16>
    %755 = vector.shape_cast %754 : vector<1x32x128xbf16> to vector<32x128xbf16>
    %c4_240 = arith.constant 4 : index
    %c0_241 = arith.constant 0 : index
    %c0_242 = arith.constant 0 : index
    %756 = vector.load %arg2[%c4_240, %c0_241, %c0_242] : memref<9x32x128xbf16, #tpu.memory_space<vmem>>, vector<1x32x128xbf16>
    %757 = vector.shape_cast %756 : vector<1x32x128xbf16> to vector<32x128xbf16>
    %c5 = arith.constant 5 : index
    %c0_243 = arith.constant 0 : index
    %c0_244 = arith.constant 0 : index
    %758 = vector.load %arg4[%c5, %c0_243, %c0_244] : memref<10x1x128xf32, #tpu.memory_space<vmem>>, vector<1x1x128xf32>
    %759 = vector.shape_cast %758 : vector<1x1x128xf32> to vector<1x128xf32>
    %cst_245 = arith.constant 0.000000e+00 : f32
    %760 = vector.broadcast %cst_245 : f32 to vector<8x32xf32>
    %cst_246 = arith.constant 0.000000e+00 : f32
    %761 = vector.broadcast %cst_246 : f32 to vector<8x32xf32>
    %c0_247 = arith.constant 0 : index
    %c0_248 = arith.constant 0 : index
    %762 = vector.load %arg12[%c0_247, %c0_248] : memref<64x128xf32, #tpu.memory_space<vmem>>, vector<8x128xf32>
    %763 = arith.truncf %760 : vector<8x32xf32> to vector<8x32xbf16>
    %cst_249 = arith.constant dense<0.000000e+00> : vector<8x128xf32>
    %764 = tpu.matmul %763, %755, %cst_249 {dimension_numbers = #tpu.dot_dimension_numbers<[1], [0], [0], [1], [0, 0, 1, 1], [], []>} : vector<8x32xbf16>, vector<32x128xbf16>, vector<8x128xf32> -> vector<8x128xf32>
    %765 = arith.addf %762, %764 : vector<8x128xf32>
    %766 = arith.mulf %765, %5 : vector<8x128xf32>
    %767 = math.tanh %766 : vector<8x128xf32>
    %768 = arith.mulf %767, %5 : vector<8x128xf32>
    %769 = arith.addf %768, %8 : vector<8x128xf32>
    %770 = vector.extract_strided_slice %769 {offsets = [0, 0], sizes = [8, 32], strides = [1, 1]} : vector<8x128xf32> to vector<8x32xf32>
    %771 = vector.extract_strided_slice %769 {offsets = [0, 32], sizes = [8, 32], strides = [1, 1]} : vector<8x128xf32> to vector<8x32xf32>
    %772 = vector.extract_strided_slice %769 {offsets = [0, 64], sizes = [8, 32], strides = [1, 1]} : vector<8x128xf32> to vector<8x32xf32>
    %773 = vector.extract_strided_slice %769 {offsets = [0, 96], sizes = [8, 32], strides = [1, 1]} : vector<8x128xf32> to vector<8x32xf32>
    %774 = arith.mulf %771, %761 : vector<8x32xf32>
    %775 = arith.mulf %770, %773 : vector<8x32xf32>
    %776 = arith.addf %774, %775 : vector<8x32xf32>
    %777 = math.tanh %776 : vector<8x32xf32>
    %778 = arith.mulf %772, %777 : vector<8x32xf32>
    %779 = arith.truncf %778 : vector<8x32xf32> to vector<8x32xbf16>
    %cst_250 = arith.constant dense<0.000000e+00> : vector<8x128xf32>
    %780 = tpu.matmul %779, %757, %cst_250 {dimension_numbers = #tpu.dot_dimension_numbers<[1], [0], [0], [1], [0, 0, 1, 1], [], []>} : vector<8x32xbf16>, vector<32x128xbf16>, vector<8x128xf32> -> vector<8x128xf32>
    %781 = vector.broadcast %759 : vector<1x128xf32> to vector<8x128xf32>
    %782 = arith.addf %780, %781 : vector<8x128xf32>
    %c0_251 = arith.constant 0 : index
    %c0_252 = arith.constant 0 : index
    %783 = vector.load %arg13[%c0_251, %c0_252] : memref<64x128xf32, #tpu.memory_space<vmem>>, vector<8x128xf32>
    tpu.vector_store %arg13[%c0_251, %c0_252], %782 {strides = array<i32>} : memref<64x128xf32, #tpu.memory_space<vmem>>, vector<8x128xf32>,
    %c8_253 = arith.constant 8 : index
    %c0_254 = arith.constant 0 : index
    %784 = vector.load %arg12[%c8_253, %c0_254] : memref<64x128xf32, #tpu.memory_space<vmem>>, vector<8x128xf32>
    %785 = arith.truncf %778 : vector<8x32xf32> to vector<8x32xbf16>
    %cst_255 = arith.constant dense<0.000000e+00> : vector<8x128xf32>
    %786 = tpu.matmul %785, %755, %cst_255 {dimension_numbers = #tpu.dot_dimension_numbers<[1], [0], [0], [1], [0, 0, 1, 1], [], []>} : vector<8x32xbf16>, vector<32x128xbf16>, vector<8x128xf32> -> vector<8x128xf32>
    %787 = arith.addf %784, %786 : vector<8x128xf32>
    %788 = arith.mulf %787, %5 : vector<8x128xf32>
    %789 = math.tanh %788 : vector<8x128xf32>
    %790 = arith.mulf %789, %5 : vector<8x128xf32>
    %791 = arith.addf %790, %8 : vector<8x128xf32>
    %792 = vector.extract_strided_slice %791 {offsets = [0, 0], sizes = [8, 32], strides = [1, 1]} : vector<8x128xf32> to vector<8x32xf32>
    %793 = vector.extract_strided_slice %791 {offsets = [0, 32], sizes = [8, 32], strides = [1, 1]} : vector<8x128xf32> to vector<8x32xf32>
    %794 = vector.extract_strided_slice %791 {offsets = [0, 64], sizes = [8, 32], strides = [1, 1]} : vector<8x128xf32> to vector<8x32xf32>
    %795 = vector.extract_strided_slice %791 {offsets = [0, 96], sizes = [8, 32], strides = [1, 1]} : vector<8x128xf32> to vector<8x32xf32>
    %796 = arith.mulf %793, %776 : vector<8x32xf32>
    %797 = arith.mulf %792, %795 : vector<8x32xf32>
    %798 = arith.addf %796, %797 : vector<8x32xf32>
    %799 = math.tanh %798 : vector<8x32xf32>
    %800 = arith.mulf %794, %799 : vector<8x32xf32>
    %801 = arith.truncf %800 : vector<8x32xf32> to vector<8x32xbf16>
    %cst_256 = arith.constant dense<0.000000e+00> : vector<8x128xf32>
    %802 = tpu.matmul %801, %757, %cst_256 {dimension_numbers = #tpu.dot_dimension_numbers<[1], [0], [0], [1], [0, 0, 1, 1], [], []>} : vector<8x32xbf16>, vector<32x128xbf16>, vector<8x128xf32> -> vector<8x128xf32>
    %803 = vector.broadcast %759 : vector<1x128xf32> to vector<8x128xf32>
    %804 = arith.addf %802, %803 : vector<8x128xf32>
    %c8_257 = arith.constant 8 : index
    %c0_258 = arith.constant 0 : index
    %805 = vector.load %arg13[%c8_257, %c0_258] : memref<64x128xf32, #tpu.memory_space<vmem>>, vector<8x128xf32>
    tpu.vector_store %arg13[%c8_257, %c0_258], %804 {strides = array<i32>} : memref<64x128xf32, #tpu.memory_space<vmem>>, vector<8x128xf32>,
    %c16_259 = arith.constant 16 : index
    %c0_260 = arith.constant 0 : index
    %806 = vector.load %arg12[%c16_259, %c0_260] : memref<64x128xf32, #tpu.memory_space<vmem>>, vector<8x128xf32>
    %807 = arith.truncf %800 : vector<8x32xf32> to vector<8x32xbf16>
    %cst_261 = arith.constant dense<0.000000e+00> : vector<8x128xf32>
    %808 = tpu.matmul %807, %755, %cst_261 {dimension_numbers = #tpu.dot_dimension_numbers<[1], [0], [0], [1], [0, 0, 1, 1], [], []>} : vector<8x32xbf16>, vector<32x128xbf16>, vector<8x128xf32> -> vector<8x128xf32>
    %809 = arith.addf %806, %808 : vector<8x128xf32>
    %810 = arith.mulf %809, %5 : vector<8x128xf32>
    %811 = math.tanh %810 : vector<8x128xf32>
    %812 = arith.mulf %811, %5 : vector<8x128xf32>
    %813 = arith.addf %812, %8 : vector<8x128xf32>
    %814 = vector.extract_strided_slice %813 {offsets = [0, 0], sizes = [8, 32], strides = [1, 1]} : vector<8x128xf32> to vector<8x32xf32>
    %815 = vector.extract_strided_slice %813 {offsets = [0, 32], sizes = [8, 32], strides = [1, 1]} : vector<8x128xf32> to vector<8x32xf32>
    %816 = vector.extract_strided_slice %813 {offsets = [0, 64], sizes = [8, 32], strides = [1, 1]} : vector<8x128xf32> to vector<8x32xf32>
    %817 = vector.extract_strided_slice %813 {offsets = [0, 96], sizes = [8, 32], strides = [1, 1]} : vector<8x128xf32> to vector<8x32xf32>
    %818 = arith.mulf %815, %798 : vector<8x32xf32>
    %819 = arith.mulf %814, %817 : vector<8x32xf32>
    %820 = arith.addf %818, %819 : vector<8x32xf32>
    %821 = math.tanh %820 : vector<8x32xf32>
    %822 = arith.mulf %816, %821 : vector<8x32xf32>
    %823 = arith.truncf %822 : vector<8x32xf32> to vector<8x32xbf16>
    %cst_262 = arith.constant dense<0.000000e+00> : vector<8x128xf32>
    %824 = tpu.matmul %823, %757, %cst_262 {dimension_numbers = #tpu.dot_dimension_numbers<[1], [0], [0], [1], [0, 0, 1, 1], [], []>} : vector<8x32xbf16>, vector<32x128xbf16>, vector<8x128xf32> -> vector<8x128xf32>
    %825 = vector.broadcast %759 : vector<1x128xf32> to vector<8x128xf32>
    %826 = arith.addf %824, %825 : vector<8x128xf32>
    %c16_263 = arith.constant 16 : index
    %c0_264 = arith.constant 0 : index
    %827 = vector.load %arg13[%c16_263, %c0_264] : memref<64x128xf32, #tpu.memory_space<vmem>>, vector<8x128xf32>
    tpu.vector_store %arg13[%c16_263, %c0_264], %826 {strides = array<i32>} : memref<64x128xf32, #tpu.memory_space<vmem>>, vector<8x128xf32>,
    %c24_265 = arith.constant 24 : index
    %c0_266 = arith.constant 0 : index
    %828 = vector.load %arg12[%c24_265, %c0_266] : memref<64x128xf32, #tpu.memory_space<vmem>>, vector<8x128xf32>
    %829 = arith.truncf %822 : vector<8x32xf32> to vector<8x32xbf16>
    %cst_267 = arith.constant dense<0.000000e+00> : vector<8x128xf32>
    %830 = tpu.matmul %829, %755, %cst_267 {dimension_numbers = #tpu.dot_dimension_numbers<[1], [0], [0], [1], [0, 0, 1, 1], [], []>} : vector<8x32xbf16>, vector<32x128xbf16>, vector<8x128xf32> -> vector<8x128xf32>
    %831 = arith.addf %828, %830 : vector<8x128xf32>
    %832 = arith.mulf %831, %5 : vector<8x128xf32>
    %833 = math.tanh %832 : vector<8x128xf32>
    %834 = arith.mulf %833, %5 : vector<8x128xf32>
    %835 = arith.addf %834, %8 : vector<8x128xf32>
    %836 = vector.extract_strided_slice %835 {offsets = [0, 0], sizes = [8, 32], strides = [1, 1]} : vector<8x128xf32> to vector<8x32xf32>
    %837 = vector.extract_strided_slice %835 {offsets = [0, 32], sizes = [8, 32], strides = [1, 1]} : vector<8x128xf32> to vector<8x32xf32>
    %838 = vector.extract_strided_slice %835 {offsets = [0, 64], sizes = [8, 32], strides = [1, 1]} : vector<8x128xf32> to vector<8x32xf32>
    %839 = vector.extract_strided_slice %835 {offsets = [0, 96], sizes = [8, 32], strides = [1, 1]} : vector<8x128xf32> to vector<8x32xf32>
    %840 = arith.mulf %837, %820 : vector<8x32xf32>
    %841 = arith.mulf %836, %839 : vector<8x32xf32>
    %842 = arith.addf %840, %841 : vector<8x32xf32>
    %843 = math.tanh %842 : vector<8x32xf32>
    %844 = arith.mulf %838, %843 : vector<8x32xf32>
    %845 = arith.truncf %844 : vector<8x32xf32> to vector<8x32xbf16>
    %cst_268 = arith.constant dense<0.000000e+00> : vector<8x128xf32>
    %846 = tpu.matmul %845, %757, %cst_268 {dimension_numbers = #tpu.dot_dimension_numbers<[1], [0], [0], [1], [0, 0, 1, 1], [], []>} : vector<8x32xbf16>, vector<32x128xbf16>, vector<8x128xf32> -> vector<8x128xf32>
    %847 = vector.broadcast %759 : vector<1x128xf32> to vector<8x128xf32>
    %848 = arith.addf %846, %847 : vector<8x128xf32>
    %c24_269 = arith.constant 24 : index
    %c0_270 = arith.constant 0 : index
    %849 = vector.load %arg13[%c24_269, %c0_270] : memref<64x128xf32, #tpu.memory_space<vmem>>, vector<8x128xf32>
    tpu.vector_store %arg13[%c24_269, %c0_270], %848 {strides = array<i32>} : memref<64x128xf32, #tpu.memory_space<vmem>>, vector<8x128xf32>,
    %c32_271 = arith.constant 32 : index
    %c0_272 = arith.constant 0 : index
    %850 = vector.load %arg12[%c32_271, %c0_272] : memref<64x128xf32, #tpu.memory_space<vmem>>, vector<8x128xf32>
    %851 = arith.truncf %844 : vector<8x32xf32> to vector<8x32xbf16>
    %cst_273 = arith.constant dense<0.000000e+00> : vector<8x128xf32>
    %852 = tpu.matmul %851, %755, %cst_273 {dimension_numbers = #tpu.dot_dimension_numbers<[1], [0], [0], [1], [0, 0, 1, 1], [], []>} : vector<8x32xbf16>, vector<32x128xbf16>, vector<8x128xf32> -> vector<8x128xf32>
    %853 = arith.addf %850, %852 : vector<8x128xf32>
    %854 = arith.mulf %853, %5 : vector<8x128xf32>
    %855 = math.tanh %854 : vector<8x128xf32>
    %856 = arith.mulf %855, %5 : vector<8x128xf32>
    %857 = arith.addf %856, %8 : vector<8x128xf32>
    %858 = vector.extract_strided_slice %857 {offsets = [0, 0], sizes = [8, 32], strides = [1, 1]} : vector<8x128xf32> to vector<8x32xf32>
    %859 = vector.extract_strided_slice %857 {offsets = [0, 32], sizes = [8, 32], strides = [1, 1]} : vector<8x128xf32> to vector<8x32xf32>
    %860 = vector.extract_strided_slice %857 {offsets = [0, 64], sizes = [8, 32], strides = [1, 1]} : vector<8x128xf32> to vector<8x32xf32>
    %861 = vector.extract_strided_slice %857 {offsets = [0, 96], sizes = [8, 32], strides = [1, 1]} : vector<8x128xf32> to vector<8x32xf32>
    %862 = arith.mulf %859, %842 : vector<8x32xf32>
    %863 = arith.mulf %858, %861 : vector<8x32xf32>
    %864 = arith.addf %862, %863 : vector<8x32xf32>
    %865 = math.tanh %864 : vector<8x32xf32>
    %866 = arith.mulf %860, %865 : vector<8x32xf32>
    %867 = arith.truncf %866 : vector<8x32xf32> to vector<8x32xbf16>
    %cst_274 = arith.constant dense<0.000000e+00> : vector<8x128xf32>
    %868 = tpu.matmul %867, %757, %cst_274 {dimension_numbers = #tpu.dot_dimension_numbers<[1], [0], [0], [1], [0, 0, 1, 1], [], []>} : vector<8x32xbf16>, vector<32x128xbf16>, vector<8x128xf32> -> vector<8x128xf32>
    %869 = vector.broadcast %759 : vector<1x128xf32> to vector<8x128xf32>
    %870 = arith.addf %868, %869 : vector<8x128xf32>
    %c32_275 = arith.constant 32 : index
    %c0_276 = arith.constant 0 : index
    %871 = vector.load %arg13[%c32_275, %c0_276] : memref<64x128xf32, #tpu.memory_space<vmem>>, vector<8x128xf32>
    tpu.vector_store %arg13[%c32_275, %c0_276], %870 {strides = array<i32>} : memref<64x128xf32, #tpu.memory_space<vmem>>, vector<8x128xf32>,
    %c40_277 = arith.constant 40 : index
    %c0_278 = arith.constant 0 : index
    %872 = vector.load %arg12[%c40_277, %c0_278] : memref<64x128xf32, #tpu.memory_space<vmem>>, vector<8x128xf32>
    %873 = arith.truncf %866 : vector<8x32xf32> to vector<8x32xbf16>
    %cst_279 = arith.constant dense<0.000000e+00> : vector<8x128xf32>
    %874 = tpu.matmul %873, %755, %cst_279 {dimension_numbers = #tpu.dot_dimension_numbers<[1], [0], [0], [1], [0, 0, 1, 1], [], []>} : vector<8x32xbf16>, vector<32x128xbf16>, vector<8x128xf32> -> vector<8x128xf32>
    %875 = arith.addf %872, %874 : vector<8x128xf32>
    %876 = arith.mulf %875, %5 : vector<8x128xf32>
    %877 = math.tanh %876 : vector<8x128xf32>
    %878 = arith.mulf %877, %5 : vector<8x128xf32>
    %879 = arith.addf %878, %8 : vector<8x128xf32>
    %880 = vector.extract_strided_slice %879 {offsets = [0, 0], sizes = [8, 32], strides = [1, 1]} : vector<8x128xf32> to vector<8x32xf32>
    %881 = vector.extract_strided_slice %879 {offsets = [0, 32], sizes = [8, 32], strides = [1, 1]} : vector<8x128xf32> to vector<8x32xf32>
    %882 = vector.extract_strided_slice %879 {offsets = [0, 64], sizes = [8, 32], strides = [1, 1]} : vector<8x128xf32> to vector<8x32xf32>
    %883 = vector.extract_strided_slice %879 {offsets = [0, 96], sizes = [8, 32], strides = [1, 1]} : vector<8x128xf32> to vector<8x32xf32>
    %884 = arith.mulf %881, %864 : vector<8x32xf32>
    %885 = arith.mulf %880, %883 : vector<8x32xf32>
    %886 = arith.addf %884, %885 : vector<8x32xf32>
    %887 = math.tanh %886 : vector<8x32xf32>
    %888 = arith.mulf %882, %887 : vector<8x32xf32>
    %889 = arith.truncf %888 : vector<8x32xf32> to vector<8x32xbf16>
    %cst_280 = arith.constant dense<0.000000e+00> : vector<8x128xf32>
    %890 = tpu.matmul %889, %757, %cst_280 {dimension_numbers = #tpu.dot_dimension_numbers<[1], [0], [0], [1], [0, 0, 1, 1], [], []>} : vector<8x32xbf16>, vector<32x128xbf16>, vector<8x128xf32> -> vector<8x128xf32>
    %891 = vector.broadcast %759 : vector<1x128xf32> to vector<8x128xf32>
    %892 = arith.addf %890, %891 : vector<8x128xf32>
    %c40_281 = arith.constant 40 : index
    %c0_282 = arith.constant 0 : index
    %893 = vector.load %arg13[%c40_281, %c0_282] : memref<64x128xf32, #tpu.memory_space<vmem>>, vector<8x128xf32>
    tpu.vector_store %arg13[%c40_281, %c0_282], %892 {strides = array<i32>} : memref<64x128xf32, #tpu.memory_space<vmem>>, vector<8x128xf32>,
    %c48_283 = arith.constant 48 : index
    %c0_284 = arith.constant 0 : index
    %894 = vector.load %arg12[%c48_283, %c0_284] : memref<64x128xf32, #tpu.memory_space<vmem>>, vector<8x128xf32>
    %895 = arith.truncf %888 : vector<8x32xf32> to vector<8x32xbf16>
    %cst_285 = arith.constant dense<0.000000e+00> : vector<8x128xf32>
    %896 = tpu.matmul %895, %755, %cst_285 {dimension_numbers = #tpu.dot_dimension_numbers<[1], [0], [0], [1], [0, 0, 1, 1], [], []>} : vector<8x32xbf16>, vector<32x128xbf16>, vector<8x128xf32> -> vector<8x128xf32>
    %897 = arith.addf %894, %896 : vector<8x128xf32>
    %898 = arith.mulf %897, %5 : vector<8x128xf32>
    %899 = math.tanh %898 : vector<8x128xf32>
    %900 = arith.mulf %899, %5 : vector<8x128xf32>
    %901 = arith.addf %900, %8 : vector<8x128xf32>
    %902 = vector.extract_strided_slice %901 {offsets = [0, 0], sizes = [8, 32], strides = [1, 1]} : vector<8x128xf32> to vector<8x32xf32>
    %903 = vector.extract_strided_slice %901 {offsets = [0, 32], sizes = [8, 32], strides = [1, 1]} : vector<8x128xf32> to vector<8x32xf32>
    %904 = vector.extract_strided_slice %901 {offsets = [0, 64], sizes = [8, 32], strides = [1, 1]} : vector<8x128xf32> to vector<8x32xf32>
    %905 = vector.extract_strided_slice %901 {offsets = [0, 96], sizes = [8, 32], strides = [1, 1]} : vector<8x128xf32> to vector<8x32xf32>
    %906 = arith.mulf %903, %886 : vector<8x32xf32>
    %907 = arith.mulf %902, %905 : vector<8x32xf32>
    %908 = arith.addf %906, %907 : vector<8x32xf32>
    %909 = math.tanh %908 : vector<8x32xf32>
    %910 = arith.mulf %904, %909 : vector<8x32xf32>
    %911 = arith.truncf %910 : vector<8x32xf32> to vector<8x32xbf16>
    %cst_286 = arith.constant dense<0.000000e+00> : vector<8x128xf32>
    %912 = tpu.matmul %911, %757, %cst_286 {dimension_numbers = #tpu.dot_dimension_numbers<[1], [0], [0], [1], [0, 0, 1, 1], [], []>} : vector<8x32xbf16>, vector<32x128xbf16>, vector<8x128xf32> -> vector<8x128xf32>
    %913 = vector.broadcast %759 : vector<1x128xf32> to vector<8x128xf32>
    %914 = arith.addf %912, %913 : vector<8x128xf32>
    %c48_287 = arith.constant 48 : index
    %c0_288 = arith.constant 0 : index
    %915 = vector.load %arg13[%c48_287, %c0_288] : memref<64x128xf32, #tpu.memory_space<vmem>>, vector<8x128xf32>
    tpu.vector_store %arg13[%c48_287, %c0_288], %914 {strides = array<i32>} : memref<64x128xf32, #tpu.memory_space<vmem>>, vector<8x128xf32>,
    %c56_289 = arith.constant 56 : index
    %c0_290 = arith.constant 0 : index
    %916 = vector.load %arg12[%c56_289, %c0_290] : memref<64x128xf32, #tpu.memory_space<vmem>>, vector<8x128xf32>
    %917 = arith.truncf %910 : vector<8x32xf32> to vector<8x32xbf16>
    %cst_291 = arith.constant dense<0.000000e+00> : vector<8x128xf32>
    %918 = tpu.matmul %917, %755, %cst_291 {dimension_numbers = #tpu.dot_dimension_numbers<[1], [0], [0], [1], [0, 0, 1, 1], [], []>} : vector<8x32xbf16>, vector<32x128xbf16>, vector<8x128xf32> -> vector<8x128xf32>
    %919 = arith.addf %916, %918 : vector<8x128xf32>
    %920 = arith.mulf %919, %5 : vector<8x128xf32>
    %921 = math.tanh %920 : vector<8x128xf32>
    %922 = arith.mulf %921, %5 : vector<8x128xf32>
    %923 = arith.addf %922, %8 : vector<8x128xf32>
    %924 = vector.extract_strided_slice %923 {offsets = [0, 0], sizes = [8, 32], strides = [1, 1]} : vector<8x128xf32> to vector<8x32xf32>
    %925 = vector.extract_strided_slice %923 {offsets = [0, 32], sizes = [8, 32], strides = [1, 1]} : vector<8x128xf32> to vector<8x32xf32>
    %926 = vector.extract_strided_slice %923 {offsets = [0, 64], sizes = [8, 32], strides = [1, 1]} : vector<8x128xf32> to vector<8x32xf32>
    %927 = vector.extract_strided_slice %923 {offsets = [0, 96], sizes = [8, 32], strides = [1, 1]} : vector<8x128xf32> to vector<8x32xf32>
    %928 = arith.mulf %925, %908 : vector<8x32xf32>
    %929 = arith.mulf %924, %927 : vector<8x32xf32>
    %930 = arith.addf %928, %929 : vector<8x32xf32>
    %931 = math.tanh %930 : vector<8x32xf32>
    %932 = arith.mulf %926, %931 : vector<8x32xf32>
    %933 = arith.truncf %932 : vector<8x32xf32> to vector<8x32xbf16>
    %cst_292 = arith.constant dense<0.000000e+00> : vector<8x128xf32>
    %934 = tpu.matmul %933, %757, %cst_292 {dimension_numbers = #tpu.dot_dimension_numbers<[1], [0], [0], [1], [0, 0, 1, 1], [], []>} : vector<8x32xbf16>, vector<32x128xbf16>, vector<8x128xf32> -> vector<8x128xf32>
    %935 = vector.broadcast %759 : vector<1x128xf32> to vector<8x128xf32>
    %936 = arith.addf %934, %935 : vector<8x128xf32>
    %c56_293 = arith.constant 56 : index
    %c0_294 = arith.constant 0 : index
    %937 = vector.load %arg13[%c56_293, %c0_294] : memref<64x128xf32, #tpu.memory_space<vmem>>, vector<8x128xf32>
    tpu.vector_store %arg13[%c56_293, %c0_294], %936 {strides = array<i32>} : memref<64x128xf32, #tpu.memory_space<vmem>>, vector<8x128xf32>,
    %c5_295 = arith.constant 5 : index
    %c0_296 = arith.constant 0 : index
    %c0_297 = arith.constant 0 : index
    %938 = vector.load %arg3[%c5_295, %c0_296, %c0_297] : memref<10x32x128xbf16, #tpu.memory_space<vmem>>, vector<1x32x128xbf16>
    %939 = vector.shape_cast %938 : vector<1x32x128xbf16> to vector<32x128xbf16>
    %c5_298 = arith.constant 5 : index
    %c0_299 = arith.constant 0 : index
    %c0_300 = arith.constant 0 : index
    %940 = vector.load %arg2[%c5_298, %c0_299, %c0_300] : memref<9x32x128xbf16, #tpu.memory_space<vmem>>, vector<1x32x128xbf16>
    %941 = vector.shape_cast %940 : vector<1x32x128xbf16> to vector<32x128xbf16>
    %c6 = arith.constant 6 : index
    %c0_301 = arith.constant 0 : index
    %c0_302 = arith.constant 0 : index
    %942 = vector.load %arg4[%c6, %c0_301, %c0_302] : memref<10x1x128xf32, #tpu.memory_space<vmem>>, vector<1x1x128xf32>
    %943 = vector.shape_cast %942 : vector<1x1x128xf32> to vector<1x128xf32>
    %cst_303 = arith.constant 0.000000e+00 : f32
    %944 = vector.broadcast %cst_303 : f32 to vector<8x32xf32>
    %cst_304 = arith.constant 0.000000e+00 : f32
    %945 = vector.broadcast %cst_304 : f32 to vector<8x32xf32>
    %c0_305 = arith.constant 0 : index
    %c0_306 = arith.constant 0 : index
    %946 = vector.load %arg13[%c0_305, %c0_306] : memref<64x128xf32, #tpu.memory_space<vmem>>, vector<8x128xf32>
    %947 = arith.truncf %944 : vector<8x32xf32> to vector<8x32xbf16>
    %cst_307 = arith.constant dense<0.000000e+00> : vector<8x128xf32>
    %948 = tpu.matmul %947, %939, %cst_307 {dimension_numbers = #tpu.dot_dimension_numbers<[1], [0], [0], [1], [0, 0, 1, 1], [], []>} : vector<8x32xbf16>, vector<32x128xbf16>, vector<8x128xf32> -> vector<8x128xf32>
    %949 = arith.addf %946, %948 : vector<8x128xf32>
    %950 = arith.mulf %949, %5 : vector<8x128xf32>
    %951 = math.tanh %950 : vector<8x128xf32>
    %952 = arith.mulf %951, %5 : vector<8x128xf32>
    %953 = arith.addf %952, %8 : vector<8x128xf32>
    %954 = vector.extract_strided_slice %953 {offsets = [0, 0], sizes = [8, 32], strides = [1, 1]} : vector<8x128xf32> to vector<8x32xf32>
    %955 = vector.extract_strided_slice %953 {offsets = [0, 32], sizes = [8, 32], strides = [1, 1]} : vector<8x128xf32> to vector<8x32xf32>
    %956 = vector.extract_strided_slice %953 {offsets = [0, 64], sizes = [8, 32], strides = [1, 1]} : vector<8x128xf32> to vector<8x32xf32>
    %957 = vector.extract_strided_slice %953 {offsets = [0, 96], sizes = [8, 32], strides = [1, 1]} : vector<8x128xf32> to vector<8x32xf32>
    %958 = arith.mulf %955, %945 : vector<8x32xf32>
    %959 = arith.mulf %954, %957 : vector<8x32xf32>
    %960 = arith.addf %958, %959 : vector<8x32xf32>
    %961 = math.tanh %960 : vector<8x32xf32>
    %962 = arith.mulf %956, %961 : vector<8x32xf32>
    %963 = arith.truncf %962 : vector<8x32xf32> to vector<8x32xbf16>
    %cst_308 = arith.constant dense<0.000000e+00> : vector<8x128xf32>
    %964 = tpu.matmul %963, %941, %cst_308 {dimension_numbers = #tpu.dot_dimension_numbers<[1], [0], [0], [1], [0, 0, 1, 1], [], []>} : vector<8x32xbf16>, vector<32x128xbf16>, vector<8x128xf32> -> vector<8x128xf32>
    %965 = vector.broadcast %943 : vector<1x128xf32> to vector<8x128xf32>
    %966 = arith.addf %964, %965 : vector<8x128xf32>
    %c0_309 = arith.constant 0 : index
    %c0_310 = arith.constant 0 : index
    %967 = vector.load %arg12[%c0_309, %c0_310] : memref<64x128xf32, #tpu.memory_space<vmem>>, vector<8x128xf32>
    tpu.vector_store %arg12[%c0_309, %c0_310], %966 {strides = array<i32>} : memref<64x128xf32, #tpu.memory_space<vmem>>, vector<8x128xf32>,
    %c8_311 = arith.constant 8 : index
    %c0_312 = arith.constant 0 : index
    %968 = vector.load %arg13[%c8_311, %c0_312] : memref<64x128xf32, #tpu.memory_space<vmem>>, vector<8x128xf32>
    %969 = arith.truncf %962 : vector<8x32xf32> to vector<8x32xbf16>
    %cst_313 = arith.constant dense<0.000000e+00> : vector<8x128xf32>
    %970 = tpu.matmul %969, %939, %cst_313 {dimension_numbers = #tpu.dot_dimension_numbers<[1], [0], [0], [1], [0, 0, 1, 1], [], []>} : vector<8x32xbf16>, vector<32x128xbf16>, vector<8x128xf32> -> vector<8x128xf32>
    %971 = arith.addf %968, %970 : vector<8x128xf32>
    %972 = arith.mulf %971, %5 : vector<8x128xf32>
    %973 = math.tanh %972 : vector<8x128xf32>
    %974 = arith.mulf %973, %5 : vector<8x128xf32>
    %975 = arith.addf %974, %8 : vector<8x128xf32>
    %976 = vector.extract_strided_slice %975 {offsets = [0, 0], sizes = [8, 32], strides = [1, 1]} : vector<8x128xf32> to vector<8x32xf32>
    %977 = vector.extract_strided_slice %975 {offsets = [0, 32], sizes = [8, 32], strides = [1, 1]} : vector<8x128xf32> to vector<8x32xf32>
    %978 = vector.extract_strided_slice %975 {offsets = [0, 64], sizes = [8, 32], strides = [1, 1]} : vector<8x128xf32> to vector<8x32xf32>
    %979 = vector.extract_strided_slice %975 {offsets = [0, 96], sizes = [8, 32], strides = [1, 1]} : vector<8x128xf32> to vector<8x32xf32>
    %980 = arith.mulf %977, %960 : vector<8x32xf32>
    %981 = arith.mulf %976, %979 : vector<8x32xf32>
    %982 = arith.addf %980, %981 : vector<8x32xf32>
    %983 = math.tanh %982 : vector<8x32xf32>
    %984 = arith.mulf %978, %983 : vector<8x32xf32>
    %985 = arith.truncf %984 : vector<8x32xf32> to vector<8x32xbf16>
    %cst_314 = arith.constant dense<0.000000e+00> : vector<8x128xf32>
    %986 = tpu.matmul %985, %941, %cst_314 {dimension_numbers = #tpu.dot_dimension_numbers<[1], [0], [0], [1], [0, 0, 1, 1], [], []>} : vector<8x32xbf16>, vector<32x128xbf16>, vector<8x128xf32> -> vector<8x128xf32>
    %987 = vector.broadcast %943 : vector<1x128xf32> to vector<8x128xf32>
    %988 = arith.addf %986, %987 : vector<8x128xf32>
    %c8_315 = arith.constant 8 : index
    %c0_316 = arith.constant 0 : index
    %989 = vector.load %arg12[%c8_315, %c0_316] : memref<64x128xf32, #tpu.memory_space<vmem>>, vector<8x128xf32>
    tpu.vector_store %arg12[%c8_315, %c0_316], %988 {strides = array<i32>} : memref<64x128xf32, #tpu.memory_space<vmem>>, vector<8x128xf32>,
    %c16_317 = arith.constant 16 : index
    %c0_318 = arith.constant 0 : index
    %990 = vector.load %arg13[%c16_317, %c0_318] : memref<64x128xf32, #tpu.memory_space<vmem>>, vector<8x128xf32>
    %991 = arith.truncf %984 : vector<8x32xf32> to vector<8x32xbf16>
    %cst_319 = arith.constant dense<0.000000e+00> : vector<8x128xf32>
    %992 = tpu.matmul %991, %939, %cst_319 {dimension_numbers = #tpu.dot_dimension_numbers<[1], [0], [0], [1], [0, 0, 1, 1], [], []>} : vector<8x32xbf16>, vector<32x128xbf16>, vector<8x128xf32> -> vector<8x128xf32>
    %993 = arith.addf %990, %992 : vector<8x128xf32>
    %994 = arith.mulf %993, %5 : vector<8x128xf32>
    %995 = math.tanh %994 : vector<8x128xf32>
    %996 = arith.mulf %995, %5 : vector<8x128xf32>
    %997 = arith.addf %996, %8 : vector<8x128xf32>
    %998 = vector.extract_strided_slice %997 {offsets = [0, 0], sizes = [8, 32], strides = [1, 1]} : vector<8x128xf32> to vector<8x32xf32>
    %999 = vector.extract_strided_slice %997 {offsets = [0, 32], sizes = [8, 32], strides = [1, 1]} : vector<8x128xf32> to vector<8x32xf32>
    %1000 = vector.extract_strided_slice %997 {offsets = [0, 64], sizes = [8, 32], strides = [1, 1]} : vector<8x128xf32> to vector<8x32xf32>
    %1001 = vector.extract_strided_slice %997 {offsets = [0, 96], sizes = [8, 32], strides = [1, 1]} : vector<8x128xf32> to vector<8x32xf32>
    %1002 = arith.mulf %999, %982 : vector<8x32xf32>
    %1003 = arith.mulf %998, %1001 : vector<8x32xf32>
    %1004 = arith.addf %1002, %1003 : vector<8x32xf32>
    %1005 = math.tanh %1004 : vector<8x32xf32>
    %1006 = arith.mulf %1000, %1005 : vector<8x32xf32>
    %1007 = arith.truncf %1006 : vector<8x32xf32> to vector<8x32xbf16>
    %cst_320 = arith.constant dense<0.000000e+00> : vector<8x128xf32>
    %1008 = tpu.matmul %1007, %941, %cst_320 {dimension_numbers = #tpu.dot_dimension_numbers<[1], [0], [0], [1], [0, 0, 1, 1], [], []>} : vector<8x32xbf16>, vector<32x128xbf16>, vector<8x128xf32> -> vector<8x128xf32>
    %1009 = vector.broadcast %943 : vector<1x128xf32> to vector<8x128xf32>
    %1010 = arith.addf %1008, %1009 : vector<8x128xf32>
    %c16_321 = arith.constant 16 : index
    %c0_322 = arith.constant 0 : index
    %1011 = vector.load %arg12[%c16_321, %c0_322] : memref<64x128xf32, #tpu.memory_space<vmem>>, vector<8x128xf32>
    tpu.vector_store %arg12[%c16_321, %c0_322], %1010 {strides = array<i32>} : memref<64x128xf32, #tpu.memory_space<vmem>>, vector<8x128xf32>,
    %c24_323 = arith.constant 24 : index
    %c0_324 = arith.constant 0 : index
    %1012 = vector.load %arg13[%c24_323, %c0_324] : memref<64x128xf32, #tpu.memory_space<vmem>>, vector<8x128xf32>
    %1013 = arith.truncf %1006 : vector<8x32xf32> to vector<8x32xbf16>
    %cst_325 = arith.constant dense<0.000000e+00> : vector<8x128xf32>
    %1014 = tpu.matmul %1013, %939, %cst_325 {dimension_numbers = #tpu.dot_dimension_numbers<[1], [0], [0], [1], [0, 0, 1, 1], [], []>} : vector<8x32xbf16>, vector<32x128xbf16>, vector<8x128xf32> -> vector<8x128xf32>
    %1015 = arith.addf %1012, %1014 : vector<8x128xf32>
    %1016 = arith.mulf %1015, %5 : vector<8x128xf32>
    %1017 = math.tanh %1016 : vector<8x128xf32>
    %1018 = arith.mulf %1017, %5 : vector<8x128xf32>
    %1019 = arith.addf %1018, %8 : vector<8x128xf32>
    %1020 = vector.extract_strided_slice %1019 {offsets = [0, 0], sizes = [8, 32], strides = [1, 1]} : vector<8x128xf32> to vector<8x32xf32>
    %1021 = vector.extract_strided_slice %1019 {offsets = [0, 32], sizes = [8, 32], strides = [1, 1]} : vector<8x128xf32> to vector<8x32xf32>
    %1022 = vector.extract_strided_slice %1019 {offsets = [0, 64], sizes = [8, 32], strides = [1, 1]} : vector<8x128xf32> to vector<8x32xf32>
    %1023 = vector.extract_strided_slice %1019 {offsets = [0, 96], sizes = [8, 32], strides = [1, 1]} : vector<8x128xf32> to vector<8x32xf32>
    %1024 = arith.mulf %1021, %1004 : vector<8x32xf32>
    %1025 = arith.mulf %1020, %1023 : vector<8x32xf32>
    %1026 = arith.addf %1024, %1025 : vector<8x32xf32>
    %1027 = math.tanh %1026 : vector<8x32xf32>
    %1028 = arith.mulf %1022, %1027 : vector<8x32xf32>
    %1029 = arith.truncf %1028 : vector<8x32xf32> to vector<8x32xbf16>
    %cst_326 = arith.constant dense<0.000000e+00> : vector<8x128xf32>
    %1030 = tpu.matmul %1029, %941, %cst_326 {dimension_numbers = #tpu.dot_dimension_numbers<[1], [0], [0], [1], [0, 0, 1, 1], [], []>} : vector<8x32xbf16>, vector<32x128xbf16>, vector<8x128xf32> -> vector<8x128xf32>
    %1031 = vector.broadcast %943 : vector<1x128xf32> to vector<8x128xf32>
    %1032 = arith.addf %1030, %1031 : vector<8x128xf32>
    %c24_327 = arith.constant 24 : index
    %c0_328 = arith.constant 0 : index
    %1033 = vector.load %arg12[%c24_327, %c0_328] : memref<64x128xf32, #tpu.memory_space<vmem>>, vector<8x128xf32>
    tpu.vector_store %arg12[%c24_327, %c0_328], %1032 {strides = array<i32>} : memref<64x128xf32, #tpu.memory_space<vmem>>, vector<8x128xf32>,
    %c32_329 = arith.constant 32 : index
    %c0_330 = arith.constant 0 : index
    %1034 = vector.load %arg13[%c32_329, %c0_330] : memref<64x128xf32, #tpu.memory_space<vmem>>, vector<8x128xf32>
    %1035 = arith.truncf %1028 : vector<8x32xf32> to vector<8x32xbf16>
    %cst_331 = arith.constant dense<0.000000e+00> : vector<8x128xf32>
    %1036 = tpu.matmul %1035, %939, %cst_331 {dimension_numbers = #tpu.dot_dimension_numbers<[1], [0], [0], [1], [0, 0, 1, 1], [], []>} : vector<8x32xbf16>, vector<32x128xbf16>, vector<8x128xf32> -> vector<8x128xf32>
    %1037 = arith.addf %1034, %1036 : vector<8x128xf32>
    %1038 = arith.mulf %1037, %5 : vector<8x128xf32>
    %1039 = math.tanh %1038 : vector<8x128xf32>
    %1040 = arith.mulf %1039, %5 : vector<8x128xf32>
    %1041 = arith.addf %1040, %8 : vector<8x128xf32>
    %1042 = vector.extract_strided_slice %1041 {offsets = [0, 0], sizes = [8, 32], strides = [1, 1]} : vector<8x128xf32> to vector<8x32xf32>
    %1043 = vector.extract_strided_slice %1041 {offsets = [0, 32], sizes = [8, 32], strides = [1, 1]} : vector<8x128xf32> to vector<8x32xf32>
    %1044 = vector.extract_strided_slice %1041 {offsets = [0, 64], sizes = [8, 32], strides = [1, 1]} : vector<8x128xf32> to vector<8x32xf32>
    %1045 = vector.extract_strided_slice %1041 {offsets = [0, 96], sizes = [8, 32], strides = [1, 1]} : vector<8x128xf32> to vector<8x32xf32>
    %1046 = arith.mulf %1043, %1026 : vector<8x32xf32>
    %1047 = arith.mulf %1042, %1045 : vector<8x32xf32>
    %1048 = arith.addf %1046, %1047 : vector<8x32xf32>
    %1049 = math.tanh %1048 : vector<8x32xf32>
    %1050 = arith.mulf %1044, %1049 : vector<8x32xf32>
    %1051 = arith.truncf %1050 : vector<8x32xf32> to vector<8x32xbf16>
    %cst_332 = arith.constant dense<0.000000e+00> : vector<8x128xf32>
    %1052 = tpu.matmul %1051, %941, %cst_332 {dimension_numbers = #tpu.dot_dimension_numbers<[1], [0], [0], [1], [0, 0, 1, 1], [], []>} : vector<8x32xbf16>, vector<32x128xbf16>, vector<8x128xf32> -> vector<8x128xf32>
    %1053 = vector.broadcast %943 : vector<1x128xf32> to vector<8x128xf32>
    %1054 = arith.addf %1052, %1053 : vector<8x128xf32>
    %c32_333 = arith.constant 32 : index
    %c0_334 = arith.constant 0 : index
    %1055 = vector.load %arg12[%c32_333, %c0_334] : memref<64x128xf32, #tpu.memory_space<vmem>>, vector<8x128xf32>
    tpu.vector_store %arg12[%c32_333, %c0_334], %1054 {strides = array<i32>} : memref<64x128xf32, #tpu.memory_space<vmem>>, vector<8x128xf32>,
    %c40_335 = arith.constant 40 : index
    %c0_336 = arith.constant 0 : index
    %1056 = vector.load %arg13[%c40_335, %c0_336] : memref<64x128xf32, #tpu.memory_space<vmem>>, vector<8x128xf32>
    %1057 = arith.truncf %1050 : vector<8x32xf32> to vector<8x32xbf16>
    %cst_337 = arith.constant dense<0.000000e+00> : vector<8x128xf32>
    %1058 = tpu.matmul %1057, %939, %cst_337 {dimension_numbers = #tpu.dot_dimension_numbers<[1], [0], [0], [1], [0, 0, 1, 1], [], []>} : vector<8x32xbf16>, vector<32x128xbf16>, vector<8x128xf32> -> vector<8x128xf32>
    %1059 = arith.addf %1056, %1058 : vector<8x128xf32>
    %1060 = arith.mulf %1059, %5 : vector<8x128xf32>
    %1061 = math.tanh %1060 : vector<8x128xf32>
    %1062 = arith.mulf %1061, %5 : vector<8x128xf32>
    %1063 = arith.addf %1062, %8 : vector<8x128xf32>
    %1064 = vector.extract_strided_slice %1063 {offsets = [0, 0], sizes = [8, 32], strides = [1, 1]} : vector<8x128xf32> to vector<8x32xf32>
    %1065 = vector.extract_strided_slice %1063 {offsets = [0, 32], sizes = [8, 32], strides = [1, 1]} : vector<8x128xf32> to vector<8x32xf32>
    %1066 = vector.extract_strided_slice %1063 {offsets = [0, 64], sizes = [8, 32], strides = [1, 1]} : vector<8x128xf32> to vector<8x32xf32>
    %1067 = vector.extract_strided_slice %1063 {offsets = [0, 96], sizes = [8, 32], strides = [1, 1]} : vector<8x128xf32> to vector<8x32xf32>
    %1068 = arith.mulf %1065, %1048 : vector<8x32xf32>
    %1069 = arith.mulf %1064, %1067 : vector<8x32xf32>
    %1070 = arith.addf %1068, %1069 : vector<8x32xf32>
    %1071 = math.tanh %1070 : vector<8x32xf32>
    %1072 = arith.mulf %1066, %1071 : vector<8x32xf32>
    %1073 = arith.truncf %1072 : vector<8x32xf32> to vector<8x32xbf16>
    %cst_338 = arith.constant dense<0.000000e+00> : vector<8x128xf32>
    %1074 = tpu.matmul %1073, %941, %cst_338 {dimension_numbers = #tpu.dot_dimension_numbers<[1], [0], [0], [1], [0, 0, 1, 1], [], []>} : vector<8x32xbf16>, vector<32x128xbf16>, vector<8x128xf32> -> vector<8x128xf32>
    %1075 = vector.broadcast %943 : vector<1x128xf32> to vector<8x128xf32>
    %1076 = arith.addf %1074, %1075 : vector<8x128xf32>
    %c40_339 = arith.constant 40 : index
    %c0_340 = arith.constant 0 : index
    %1077 = vector.load %arg12[%c40_339, %c0_340] : memref<64x128xf32, #tpu.memory_space<vmem>>, vector<8x128xf32>
    tpu.vector_store %arg12[%c40_339, %c0_340], %1076 {strides = array<i32>} : memref<64x128xf32, #tpu.memory_space<vmem>>, vector<8x128xf32>,
    %c48_341 = arith.constant 48 : index
    %c0_342 = arith.constant 0 : index
    %1078 = vector.load %arg13[%c48_341, %c0_342] : memref<64x128xf32, #tpu.memory_space<vmem>>, vector<8x128xf32>
    %1079 = arith.truncf %1072 : vector<8x32xf32> to vector<8x32xbf16>
    %cst_343 = arith.constant dense<0.000000e+00> : vector<8x128xf32>
    %1080 = tpu.matmul %1079, %939, %cst_343 {dimension_numbers = #tpu.dot_dimension_numbers<[1], [0], [0], [1], [0, 0, 1, 1], [], []>} : vector<8x32xbf16>, vector<32x128xbf16>, vector<8x128xf32> -> vector<8x128xf32>
    %1081 = arith.addf %1078, %1080 : vector<8x128xf32>
    %1082 = arith.mulf %1081, %5 : vector<8x128xf32>
    %1083 = math.tanh %1082 : vector<8x128xf32>
    %1084 = arith.mulf %1083, %5 : vector<8x128xf32>
    %1085 = arith.addf %1084, %8 : vector<8x128xf32>
    %1086 = vector.extract_strided_slice %1085 {offsets = [0, 0], sizes = [8, 32], strides = [1, 1]} : vector<8x128xf32> to vector<8x32xf32>
    %1087 = vector.extract_strided_slice %1085 {offsets = [0, 32], sizes = [8, 32], strides = [1, 1]} : vector<8x128xf32> to vector<8x32xf32>
    %1088 = vector.extract_strided_slice %1085 {offsets = [0, 64], sizes = [8, 32], strides = [1, 1]} : vector<8x128xf32> to vector<8x32xf32>
    %1089 = vector.extract_strided_slice %1085 {offsets = [0, 96], sizes = [8, 32], strides = [1, 1]} : vector<8x128xf32> to vector<8x32xf32>
    %1090 = arith.mulf %1087, %1070 : vector<8x32xf32>
    %1091 = arith.mulf %1086, %1089 : vector<8x32xf32>
    %1092 = arith.addf %1090, %1091 : vector<8x32xf32>
    %1093 = math.tanh %1092 : vector<8x32xf32>
    %1094 = arith.mulf %1088, %1093 : vector<8x32xf32>
    %1095 = arith.truncf %1094 : vector<8x32xf32> to vector<8x32xbf16>
    %cst_344 = arith.constant dense<0.000000e+00> : vector<8x128xf32>
    %1096 = tpu.matmul %1095, %941, %cst_344 {dimension_numbers = #tpu.dot_dimension_numbers<[1], [0], [0], [1], [0, 0, 1, 1], [], []>} : vector<8x32xbf16>, vector<32x128xbf16>, vector<8x128xf32> -> vector<8x128xf32>
    %1097 = vector.broadcast %943 : vector<1x128xf32> to vector<8x128xf32>
    %1098 = arith.addf %1096, %1097 : vector<8x128xf32>
    %c48_345 = arith.constant 48 : index
    %c0_346 = arith.constant 0 : index
    %1099 = vector.load %arg12[%c48_345, %c0_346] : memref<64x128xf32, #tpu.memory_space<vmem>>, vector<8x128xf32>
    tpu.vector_store %arg12[%c48_345, %c0_346], %1098 {strides = array<i32>} : memref<64x128xf32, #tpu.memory_space<vmem>>, vector<8x128xf32>,
    %c56_347 = arith.constant 56 : index
    %c0_348 = arith.constant 0 : index
    %1100 = vector.load %arg13[%c56_347, %c0_348] : memref<64x128xf32, #tpu.memory_space<vmem>>, vector<8x128xf32>
    %1101 = arith.truncf %1094 : vector<8x32xf32> to vector<8x32xbf16>
    %cst_349 = arith.constant dense<0.000000e+00> : vector<8x128xf32>
    %1102 = tpu.matmul %1101, %939, %cst_349 {dimension_numbers = #tpu.dot_dimension_numbers<[1], [0], [0], [1], [0, 0, 1, 1], [], []>} : vector<8x32xbf16>, vector<32x128xbf16>, vector<8x128xf32> -> vector<8x128xf32>
    %1103 = arith.addf %1100, %1102 : vector<8x128xf32>
    %1104 = arith.mulf %1103, %5 : vector<8x128xf32>
    %1105 = math.tanh %1104 : vector<8x128xf32>
    %1106 = arith.mulf %1105, %5 : vector<8x128xf32>
    %1107 = arith.addf %1106, %8 : vector<8x128xf32>
    %1108 = vector.extract_strided_slice %1107 {offsets = [0, 0], sizes = [8, 32], strides = [1, 1]} : vector<8x128xf32> to vector<8x32xf32>
    %1109 = vector.extract_strided_slice %1107 {offsets = [0, 32], sizes = [8, 32], strides = [1, 1]} : vector<8x128xf32> to vector<8x32xf32>
    %1110 = vector.extract_strided_slice %1107 {offsets = [0, 64], sizes = [8, 32], strides = [1, 1]} : vector<8x128xf32> to vector<8x32xf32>
    %1111 = vector.extract_strided_slice %1107 {offsets = [0, 96], sizes = [8, 32], strides = [1, 1]} : vector<8x128xf32> to vector<8x32xf32>
    %1112 = arith.mulf %1109, %1092 : vector<8x32xf32>
    %1113 = arith.mulf %1108, %1111 : vector<8x32xf32>
    %1114 = arith.addf %1112, %1113 : vector<8x32xf32>
    %1115 = math.tanh %1114 : vector<8x32xf32>
    %1116 = arith.mulf %1110, %1115 : vector<8x32xf32>
    %1117 = arith.truncf %1116 : vector<8x32xf32> to vector<8x32xbf16>
    %cst_350 = arith.constant dense<0.000000e+00> : vector<8x128xf32>
    %1118 = tpu.matmul %1117, %941, %cst_350 {dimension_numbers = #tpu.dot_dimension_numbers<[1], [0], [0], [1], [0, 0, 1, 1], [], []>} : vector<8x32xbf16>, vector<32x128xbf16>, vector<8x128xf32> -> vector<8x128xf32>
    %1119 = vector.broadcast %943 : vector<1x128xf32> to vector<8x128xf32>
    %1120 = arith.addf %1118, %1119 : vector<8x128xf32>
    %c56_351 = arith.constant 56 : index
    %c0_352 = arith.constant 0 : index
    %1121 = vector.load %arg12[%c56_351, %c0_352] : memref<64x128xf32, #tpu.memory_space<vmem>>, vector<8x128xf32>
    tpu.vector_store %arg12[%c56_351, %c0_352], %1120 {strides = array<i32>} : memref<64x128xf32, #tpu.memory_space<vmem>>, vector<8x128xf32>,
    %c6_353 = arith.constant 6 : index
    %c0_354 = arith.constant 0 : index
    %c0_355 = arith.constant 0 : index
    %1122 = vector.load %arg3[%c6_353, %c0_354, %c0_355] : memref<10x32x128xbf16, #tpu.memory_space<vmem>>, vector<1x32x128xbf16>
    %1123 = vector.shape_cast %1122 : vector<1x32x128xbf16> to vector<32x128xbf16>
    %c6_356 = arith.constant 6 : index
    %c0_357 = arith.constant 0 : index
    %c0_358 = arith.constant 0 : index
    %1124 = vector.load %arg2[%c6_356, %c0_357, %c0_358] : memref<9x32x128xbf16, #tpu.memory_space<vmem>>, vector<1x32x128xbf16>
    %1125 = vector.shape_cast %1124 : vector<1x32x128xbf16> to vector<32x128xbf16>
    %c7 = arith.constant 7 : index
    %c0_359 = arith.constant 0 : index
    %c0_360 = arith.constant 0 : index
    %1126 = vector.load %arg4[%c7, %c0_359, %c0_360] : memref<10x1x128xf32, #tpu.memory_space<vmem>>, vector<1x1x128xf32>
    %1127 = vector.shape_cast %1126 : vector<1x1x128xf32> to vector<1x128xf32>
    %cst_361 = arith.constant 0.000000e+00 : f32
    %1128 = vector.broadcast %cst_361 : f32 to vector<8x32xf32>
    %cst_362 = arith.constant 0.000000e+00 : f32
    %1129 = vector.broadcast %cst_362 : f32 to vector<8x32xf32>
    %c0_363 = arith.constant 0 : index
    %c0_364 = arith.constant 0 : index
    %1130 = vector.load %arg12[%c0_363, %c0_364] : memref<64x128xf32, #tpu.memory_space<vmem>>, vector<8x128xf32>
    %1131 = arith.truncf %1128 : vector<8x32xf32> to vector<8x32xbf16>
    %cst_365 = arith.constant dense<0.000000e+00> : vector<8x128xf32>
    %1132 = tpu.matmul %1131, %1123, %cst_365 {dimension_numbers = #tpu.dot_dimension_numbers<[1], [0], [0], [1], [0, 0, 1, 1], [], []>} : vector<8x32xbf16>, vector<32x128xbf16>, vector<8x128xf32> -> vector<8x128xf32>
    %1133 = arith.addf %1130, %1132 : vector<8x128xf32>
    %1134 = arith.mulf %1133, %5 : vector<8x128xf32>
    %1135 = math.tanh %1134 : vector<8x128xf32>
    %1136 = arith.mulf %1135, %5 : vector<8x128xf32>
    %1137 = arith.addf %1136, %8 : vector<8x128xf32>
    %1138 = vector.extract_strided_slice %1137 {offsets = [0, 0], sizes = [8, 32], strides = [1, 1]} : vector<8x128xf32> to vector<8x32xf32>
    %1139 = vector.extract_strided_slice %1137 {offsets = [0, 32], sizes = [8, 32], strides = [1, 1]} : vector<8x128xf32> to vector<8x32xf32>
    %1140 = vector.extract_strided_slice %1137 {offsets = [0, 64], sizes = [8, 32], strides = [1, 1]} : vector<8x128xf32> to vector<8x32xf32>
    %1141 = vector.extract_strided_slice %1137 {offsets = [0, 96], sizes = [8, 32], strides = [1, 1]} : vector<8x128xf32> to vector<8x32xf32>
    %1142 = arith.mulf %1139, %1129 : vector<8x32xf32>
    %1143 = arith.mulf %1138, %1141 : vector<8x32xf32>
    %1144 = arith.addf %1142, %1143 : vector<8x32xf32>
    %1145 = math.tanh %1144 : vector<8x32xf32>
    %1146 = arith.mulf %1140, %1145 : vector<8x32xf32>
    %1147 = arith.truncf %1146 : vector<8x32xf32> to vector<8x32xbf16>
    %cst_366 = arith.constant dense<0.000000e+00> : vector<8x128xf32>
    %1148 = tpu.matmul %1147, %1125, %cst_366 {dimension_numbers = #tpu.dot_dimension_numbers<[1], [0], [0], [1], [0, 0, 1, 1], [], []>} : vector<8x32xbf16>, vector<32x128xbf16>, vector<8x128xf32> -> vector<8x128xf32>
    %1149 = vector.broadcast %1127 : vector<1x128xf32> to vector<8x128xf32>
    %1150 = arith.addf %1148, %1149 : vector<8x128xf32>
    %c0_367 = arith.constant 0 : index
    %c0_368 = arith.constant 0 : index
    %1151 = vector.load %arg13[%c0_367, %c0_368] : memref<64x128xf32, #tpu.memory_space<vmem>>, vector<8x128xf32>
    tpu.vector_store %arg13[%c0_367, %c0_368], %1150 {strides = array<i32>} : memref<64x128xf32, #tpu.memory_space<vmem>>, vector<8x128xf32>,
    %c8_369 = arith.constant 8 : index
    %c0_370 = arith.constant 0 : index
    %1152 = vector.load %arg12[%c8_369, %c0_370] : memref<64x128xf32, #tpu.memory_space<vmem>>, vector<8x128xf32>
    %1153 = arith.truncf %1146 : vector<8x32xf32> to vector<8x32xbf16>
    %cst_371 = arith.constant dense<0.000000e+00> : vector<8x128xf32>
    %1154 = tpu.matmul %1153, %1123, %cst_371 {dimension_numbers = #tpu.dot_dimension_numbers<[1], [0], [0], [1], [0, 0, 1, 1], [], []>} : vector<8x32xbf16>, vector<32x128xbf16>, vector<8x128xf32> -> vector<8x128xf32>
    %1155 = arith.addf %1152, %1154 : vector<8x128xf32>
    %1156 = arith.mulf %1155, %5 : vector<8x128xf32>
    %1157 = math.tanh %1156 : vector<8x128xf32>
    %1158 = arith.mulf %1157, %5 : vector<8x128xf32>
    %1159 = arith.addf %1158, %8 : vector<8x128xf32>
    %1160 = vector.extract_strided_slice %1159 {offsets = [0, 0], sizes = [8, 32], strides = [1, 1]} : vector<8x128xf32> to vector<8x32xf32>
    %1161 = vector.extract_strided_slice %1159 {offsets = [0, 32], sizes = [8, 32], strides = [1, 1]} : vector<8x128xf32> to vector<8x32xf32>
    %1162 = vector.extract_strided_slice %1159 {offsets = [0, 64], sizes = [8, 32], strides = [1, 1]} : vector<8x128xf32> to vector<8x32xf32>
    %1163 = vector.extract_strided_slice %1159 {offsets = [0, 96], sizes = [8, 32], strides = [1, 1]} : vector<8x128xf32> to vector<8x32xf32>
    %1164 = arith.mulf %1161, %1144 : vector<8x32xf32>
    %1165 = arith.mulf %1160, %1163 : vector<8x32xf32>
    %1166 = arith.addf %1164, %1165 : vector<8x32xf32>
    %1167 = math.tanh %1166 : vector<8x32xf32>
    %1168 = arith.mulf %1162, %1167 : vector<8x32xf32>
    %1169 = arith.truncf %1168 : vector<8x32xf32> to vector<8x32xbf16>
    %cst_372 = arith.constant dense<0.000000e+00> : vector<8x128xf32>
    %1170 = tpu.matmul %1169, %1125, %cst_372 {dimension_numbers = #tpu.dot_dimension_numbers<[1], [0], [0], [1], [0, 0, 1, 1], [], []>} : vector<8x32xbf16>, vector<32x128xbf16>, vector<8x128xf32> -> vector<8x128xf32>
    %1171 = vector.broadcast %1127 : vector<1x128xf32> to vector<8x128xf32>
    %1172 = arith.addf %1170, %1171 : vector<8x128xf32>
    %c8_373 = arith.constant 8 : index
    %c0_374 = arith.constant 0 : index
    %1173 = vector.load %arg13[%c8_373, %c0_374] : memref<64x128xf32, #tpu.memory_space<vmem>>, vector<8x128xf32>
    tpu.vector_store %arg13[%c8_373, %c0_374], %1172 {strides = array<i32>} : memref<64x128xf32, #tpu.memory_space<vmem>>, vector<8x128xf32>,
    %c16_375 = arith.constant 16 : index
    %c0_376 = arith.constant 0 : index
    %1174 = vector.load %arg12[%c16_375, %c0_376] : memref<64x128xf32, #tpu.memory_space<vmem>>, vector<8x128xf32>
    %1175 = arith.truncf %1168 : vector<8x32xf32> to vector<8x32xbf16>
    %cst_377 = arith.constant dense<0.000000e+00> : vector<8x128xf32>
    %1176 = tpu.matmul %1175, %1123, %cst_377 {dimension_numbers = #tpu.dot_dimension_numbers<[1], [0], [0], [1], [0, 0, 1, 1], [], []>} : vector<8x32xbf16>, vector<32x128xbf16>, vector<8x128xf32> -> vector<8x128xf32>
    %1177 = arith.addf %1174, %1176 : vector<8x128xf32>
    %1178 = arith.mulf %1177, %5 : vector<8x128xf32>
    %1179 = math.tanh %1178 : vector<8x128xf32>
    %1180 = arith.mulf %1179, %5 : vector<8x128xf32>
    %1181 = arith.addf %1180, %8 : vector<8x128xf32>
    %1182 = vector.extract_strided_slice %1181 {offsets = [0, 0], sizes = [8, 32], strides = [1, 1]} : vector<8x128xf32> to vector<8x32xf32>
    %1183 = vector.extract_strided_slice %1181 {offsets = [0, 32], sizes = [8, 32], strides = [1, 1]} : vector<8x128xf32> to vector<8x32xf32>
    %1184 = vector.extract_strided_slice %1181 {offsets = [0, 64], sizes = [8, 32], strides = [1, 1]} : vector<8x128xf32> to vector<8x32xf32>
    %1185 = vector.extract_strided_slice %1181 {offsets = [0, 96], sizes = [8, 32], strides = [1, 1]} : vector<8x128xf32> to vector<8x32xf32>
    %1186 = arith.mulf %1183, %1166 : vector<8x32xf32>
    %1187 = arith.mulf %1182, %1185 : vector<8x32xf32>
    %1188 = arith.addf %1186, %1187 : vector<8x32xf32>
    %1189 = math.tanh %1188 : vector<8x32xf32>
    %1190 = arith.mulf %1184, %1189 : vector<8x32xf32>
    %1191 = arith.truncf %1190 : vector<8x32xf32> to vector<8x32xbf16>
    %cst_378 = arith.constant dense<0.000000e+00> : vector<8x128xf32>
    %1192 = tpu.matmul %1191, %1125, %cst_378 {dimension_numbers = #tpu.dot_dimension_numbers<[1], [0], [0], [1], [0, 0, 1, 1], [], []>} : vector<8x32xbf16>, vector<32x128xbf16>, vector<8x128xf32> -> vector<8x128xf32>
    %1193 = vector.broadcast %1127 : vector<1x128xf32> to vector<8x128xf32>
    %1194 = arith.addf %1192, %1193 : vector<8x128xf32>
    %c16_379 = arith.constant 16 : index
    %c0_380 = arith.constant 0 : index
    %1195 = vector.load %arg13[%c16_379, %c0_380] : memref<64x128xf32, #tpu.memory_space<vmem>>, vector<8x128xf32>
    tpu.vector_store %arg13[%c16_379, %c0_380], %1194 {strides = array<i32>} : memref<64x128xf32, #tpu.memory_space<vmem>>, vector<8x128xf32>,
    %c24_381 = arith.constant 24 : index
    %c0_382 = arith.constant 0 : index
    %1196 = vector.load %arg12[%c24_381, %c0_382] : memref<64x128xf32, #tpu.memory_space<vmem>>, vector<8x128xf32>
    %1197 = arith.truncf %1190 : vector<8x32xf32> to vector<8x32xbf16>
    %cst_383 = arith.constant dense<0.000000e+00> : vector<8x128xf32>
    %1198 = tpu.matmul %1197, %1123, %cst_383 {dimension_numbers = #tpu.dot_dimension_numbers<[1], [0], [0], [1], [0, 0, 1, 1], [], []>} : vector<8x32xbf16>, vector<32x128xbf16>, vector<8x128xf32> -> vector<8x128xf32>
    %1199 = arith.addf %1196, %1198 : vector<8x128xf32>
    %1200 = arith.mulf %1199, %5 : vector<8x128xf32>
    %1201 = math.tanh %1200 : vector<8x128xf32>
    %1202 = arith.mulf %1201, %5 : vector<8x128xf32>
    %1203 = arith.addf %1202, %8 : vector<8x128xf32>
    %1204 = vector.extract_strided_slice %1203 {offsets = [0, 0], sizes = [8, 32], strides = [1, 1]} : vector<8x128xf32> to vector<8x32xf32>
    %1205 = vector.extract_strided_slice %1203 {offsets = [0, 32], sizes = [8, 32], strides = [1, 1]} : vector<8x128xf32> to vector<8x32xf32>
    %1206 = vector.extract_strided_slice %1203 {offsets = [0, 64], sizes = [8, 32], strides = [1, 1]} : vector<8x128xf32> to vector<8x32xf32>
    %1207 = vector.extract_strided_slice %1203 {offsets = [0, 96], sizes = [8, 32], strides = [1, 1]} : vector<8x128xf32> to vector<8x32xf32>
    %1208 = arith.mulf %1205, %1188 : vector<8x32xf32>
    %1209 = arith.mulf %1204, %1207 : vector<8x32xf32>
    %1210 = arith.addf %1208, %1209 : vector<8x32xf32>
    %1211 = math.tanh %1210 : vector<8x32xf32>
    %1212 = arith.mulf %1206, %1211 : vector<8x32xf32>
    %1213 = arith.truncf %1212 : vector<8x32xf32> to vector<8x32xbf16>
    %cst_384 = arith.constant dense<0.000000e+00> : vector<8x128xf32>
    %1214 = tpu.matmul %1213, %1125, %cst_384 {dimension_numbers = #tpu.dot_dimension_numbers<[1], [0], [0], [1], [0, 0, 1, 1], [], []>} : vector<8x32xbf16>, vector<32x128xbf16>, vector<8x128xf32> -> vector<8x128xf32>
    %1215 = vector.broadcast %1127 : vector<1x128xf32> to vector<8x128xf32>
    %1216 = arith.addf %1214, %1215 : vector<8x128xf32>
    %c24_385 = arith.constant 24 : index
    %c0_386 = arith.constant 0 : index
    %1217 = vector.load %arg13[%c24_385, %c0_386] : memref<64x128xf32, #tpu.memory_space<vmem>>, vector<8x128xf32>
    tpu.vector_store %arg13[%c24_385, %c0_386], %1216 {strides = array<i32>} : memref<64x128xf32, #tpu.memory_space<vmem>>, vector<8x128xf32>,
    %c32_387 = arith.constant 32 : index
    %c0_388 = arith.constant 0 : index
    %1218 = vector.load %arg12[%c32_387, %c0_388] : memref<64x128xf32, #tpu.memory_space<vmem>>, vector<8x128xf32>
    %1219 = arith.truncf %1212 : vector<8x32xf32> to vector<8x32xbf16>
    %cst_389 = arith.constant dense<0.000000e+00> : vector<8x128xf32>
    %1220 = tpu.matmul %1219, %1123, %cst_389 {dimension_numbers = #tpu.dot_dimension_numbers<[1], [0], [0], [1], [0, 0, 1, 1], [], []>} : vector<8x32xbf16>, vector<32x128xbf16>, vector<8x128xf32> -> vector<8x128xf32>
    %1221 = arith.addf %1218, %1220 : vector<8x128xf32>
    %1222 = arith.mulf %1221, %5 : vector<8x128xf32>
    %1223 = math.tanh %1222 : vector<8x128xf32>
    %1224 = arith.mulf %1223, %5 : vector<8x128xf32>
    %1225 = arith.addf %1224, %8 : vector<8x128xf32>
    %1226 = vector.extract_strided_slice %1225 {offsets = [0, 0], sizes = [8, 32], strides = [1, 1]} : vector<8x128xf32> to vector<8x32xf32>
    %1227 = vector.extract_strided_slice %1225 {offsets = [0, 32], sizes = [8, 32], strides = [1, 1]} : vector<8x128xf32> to vector<8x32xf32>
    %1228 = vector.extract_strided_slice %1225 {offsets = [0, 64], sizes = [8, 32], strides = [1, 1]} : vector<8x128xf32> to vector<8x32xf32>
    %1229 = vector.extract_strided_slice %1225 {offsets = [0, 96], sizes = [8, 32], strides = [1, 1]} : vector<8x128xf32> to vector<8x32xf32>
    %1230 = arith.mulf %1227, %1210 : vector<8x32xf32>
    %1231 = arith.mulf %1226, %1229 : vector<8x32xf32>
    %1232 = arith.addf %1230, %1231 : vector<8x32xf32>
    %1233 = math.tanh %1232 : vector<8x32xf32>
    %1234 = arith.mulf %1228, %1233 : vector<8x32xf32>
    %1235 = arith.truncf %1234 : vector<8x32xf32> to vector<8x32xbf16>
    %cst_390 = arith.constant dense<0.000000e+00> : vector<8x128xf32>
    %1236 = tpu.matmul %1235, %1125, %cst_390 {dimension_numbers = #tpu.dot_dimension_numbers<[1], [0], [0], [1], [0, 0, 1, 1], [], []>} : vector<8x32xbf16>, vector<32x128xbf16>, vector<8x128xf32> -> vector<8x128xf32>
    %1237 = vector.broadcast %1127 : vector<1x128xf32> to vector<8x128xf32>
    %1238 = arith.addf %1236, %1237 : vector<8x128xf32>
    %c32_391 = arith.constant 32 : index
    %c0_392 = arith.constant 0 : index
    %1239 = vector.load %arg13[%c32_391, %c0_392] : memref<64x128xf32, #tpu.memory_space<vmem>>, vector<8x128xf32>
    tpu.vector_store %arg13[%c32_391, %c0_392], %1238 {strides = array<i32>} : memref<64x128xf32, #tpu.memory_space<vmem>>, vector<8x128xf32>,
    %c40_393 = arith.constant 40 : index
    %c0_394 = arith.constant 0 : index
    %1240 = vector.load %arg12[%c40_393, %c0_394] : memref<64x128xf32, #tpu.memory_space<vmem>>, vector<8x128xf32>
    %1241 = arith.truncf %1234 : vector<8x32xf32> to vector<8x32xbf16>
    %cst_395 = arith.constant dense<0.000000e+00> : vector<8x128xf32>
    %1242 = tpu.matmul %1241, %1123, %cst_395 {dimension_numbers = #tpu.dot_dimension_numbers<[1], [0], [0], [1], [0, 0, 1, 1], [], []>} : vector<8x32xbf16>, vector<32x128xbf16>, vector<8x128xf32> -> vector<8x128xf32>
    %1243 = arith.addf %1240, %1242 : vector<8x128xf32>
    %1244 = arith.mulf %1243, %5 : vector<8x128xf32>
    %1245 = math.tanh %1244 : vector<8x128xf32>
    %1246 = arith.mulf %1245, %5 : vector<8x128xf32>
    %1247 = arith.addf %1246, %8 : vector<8x128xf32>
    %1248 = vector.extract_strided_slice %1247 {offsets = [0, 0], sizes = [8, 32], strides = [1, 1]} : vector<8x128xf32> to vector<8x32xf32>
    %1249 = vector.extract_strided_slice %1247 {offsets = [0, 32], sizes = [8, 32], strides = [1, 1]} : vector<8x128xf32> to vector<8x32xf32>
    %1250 = vector.extract_strided_slice %1247 {offsets = [0, 64], sizes = [8, 32], strides = [1, 1]} : vector<8x128xf32> to vector<8x32xf32>
    %1251 = vector.extract_strided_slice %1247 {offsets = [0, 96], sizes = [8, 32], strides = [1, 1]} : vector<8x128xf32> to vector<8x32xf32>
    %1252 = arith.mulf %1249, %1232 : vector<8x32xf32>
    %1253 = arith.mulf %1248, %1251 : vector<8x32xf32>
    %1254 = arith.addf %1252, %1253 : vector<8x32xf32>
    %1255 = math.tanh %1254 : vector<8x32xf32>
    %1256 = arith.mulf %1250, %1255 : vector<8x32xf32>
    %1257 = arith.truncf %1256 : vector<8x32xf32> to vector<8x32xbf16>
    %cst_396 = arith.constant dense<0.000000e+00> : vector<8x128xf32>
    %1258 = tpu.matmul %1257, %1125, %cst_396 {dimension_numbers = #tpu.dot_dimension_numbers<[1], [0], [0], [1], [0, 0, 1, 1], [], []>} : vector<8x32xbf16>, vector<32x128xbf16>, vector<8x128xf32> -> vector<8x128xf32>
    %1259 = vector.broadcast %1127 : vector<1x128xf32> to vector<8x128xf32>
    %1260 = arith.addf %1258, %1259 : vector<8x128xf32>
    %c40_397 = arith.constant 40 : index
    %c0_398 = arith.constant 0 : index
    %1261 = vector.load %arg13[%c40_397, %c0_398] : memref<64x128xf32, #tpu.memory_space<vmem>>, vector<8x128xf32>
    tpu.vector_store %arg13[%c40_397, %c0_398], %1260 {strides = array<i32>} : memref<64x128xf32, #tpu.memory_space<vmem>>, vector<8x128xf32>,
    %c48_399 = arith.constant 48 : index
    %c0_400 = arith.constant 0 : index
    %1262 = vector.load %arg12[%c48_399, %c0_400] : memref<64x128xf32, #tpu.memory_space<vmem>>, vector<8x128xf32>
    %1263 = arith.truncf %1256 : vector<8x32xf32> to vector<8x32xbf16>
    %cst_401 = arith.constant dense<0.000000e+00> : vector<8x128xf32>
    %1264 = tpu.matmul %1263, %1123, %cst_401 {dimension_numbers = #tpu.dot_dimension_numbers<[1], [0], [0], [1], [0, 0, 1, 1], [], []>} : vector<8x32xbf16>, vector<32x128xbf16>, vector<8x128xf32> -> vector<8x128xf32>
    %1265 = arith.addf %1262, %1264 : vector<8x128xf32>
    %1266 = arith.mulf %1265, %5 : vector<8x128xf32>
    %1267 = math.tanh %1266 : vector<8x128xf32>
    %1268 = arith.mulf %1267, %5 : vector<8x128xf32>
    %1269 = arith.addf %1268, %8 : vector<8x128xf32>
    %1270 = vector.extract_strided_slice %1269 {offsets = [0, 0], sizes = [8, 32], strides = [1, 1]} : vector<8x128xf32> to vector<8x32xf32>
    %1271 = vector.extract_strided_slice %1269 {offsets = [0, 32], sizes = [8, 32], strides = [1, 1]} : vector<8x128xf32> to vector<8x32xf32>
    %1272 = vector.extract_strided_slice %1269 {offsets = [0, 64], sizes = [8, 32], strides = [1, 1]} : vector<8x128xf32> to vector<8x32xf32>
    %1273 = vector.extract_strided_slice %1269 {offsets = [0, 96], sizes = [8, 32], strides = [1, 1]} : vector<8x128xf32> to vector<8x32xf32>
    %1274 = arith.mulf %1271, %1254 : vector<8x32xf32>
    %1275 = arith.mulf %1270, %1273 : vector<8x32xf32>
    %1276 = arith.addf %1274, %1275 : vector<8x32xf32>
    %1277 = math.tanh %1276 : vector<8x32xf32>
    %1278 = arith.mulf %1272, %1277 : vector<8x32xf32>
    %1279 = arith.truncf %1278 : vector<8x32xf32> to vector<8x32xbf16>
    %cst_402 = arith.constant dense<0.000000e+00> : vector<8x128xf32>
    %1280 = tpu.matmul %1279, %1125, %cst_402 {dimension_numbers = #tpu.dot_dimension_numbers<[1], [0], [0], [1], [0, 0, 1, 1], [], []>} : vector<8x32xbf16>, vector<32x128xbf16>, vector<8x128xf32> -> vector<8x128xf32>
    %1281 = vector.broadcast %1127 : vector<1x128xf32> to vector<8x128xf32>
    %1282 = arith.addf %1280, %1281 : vector<8x128xf32>
    %c48_403 = arith.constant 48 : index
    %c0_404 = arith.constant 0 : index
    %1283 = vector.load %arg13[%c48_403, %c0_404] : memref<64x128xf32, #tpu.memory_space<vmem>>, vector<8x128xf32>
    tpu.vector_store %arg13[%c48_403, %c0_404], %1282 {strides = array<i32>} : memref<64x128xf32, #tpu.memory_space<vmem>>, vector<8x128xf32>,
    %c56_405 = arith.constant 56 : index
    %c0_406 = arith.constant 0 : index
    %1284 = vector.load %arg12[%c56_405, %c0_406] : memref<64x128xf32, #tpu.memory_space<vmem>>, vector<8x128xf32>
    %1285 = arith.truncf %1278 : vector<8x32xf32> to vector<8x32xbf16>
    %cst_407 = arith.constant dense<0.000000e+00> : vector<8x128xf32>
    %1286 = tpu.matmul %1285, %1123, %cst_407 {dimension_numbers = #tpu.dot_dimension_numbers<[1], [0], [0], [1], [0, 0, 1, 1], [], []>} : vector<8x32xbf16>, vector<32x128xbf16>, vector<8x128xf32> -> vector<8x128xf32>
    %1287 = arith.addf %1284, %1286 : vector<8x128xf32>
    %1288 = arith.mulf %1287, %5 : vector<8x128xf32>
    %1289 = math.tanh %1288 : vector<8x128xf32>
    %1290 = arith.mulf %1289, %5 : vector<8x128xf32>
    %1291 = arith.addf %1290, %8 : vector<8x128xf32>
    %1292 = vector.extract_strided_slice %1291 {offsets = [0, 0], sizes = [8, 32], strides = [1, 1]} : vector<8x128xf32> to vector<8x32xf32>
    %1293 = vector.extract_strided_slice %1291 {offsets = [0, 32], sizes = [8, 32], strides = [1, 1]} : vector<8x128xf32> to vector<8x32xf32>
    %1294 = vector.extract_strided_slice %1291 {offsets = [0, 64], sizes = [8, 32], strides = [1, 1]} : vector<8x128xf32> to vector<8x32xf32>
    %1295 = vector.extract_strided_slice %1291 {offsets = [0, 96], sizes = [8, 32], strides = [1, 1]} : vector<8x128xf32> to vector<8x32xf32>
    %1296 = arith.mulf %1293, %1276 : vector<8x32xf32>
    %1297 = arith.mulf %1292, %1295 : vector<8x32xf32>
    %1298 = arith.addf %1296, %1297 : vector<8x32xf32>
    %1299 = math.tanh %1298 : vector<8x32xf32>
    %1300 = arith.mulf %1294, %1299 : vector<8x32xf32>
    %1301 = arith.truncf %1300 : vector<8x32xf32> to vector<8x32xbf16>
    %cst_408 = arith.constant dense<0.000000e+00> : vector<8x128xf32>
    %1302 = tpu.matmul %1301, %1125, %cst_408 {dimension_numbers = #tpu.dot_dimension_numbers<[1], [0], [0], [1], [0, 0, 1, 1], [], []>} : vector<8x32xbf16>, vector<32x128xbf16>, vector<8x128xf32> -> vector<8x128xf32>
    %1303 = vector.broadcast %1127 : vector<1x128xf32> to vector<8x128xf32>
    %1304 = arith.addf %1302, %1303 : vector<8x128xf32>
    %c56_409 = arith.constant 56 : index
    %c0_410 = arith.constant 0 : index
    %1305 = vector.load %arg13[%c56_409, %c0_410] : memref<64x128xf32, #tpu.memory_space<vmem>>, vector<8x128xf32>
    tpu.vector_store %arg13[%c56_409, %c0_410], %1304 {strides = array<i32>} : memref<64x128xf32, #tpu.memory_space<vmem>>, vector<8x128xf32>,
    %c7_411 = arith.constant 7 : index
    %c0_412 = arith.constant 0 : index
    %c0_413 = arith.constant 0 : index
    %1306 = vector.load %arg3[%c7_411, %c0_412, %c0_413] : memref<10x32x128xbf16, #tpu.memory_space<vmem>>, vector<1x32x128xbf16>
    %1307 = vector.shape_cast %1306 : vector<1x32x128xbf16> to vector<32x128xbf16>
    %c7_414 = arith.constant 7 : index
    %c0_415 = arith.constant 0 : index
    %c0_416 = arith.constant 0 : index
    %1308 = vector.load %arg2[%c7_414, %c0_415, %c0_416] : memref<9x32x128xbf16, #tpu.memory_space<vmem>>, vector<1x32x128xbf16>
    %1309 = vector.shape_cast %1308 : vector<1x32x128xbf16> to vector<32x128xbf16>
    %c8_417 = arith.constant 8 : index
    %c0_418 = arith.constant 0 : index
    %c0_419 = arith.constant 0 : index
    %1310 = vector.load %arg4[%c8_417, %c0_418, %c0_419] : memref<10x1x128xf32, #tpu.memory_space<vmem>>, vector<1x1x128xf32>
    %1311 = vector.shape_cast %1310 : vector<1x1x128xf32> to vector<1x128xf32>
    %cst_420 = arith.constant 0.000000e+00 : f32
    %1312 = vector.broadcast %cst_420 : f32 to vector<8x32xf32>
    %cst_421 = arith.constant 0.000000e+00 : f32
    %1313 = vector.broadcast %cst_421 : f32 to vector<8x32xf32>
    %c0_422 = arith.constant 0 : index
    %c0_423 = arith.constant 0 : index
    %1314 = vector.load %arg13[%c0_422, %c0_423] : memref<64x128xf32, #tpu.memory_space<vmem>>, vector<8x128xf32>
    %1315 = arith.truncf %1312 : vector<8x32xf32> to vector<8x32xbf16>
    %cst_424 = arith.constant dense<0.000000e+00> : vector<8x128xf32>
    %1316 = tpu.matmul %1315, %1307, %cst_424 {dimension_numbers = #tpu.dot_dimension_numbers<[1], [0], [0], [1], [0, 0, 1, 1], [], []>} : vector<8x32xbf16>, vector<32x128xbf16>, vector<8x128xf32> -> vector<8x128xf32>
    %1317 = arith.addf %1314, %1316 : vector<8x128xf32>
    %1318 = arith.mulf %1317, %5 : vector<8x128xf32>
    %1319 = math.tanh %1318 : vector<8x128xf32>
    %1320 = arith.mulf %1319, %5 : vector<8x128xf32>
    %1321 = arith.addf %1320, %8 : vector<8x128xf32>
    %1322 = vector.extract_strided_slice %1321 {offsets = [0, 0], sizes = [8, 32], strides = [1, 1]} : vector<8x128xf32> to vector<8x32xf32>
    %1323 = vector.extract_strided_slice %1321 {offsets = [0, 32], sizes = [8, 32], strides = [1, 1]} : vector<8x128xf32> to vector<8x32xf32>
    %1324 = vector.extract_strided_slice %1321 {offsets = [0, 64], sizes = [8, 32], strides = [1, 1]} : vector<8x128xf32> to vector<8x32xf32>
    %1325 = vector.extract_strided_slice %1321 {offsets = [0, 96], sizes = [8, 32], strides = [1, 1]} : vector<8x128xf32> to vector<8x32xf32>
    %1326 = arith.mulf %1323, %1313 : vector<8x32xf32>
    %1327 = arith.mulf %1322, %1325 : vector<8x32xf32>
    %1328 = arith.addf %1326, %1327 : vector<8x32xf32>
    %1329 = math.tanh %1328 : vector<8x32xf32>
    %1330 = arith.mulf %1324, %1329 : vector<8x32xf32>
    %1331 = arith.truncf %1330 : vector<8x32xf32> to vector<8x32xbf16>
    %cst_425 = arith.constant dense<0.000000e+00> : vector<8x128xf32>
    %1332 = tpu.matmul %1331, %1309, %cst_425 {dimension_numbers = #tpu.dot_dimension_numbers<[1], [0], [0], [1], [0, 0, 1, 1], [], []>} : vector<8x32xbf16>, vector<32x128xbf16>, vector<8x128xf32> -> vector<8x128xf32>
    %1333 = vector.broadcast %1311 : vector<1x128xf32> to vector<8x128xf32>
    %1334 = arith.addf %1332, %1333 : vector<8x128xf32>
    %c0_426 = arith.constant 0 : index
    %c0_427 = arith.constant 0 : index
    %1335 = vector.load %arg12[%c0_426, %c0_427] : memref<64x128xf32, #tpu.memory_space<vmem>>, vector<8x128xf32>
    tpu.vector_store %arg12[%c0_426, %c0_427], %1334 {strides = array<i32>} : memref<64x128xf32, #tpu.memory_space<vmem>>, vector<8x128xf32>,
    %c8_428 = arith.constant 8 : index
    %c0_429 = arith.constant 0 : index
    %1336 = vector.load %arg13[%c8_428, %c0_429] : memref<64x128xf32, #tpu.memory_space<vmem>>, vector<8x128xf32>
    %1337 = arith.truncf %1330 : vector<8x32xf32> to vector<8x32xbf16>
    %cst_430 = arith.constant dense<0.000000e+00> : vector<8x128xf32>
    %1338 = tpu.matmul %1337, %1307, %cst_430 {dimension_numbers = #tpu.dot_dimension_numbers<[1], [0], [0], [1], [0, 0, 1, 1], [], []>} : vector<8x32xbf16>, vector<32x128xbf16>, vector<8x128xf32> -> vector<8x128xf32>
    %1339 = arith.addf %1336, %1338 : vector<8x128xf32>
    %1340 = arith.mulf %1339, %5 : vector<8x128xf32>
    %1341 = math.tanh %1340 : vector<8x128xf32>
    %1342 = arith.mulf %1341, %5 : vector<8x128xf32>
    %1343 = arith.addf %1342, %8 : vector<8x128xf32>
    %1344 = vector.extract_strided_slice %1343 {offsets = [0, 0], sizes = [8, 32], strides = [1, 1]} : vector<8x128xf32> to vector<8x32xf32>
    %1345 = vector.extract_strided_slice %1343 {offsets = [0, 32], sizes = [8, 32], strides = [1, 1]} : vector<8x128xf32> to vector<8x32xf32>
    %1346 = vector.extract_strided_slice %1343 {offsets = [0, 64], sizes = [8, 32], strides = [1, 1]} : vector<8x128xf32> to vector<8x32xf32>
    %1347 = vector.extract_strided_slice %1343 {offsets = [0, 96], sizes = [8, 32], strides = [1, 1]} : vector<8x128xf32> to vector<8x32xf32>
    %1348 = arith.mulf %1345, %1328 : vector<8x32xf32>
    %1349 = arith.mulf %1344, %1347 : vector<8x32xf32>
    %1350 = arith.addf %1348, %1349 : vector<8x32xf32>
    %1351 = math.tanh %1350 : vector<8x32xf32>
    %1352 = arith.mulf %1346, %1351 : vector<8x32xf32>
    %1353 = arith.truncf %1352 : vector<8x32xf32> to vector<8x32xbf16>
    %cst_431 = arith.constant dense<0.000000e+00> : vector<8x128xf32>
    %1354 = tpu.matmul %1353, %1309, %cst_431 {dimension_numbers = #tpu.dot_dimension_numbers<[1], [0], [0], [1], [0, 0, 1, 1], [], []>} : vector<8x32xbf16>, vector<32x128xbf16>, vector<8x128xf32> -> vector<8x128xf32>
    %1355 = vector.broadcast %1311 : vector<1x128xf32> to vector<8x128xf32>
    %1356 = arith.addf %1354, %1355 : vector<8x128xf32>
    %c8_432 = arith.constant 8 : index
    %c0_433 = arith.constant 0 : index
    %1357 = vector.load %arg12[%c8_432, %c0_433] : memref<64x128xf32, #tpu.memory_space<vmem>>, vector<8x128xf32>
    tpu.vector_store %arg12[%c8_432, %c0_433], %1356 {strides = array<i32>} : memref<64x128xf32, #tpu.memory_space<vmem>>, vector<8x128xf32>,
    %c16_434 = arith.constant 16 : index
    %c0_435 = arith.constant 0 : index
    %1358 = vector.load %arg13[%c16_434, %c0_435] : memref<64x128xf32, #tpu.memory_space<vmem>>, vector<8x128xf32>
    %1359 = arith.truncf %1352 : vector<8x32xf32> to vector<8x32xbf16>
    %cst_436 = arith.constant dense<0.000000e+00> : vector<8x128xf32>
    %1360 = tpu.matmul %1359, %1307, %cst_436 {dimension_numbers = #tpu.dot_dimension_numbers<[1], [0], [0], [1], [0, 0, 1, 1], [], []>} : vector<8x32xbf16>, vector<32x128xbf16>, vector<8x128xf32> -> vector<8x128xf32>
    %1361 = arith.addf %1358, %1360 : vector<8x128xf32>
    %1362 = arith.mulf %1361, %5 : vector<8x128xf32>
    %1363 = math.tanh %1362 : vector<8x128xf32>
    %1364 = arith.mulf %1363, %5 : vector<8x128xf32>
    %1365 = arith.addf %1364, %8 : vector<8x128xf32>
    %1366 = vector.extract_strided_slice %1365 {offsets = [0, 0], sizes = [8, 32], strides = [1, 1]} : vector<8x128xf32> to vector<8x32xf32>
    %1367 = vector.extract_strided_slice %1365 {offsets = [0, 32], sizes = [8, 32], strides = [1, 1]} : vector<8x128xf32> to vector<8x32xf32>
    %1368 = vector.extract_strided_slice %1365 {offsets = [0, 64], sizes = [8, 32], strides = [1, 1]} : vector<8x128xf32> to vector<8x32xf32>
    %1369 = vector.extract_strided_slice %1365 {offsets = [0, 96], sizes = [8, 32], strides = [1, 1]} : vector<8x128xf32> to vector<8x32xf32>
    %1370 = arith.mulf %1367, %1350 : vector<8x32xf32>
    %1371 = arith.mulf %1366, %1369 : vector<8x32xf32>
    %1372 = arith.addf %1370, %1371 : vector<8x32xf32>
    %1373 = math.tanh %1372 : vector<8x32xf32>
    %1374 = arith.mulf %1368, %1373 : vector<8x32xf32>
    %1375 = arith.truncf %1374 : vector<8x32xf32> to vector<8x32xbf16>
    %cst_437 = arith.constant dense<0.000000e+00> : vector<8x128xf32>
    %1376 = tpu.matmul %1375, %1309, %cst_437 {dimension_numbers = #tpu.dot_dimension_numbers<[1], [0], [0], [1], [0, 0, 1, 1], [], []>} : vector<8x32xbf16>, vector<32x128xbf16>, vector<8x128xf32> -> vector<8x128xf32>
    %1377 = vector.broadcast %1311 : vector<1x128xf32> to vector<8x128xf32>
    %1378 = arith.addf %1376, %1377 : vector<8x128xf32>
    %c16_438 = arith.constant 16 : index
    %c0_439 = arith.constant 0 : index
    %1379 = vector.load %arg12[%c16_438, %c0_439] : memref<64x128xf32, #tpu.memory_space<vmem>>, vector<8x128xf32>
    tpu.vector_store %arg12[%c16_438, %c0_439], %1378 {strides = array<i32>} : memref<64x128xf32, #tpu.memory_space<vmem>>, vector<8x128xf32>,
    %c24_440 = arith.constant 24 : index
    %c0_441 = arith.constant 0 : index
    %1380 = vector.load %arg13[%c24_440, %c0_441] : memref<64x128xf32, #tpu.memory_space<vmem>>, vector<8x128xf32>
    %1381 = arith.truncf %1374 : vector<8x32xf32> to vector<8x32xbf16>
    %cst_442 = arith.constant dense<0.000000e+00> : vector<8x128xf32>
    %1382 = tpu.matmul %1381, %1307, %cst_442 {dimension_numbers = #tpu.dot_dimension_numbers<[1], [0], [0], [1], [0, 0, 1, 1], [], []>} : vector<8x32xbf16>, vector<32x128xbf16>, vector<8x128xf32> -> vector<8x128xf32>
    %1383 = arith.addf %1380, %1382 : vector<8x128xf32>
    %1384 = arith.mulf %1383, %5 : vector<8x128xf32>
    %1385 = math.tanh %1384 : vector<8x128xf32>
    %1386 = arith.mulf %1385, %5 : vector<8x128xf32>
    %1387 = arith.addf %1386, %8 : vector<8x128xf32>
    %1388 = vector.extract_strided_slice %1387 {offsets = [0, 0], sizes = [8, 32], strides = [1, 1]} : vector<8x128xf32> to vector<8x32xf32>
    %1389 = vector.extract_strided_slice %1387 {offsets = [0, 32], sizes = [8, 32], strides = [1, 1]} : vector<8x128xf32> to vector<8x32xf32>
    %1390 = vector.extract_strided_slice %1387 {offsets = [0, 64], sizes = [8, 32], strides = [1, 1]} : vector<8x128xf32> to vector<8x32xf32>
    %1391 = vector.extract_strided_slice %1387 {offsets = [0, 96], sizes = [8, 32], strides = [1, 1]} : vector<8x128xf32> to vector<8x32xf32>
    %1392 = arith.mulf %1389, %1372 : vector<8x32xf32>
    %1393 = arith.mulf %1388, %1391 : vector<8x32xf32>
    %1394 = arith.addf %1392, %1393 : vector<8x32xf32>
    %1395 = math.tanh %1394 : vector<8x32xf32>
    %1396 = arith.mulf %1390, %1395 : vector<8x32xf32>
    %1397 = arith.truncf %1396 : vector<8x32xf32> to vector<8x32xbf16>
    %cst_443 = arith.constant dense<0.000000e+00> : vector<8x128xf32>
    %1398 = tpu.matmul %1397, %1309, %cst_443 {dimension_numbers = #tpu.dot_dimension_numbers<[1], [0], [0], [1], [0, 0, 1, 1], [], []>} : vector<8x32xbf16>, vector<32x128xbf16>, vector<8x128xf32> -> vector<8x128xf32>
    %1399 = vector.broadcast %1311 : vector<1x128xf32> to vector<8x128xf32>
    %1400 = arith.addf %1398, %1399 : vector<8x128xf32>
    %c24_444 = arith.constant 24 : index
    %c0_445 = arith.constant 0 : index
    %1401 = vector.load %arg12[%c24_444, %c0_445] : memref<64x128xf32, #tpu.memory_space<vmem>>, vector<8x128xf32>
    tpu.vector_store %arg12[%c24_444, %c0_445], %1400 {strides = array<i32>} : memref<64x128xf32, #tpu.memory_space<vmem>>, vector<8x128xf32>,
    %c32_446 = arith.constant 32 : index
    %c0_447 = arith.constant 0 : index
    %1402 = vector.load %arg13[%c32_446, %c0_447] : memref<64x128xf32, #tpu.memory_space<vmem>>, vector<8x128xf32>
    %1403 = arith.truncf %1396 : vector<8x32xf32> to vector<8x32xbf16>
    %cst_448 = arith.constant dense<0.000000e+00> : vector<8x128xf32>
    %1404 = tpu.matmul %1403, %1307, %cst_448 {dimension_numbers = #tpu.dot_dimension_numbers<[1], [0], [0], [1], [0, 0, 1, 1], [], []>} : vector<8x32xbf16>, vector<32x128xbf16>, vector<8x128xf32> -> vector<8x128xf32>
    %1405 = arith.addf %1402, %1404 : vector<8x128xf32>
    %1406 = arith.mulf %1405, %5 : vector<8x128xf32>
    %1407 = math.tanh %1406 : vector<8x128xf32>
    %1408 = arith.mulf %1407, %5 : vector<8x128xf32>
    %1409 = arith.addf %1408, %8 : vector<8x128xf32>
    %1410 = vector.extract_strided_slice %1409 {offsets = [0, 0], sizes = [8, 32], strides = [1, 1]} : vector<8x128xf32> to vector<8x32xf32>
    %1411 = vector.extract_strided_slice %1409 {offsets = [0, 32], sizes = [8, 32], strides = [1, 1]} : vector<8x128xf32> to vector<8x32xf32>
    %1412 = vector.extract_strided_slice %1409 {offsets = [0, 64], sizes = [8, 32], strides = [1, 1]} : vector<8x128xf32> to vector<8x32xf32>
    %1413 = vector.extract_strided_slice %1409 {offsets = [0, 96], sizes = [8, 32], strides = [1, 1]} : vector<8x128xf32> to vector<8x32xf32>
    %1414 = arith.mulf %1411, %1394 : vector<8x32xf32>
    %1415 = arith.mulf %1410, %1413 : vector<8x32xf32>
    %1416 = arith.addf %1414, %1415 : vector<8x32xf32>
    %1417 = math.tanh %1416 : vector<8x32xf32>
    %1418 = arith.mulf %1412, %1417 : vector<8x32xf32>
    %1419 = arith.truncf %1418 : vector<8x32xf32> to vector<8x32xbf16>
    %cst_449 = arith.constant dense<0.000000e+00> : vector<8x128xf32>
    %1420 = tpu.matmul %1419, %1309, %cst_449 {dimension_numbers = #tpu.dot_dimension_numbers<[1], [0], [0], [1], [0, 0, 1, 1], [], []>} : vector<8x32xbf16>, vector<32x128xbf16>, vector<8x128xf32> -> vector<8x128xf32>
    %1421 = vector.broadcast %1311 : vector<1x128xf32> to vector<8x128xf32>
    %1422 = arith.addf %1420, %1421 : vector<8x128xf32>
    %c32_450 = arith.constant 32 : index
    %c0_451 = arith.constant 0 : index
    %1423 = vector.load %arg12[%c32_450, %c0_451] : memref<64x128xf32, #tpu.memory_space<vmem>>, vector<8x128xf32>
    tpu.vector_store %arg12[%c32_450, %c0_451], %1422 {strides = array<i32>} : memref<64x128xf32, #tpu.memory_space<vmem>>, vector<8x128xf32>,
    %c40_452 = arith.constant 40 : index
    %c0_453 = arith.constant 0 : index
    %1424 = vector.load %arg13[%c40_452, %c0_453] : memref<64x128xf32, #tpu.memory_space<vmem>>, vector<8x128xf32>
    %1425 = arith.truncf %1418 : vector<8x32xf32> to vector<8x32xbf16>
    %cst_454 = arith.constant dense<0.000000e+00> : vector<8x128xf32>
    %1426 = tpu.matmul %1425, %1307, %cst_454 {dimension_numbers = #tpu.dot_dimension_numbers<[1], [0], [0], [1], [0, 0, 1, 1], [], []>} : vector<8x32xbf16>, vector<32x128xbf16>, vector<8x128xf32> -> vector<8x128xf32>
    %1427 = arith.addf %1424, %1426 : vector<8x128xf32>
    %1428 = arith.mulf %1427, %5 : vector<8x128xf32>
    %1429 = math.tanh %1428 : vector<8x128xf32>
    %1430 = arith.mulf %1429, %5 : vector<8x128xf32>
    %1431 = arith.addf %1430, %8 : vector<8x128xf32>
    %1432 = vector.extract_strided_slice %1431 {offsets = [0, 0], sizes = [8, 32], strides = [1, 1]} : vector<8x128xf32> to vector<8x32xf32>
    %1433 = vector.extract_strided_slice %1431 {offsets = [0, 32], sizes = [8, 32], strides = [1, 1]} : vector<8x128xf32> to vector<8x32xf32>
    %1434 = vector.extract_strided_slice %1431 {offsets = [0, 64], sizes = [8, 32], strides = [1, 1]} : vector<8x128xf32> to vector<8x32xf32>
    %1435 = vector.extract_strided_slice %1431 {offsets = [0, 96], sizes = [8, 32], strides = [1, 1]} : vector<8x128xf32> to vector<8x32xf32>
    %1436 = arith.mulf %1433, %1416 : vector<8x32xf32>
    %1437 = arith.mulf %1432, %1435 : vector<8x32xf32>
    %1438 = arith.addf %1436, %1437 : vector<8x32xf32>
    %1439 = math.tanh %1438 : vector<8x32xf32>
    %1440 = arith.mulf %1434, %1439 : vector<8x32xf32>
    %1441 = arith.truncf %1440 : vector<8x32xf32> to vector<8x32xbf16>
    %cst_455 = arith.constant dense<0.000000e+00> : vector<8x128xf32>
    %1442 = tpu.matmul %1441, %1309, %cst_455 {dimension_numbers = #tpu.dot_dimension_numbers<[1], [0], [0], [1], [0, 0, 1, 1], [], []>} : vector<8x32xbf16>, vector<32x128xbf16>, vector<8x128xf32> -> vector<8x128xf32>
    %1443 = vector.broadcast %1311 : vector<1x128xf32> to vector<8x128xf32>
    %1444 = arith.addf %1442, %1443 : vector<8x128xf32>
    %c40_456 = arith.constant 40 : index
    %c0_457 = arith.constant 0 : index
    %1445 = vector.load %arg12[%c40_456, %c0_457] : memref<64x128xf32, #tpu.memory_space<vmem>>, vector<8x128xf32>
    tpu.vector_store %arg12[%c40_456, %c0_457], %1444 {strides = array<i32>} : memref<64x128xf32, #tpu.memory_space<vmem>>, vector<8x128xf32>,
    %c48_458 = arith.constant 48 : index
    %c0_459 = arith.constant 0 : index
    %1446 = vector.load %arg13[%c48_458, %c0_459] : memref<64x128xf32, #tpu.memory_space<vmem>>, vector<8x128xf32>
    %1447 = arith.truncf %1440 : vector<8x32xf32> to vector<8x32xbf16>
    %cst_460 = arith.constant dense<0.000000e+00> : vector<8x128xf32>
    %1448 = tpu.matmul %1447, %1307, %cst_460 {dimension_numbers = #tpu.dot_dimension_numbers<[1], [0], [0], [1], [0, 0, 1, 1], [], []>} : vector<8x32xbf16>, vector<32x128xbf16>, vector<8x128xf32> -> vector<8x128xf32>
    %1449 = arith.addf %1446, %1448 : vector<8x128xf32>
    %1450 = arith.mulf %1449, %5 : vector<8x128xf32>
    %1451 = math.tanh %1450 : vector<8x128xf32>
    %1452 = arith.mulf %1451, %5 : vector<8x128xf32>
    %1453 = arith.addf %1452, %8 : vector<8x128xf32>
    %1454 = vector.extract_strided_slice %1453 {offsets = [0, 0], sizes = [8, 32], strides = [1, 1]} : vector<8x128xf32> to vector<8x32xf32>
    %1455 = vector.extract_strided_slice %1453 {offsets = [0, 32], sizes = [8, 32], strides = [1, 1]} : vector<8x128xf32> to vector<8x32xf32>
    %1456 = vector.extract_strided_slice %1453 {offsets = [0, 64], sizes = [8, 32], strides = [1, 1]} : vector<8x128xf32> to vector<8x32xf32>
    %1457 = vector.extract_strided_slice %1453 {offsets = [0, 96], sizes = [8, 32], strides = [1, 1]} : vector<8x128xf32> to vector<8x32xf32>
    %1458 = arith.mulf %1455, %1438 : vector<8x32xf32>
    %1459 = arith.mulf %1454, %1457 : vector<8x32xf32>
    %1460 = arith.addf %1458, %1459 : vector<8x32xf32>
    %1461 = math.tanh %1460 : vector<8x32xf32>
    %1462 = arith.mulf %1456, %1461 : vector<8x32xf32>
    %1463 = arith.truncf %1462 : vector<8x32xf32> to vector<8x32xbf16>
    %cst_461 = arith.constant dense<0.000000e+00> : vector<8x128xf32>
    %1464 = tpu.matmul %1463, %1309, %cst_461 {dimension_numbers = #tpu.dot_dimension_numbers<[1], [0], [0], [1], [0, 0, 1, 1], [], []>} : vector<8x32xbf16>, vector<32x128xbf16>, vector<8x128xf32> -> vector<8x128xf32>
    %1465 = vector.broadcast %1311 : vector<1x128xf32> to vector<8x128xf32>
    %1466 = arith.addf %1464, %1465 : vector<8x128xf32>
    %c48_462 = arith.constant 48 : index
    %c0_463 = arith.constant 0 : index
    %1467 = vector.load %arg12[%c48_462, %c0_463] : memref<64x128xf32, #tpu.memory_space<vmem>>, vector<8x128xf32>
    tpu.vector_store %arg12[%c48_462, %c0_463], %1466 {strides = array<i32>} : memref<64x128xf32, #tpu.memory_space<vmem>>, vector<8x128xf32>,
    %c56_464 = arith.constant 56 : index
    %c0_465 = arith.constant 0 : index
    %1468 = vector.load %arg13[%c56_464, %c0_465] : memref<64x128xf32, #tpu.memory_space<vmem>>, vector<8x128xf32>
    %1469 = arith.truncf %1462 : vector<8x32xf32> to vector<8x32xbf16>
    %cst_466 = arith.constant dense<0.000000e+00> : vector<8x128xf32>
    %1470 = tpu.matmul %1469, %1307, %cst_466 {dimension_numbers = #tpu.dot_dimension_numbers<[1], [0], [0], [1], [0, 0, 1, 1], [], []>} : vector<8x32xbf16>, vector<32x128xbf16>, vector<8x128xf32> -> vector<8x128xf32>
    %1471 = arith.addf %1468, %1470 : vector<8x128xf32>
    %1472 = arith.mulf %1471, %5 : vector<8x128xf32>
    %1473 = math.tanh %1472 : vector<8x128xf32>
    %1474 = arith.mulf %1473, %5 : vector<8x128xf32>
    %1475 = arith.addf %1474, %8 : vector<8x128xf32>
    %1476 = vector.extract_strided_slice %1475 {offsets = [0, 0], sizes = [8, 32], strides = [1, 1]} : vector<8x128xf32> to vector<8x32xf32>
    %1477 = vector.extract_strided_slice %1475 {offsets = [0, 32], sizes = [8, 32], strides = [1, 1]} : vector<8x128xf32> to vector<8x32xf32>
    %1478 = vector.extract_strided_slice %1475 {offsets = [0, 64], sizes = [8, 32], strides = [1, 1]} : vector<8x128xf32> to vector<8x32xf32>
    %1479 = vector.extract_strided_slice %1475 {offsets = [0, 96], sizes = [8, 32], strides = [1, 1]} : vector<8x128xf32> to vector<8x32xf32>
    %1480 = arith.mulf %1477, %1460 : vector<8x32xf32>
    %1481 = arith.mulf %1476, %1479 : vector<8x32xf32>
    %1482 = arith.addf %1480, %1481 : vector<8x32xf32>
    %1483 = math.tanh %1482 : vector<8x32xf32>
    %1484 = arith.mulf %1478, %1483 : vector<8x32xf32>
    %1485 = arith.truncf %1484 : vector<8x32xf32> to vector<8x32xbf16>
    %cst_467 = arith.constant dense<0.000000e+00> : vector<8x128xf32>
    %1486 = tpu.matmul %1485, %1309, %cst_467 {dimension_numbers = #tpu.dot_dimension_numbers<[1], [0], [0], [1], [0, 0, 1, 1], [], []>} : vector<8x32xbf16>, vector<32x128xbf16>, vector<8x128xf32> -> vector<8x128xf32>
    %1487 = vector.broadcast %1311 : vector<1x128xf32> to vector<8x128xf32>
    %1488 = arith.addf %1486, %1487 : vector<8x128xf32>
    %c56_468 = arith.constant 56 : index
    %c0_469 = arith.constant 0 : index
    %1489 = vector.load %arg12[%c56_468, %c0_469] : memref<64x128xf32, #tpu.memory_space<vmem>>, vector<8x128xf32>
    tpu.vector_store %arg12[%c56_468, %c0_469], %1488 {strides = array<i32>} : memref<64x128xf32, #tpu.memory_space<vmem>>, vector<8x128xf32>,
    %c8_470 = arith.constant 8 : index
    %c0_471 = arith.constant 0 : index
    %c0_472 = arith.constant 0 : index
    %1490 = vector.load %arg3[%c8_470, %c0_471, %c0_472] : memref<10x32x128xbf16, #tpu.memory_space<vmem>>, vector<1x32x128xbf16>
    %1491 = vector.shape_cast %1490 : vector<1x32x128xbf16> to vector<32x128xbf16>
    %c8_473 = arith.constant 8 : index
    %c0_474 = arith.constant 0 : index
    %c0_475 = arith.constant 0 : index
    %1492 = vector.load %arg2[%c8_473, %c0_474, %c0_475] : memref<9x32x128xbf16, #tpu.memory_space<vmem>>, vector<1x32x128xbf16>
    %1493 = vector.shape_cast %1492 : vector<1x32x128xbf16> to vector<32x128xbf16>
    %c9 = arith.constant 9 : index
    %c0_476 = arith.constant 0 : index
    %c0_477 = arith.constant 0 : index
    %1494 = vector.load %arg4[%c9, %c0_476, %c0_477] : memref<10x1x128xf32, #tpu.memory_space<vmem>>, vector<1x1x128xf32>
    %1495 = vector.shape_cast %1494 : vector<1x1x128xf32> to vector<1x128xf32>
    %cst_478 = arith.constant 0.000000e+00 : f32
    %1496 = vector.broadcast %cst_478 : f32 to vector<8x32xf32>
    %cst_479 = arith.constant 0.000000e+00 : f32
    %1497 = vector.broadcast %cst_479 : f32 to vector<8x32xf32>
    %c0_480 = arith.constant 0 : index
    %c0_481 = arith.constant 0 : index
    %1498 = vector.load %arg12[%c0_480, %c0_481] : memref<64x128xf32, #tpu.memory_space<vmem>>, vector<8x128xf32>
    %1499 = arith.truncf %1496 : vector<8x32xf32> to vector<8x32xbf16>
    %cst_482 = arith.constant dense<0.000000e+00> : vector<8x128xf32>
    %1500 = tpu.matmul %1499, %1491, %cst_482 {dimension_numbers = #tpu.dot_dimension_numbers<[1], [0], [0], [1], [0, 0, 1, 1], [], []>} : vector<8x32xbf16>, vector<32x128xbf16>, vector<8x128xf32> -> vector<8x128xf32>
    %1501 = arith.addf %1498, %1500 : vector<8x128xf32>
    %1502 = arith.mulf %1501, %5 : vector<8x128xf32>
    %1503 = math.tanh %1502 : vector<8x128xf32>
    %1504 = arith.mulf %1503, %5 : vector<8x128xf32>
    %1505 = arith.addf %1504, %8 : vector<8x128xf32>
    %1506 = vector.extract_strided_slice %1505 {offsets = [0, 0], sizes = [8, 32], strides = [1, 1]} : vector<8x128xf32> to vector<8x32xf32>
    %1507 = vector.extract_strided_slice %1505 {offsets = [0, 32], sizes = [8, 32], strides = [1, 1]} : vector<8x128xf32> to vector<8x32xf32>
    %1508 = vector.extract_strided_slice %1505 {offsets = [0, 64], sizes = [8, 32], strides = [1, 1]} : vector<8x128xf32> to vector<8x32xf32>
    %1509 = vector.extract_strided_slice %1505 {offsets = [0, 96], sizes = [8, 32], strides = [1, 1]} : vector<8x128xf32> to vector<8x32xf32>
    %1510 = arith.mulf %1507, %1497 : vector<8x32xf32>
    %1511 = arith.mulf %1506, %1509 : vector<8x32xf32>
    %1512 = arith.addf %1510, %1511 : vector<8x32xf32>
    %1513 = math.tanh %1512 : vector<8x32xf32>
    %1514 = arith.mulf %1508, %1513 : vector<8x32xf32>
    %1515 = arith.truncf %1514 : vector<8x32xf32> to vector<8x32xbf16>
    %cst_483 = arith.constant dense<0.000000e+00> : vector<8x128xf32>
    %1516 = tpu.matmul %1515, %1493, %cst_483 {dimension_numbers = #tpu.dot_dimension_numbers<[1], [0], [0], [1], [0, 0, 1, 1], [], []>} : vector<8x32xbf16>, vector<32x128xbf16>, vector<8x128xf32> -> vector<8x128xf32>
    %1517 = vector.broadcast %1495 : vector<1x128xf32> to vector<8x128xf32>
    %1518 = arith.addf %1516, %1517 : vector<8x128xf32>
    %c0_484 = arith.constant 0 : index
    %c0_485 = arith.constant 0 : index
    %1519 = vector.load %arg13[%c0_484, %c0_485] : memref<64x128xf32, #tpu.memory_space<vmem>>, vector<8x128xf32>
    tpu.vector_store %arg13[%c0_484, %c0_485], %1518 {strides = array<i32>} : memref<64x128xf32, #tpu.memory_space<vmem>>, vector<8x128xf32>,
    %c8_486 = arith.constant 8 : index
    %c0_487 = arith.constant 0 : index
    %1520 = vector.load %arg12[%c8_486, %c0_487] : memref<64x128xf32, #tpu.memory_space<vmem>>, vector<8x128xf32>
    %1521 = arith.truncf %1514 : vector<8x32xf32> to vector<8x32xbf16>
    %cst_488 = arith.constant dense<0.000000e+00> : vector<8x128xf32>
    %1522 = tpu.matmul %1521, %1491, %cst_488 {dimension_numbers = #tpu.dot_dimension_numbers<[1], [0], [0], [1], [0, 0, 1, 1], [], []>} : vector<8x32xbf16>, vector<32x128xbf16>, vector<8x128xf32> -> vector<8x128xf32>
    %1523 = arith.addf %1520, %1522 : vector<8x128xf32>
    %1524 = arith.mulf %1523, %5 : vector<8x128xf32>
    %1525 = math.tanh %1524 : vector<8x128xf32>
    %1526 = arith.mulf %1525, %5 : vector<8x128xf32>
    %1527 = arith.addf %1526, %8 : vector<8x128xf32>
    %1528 = vector.extract_strided_slice %1527 {offsets = [0, 0], sizes = [8, 32], strides = [1, 1]} : vector<8x128xf32> to vector<8x32xf32>
    %1529 = vector.extract_strided_slice %1527 {offsets = [0, 32], sizes = [8, 32], strides = [1, 1]} : vector<8x128xf32> to vector<8x32xf32>
    %1530 = vector.extract_strided_slice %1527 {offsets = [0, 64], sizes = [8, 32], strides = [1, 1]} : vector<8x128xf32> to vector<8x32xf32>
    %1531 = vector.extract_strided_slice %1527 {offsets = [0, 96], sizes = [8, 32], strides = [1, 1]} : vector<8x128xf32> to vector<8x32xf32>
    %1532 = arith.mulf %1529, %1512 : vector<8x32xf32>
    %1533 = arith.mulf %1528, %1531 : vector<8x32xf32>
    %1534 = arith.addf %1532, %1533 : vector<8x32xf32>
    %1535 = math.tanh %1534 : vector<8x32xf32>
    %1536 = arith.mulf %1530, %1535 : vector<8x32xf32>
    %1537 = arith.truncf %1536 : vector<8x32xf32> to vector<8x32xbf16>
    %cst_489 = arith.constant dense<0.000000e+00> : vector<8x128xf32>
    %1538 = tpu.matmul %1537, %1493, %cst_489 {dimension_numbers = #tpu.dot_dimension_numbers<[1], [0], [0], [1], [0, 0, 1, 1], [], []>} : vector<8x32xbf16>, vector<32x128xbf16>, vector<8x128xf32> -> vector<8x128xf32>
    %1539 = vector.broadcast %1495 : vector<1x128xf32> to vector<8x128xf32>
    %1540 = arith.addf %1538, %1539 : vector<8x128xf32>
    %c8_490 = arith.constant 8 : index
    %c0_491 = arith.constant 0 : index
    %1541 = vector.load %arg13[%c8_490, %c0_491] : memref<64x128xf32, #tpu.memory_space<vmem>>, vector<8x128xf32>
    tpu.vector_store %arg13[%c8_490, %c0_491], %1540 {strides = array<i32>} : memref<64x128xf32, #tpu.memory_space<vmem>>, vector<8x128xf32>,
    %c16_492 = arith.constant 16 : index
    %c0_493 = arith.constant 0 : index
    %1542 = vector.load %arg12[%c16_492, %c0_493] : memref<64x128xf32, #tpu.memory_space<vmem>>, vector<8x128xf32>
    %1543 = arith.truncf %1536 : vector<8x32xf32> to vector<8x32xbf16>
    %cst_494 = arith.constant dense<0.000000e+00> : vector<8x128xf32>
    %1544 = tpu.matmul %1543, %1491, %cst_494 {dimension_numbers = #tpu.dot_dimension_numbers<[1], [0], [0], [1], [0, 0, 1, 1], [], []>} : vector<8x32xbf16>, vector<32x128xbf16>, vector<8x128xf32> -> vector<8x128xf32>
    %1545 = arith.addf %1542, %1544 : vector<8x128xf32>
    %1546 = arith.mulf %1545, %5 : vector<8x128xf32>
    %1547 = math.tanh %1546 : vector<8x128xf32>
    %1548 = arith.mulf %1547, %5 : vector<8x128xf32>
    %1549 = arith.addf %1548, %8 : vector<8x128xf32>
    %1550 = vector.extract_strided_slice %1549 {offsets = [0, 0], sizes = [8, 32], strides = [1, 1]} : vector<8x128xf32> to vector<8x32xf32>
    %1551 = vector.extract_strided_slice %1549 {offsets = [0, 32], sizes = [8, 32], strides = [1, 1]} : vector<8x128xf32> to vector<8x32xf32>
    %1552 = vector.extract_strided_slice %1549 {offsets = [0, 64], sizes = [8, 32], strides = [1, 1]} : vector<8x128xf32> to vector<8x32xf32>
    %1553 = vector.extract_strided_slice %1549 {offsets = [0, 96], sizes = [8, 32], strides = [1, 1]} : vector<8x128xf32> to vector<8x32xf32>
    %1554 = arith.mulf %1551, %1534 : vector<8x32xf32>
    %1555 = arith.mulf %1550, %1553 : vector<8x32xf32>
    %1556 = arith.addf %1554, %1555 : vector<8x32xf32>
    %1557 = math.tanh %1556 : vector<8x32xf32>
    %1558 = arith.mulf %1552, %1557 : vector<8x32xf32>
    %1559 = arith.truncf %1558 : vector<8x32xf32> to vector<8x32xbf16>
    %cst_495 = arith.constant dense<0.000000e+00> : vector<8x128xf32>
    %1560 = tpu.matmul %1559, %1493, %cst_495 {dimension_numbers = #tpu.dot_dimension_numbers<[1], [0], [0], [1], [0, 0, 1, 1], [], []>} : vector<8x32xbf16>, vector<32x128xbf16>, vector<8x128xf32> -> vector<8x128xf32>
    %1561 = vector.broadcast %1495 : vector<1x128xf32> to vector<8x128xf32>
    %1562 = arith.addf %1560, %1561 : vector<8x128xf32>
    %c16_496 = arith.constant 16 : index
    %c0_497 = arith.constant 0 : index
    %1563 = vector.load %arg13[%c16_496, %c0_497] : memref<64x128xf32, #tpu.memory_space<vmem>>, vector<8x128xf32>
    tpu.vector_store %arg13[%c16_496, %c0_497], %1562 {strides = array<i32>} : memref<64x128xf32, #tpu.memory_space<vmem>>, vector<8x128xf32>,
    %c24_498 = arith.constant 24 : index
    %c0_499 = arith.constant 0 : index
    %1564 = vector.load %arg12[%c24_498, %c0_499] : memref<64x128xf32, #tpu.memory_space<vmem>>, vector<8x128xf32>
    %1565 = arith.truncf %1558 : vector<8x32xf32> to vector<8x32xbf16>
    %cst_500 = arith.constant dense<0.000000e+00> : vector<8x128xf32>
    %1566 = tpu.matmul %1565, %1491, %cst_500 {dimension_numbers = #tpu.dot_dimension_numbers<[1], [0], [0], [1], [0, 0, 1, 1], [], []>} : vector<8x32xbf16>, vector<32x128xbf16>, vector<8x128xf32> -> vector<8x128xf32>
    %1567 = arith.addf %1564, %1566 : vector<8x128xf32>
    %1568 = arith.mulf %1567, %5 : vector<8x128xf32>
    %1569 = math.tanh %1568 : vector<8x128xf32>
    %1570 = arith.mulf %1569, %5 : vector<8x128xf32>
    %1571 = arith.addf %1570, %8 : vector<8x128xf32>
    %1572 = vector.extract_strided_slice %1571 {offsets = [0, 0], sizes = [8, 32], strides = [1, 1]} : vector<8x128xf32> to vector<8x32xf32>
    %1573 = vector.extract_strided_slice %1571 {offsets = [0, 32], sizes = [8, 32], strides = [1, 1]} : vector<8x128xf32> to vector<8x32xf32>
    %1574 = vector.extract_strided_slice %1571 {offsets = [0, 64], sizes = [8, 32], strides = [1, 1]} : vector<8x128xf32> to vector<8x32xf32>
    %1575 = vector.extract_strided_slice %1571 {offsets = [0, 96], sizes = [8, 32], strides = [1, 1]} : vector<8x128xf32> to vector<8x32xf32>
    %1576 = arith.mulf %1573, %1556 : vector<8x32xf32>
    %1577 = arith.mulf %1572, %1575 : vector<8x32xf32>
    %1578 = arith.addf %1576, %1577 : vector<8x32xf32>
    %1579 = math.tanh %1578 : vector<8x32xf32>
    %1580 = arith.mulf %1574, %1579 : vector<8x32xf32>
    %1581 = arith.truncf %1580 : vector<8x32xf32> to vector<8x32xbf16>
    %cst_501 = arith.constant dense<0.000000e+00> : vector<8x128xf32>
    %1582 = tpu.matmul %1581, %1493, %cst_501 {dimension_numbers = #tpu.dot_dimension_numbers<[1], [0], [0], [1], [0, 0, 1, 1], [], []>} : vector<8x32xbf16>, vector<32x128xbf16>, vector<8x128xf32> -> vector<8x128xf32>
    %1583 = vector.broadcast %1495 : vector<1x128xf32> to vector<8x128xf32>
    %1584 = arith.addf %1582, %1583 : vector<8x128xf32>
    %c24_502 = arith.constant 24 : index
    %c0_503 = arith.constant 0 : index
    %1585 = vector.load %arg13[%c24_502, %c0_503] : memref<64x128xf32, #tpu.memory_space<vmem>>, vector<8x128xf32>
    tpu.vector_store %arg13[%c24_502, %c0_503], %1584 {strides = array<i32>} : memref<64x128xf32, #tpu.memory_space<vmem>>, vector<8x128xf32>,
    %c32_504 = arith.constant 32 : index
    %c0_505 = arith.constant 0 : index
    %1586 = vector.load %arg12[%c32_504, %c0_505] : memref<64x128xf32, #tpu.memory_space<vmem>>, vector<8x128xf32>
    %1587 = arith.truncf %1580 : vector<8x32xf32> to vector<8x32xbf16>
    %cst_506 = arith.constant dense<0.000000e+00> : vector<8x128xf32>
    %1588 = tpu.matmul %1587, %1491, %cst_506 {dimension_numbers = #tpu.dot_dimension_numbers<[1], [0], [0], [1], [0, 0, 1, 1], [], []>} : vector<8x32xbf16>, vector<32x128xbf16>, vector<8x128xf32> -> vector<8x128xf32>
    %1589 = arith.addf %1586, %1588 : vector<8x128xf32>
    %1590 = arith.mulf %1589, %5 : vector<8x128xf32>
    %1591 = math.tanh %1590 : vector<8x128xf32>
    %1592 = arith.mulf %1591, %5 : vector<8x128xf32>
    %1593 = arith.addf %1592, %8 : vector<8x128xf32>
    %1594 = vector.extract_strided_slice %1593 {offsets = [0, 0], sizes = [8, 32], strides = [1, 1]} : vector<8x128xf32> to vector<8x32xf32>
    %1595 = vector.extract_strided_slice %1593 {offsets = [0, 32], sizes = [8, 32], strides = [1, 1]} : vector<8x128xf32> to vector<8x32xf32>
    %1596 = vector.extract_strided_slice %1593 {offsets = [0, 64], sizes = [8, 32], strides = [1, 1]} : vector<8x128xf32> to vector<8x32xf32>
    %1597 = vector.extract_strided_slice %1593 {offsets = [0, 96], sizes = [8, 32], strides = [1, 1]} : vector<8x128xf32> to vector<8x32xf32>
    %1598 = arith.mulf %1595, %1578 : vector<8x32xf32>
    %1599 = arith.mulf %1594, %1597 : vector<8x32xf32>
    %1600 = arith.addf %1598, %1599 : vector<8x32xf32>
    %1601 = math.tanh %1600 : vector<8x32xf32>
    %1602 = arith.mulf %1596, %1601 : vector<8x32xf32>
    %1603 = arith.truncf %1602 : vector<8x32xf32> to vector<8x32xbf16>
    %cst_507 = arith.constant dense<0.000000e+00> : vector<8x128xf32>
    %1604 = tpu.matmul %1603, %1493, %cst_507 {dimension_numbers = #tpu.dot_dimension_numbers<[1], [0], [0], [1], [0, 0, 1, 1], [], []>} : vector<8x32xbf16>, vector<32x128xbf16>, vector<8x128xf32> -> vector<8x128xf32>
    %1605 = vector.broadcast %1495 : vector<1x128xf32> to vector<8x128xf32>
    %1606 = arith.addf %1604, %1605 : vector<8x128xf32>
    %c32_508 = arith.constant 32 : index
    %c0_509 = arith.constant 0 : index
    %1607 = vector.load %arg13[%c32_508, %c0_509] : memref<64x128xf32, #tpu.memory_space<vmem>>, vector<8x128xf32>
    tpu.vector_store %arg13[%c32_508, %c0_509], %1606 {strides = array<i32>} : memref<64x128xf32, #tpu.memory_space<vmem>>, vector<8x128xf32>,
    %c40_510 = arith.constant 40 : index
    %c0_511 = arith.constant 0 : index
    %1608 = vector.load %arg12[%c40_510, %c0_511] : memref<64x128xf32, #tpu.memory_space<vmem>>, vector<8x128xf32>
    %1609 = arith.truncf %1602 : vector<8x32xf32> to vector<8x32xbf16>
    %cst_512 = arith.constant dense<0.000000e+00> : vector<8x128xf32>
    %1610 = tpu.matmul %1609, %1491, %cst_512 {dimension_numbers = #tpu.dot_dimension_numbers<[1], [0], [0], [1], [0, 0, 1, 1], [], []>} : vector<8x32xbf16>, vector<32x128xbf16>, vector<8x128xf32> -> vector<8x128xf32>
    %1611 = arith.addf %1608, %1610 : vector<8x128xf32>
    %1612 = arith.mulf %1611, %5 : vector<8x128xf32>
    %1613 = math.tanh %1612 : vector<8x128xf32>
    %1614 = arith.mulf %1613, %5 : vector<8x128xf32>
    %1615 = arith.addf %1614, %8 : vector<8x128xf32>
    %1616 = vector.extract_strided_slice %1615 {offsets = [0, 0], sizes = [8, 32], strides = [1, 1]} : vector<8x128xf32> to vector<8x32xf32>
    %1617 = vector.extract_strided_slice %1615 {offsets = [0, 32], sizes = [8, 32], strides = [1, 1]} : vector<8x128xf32> to vector<8x32xf32>
    %1618 = vector.extract_strided_slice %1615 {offsets = [0, 64], sizes = [8, 32], strides = [1, 1]} : vector<8x128xf32> to vector<8x32xf32>
    %1619 = vector.extract_strided_slice %1615 {offsets = [0, 96], sizes = [8, 32], strides = [1, 1]} : vector<8x128xf32> to vector<8x32xf32>
    %1620 = arith.mulf %1617, %1600 : vector<8x32xf32>
    %1621 = arith.mulf %1616, %1619 : vector<8x32xf32>
    %1622 = arith.addf %1620, %1621 : vector<8x32xf32>
    %1623 = math.tanh %1622 : vector<8x32xf32>
    %1624 = arith.mulf %1618, %1623 : vector<8x32xf32>
    %1625 = arith.truncf %1624 : vector<8x32xf32> to vector<8x32xbf16>
    %cst_513 = arith.constant dense<0.000000e+00> : vector<8x128xf32>
    %1626 = tpu.matmul %1625, %1493, %cst_513 {dimension_numbers = #tpu.dot_dimension_numbers<[1], [0], [0], [1], [0, 0, 1, 1], [], []>} : vector<8x32xbf16>, vector<32x128xbf16>, vector<8x128xf32> -> vector<8x128xf32>
    %1627 = vector.broadcast %1495 : vector<1x128xf32> to vector<8x128xf32>
    %1628 = arith.addf %1626, %1627 : vector<8x128xf32>
    %c40_514 = arith.constant 40 : index
    %c0_515 = arith.constant 0 : index
    %1629 = vector.load %arg13[%c40_514, %c0_515] : memref<64x128xf32, #tpu.memory_space<vmem>>, vector<8x128xf32>
    tpu.vector_store %arg13[%c40_514, %c0_515], %1628 {strides = array<i32>} : memref<64x128xf32, #tpu.memory_space<vmem>>, vector<8x128xf32>,
    %c48_516 = arith.constant 48 : index
    %c0_517 = arith.constant 0 : index
    %1630 = vector.load %arg12[%c48_516, %c0_517] : memref<64x128xf32, #tpu.memory_space<vmem>>, vector<8x128xf32>
    %1631 = arith.truncf %1624 : vector<8x32xf32> to vector<8x32xbf16>
    %cst_518 = arith.constant dense<0.000000e+00> : vector<8x128xf32>
    %1632 = tpu.matmul %1631, %1491, %cst_518 {dimension_numbers = #tpu.dot_dimension_numbers<[1], [0], [0], [1], [0, 0, 1, 1], [], []>} : vector<8x32xbf16>, vector<32x128xbf16>, vector<8x128xf32> -> vector<8x128xf32>
    %1633 = arith.addf %1630, %1632 : vector<8x128xf32>
    %1634 = arith.mulf %1633, %5 : vector<8x128xf32>
    %1635 = math.tanh %1634 : vector<8x128xf32>
    %1636 = arith.mulf %1635, %5 : vector<8x128xf32>
    %1637 = arith.addf %1636, %8 : vector<8x128xf32>
    %1638 = vector.extract_strided_slice %1637 {offsets = [0, 0], sizes = [8, 32], strides = [1, 1]} : vector<8x128xf32> to vector<8x32xf32>
    %1639 = vector.extract_strided_slice %1637 {offsets = [0, 32], sizes = [8, 32], strides = [1, 1]} : vector<8x128xf32> to vector<8x32xf32>
    %1640 = vector.extract_strided_slice %1637 {offsets = [0, 64], sizes = [8, 32], strides = [1, 1]} : vector<8x128xf32> to vector<8x32xf32>
    %1641 = vector.extract_strided_slice %1637 {offsets = [0, 96], sizes = [8, 32], strides = [1, 1]} : vector<8x128xf32> to vector<8x32xf32>
    %1642 = arith.mulf %1639, %1622 : vector<8x32xf32>
    %1643 = arith.mulf %1638, %1641 : vector<8x32xf32>
    %1644 = arith.addf %1642, %1643 : vector<8x32xf32>
    %1645 = math.tanh %1644 : vector<8x32xf32>
    %1646 = arith.mulf %1640, %1645 : vector<8x32xf32>
    %1647 = arith.truncf %1646 : vector<8x32xf32> to vector<8x32xbf16>
    %cst_519 = arith.constant dense<0.000000e+00> : vector<8x128xf32>
    %1648 = tpu.matmul %1647, %1493, %cst_519 {dimension_numbers = #tpu.dot_dimension_numbers<[1], [0], [0], [1], [0, 0, 1, 1], [], []>} : vector<8x32xbf16>, vector<32x128xbf16>, vector<8x128xf32> -> vector<8x128xf32>
    %1649 = vector.broadcast %1495 : vector<1x128xf32> to vector<8x128xf32>
    %1650 = arith.addf %1648, %1649 : vector<8x128xf32>
    %c48_520 = arith.constant 48 : index
    %c0_521 = arith.constant 0 : index
    %1651 = vector.load %arg13[%c48_520, %c0_521] : memref<64x128xf32, #tpu.memory_space<vmem>>, vector<8x128xf32>
    tpu.vector_store %arg13[%c48_520, %c0_521], %1650 {strides = array<i32>} : memref<64x128xf32, #tpu.memory_space<vmem>>, vector<8x128xf32>,
    %c56_522 = arith.constant 56 : index
    %c0_523 = arith.constant 0 : index
    %1652 = vector.load %arg12[%c56_522, %c0_523] : memref<64x128xf32, #tpu.memory_space<vmem>>, vector<8x128xf32>
    %1653 = arith.truncf %1646 : vector<8x32xf32> to vector<8x32xbf16>
    %cst_524 = arith.constant dense<0.000000e+00> : vector<8x128xf32>
    %1654 = tpu.matmul %1653, %1491, %cst_524 {dimension_numbers = #tpu.dot_dimension_numbers<[1], [0], [0], [1], [0, 0, 1, 1], [], []>} : vector<8x32xbf16>, vector<32x128xbf16>, vector<8x128xf32> -> vector<8x128xf32>
    %1655 = arith.addf %1652, %1654 : vector<8x128xf32>
    %1656 = arith.mulf %1655, %5 : vector<8x128xf32>
    %1657 = math.tanh %1656 : vector<8x128xf32>
    %1658 = arith.mulf %1657, %5 : vector<8x128xf32>
    %1659 = arith.addf %1658, %8 : vector<8x128xf32>
    %1660 = vector.extract_strided_slice %1659 {offsets = [0, 0], sizes = [8, 32], strides = [1, 1]} : vector<8x128xf32> to vector<8x32xf32>
    %1661 = vector.extract_strided_slice %1659 {offsets = [0, 32], sizes = [8, 32], strides = [1, 1]} : vector<8x128xf32> to vector<8x32xf32>
    %1662 = vector.extract_strided_slice %1659 {offsets = [0, 64], sizes = [8, 32], strides = [1, 1]} : vector<8x128xf32> to vector<8x32xf32>
    %1663 = vector.extract_strided_slice %1659 {offsets = [0, 96], sizes = [8, 32], strides = [1, 1]} : vector<8x128xf32> to vector<8x32xf32>
    %1664 = arith.mulf %1661, %1644 : vector<8x32xf32>
    %1665 = arith.mulf %1660, %1663 : vector<8x32xf32>
    %1666 = arith.addf %1664, %1665 : vector<8x32xf32>
    %1667 = math.tanh %1666 : vector<8x32xf32>
    %1668 = arith.mulf %1662, %1667 : vector<8x32xf32>
    %1669 = arith.truncf %1668 : vector<8x32xf32> to vector<8x32xbf16>
    %cst_525 = arith.constant dense<0.000000e+00> : vector<8x128xf32>
    %1670 = tpu.matmul %1669, %1493, %cst_525 {dimension_numbers = #tpu.dot_dimension_numbers<[1], [0], [0], [1], [0, 0, 1, 1], [], []>} : vector<8x32xbf16>, vector<32x128xbf16>, vector<8x128xf32> -> vector<8x128xf32>
    %1671 = vector.broadcast %1495 : vector<1x128xf32> to vector<8x128xf32>
    %1672 = arith.addf %1670, %1671 : vector<8x128xf32>
    %c56_526 = arith.constant 56 : index
    %c0_527 = arith.constant 0 : index
    %1673 = vector.load %arg13[%c56_526, %c0_527] : memref<64x128xf32, #tpu.memory_space<vmem>>, vector<8x128xf32>
    tpu.vector_store %arg13[%c56_526, %c0_527], %1672 {strides = array<i32>} : memref<64x128xf32, #tpu.memory_space<vmem>>, vector<8x128xf32>,
    %c9_528 = arith.constant 9 : index
    %c0_529 = arith.constant 0 : index
    %c0_530 = arith.constant 0 : index
    %1674 = vector.load %arg3[%c9_528, %c0_529, %c0_530] : memref<10x32x128xbf16, #tpu.memory_space<vmem>>, vector<1x32x128xbf16>
    %1675 = vector.shape_cast %1674 : vector<1x32x128xbf16> to vector<32x128xbf16>
    %cst_531 = arith.constant 0.000000e+00 : f32
    %1676 = vector.broadcast %cst_531 : f32 to vector<8x32xf32>
    %cst_532 = arith.constant 0.000000e+00 : f32
    %1677 = vector.broadcast %cst_532 : f32 to vector<8x32xf32>
    %c0_533 = arith.constant 0 : index
    %c0_534 = arith.constant 0 : index
    %1678 = vector.load %arg13[%c0_533, %c0_534] : memref<64x128xf32, #tpu.memory_space<vmem>>, vector<8x128xf32>
    %1679 = arith.truncf %1676 : vector<8x32xf32> to vector<8x32xbf16>
    %cst_535 = arith.constant dense<0.000000e+00> : vector<8x128xf32>
    %1680 = tpu.matmul %1679, %1675, %cst_535 {dimension_numbers = #tpu.dot_dimension_numbers<[1], [0], [0], [1], [0, 0, 1, 1], [], []>} : vector<8x32xbf16>, vector<32x128xbf16>, vector<8x128xf32> -> vector<8x128xf32>
    %1681 = arith.addf %1678, %1680 : vector<8x128xf32>
    %1682 = arith.mulf %1681, %5 : vector<8x128xf32>
    %1683 = math.tanh %1682 : vector<8x128xf32>
    %1684 = arith.mulf %1683, %5 : vector<8x128xf32>
    %1685 = arith.addf %1684, %8 : vector<8x128xf32>
    %1686 = vector.extract_strided_slice %1685 {offsets = [0, 0], sizes = [8, 32], strides = [1, 1]} : vector<8x128xf32> to vector<8x32xf32>
    %1687 = vector.extract_strided_slice %1685 {offsets = [0, 32], sizes = [8, 32], strides = [1, 1]} : vector<8x128xf32> to vector<8x32xf32>
    %1688 = vector.extract_strided_slice %1685 {offsets = [0, 64], sizes = [8, 32], strides = [1, 1]} : vector<8x128xf32> to vector<8x32xf32>
    %1689 = vector.extract_strided_slice %1685 {offsets = [0, 96], sizes = [8, 32], strides = [1, 1]} : vector<8x128xf32> to vector<8x32xf32>
    %1690 = arith.mulf %1687, %1677 : vector<8x32xf32>
    %1691 = arith.mulf %1686, %1689 : vector<8x32xf32>
    %1692 = arith.addf %1690, %1691 : vector<8x32xf32>
    %1693 = math.tanh %1692 : vector<8x32xf32>
    %1694 = arith.mulf %1688, %1693 : vector<8x32xf32>
    %c8_536 = arith.constant 8 : index
    %c0_537 = arith.constant 0 : index
    %1695 = vector.load %arg13[%c8_536, %c0_537] : memref<64x128xf32, #tpu.memory_space<vmem>>, vector<8x128xf32>
    %1696 = arith.truncf %1694 : vector<8x32xf32> to vector<8x32xbf16>
    %cst_538 = arith.constant dense<0.000000e+00> : vector<8x128xf32>
    %1697 = tpu.matmul %1696, %1675, %cst_538 {dimension_numbers = #tpu.dot_dimension_numbers<[1], [0], [0], [1], [0, 0, 1, 1], [], []>} : vector<8x32xbf16>, vector<32x128xbf16>, vector<8x128xf32> -> vector<8x128xf32>
    %1698 = arith.addf %1695, %1697 : vector<8x128xf32>
    %1699 = arith.mulf %1698, %5 : vector<8x128xf32>
    %1700 = math.tanh %1699 : vector<8x128xf32>
    %1701 = arith.mulf %1700, %5 : vector<8x128xf32>
    %1702 = arith.addf %1701, %8 : vector<8x128xf32>
    %1703 = vector.extract_strided_slice %1702 {offsets = [0, 0], sizes = [8, 32], strides = [1, 1]} : vector<8x128xf32> to vector<8x32xf32>
    %1704 = vector.extract_strided_slice %1702 {offsets = [0, 32], sizes = [8, 32], strides = [1, 1]} : vector<8x128xf32> to vector<8x32xf32>
    %1705 = vector.extract_strided_slice %1702 {offsets = [0, 64], sizes = [8, 32], strides = [1, 1]} : vector<8x128xf32> to vector<8x32xf32>
    %1706 = vector.extract_strided_slice %1702 {offsets = [0, 96], sizes = [8, 32], strides = [1, 1]} : vector<8x128xf32> to vector<8x32xf32>
    %1707 = arith.mulf %1704, %1692 : vector<8x32xf32>
    %1708 = arith.mulf %1703, %1706 : vector<8x32xf32>
    %1709 = arith.addf %1707, %1708 : vector<8x32xf32>
    %1710 = math.tanh %1709 : vector<8x32xf32>
    %1711 = arith.mulf %1705, %1710 : vector<8x32xf32>
    %c16_539 = arith.constant 16 : index
    %c0_540 = arith.constant 0 : index
    %1712 = vector.load %arg13[%c16_539, %c0_540] : memref<64x128xf32, #tpu.memory_space<vmem>>, vector<8x128xf32>
    %1713 = arith.truncf %1711 : vector<8x32xf32> to vector<8x32xbf16>
    %cst_541 = arith.constant dense<0.000000e+00> : vector<8x128xf32>
    %1714 = tpu.matmul %1713, %1675, %cst_541 {dimension_numbers = #tpu.dot_dimension_numbers<[1], [0], [0], [1], [0, 0, 1, 1], [], []>} : vector<8x32xbf16>, vector<32x128xbf16>, vector<8x128xf32> -> vector<8x128xf32>
    %1715 = arith.addf %1712, %1714 : vector<8x128xf32>
    %1716 = arith.mulf %1715, %5 : vector<8x128xf32>
    %1717 = math.tanh %1716 : vector<8x128xf32>
    %1718 = arith.mulf %1717, %5 : vector<8x128xf32>
    %1719 = arith.addf %1718, %8 : vector<8x128xf32>
    %1720 = vector.extract_strided_slice %1719 {offsets = [0, 0], sizes = [8, 32], strides = [1, 1]} : vector<8x128xf32> to vector<8x32xf32>
    %1721 = vector.extract_strided_slice %1719 {offsets = [0, 32], sizes = [8, 32], strides = [1, 1]} : vector<8x128xf32> to vector<8x32xf32>
    %1722 = vector.extract_strided_slice %1719 {offsets = [0, 64], sizes = [8, 32], strides = [1, 1]} : vector<8x128xf32> to vector<8x32xf32>
    %1723 = vector.extract_strided_slice %1719 {offsets = [0, 96], sizes = [8, 32], strides = [1, 1]} : vector<8x128xf32> to vector<8x32xf32>
    %1724 = arith.mulf %1721, %1709 : vector<8x32xf32>
    %1725 = arith.mulf %1720, %1723 : vector<8x32xf32>
    %1726 = arith.addf %1724, %1725 : vector<8x32xf32>
    %1727 = math.tanh %1726 : vector<8x32xf32>
    %1728 = arith.mulf %1722, %1727 : vector<8x32xf32>
    %c24_542 = arith.constant 24 : index
    %c0_543 = arith.constant 0 : index
    %1729 = vector.load %arg13[%c24_542, %c0_543] : memref<64x128xf32, #tpu.memory_space<vmem>>, vector<8x128xf32>
    %1730 = arith.truncf %1728 : vector<8x32xf32> to vector<8x32xbf16>
    %cst_544 = arith.constant dense<0.000000e+00> : vector<8x128xf32>
    %1731 = tpu.matmul %1730, %1675, %cst_544 {dimension_numbers = #tpu.dot_dimension_numbers<[1], [0], [0], [1], [0, 0, 1, 1], [], []>} : vector<8x32xbf16>, vector<32x128xbf16>, vector<8x128xf32> -> vector<8x128xf32>
    %1732 = arith.addf %1729, %1731 : vector<8x128xf32>
    %1733 = arith.mulf %1732, %5 : vector<8x128xf32>
    %1734 = math.tanh %1733 : vector<8x128xf32>
    %1735 = arith.mulf %1734, %5 : vector<8x128xf32>
    %1736 = arith.addf %1735, %8 : vector<8x128xf32>
    %1737 = vector.extract_strided_slice %1736 {offsets = [0, 0], sizes = [8, 32], strides = [1, 1]} : vector<8x128xf32> to vector<8x32xf32>
    %1738 = vector.extract_strided_slice %1736 {offsets = [0, 32], sizes = [8, 32], strides = [1, 1]} : vector<8x128xf32> to vector<8x32xf32>
    %1739 = vector.extract_strided_slice %1736 {offsets = [0, 64], sizes = [8, 32], strides = [1, 1]} : vector<8x128xf32> to vector<8x32xf32>
    %1740 = vector.extract_strided_slice %1736 {offsets = [0, 96], sizes = [8, 32], strides = [1, 1]} : vector<8x128xf32> to vector<8x32xf32>
    %1741 = arith.mulf %1738, %1726 : vector<8x32xf32>
    %1742 = arith.mulf %1737, %1740 : vector<8x32xf32>
    %1743 = arith.addf %1741, %1742 : vector<8x32xf32>
    %1744 = math.tanh %1743 : vector<8x32xf32>
    %1745 = arith.mulf %1739, %1744 : vector<8x32xf32>
    %c32_545 = arith.constant 32 : index
    %c0_546 = arith.constant 0 : index
    %1746 = vector.load %arg13[%c32_545, %c0_546] : memref<64x128xf32, #tpu.memory_space<vmem>>, vector<8x128xf32>
    %1747 = arith.truncf %1745 : vector<8x32xf32> to vector<8x32xbf16>
    %cst_547 = arith.constant dense<0.000000e+00> : vector<8x128xf32>
    %1748 = tpu.matmul %1747, %1675, %cst_547 {dimension_numbers = #tpu.dot_dimension_numbers<[1], [0], [0], [1], [0, 0, 1, 1], [], []>} : vector<8x32xbf16>, vector<32x128xbf16>, vector<8x128xf32> -> vector<8x128xf32>
    %1749 = arith.addf %1746, %1748 : vector<8x128xf32>
    %1750 = arith.mulf %1749, %5 : vector<8x128xf32>
    %1751 = math.tanh %1750 : vector<8x128xf32>
    %1752 = arith.mulf %1751, %5 : vector<8x128xf32>
    %1753 = arith.addf %1752, %8 : vector<8x128xf32>
    %1754 = vector.extract_strided_slice %1753 {offsets = [0, 0], sizes = [8, 32], strides = [1, 1]} : vector<8x128xf32> to vector<8x32xf32>
    %1755 = vector.extract_strided_slice %1753 {offsets = [0, 32], sizes = [8, 32], strides = [1, 1]} : vector<8x128xf32> to vector<8x32xf32>
    %1756 = vector.extract_strided_slice %1753 {offsets = [0, 64], sizes = [8, 32], strides = [1, 1]} : vector<8x128xf32> to vector<8x32xf32>
    %1757 = vector.extract_strided_slice %1753 {offsets = [0, 96], sizes = [8, 32], strides = [1, 1]} : vector<8x128xf32> to vector<8x32xf32>
    %1758 = arith.mulf %1755, %1743 : vector<8x32xf32>
    %1759 = arith.mulf %1754, %1757 : vector<8x32xf32>
    %1760 = arith.addf %1758, %1759 : vector<8x32xf32>
    %1761 = math.tanh %1760 : vector<8x32xf32>
    %1762 = arith.mulf %1756, %1761 : vector<8x32xf32>
    %c40_548 = arith.constant 40 : index
    %c0_549 = arith.constant 0 : index
    %1763 = vector.load %arg13[%c40_548, %c0_549] : memref<64x128xf32, #tpu.memory_space<vmem>>, vector<8x128xf32>
    %1764 = arith.truncf %1762 : vector<8x32xf32> to vector<8x32xbf16>
    %cst_550 = arith.constant dense<0.000000e+00> : vector<8x128xf32>
    %1765 = tpu.matmul %1764, %1675, %cst_550 {dimension_numbers = #tpu.dot_dimension_numbers<[1], [0], [0], [1], [0, 0, 1, 1], [], []>} : vector<8x32xbf16>, vector<32x128xbf16>, vector<8x128xf32> -> vector<8x128xf32>
    %1766 = arith.addf %1763, %1765 : vector<8x128xf32>
    %1767 = arith.mulf %1766, %5 : vector<8x128xf32>
    %1768 = math.tanh %1767 : vector<8x128xf32>
    %1769 = arith.mulf %1768, %5 : vector<8x128xf32>
    %1770 = arith.addf %1769, %8 : vector<8x128xf32>
    %1771 = vector.extract_strided_slice %1770 {offsets = [0, 0], sizes = [8, 32], strides = [1, 1]} : vector<8x128xf32> to vector<8x32xf32>
    %1772 = vector.extract_strided_slice %1770 {offsets = [0, 32], sizes = [8, 32], strides = [1, 1]} : vector<8x128xf32> to vector<8x32xf32>
    %1773 = vector.extract_strided_slice %1770 {offsets = [0, 64], sizes = [8, 32], strides = [1, 1]} : vector<8x128xf32> to vector<8x32xf32>
    %1774 = vector.extract_strided_slice %1770 {offsets = [0, 96], sizes = [8, 32], strides = [1, 1]} : vector<8x128xf32> to vector<8x32xf32>
    %1775 = arith.mulf %1772, %1760 : vector<8x32xf32>
    %1776 = arith.mulf %1771, %1774 : vector<8x32xf32>
    %1777 = arith.addf %1775, %1776 : vector<8x32xf32>
    %1778 = math.tanh %1777 : vector<8x32xf32>
    %1779 = arith.mulf %1773, %1778 : vector<8x32xf32>
    %c48_551 = arith.constant 48 : index
    %c0_552 = arith.constant 0 : index
    %1780 = vector.load %arg13[%c48_551, %c0_552] : memref<64x128xf32, #tpu.memory_space<vmem>>, vector<8x128xf32>
    %1781 = arith.truncf %1779 : vector<8x32xf32> to vector<8x32xbf16>
    %cst_553 = arith.constant dense<0.000000e+00> : vector<8x128xf32>
    %1782 = tpu.matmul %1781, %1675, %cst_553 {dimension_numbers = #tpu.dot_dimension_numbers<[1], [0], [0], [1], [0, 0, 1, 1], [], []>} : vector<8x32xbf16>, vector<32x128xbf16>, vector<8x128xf32> -> vector<8x128xf32>
    %1783 = arith.addf %1780, %1782 : vector<8x128xf32>
    %1784 = arith.mulf %1783, %5 : vector<8x128xf32>
    %1785 = math.tanh %1784 : vector<8x128xf32>
    %1786 = arith.mulf %1785, %5 : vector<8x128xf32>
    %1787 = arith.addf %1786, %8 : vector<8x128xf32>
    %1788 = vector.extract_strided_slice %1787 {offsets = [0, 0], sizes = [8, 32], strides = [1, 1]} : vector<8x128xf32> to vector<8x32xf32>
    %1789 = vector.extract_strided_slice %1787 {offsets = [0, 32], sizes = [8, 32], strides = [1, 1]} : vector<8x128xf32> to vector<8x32xf32>
    %1790 = vector.extract_strided_slice %1787 {offsets = [0, 64], sizes = [8, 32], strides = [1, 1]} : vector<8x128xf32> to vector<8x32xf32>
    %1791 = vector.extract_strided_slice %1787 {offsets = [0, 96], sizes = [8, 32], strides = [1, 1]} : vector<8x128xf32> to vector<8x32xf32>
    %1792 = arith.mulf %1789, %1777 : vector<8x32xf32>
    %1793 = arith.mulf %1788, %1791 : vector<8x32xf32>
    %1794 = arith.addf %1792, %1793 : vector<8x32xf32>
    %1795 = math.tanh %1794 : vector<8x32xf32>
    %1796 = arith.mulf %1790, %1795 : vector<8x32xf32>
    %c56_554 = arith.constant 56 : index
    %c0_555 = arith.constant 0 : index
    %1797 = vector.load %arg13[%c56_554, %c0_555] : memref<64x128xf32, #tpu.memory_space<vmem>>, vector<8x128xf32>
    %1798 = arith.truncf %1796 : vector<8x32xf32> to vector<8x32xbf16>
    %cst_556 = arith.constant dense<0.000000e+00> : vector<8x128xf32>
    %1799 = tpu.matmul %1798, %1675, %cst_556 {dimension_numbers = #tpu.dot_dimension_numbers<[1], [0], [0], [1], [0, 0, 1, 1], [], []>} : vector<8x32xbf16>, vector<32x128xbf16>, vector<8x128xf32> -> vector<8x128xf32>
    %1800 = arith.addf %1797, %1799 : vector<8x128xf32>
    %1801 = arith.mulf %1800, %5 : vector<8x128xf32>
    %1802 = math.tanh %1801 : vector<8x128xf32>
    %1803 = arith.mulf %1802, %5 : vector<8x128xf32>
    %1804 = arith.addf %1803, %8 : vector<8x128xf32>
    %1805 = vector.extract_strided_slice %1804 {offsets = [0, 0], sizes = [8, 32], strides = [1, 1]} : vector<8x128xf32> to vector<8x32xf32>
    %1806 = vector.extract_strided_slice %1804 {offsets = [0, 32], sizes = [8, 32], strides = [1, 1]} : vector<8x128xf32> to vector<8x32xf32>
    %1807 = vector.extract_strided_slice %1804 {offsets = [0, 64], sizes = [8, 32], strides = [1, 1]} : vector<8x128xf32> to vector<8x32xf32>
    %1808 = vector.extract_strided_slice %1804 {offsets = [0, 96], sizes = [8, 32], strides = [1, 1]} : vector<8x128xf32> to vector<8x32xf32>
    %1809 = arith.mulf %1806, %1794 : vector<8x32xf32>
    %1810 = arith.mulf %1805, %1808 : vector<8x32xf32>
    %1811 = arith.addf %1809, %1810 : vector<8x32xf32>
    %1812 = math.tanh %1811 : vector<8x32xf32>
    %1813 = arith.mulf %1807, %1812 : vector<8x32xf32>
    %cst_557 = arith.constant 0.000000e+00 : f32
    %1814 = vector.broadcast %cst_557 : f32 to vector<8x32xf32>
    %1815 = arith.maximumf %1813, %1814 : vector<8x32xf32>
    %1816 = arith.truncf %1815 : vector<8x32xf32> to vector<8x32xbf16>
    %c0_558 = arith.constant 0 : index
    %c0_559 = arith.constant 0 : index
    %1817 = vector.load %arg5[%c0_558, %c0_559] : memref<32x256xbf16, #tpu.memory_space<vmem>>, vector<32x256xbf16>
    %cst_560 = arith.constant dense<0.000000e+00> : vector<8x256xf32>
    %1818 = tpu.matmul %1816, %1817, %cst_560 {dimension_numbers = #tpu.dot_dimension_numbers<[1], [0], [0], [1], [0, 0, 1, 1], [], []>} : vector<8x32xbf16>, vector<32x256xbf16>, vector<8x256xf32> -> vector<8x256xf32>
    %c0_561 = arith.constant 0 : index
    %c0_562 = arith.constant 0 : index
    %1819 = vector.load %arg6[%c0_561, %c0_562] : memref<1x256xf32, #tpu.memory_space<vmem>>, vector<1x256xf32>
    %1820 = vector.broadcast %1819 : vector<1x256xf32> to vector<8x256xf32>
    %1821 = arith.addf %1818, %1820 : vector<8x256xf32>
    %cst_563 = arith.constant 0.000000e+00 : f32
    %1822 = vector.broadcast %cst_563 : f32 to vector<8x256xf32>
    %1823 = arith.maximumf %1821, %1822 : vector<8x256xf32>
    %1824 = arith.truncf %1823 : vector<8x256xf32> to vector<8x256xbf16>
    %c0_564 = arith.constant 0 : index
    %c0_565 = arith.constant 0 : index
    %1825 = vector.load %arg7[%c0_564, %c0_565] : memref<256x128xbf16, #tpu.memory_space<vmem>>, vector<256x128xbf16>
    %cst_566 = arith.constant dense<0.000000e+00> : vector<8x128xf32>
    %1826 = tpu.matmul %1824, %1825, %cst_566 {dimension_numbers = #tpu.dot_dimension_numbers<[1], [0], [0], [1], [0, 0, 1, 1], [], []>} : vector<8x256xbf16>, vector<256x128xbf16>, vector<8x128xf32> -> vector<8x128xf32>
    %c0_567 = arith.constant 0 : index
    %c0_568 = arith.constant 0 : index
    %1827 = vector.load %arg8[%c0_567, %c0_568] : memref<1x128xf32, #tpu.memory_space<vmem>>, vector<1x128xf32>
    %1828 = vector.broadcast %1827 : vector<1x128xf32> to vector<8x128xf32>
    %1829 = arith.addf %1826, %1828 : vector<8x128xf32>
    %cst_569 = arith.constant 0.000000e+00 : f32
    %1830 = vector.broadcast %cst_569 : f32 to vector<8x128xf32>
    %1831 = arith.maximumf %1829, %1830 : vector<8x128xf32>
    %1832 = arith.truncf %1831 : vector<8x128xf32> to vector<8x128xbf16>
    %c0_570 = arith.constant 0 : index
    %c0_571 = arith.constant 0 : index
    %1833 = vector.load %arg9[%c0_570, %c0_571] : memref<128x128xbf16, #tpu.memory_space<vmem>>, vector<128x128xbf16>
    %cst_572 = arith.constant dense<0.000000e+00> : vector<8x128xf32>
    %1834 = tpu.matmul %1832, %1833, %cst_572 {dimension_numbers = #tpu.dot_dimension_numbers<[1], [0], [0], [1], [0, 0, 1, 1], [], []>} : vector<8x128xbf16>, vector<128x128xbf16>, vector<8x128xf32> -> vector<8x128xf32>
    %c0_573 = arith.constant 0 : index
    %c0_574 = arith.constant 0 : index
    %1835 = vector.load %arg10[%c0_573, %c0_574] : memref<1x128xf32, #tpu.memory_space<vmem>>, vector<1x128xf32>
    %1836 = vector.broadcast %1835 : vector<1x128xf32> to vector<8x128xf32>
    %1837 = arith.addf %1834, %1836 : vector<8x128xf32>
    %c0_575 = arith.constant 0 : index
    %c0_576 = arith.constant 0 : index
    %1838 = vector.load %arg11[%c0_575, %c0_576] : memref<8x128xf32, #tpu.memory_space<vmem>>, vector<8x128xf32>
    tpu.vector_store %arg11[%c0_575, %c0_576], %1837 {strides = array<i32>} : memref<8x128xf32, #tpu.memory_space<vmem>>, vector<8x128xf32>,
    return
  }
}

</mosaic_0001>

<bundles_post_ra>
// kernel: lstm_for_best_forward.1
= control target key start
LH: loop header
LB: loop body
LE: loop exit
PB: predicated region body
PF: predicated region fallthrough
CT: control target
= control target key end

     0   :  { %16 = vsyncpa [#allocation5], 0  ;;  %s14479_s0 = inlined_call_operand.vmem [shape: f32[64,8], index: 0, kind: input, shape index: {}]   ;;  %s14480_s1 = inlined_call_operand.vmem [shape: bf16[8,128], index: 1, kind: input, shape index: {}]   ;;  %s14481_s2 = inlined_call_operand.hbm [shape: bf16[9,32,128], index: 2, kind: input, shape index: {}]   ;;  %s14482_s3 = inlined_call_operand.hbm [shape: bf16[10,32,128], index: 3, kind: input, shape index: {}]   ;;  %s14483_s4 = inlined_call_operand.hbm [shape: f32[10,1,128], index: 4, kind: input, shape index: {}]   ;;  %s14484_s5 = inlined_call_operand.hbm [shape: bf16[32,256], index: 5, kind: input, shape index: {}]   ;;  %s14485_s6 = inlined_call_operand.vmem [shape: f32[1,256], index: 6, kind: input, shape index: {}]   ;;  %s14486_s7 = inlined_call_operand.vmem [shape: bf16[256,128], index: 7, kind: input, shape index: {}]   ;;  %s14487_s8 = inlined_call_operand.vmem [shape: f32[1,128], index: 8, kind: input, shape index: {}]   ;;  %s14488_s9 = inlined_call_operand.hbm [shape: bf16[128,128], index: 9, kind: input, shape index: {}]   ;;  %s14489_s10 = inlined_call_operand.vmem [shape: f32[1,128], index: 10, kind: input, shape index: {}]   ;;  %s14490_s11 = inlined_call_operand.vmem [shape: f32[8,128], index: 11, kind: output, shape index: {}]  }
   0x1   :  { %17 = vsyncpa [#allocation7], 0 }
   0x2   :  { %18 = vsyncpa [#allocation10], 0  ;;  %s12393_s17 = smov [#allocation6]   ;;  %s12394_s19 = smov [#allocation9]  }
   0x3   :  { %s40_s18 = sshll.u32 %s12393_s17, 4  ;;  %s64_s20 = sshll.u32 %s12394_s19, 4  ;;  %s41_s18 = int_to_ptr.vmem [resolvable:$true] %s40_s18  ;;  %s12469_s20 = int_to_ptr.vmem [resolvable:$true] %s64_s20 }
   0x4   :  { %s12277_s23 = scalar_lea.hbm %s14482_s3, 2560 }
   0x5   :  { %p12278_p0 = scmp.ne.s32.totalorder %s14482_s3, %s12277_s23  ;;  %p12281_p1 = scmp.lt.u32.totalorder %s12277_s23, %s14482_s3 }
   0x7   :  { %p12283_p2 = pnand %p12281_p1, %p12278_p0 }
   0x9   :  { %12286 = shalt.err (!%p12283_p2)
}
   0xa   :  { %s12287_s28 = scalar_lea.vmem %s41_s18, 2560  ;;  %p12292_p4 = scmp.lt.s32.totalorder %s41_s18, %s41_s18 }
   0xb   :  { %p12288_p3 = scmp.ne.s32.totalorder %s41_s18, %s12287_s28  ;;  %p12293_p5 = scmp.lt.s32.totalorder %s12287_s28, %s12287_s28 }
   0xd   :  { %p12294_p6 = por %p12293_p5, %p12292_p4 }
   0xf   :  { %p12295_p7 = pnand %p12294_p6, %p12288_p3 }
  0x11   :  { %12298 = shalt.err (!%p12295_p7)
}
  0x12   :  { %s12395_s29 = smov 64   ;;  %s12396_s30 = smov 4  }
  0x13   :  { %46 = dma.hbm_to_vmem [thread:$0]  %s14482_s3, 2560, %s41_s18, [#allocation7], %s12395_s29, %s12395_s29, %s12396_s30  }
  0x14   :  { %s12299_s16 = scalar_lea.hbm %s14484_s5, 512 }
  0x15   :  { %p12300_p8 = scmp.ne.s32.totalorder %s14484_s5, %s12299_s16  ;;  %p12303_p9 = scmp.lt.u32.totalorder %s12299_s16, %s14484_s5 }
  0x17   :  { %p12305_p10 = pnand %p12303_p9, %p12300_p8 }
  0x19   :  { %12308 = shalt.err (!%p12305_p10)
}
  0x1a   :  { %s12309_s23 = scalar_lea.vmem %s12469_s20, 512  ;;  %p12314_p12 = scmp.lt.s32.totalorder %s12469_s20, %s12469_s20 }
  0x1b   :  { %p12310_p11 = scmp.ne.s32.totalorder %s12469_s20, %s12309_s23  ;;  %p12315_p13 = scmp.lt.s32.totalorder %s12309_s23, %s12309_s23 }
  0x1d   :  { %p12316_p0 = por %p12315_p13, %p12314_p12 }
  0x1f   :  { %p12317_p1 = pnand %p12316_p0, %p12310_p11 }
  0x21   :  { %12320 = shalt.err (!%p12317_p1)
}
  0x22   :  { %s12397_s3 = smov 128   ;;  %s12398_s18 = smov 8  }
  0x23   :  { %70 = dma.hbm_to_vmem [thread:$0]  %s14484_s5, 512, %s12469_s20, [#allocation10], %s12397_s3, %s12397_s3, %s12398_s18  }
  0x24   :  { %s12399_s26 = smov [#allocation4]   ;;  %s12400_s28 = smov [#allocation8]  }
  0x25   :  { %s28_s27 = sshll.u32 %s12399_s26, 4  ;;  %s52_s12 = sshll.u32 %s12400_s28, 4  ;;  %s29_s27 = int_to_ptr.vmem [resolvable:$true] %s28_s27  ;;  %s12503_s12 = int_to_ptr.vmem [resolvable:$true] %s52_s12 }
  0x26   :  { %s12321_s15 = scalar_lea.hbm %s14481_s2, 2304 }
  0x27   :  { %p12322_p2 = scmp.ne.s32.totalorder %s14481_s2, %s12321_s15  ;;  %p12325_p3 = scmp.lt.u32.totalorder %s12321_s15, %s14481_s2 }
  0x29   :  { %p12327_p4 = pnand %p12325_p3, %p12322_p2 }
  0x2b   :  { %12330 = shalt.err (!%p12327_p4)
}
  0x2c   :  { %s12331_s5 = scalar_lea.vmem %s29_s27, 2304  ;;  %p12336_p6 = scmp.lt.s32.totalorder %s29_s27, %s29_s27 }
  0x2d   :  { %p12332_p5 = scmp.ne.s32.totalorder %s29_s27, %s12331_s5  ;;  %p12337_p7 = scmp.lt.s32.totalorder %s12331_s5, %s12331_s5 }
  0x2f   :  { %p12338_p8 = por %p12337_p7, %p12336_p6 }
  0x31   :  { %p12339_p9 = pnand %p12338_p8, %p12332_p5 }
  0x33   :  { %12342 = shalt.err (!%p12339_p9)
}
  0x34   :  { %34 = dma.hbm_to_vmem [thread:$0]  %s14481_s2, 2304, %s29_s27, [#allocation5], %s12395_s29, %s12395_s29, %s12396_s30  }
  0x35   :  { %s12343_s18 = scalar_lea.hbm %s14483_s4, 160 }
  0x36   :  { %p12344_p10 = scmp.ne.s32.totalorder %s14483_s4, %s12343_s18  ;;  %p12347_p11 = scmp.lt.u32.totalorder %s12343_s18, %s14483_s4 }
  0x38   :  { %p12349_p12 = pnand %p12347_p11, %p12344_p10 }
  0x3a   :  { %12352 = shalt.err (!%p12349_p12)
}
  0x3b   :  { %s12353_s13 = scalar_lea.vmem %s12503_s12, 160  ;;  %p12358_p0 = scmp.lt.s32.totalorder %s12503_s12, %s12503_s12 }
  0x3c   :  { %p12354_p13 = scmp.ne.s32.totalorder %s12503_s12, %s12353_s13  ;;  %p12359_p1 = scmp.lt.s32.totalorder %s12353_s13, %s12353_s13 }
  0x3e   :  { %p12360_p2 = por %p12359_p1, %p12358_p0 }
  0x40   :  { %p12361_p3 = pnand %p12360_p2, %p12354_p13 }
  0x42   :  { %12364 = shalt.err (!%p12361_p3)
}
  0x43   :  { %s12401_s2 = smov 16   ;;  %s12402_s27 = smov 1  }
  0x44   :  { %58 = dma.hbm_to_vmem [thread:$0]  %s14483_s4, 160, %s12503_s12, [#allocation7], %s12401_s2, %s12401_s2, %s12402_s27  }
  0x45   :  { %s12403_s16 = smov [#allocation11]   ;;  %s12365_s5 = scalar_lea.hbm %s14488_s9, 1024 }
  0x46   :  { %s82_s17 = sshll.u32 %s12403_s16, 4  ;;  %p12366_p4 = scmp.ne.s32.totalorder %s14488_s9, %s12365_s5  ;;  %s83_s17 = int_to_ptr.vmem [resolvable:$true] %s82_s17 }
  0x47   :  { %p12369_p5 = scmp.lt.u32.totalorder %s12365_s5, %s14488_s9 }
  0x49   :  { %p12371_p6 = pnand %p12369_p5, %p12366_p4 }
  0x4b   :  { %12374 = shalt.err (!%p12371_p6)
}
  0x4c   :  { %s12375_s18 = scalar_lea.vmem %s83_s17, 1024  ;;  %p12380_p8 = scmp.lt.s32.totalorder %s83_s17, %s83_s17 }
  0x4d   :  { %p12376_p7 = scmp.ne.s32.totalorder %s83_s17, %s12375_s18  ;;  %p12381_p9 = scmp.lt.s32.totalorder %s12375_s18, %s12375_s18 }
  0x4f   :  { %p12382_p10 = por %p12381_p9, %p12380_p8 }
  0x51   :  { %p12383_p11 = pnand %p12382_p10, %p12376_p7 }
  0x53   :  { %12386 = shalt.err (!%p12383_p11)
}
  0x54   :  { %88 = dma.hbm_to_vmem [thread:$0]  %s14488_s9, 1024, %s83_s17, [#allocation10], %s12395_s29, %s12395_s29, %s12396_s30  }
  0x55   :  { %12387 = dma.done.wait [#allocation5], 2304  }
  0x56   :  { %12388 = vsyncadd [#allocation5], 4294964992 }
  0x57   :  { %12389 = dma.done.wait [#allocation7], 2720  }
  0x58   :  { %12390 = vsyncadd [#allocation7], 4294964576 }
  0x59   :  { %12391 = dma.done.wait [#allocation10], 1536  }
  0x5a   :  { %12392 = vsyncadd [#allocation10], 4294965760  ;;  %v12404_v0 = vmov 0.0   ;;  %vm12405_vm0 = vmmov 0   ;;  %vm145_vm1 = vcmask 1043456   ;;  %v12558_v3 = vld [vmem:[#allocation6] sm:$0xff]   ;;  %v107_v12 = vlaneseq }
  0x5b   :  { %10276 = vmatprep.subr.bf16.mxu1 %v12404_v0  ;;  %10280 = vmatprep.mubr.msk.bf16.mxu1 %vm12405_vm0, %v12404_v0  ;;  %v124_v1 = vld [vmem:[%s14480_s1] sm:$0xf]  ;;  %v113_v5 = vld [vmem:[%s14479_s0 + $0x8] sm:$0xff]  ;;  %vm132_vm2 = vcmask 64512   ;;  %v114_v7 = vld [vmem:[%s14479_s0 + $0x10] sm:$0xff]  ;;  %v12406_v11 = vmov 0  }
  0x5c   :  { %11872 = vmatprep.subr.msk.bf16.mxu0 %vm145_vm1, %v124_v1  ;;  %v147_v2 = vsel %vm145_vm1, %v124_v1, 0  ;;  %v112_v4 = vld [vmem:[%s14479_s0] sm:$0xff]  ;;  %v115_v8 = vld [vmem:[%s14479_s0 + $0x18] sm:$0xff]  ;;  %10277 = vmatpush3.bf16.msra.mxu1 %v12558_v3  ;;  %v108_v13 = vand.u32 127, %v107_v12  ;;  %v12589_v14 = vld [vmem:[#allocation8] ss:$0 sm:$0xff] }
  0x5d   :  { %10267 = vmatpush3.bf16.msra.mxu0 %v147_v2  ;;  %v120_v6 = vpack.c.bf16 %v113_v5, %v112_v4  ;;  %v121_v9 = vpack.c.bf16 %v115_v8, %v114_v7  ;;  %v12573_v10 = vld [vmem:[#allocation6 + $0x8] sm:$0xff]   ;;  %10278 = vmatprep.subr.bf16.mxu1 %v12404_v0  ;;  %v12407_v20 = vmov 0.5   ;;  %s12408_s14 = smov 32   ;;  %v116_v37 = vld [vmem:[%s14479_s0 + $0x20] sm:$0xff]  ;;  %v117_v38 = vld [vmem:[%s14479_s0 + $0x28] sm:$0xff]  ;;  %vm245_vm4 = vcmask 261120  }
  0x5e   :  { %10292 = vmatprep.subr.bf16.mxu0 %v12404_v0  ;;  %vm109_vm3 = vcmp.ge.s32.totalorder %v108_v13, 96  ;;  %v118_v39 = vld [vmem:[%s14479_s0 + $0x30] sm:$0xff]  ;;  %v122_v40 = vpack.c.bf16 %v117_v38, %v116_v37  ;;  %v119_v41 = vld [vmem:[%s14479_s0 + $0x38] sm:$0xff]  ;;  %v12617_v42 = vld [vmem:[#allocation4] sm:$0xff]  }
  0x5f   :  { %10268 = vmatprep.mubr.msk.bf16.mxu0 %vm132_vm2, %v120_v6  ;;  %v12596_v21 = vsel %vm109_vm3, 1.0, %v12407_v20  ;;  %v12599_v29 = vsel %vm109_vm3, 0.0, %v12407_v20  ;;  %v123_v43 = vpack.c.bf16 %v119_v41, %v118_v39  ;;  %v12621_v44 = vld [vmem:[#allocation4 + $0x8] sm:$0xff]  }
  0x60   :  { %10269 = vmatmul.mubr.msk.bf16.vlgmr.msra.gmra.mrb[0].mxu0 %vm132_vm2, %v121_v9  ;;  %10279 = vmatpush3.bf16.msra.mxu1 %v12573_v10 }
  0x61   :  { %10293 = vmatpush3.bf16.msra.mxu0 %v12558_v3  ;;  %10284 = vmatprep.subr.bf16.mxu1 %v12404_v0 }
  0x62   :  { %10294 = vmatprep.subr.bf16.mxu0 %v12404_v0  ;;  %10272 = vmatprep.mubr.msk.bf16.mxu0 %vm132_vm2, %v122_v40 }
  0x63   :  { %10281 = vmatmul.mubr.bf16.vlgmr.msra.gmra.mrb[0].mxu1 %v12406_v11 }
  0x64   :  { %10288 = vmatprep.mubr.msk.bf16.mxu1 %vm12405_vm0, %v12404_v0  ;;  %10285 = vmatpush3.bf16.msra.mxu1 %v12617_v42 }
  0x65   :  { %10295 = vmatpush3.bf16.msra.mxu0 %v12573_v10  ;;  %10286 = vmatprep.subr.bf16.mxu1 %v12404_v0 }
  0x66   :  { %10308 = vmatprep.subr.bf16.mxu0 %v12404_v0 }
  0x68   :  { %10273 = vmatmul.mubr.msk.bf16.gmra.mrb[4].mxu0 %vm132_vm2, %v123_v43  ;;  %10287 = vmatpush3.bf16.msra.mxu1 %v12621_v44 }
  0x69   :  { %10296 = vmatprep.mubr.msk.bf16.mxu0 %vm12405_vm0, %v12404_v0  ;;  %10300 = vmatprep.subr.bf16.mxu1 %v12404_v0 }
 0x133   :  { %v12591_v15 = vpop.f32.mrb[0].mxu0 }
 0x134   :  { %v183_v16 = vpop.f32.mrb[1].mxu0 }
 0x135   :  { %v184_v17 = vadd.f32 %v12589_v14, %v183_v16  ;;  %v12594_v18 = vpop.f32.mrb[2].mxu0 }
 0x136   :  { %v186_v19 = vpop.f32.mrb[3].mxu0  ;;  %v283_v22 = vpop.f32.mrb[0].mxu1  ;;  %v195_v39 = vadd.f32 %v12594_v18, %v12589_v14 }
 0x137   :  { %v289_v23 = vadd.f32 %v283_v22, %v184_v17  ;;  %v10282_v24 = vpop.f32.mrb[1].mxu1  ;;  %v187_v54 = vadd.f32 %v12589_v14, %v186_v19  ;;  %v192_v17 = vadd.f32 %v12591_v15, %v12589_v14 }
 0x138   :  { %v286_v25 = vpop.f32.mrb[2].mxu1 }
 0x139   :  { %v290_v26 = vmul.f32 %v289_v23, %v12596_v21  ;;  %v10283_v27 = vpop.f32.mrb[3].mxu1 }
 0x13b   :  { %11957 = vtanh.f32 %v290_v26  ;;  %v12631_v49 = vpop.f32.mrb[4].mxu0 }
 0x13c   :  { %v12633_v50 = vpop.f32.mrb[5].mxu0 }
 0x13d   :  { %v12635_v51 = vpop.f32.mrb[6].mxu0 }
 0x13e   :  { %v12637_v52 = vpop.f32.mrb[7].mxu0 }
 0x145   :  { %v11958_v28 = vpop.eup %11957 }
 0x146   :  { %v292_v30 = vmul.f32 %v11958_v28, %v12596_v21 }
 0x148   :  { %v293_v31 = vadd.f32 %v292_v30, %v12599_v29 }
 0x14a   :  { %296 = vrot.lane.b32.xlu0 %v293_v31, %s12408_s14  ;;  %v294_v34 = vmul.f32 0.0, %v293_v31 }
 0x1bc   :  { %v297_v32 = vpop.permute.xlu0 %296 }
 0x1bd   :  { %v299_v33 = vmul.f32 %v297_v32, %v293_v31 }
 0x1bf   :  { %301 = vrot.lane.b32.xlu0 %v299_v33, %s12408_s14 }
 0x231   :  { %v302_v35 = vpop.permute.xlu0 %301 }
 0x232   :  { %v304_v36 = vadd.f32 %v302_v35, %v294_v34 }
 0x234   :  { %11959 = vtanh.f32 %v304_v36 }
 0x23e   :  { %v11960_v45 = vpop.eup %11959 }
 0x23f   :  { %307 = vrot.lane.b32.xlu1 %v11960_v45, %s12408_s14 }
 0x2b1   :  { %v308_v46 = vpop.permute.xlu1 %307 }
 0x2b2   :  { %v310_v47 = vmul.f32 %v308_v46, %v293_v31 }
 0x2b4   :  { %v311_v48 = vpack.c.bf16 %v310_v47, %v310_v47 }
 0x2b6   :  { %319 = vrot.lane.b32.xlu1 %v311_v48, %s12395_s29 }
 0x328   :  { %v320_v53 = vpop.permute.xlu1 %319 }
 0x329   :  { %10289 = vmatmul.mubr.msk.bf16.vlgmr.msra.gmra.mrb[4].mxu1 %vm245_vm4, %v320_v53  ;;  %10297 = vmatmul.mubr.msk.bf16.vlgmr.msra.gmra.mrb[8].mxu0 %vm245_vm4, %v320_v53 }
 0x32a   :  { %10309 = vmatpush3.bf16.msra.mxu0 %v12558_v3  ;;  %10301 = vmatpush3.bf16.msra.mxu1 %v12617_v42 }
 0x32b   :  { %10310 = vmatprep.subr.bf16.mxu0 %v12404_v0  ;;  %10302 = vmatprep.subr.bf16.mxu1 %v12404_v0 }
 0x32c   :  { %10312 = vmatprep.mubr.msk.bf16.mxu0 %vm12405_vm0, %v12404_v0  ;;  %10304 = vmatprep.mubr.msk.bf16.mxu1 %vm12405_vm0, %v12404_v0 }
 0x32e   :  { %10311 = vmatpush3.bf16.msra.mxu0 %v12573_v10  ;;  %10303 = vmatpush3.bf16.msra.mxu1 %v12621_v44 }
 0x32f   :  { %10324 = vmatprep.subr.bf16.mxu0 %v12404_v0  ;;  %10316 = vmatprep.subr.bf16.mxu1 %v12404_v0 }
 0x3fc   :  { %v412_v55 = vpop.f32.mrb[8].mxu0 }
 0x3fd   :  { %v418_v56 = vadd.f32 %v412_v55, %v187_v54  ;;  %v10298_v57 = vpop.f32.mrb[9].mxu0 }
 0x3fe   :  { %v415_v58 = vpop.f32.mrb[10].mxu0 }
 0x3ff   :  { %v419_v59 = vmul.f32 %v418_v56, %v12596_v21  ;;  %v10299_v60 = vpop.f32.mrb[11].mxu0 }
 0x401   :  { %11961 = vtanh.f32 %v419_v59 }
 0x40b   :  { %v11962_v61 = vpop.eup %11961 }
 0x40c   :  { %v421_v62 = vmul.f32 %v11962_v61, %v12596_v21 }
 0x40e   :  { %v422_v63 = vadd.f32 %v421_v62, %v12599_v29 }
 0x410   :  { %425 = vrot.lane.b32.xlu0 %v422_v63, %s12408_s14  ;;  %v423_v4 = vmul.f32 %v422_v63, %v304_v36 }
 0x482   :  { %v426_v1 = vpop.permute.xlu0 %425 }
 0x483   :  { %v428_v2 = vmul.f32 %v426_v1, %v422_v63  ;;  %v200_v1 = vadd.f32 %v12589_v14, %v12633_v50 }
 0x485   :  { %430 = vrot.lane.b32.xlu1 %v428_v2, %s12408_s14 }
 0x4f7   :  { %v431_v5 = vpop.permute.xlu1 %430 }
 0x4f8   :  { %v433_v6 = vadd.f32 %v431_v5, %v423_v4 }
 0x4fa   :  { %11963 = vtanh.f32 %v433_v6 }
 0x504   :  { %v11964_v7 = vpop.eup %11963 }
 0x505   :  { %436 = vrot.lane.b32.xlu0 %v11964_v7, %s12408_s14 }
 0x577   :  { %v437_v8 = vpop.permute.xlu0 %436 }
 0x578   :  { %v439_v9 = vmul.f32 %v437_v8, %v422_v63 }
 0x57a   :  { %v440_v13 = vpack.c.bf16 %v439_v9, %v439_v9 }
 0x57c   :  { %442 = vrot.lane.b32.xlu1 %v440_v13, %s12395_s29 }
 0x5ee   :  { %v443_v16 = vpop.permute.xlu1 %442 }
 0x5ef   :  { %10305 = vmatmul.mubr.msk.bf16.vlgmr.msra.gmra.mrb[8].mxu1 %vm245_vm4, %v443_v16  ;;  %10313 = vmatmul.mubr.msk.bf16.vlgmr.msra.gmra.mrb[12].mxu0 %vm245_vm4, %v443_v16 }
 0x5f0   :  { %10325 = vmatpush3.bf16.msra.mxu0 %v12558_v3  ;;  %10317 = vmatpush3.bf16.msra.mxu1 %v12617_v42 }
 0x5f1   :  { %10326 = vmatprep.subr.bf16.mxu0 %v12404_v0  ;;  %10318 = vmatprep.subr.bf16.mxu1 %v12404_v0 }
 0x5f2   :  { %10328 = vmatprep.mubr.msk.bf16.mxu0 %vm12405_vm0, %v12404_v0  ;;  %10320 = vmatprep.mubr.msk.bf16.mxu1 %vm12405_vm0, %v12404_v0 }
 0x5f4   :  { %10327 = vmatpush3.bf16.msra.mxu0 %v12573_v10  ;;  %10319 = vmatpush3.bf16.msra.mxu1 %v12621_v44 }
 0x5f5   :  { %10340 = vmatprep.subr.bf16.mxu0 %v12404_v0  ;;  %10332 = vmatprep.subr.bf16.mxu1 %v12404_v0 }
 0x6c2   :  { %v523_v19 = vpop.f32.mrb[12].mxu0 }
 0x6c3   :  { %v529_v20 = vadd.f32 %v523_v19, %v192_v17  ;;  %v10314_v22 = vpop.f32.mrb[13].mxu0 }
 0x6c4   :  { %v526_v23 = vpop.f32.mrb[14].mxu0 }
 0x6c5   :  { %v530_v24 = vmul.f32 %v529_v20, %v12596_v21  ;;  %v10315_v25 = vpop.f32.mrb[15].mxu0 }
 0x6c7   :  { %11965 = vtanh.f32 %v530_v24 }
 0x6d1   :  { %v11966_v26 = vpop.eup %11965 }
 0x6d2   :  { %v532_v27 = vmul.f32 %v11966_v26, %v12596_v21 }
 0x6d4   :  { %v533_v28 = vadd.f32 %v532_v27, %v12599_v29 }
 0x6d6   :  { %536 = vrot.lane.b32.xlu0 %v533_v28, %s12408_s14  ;;  %v534_v15 = vmul.f32 %v533_v28, %v433_v6 }
 0x748   :  { %v537_v30 = vpop.permute.xlu0 %536 }
 0x749   :  { %v539_v31 = vmul.f32 %v537_v30, %v533_v28 }
 0x74b   :  { %541 = vrot.lane.b32.xlu1 %v539_v31, %s12408_s14 }
 0x7bd   :  { %v542_v32 = vpop.permute.xlu1 %541 }
 0x7be   :  { %v544_v33 = vadd.f32 %v542_v32, %v534_v15 }
 0x7c0   :  { %11967 = vtanh.f32 %v544_v33 }
 0x7ca   :  { %v11968_v34 = vpop.eup %11967 }
 0x7cb   :  { %547 = vrot.lane.b32.xlu0 %v11968_v34, %s12408_s14 }
 0x83d   :  { %v548_v35 = vpop.permute.xlu0 %547 }
 0x83e   :  { %v550_v36 = vmul.f32 %v548_v35, %v533_v28  ;;  %v203_v28 = vadd.f32 %v12589_v14, %v12637_v52 }
 0x840   :  { %v551_v37 = vpack.c.bf16 %v550_v36, %v550_v36 }
 0x842   :  { %553 = vrot.lane.b32.xlu1 %v551_v37, %s12395_s29 }
 0x8b4   :  { %v554_v38 = vpop.permute.xlu1 %553 }
 0x8b5   :  { %10321 = vmatmul.mubr.msk.bf16.vlgmr.msra.gmra.mrb[12].mxu1 %vm245_vm4, %v554_v38  ;;  %10329 = vmatmul.mubr.msk.bf16.vlgmr.msra.gmra.mrb[16].mxu0 %vm245_vm4, %v554_v38 }
 0x8b6   :  { %10341 = vmatpush3.bf16.msra.mxu0 %v12558_v3  ;;  %10333 = vmatpush3.bf16.msra.mxu1 %v12617_v42 }
 0x8b7   :  { %10342 = vmatprep.subr.bf16.mxu0 %v12404_v0  ;;  %10334 = vmatprep.subr.bf16.mxu1 %v12404_v0 }
 0x8b8   :  { %10344 = vmatprep.mubr.msk.bf16.mxu0 %vm12405_vm0, %v12404_v0  ;;  %10336 = vmatprep.mubr.msk.bf16.mxu1 %vm12405_vm0, %v12404_v0 }
 0x8ba   :  { %10343 = vmatpush3.bf16.msra.mxu0 %v12573_v10  ;;  %10335 = vmatpush3.bf16.msra.mxu1 %v12621_v44 }
 0x8bb   :  { %10356 = vmatprep.subr.bf16.mxu0 %v12404_v0  ;;  %10348 = vmatprep.subr.bf16.mxu1 %v12404_v0 }
 0x988   :  { %v634_v40 = vpop.f32.mrb[16].mxu0 }
 0x989   :  { %v640_v41 = vadd.f32 %v634_v40, %v195_v39  ;;  %v10330_v43 = vpop.f32.mrb[17].mxu0 }
 0x98a   :  { %v637_v45 = vpop.f32.mrb[18].mxu0 }
 0x98b   :  { %v641_v46 = vmul.f32 %v640_v41, %v12596_v21  ;;  %v10331_v47 = vpop.f32.mrb[19].mxu0 }
 0x98d   :  { %11969 = vtanh.f32 %v641_v46 }
 0x997   :  { %v11970_v48 = vpop.eup %11969 }
 0x998   :  { %v643_v53 = vmul.f32 %v11970_v48, %v12596_v21 }
 0x99a   :  { %v644_v54 = vadd.f32 %v643_v53, %v12599_v29 }
 0x99c   :  { %647 = vrot.lane.b32.xlu0 %v644_v54, %s12408_s14  ;;  %v645_v18 = vmul.f32 %v644_v54, %v544_v33 }
 0xa0e   :  { %v648_v55 = vpop.permute.xlu0 %647 }
 0xa0f   :  { %v650_v56 = vmul.f32 %v648_v55, %v644_v54 }
 0xa11   :  { %652 = vrot.lane.b32.xlu1 %v650_v56, %s12408_s14 }
 0xa83   :  { %v653_v57 = vpop.permute.xlu1 %652 }
 0xa84   :  { %v655_v58 = vadd.f32 %v653_v57, %v645_v18 }
 0xa86   :  { %11971 = vtanh.f32 %v655_v58 }
 0xa90   :  { %v11972_v59 = vpop.eup %11971 }
 0xa91   :  { %658 = vrot.lane.b32.xlu0 %v11972_v59, %s12408_s14 }
 0xb03   :  { %v659_v60 = vpop.permute.xlu0 %658 }
 0xb04   :  { %v661_v61 = vmul.f32 %v659_v60, %v644_v54 }
 0xb06   :  { %v662_v62 = vpack.c.bf16 %v661_v61, %v661_v61 }
 0xb08   :  { %664 = vrot.lane.b32.xlu1 %v662_v62, %s12395_s29 }
 0xb7a   :  { %v665_v63 = vpop.permute.xlu1 %664 }
 0xb7b   :  { %10337 = vmatmul.mubr.msk.bf16.vlgmr.msra.gmra.mrb[16].mxu1 %vm245_vm4, %v665_v63  ;;  %10345 = vmatmul.mubr.msk.bf16.vlgmr.msra.gmra.mrb[20].mxu0 %vm245_vm4, %v665_v63 }
 0xb7c   :  { %10357 = vmatpush3.bf16.msra.mxu0 %v12558_v3  ;;  %10349 = vmatpush3.bf16.msra.mxu1 %v12617_v42 }
 0xb7d   :  { %10358 = vmatprep.subr.bf16.mxu0 %v12404_v0  ;;  %10350 = vmatprep.subr.bf16.mxu1 %v12404_v0 }
 0xb7e   :  { %10360 = vmatprep.mubr.msk.bf16.mxu0 %vm12405_vm0, %v12404_v0  ;;  %10352 = vmatprep.mubr.msk.bf16.mxu1 %vm12405_vm0, %v12404_v0 }
 0xb80   :  { %10359 = vmatpush3.bf16.msra.mxu0 %v12573_v10  ;;  %10351 = vmatpush3.bf16.msra.mxu1 %v12621_v44 }
 0xb81   :  { %10372 = vmatprep.subr.bf16.mxu0 %v12404_v0  ;;  %10364 = vmatprep.subr.bf16.mxu1 %v12404_v0 }
 0xc4e   :  { %v745_v2 = vpop.f32.mrb[20].mxu0 }
 0xc4f   :  { %v751_v4 = vadd.f32 %v745_v2, %v200_v1  ;;  %v10346_v5 = vpop.f32.mrb[21].mxu0 }
 0xc50   :  { %v748_v6 = vpop.f32.mrb[22].mxu0 }
 0xc51   :  { %v752_v7 = vmul.f32 %v751_v4, %v12596_v21  ;;  %v10347_v8 = vpop.f32.mrb[23].mxu0 }
 0xc53   :  { %11973 = vtanh.f32 %v752_v7  ;;  %v211_v7 = vadd.f32 %v12635_v51, %v12589_v14 }
 0xc5d   :  { %v11974_v9 = vpop.eup %11973 }
 0xc5e   :  { %v754_v13 = vmul.f32 %v11974_v9, %v12596_v21 }
 0xc60   :  { %v755_v16 = vadd.f32 %v754_v13, %v12599_v29 }
 0xc62   :  { %758 = vrot.lane.b32.xlu0 %v755_v16, %s12408_s14  ;;  %v756_v50 = vmul.f32 %v755_v16, %v655_v58 }
 0xcd4   :  { %v759_v17 = vpop.permute.xlu0 %758 }
 0xcd5   :  { %v761_v19 = vmul.f32 %v759_v17, %v755_v16 }
 0xcd7   :  { %763 = vrot.lane.b32.xlu1 %v761_v19, %s12408_s14 }
 0xd49   :  { %v764_v20 = vpop.permute.xlu1 %763 }
 0xd4a   :  { %v766_v22 = vadd.f32 %v764_v20, %v756_v50 }
 0xd4c   :  { %11975 = vtanh.f32 %v766_v22 }
 0xd56   :  { %v11976_v23 = vpop.eup %11975 }
 0xd57   :  { %769 = vrot.lane.b32.xlu0 %v11976_v23, %s12408_s14 }
 0xdc9   :  { %v770_v24 = vpop.permute.xlu0 %769 }
 0xdca   :  { %v772_v25 = vmul.f32 %v770_v24, %v755_v16 }
 0xdcc   :  { %v773_v26 = vpack.c.bf16 %v772_v25, %v772_v25 }
 0xdce   :  { %775 = vrot.lane.b32.xlu1 %v773_v26, %s12395_s29 }
 0xe40   :  { %v776_v27 = vpop.permute.xlu1 %775 }
 0xe41   :  { %10353 = vmatmul.mubr.msk.bf16.vlgmr.msra.gmra.mrb[20].mxu1 %vm245_vm4, %v776_v27  ;;  %10361 = vmatmul.mubr.msk.bf16.vlgmr.msra.gmra.mrb[24].mxu0 %vm245_vm4, %v776_v27 }
 0xe42   :  { %10373 = vmatpush3.bf16.msra.mxu0 %v12558_v3  ;;  %10365 = vmatpush3.bf16.msra.mxu1 %v12617_v42 }
 0xe43   :  { %10374 = vmatprep.subr.bf16.mxu0 %v12404_v0  ;;  %10366 = vmatprep.subr.bf16.mxu1 %v12404_v0 }
 0xe44   :  { %10376 = vmatprep.mubr.msk.bf16.mxu0 %vm12405_vm0, %v12404_v0  ;;  %10368 = vmatprep.mubr.msk.bf16.mxu1 %vm12405_vm0, %v12404_v0 }
 0xe46   :  { %10375 = vmatpush3.bf16.msra.mxu0 %v12573_v10  ;;  %10367 = vmatpush3.bf16.msra.mxu1 %v12621_v44 }
 0xe47   :  { %10388 = vmatprep.subr.bf16.mxu0 %v12404_v0  ;;  %10380 = vmatprep.subr.bf16.mxu1 %v12404_v0 }
 0xf14   :  { %v856_v30 = vpop.f32.mrb[24].mxu0 }
 0xf15   :  { %v862_v31 = vadd.f32 %v856_v30, %v203_v28  ;;  %v10362_v15 = vpop.f32.mrb[25].mxu0  ;;  %v12795_v28 = vld [vmem:[#allocation6 + $0x10] sm:$0xff]  }
 0xf16   :  { %v859_v32 = vpop.f32.mrb[26].mxu0  ;;  %v12813_v15 = vld [vmem:[#allocation8 + $0x1] ss:$0 sm:$0xff] }
 0xf17   :  { %v863_v33 = vmul.f32 %v862_v31, %v12596_v21  ;;  %v10363_v34 = vpop.f32.mrb[27].mxu0  ;;  %v12799_v31 = vld [vmem:[#allocation6 + $0x18] sm:$0xff]  }
 0xf19   :  { %11977 = vtanh.f32 %v863_v33 }
 0xf23   :  { %v11978_v35 = vpop.eup %11977 }
 0xf24   :  { %v865_v36 = vmul.f32 %v11978_v35, %v12596_v21 }
 0xf26   :  { %v866_v37 = vadd.f32 %v865_v36, %v12599_v29 }
 0xf28   :  { %869 = vrot.lane.b32.xlu0 %v866_v37, %s12408_s14  ;;  %v867_v52 = vmul.f32 %v866_v37, %v766_v22 }
 0xf9a   :  { %v870_v38 = vpop.permute.xlu0 %869 }
 0xf9b   :  { %v872_v39 = vmul.f32 %v870_v38, %v866_v37 }
 0xf9d   :  { %874 = vrot.lane.b32.xlu1 %v872_v39, %s12408_s14 }
0x100f   :  { %v875_v40 = vpop.permute.xlu1 %874 }
0x1010   :  { %v877_v41 = vadd.f32 %v875_v40, %v867_v52 }
0x1012   :  { %11979 = vtanh.f32 %v877_v41 }
0x101c   :  { %v11980_v43 = vpop.eup %11979 }
0x101d   :  { %880 = vrot.lane.b32.xlu0 %v11980_v43, %s12408_s14 }
0x108f   :  { %v881_v45 = vpop.permute.xlu0 %880 }
0x1090   :  { %v883_v46 = vmul.f32 %v881_v45, %v866_v37 }
0x1092   :  { %v884_v47 = vpack.c.bf16 %v883_v46, %v883_v46 }
0x1094   :  { %886 = vrot.lane.b32.xlu1 %v884_v47, %s12395_s29  ;;  %v12821_v47 = vld [vmem:[#allocation4 + $0x10] sm:$0xff]  }
0x1106   :  { %v887_v48 = vpop.permute.xlu1 %886 }
0x1107   :  { %10369 = vmatmul.mubr.msk.bf16.vlgmr.msra.gmra.mrb[24].mxu1 %vm245_vm4, %v887_v48  ;;  %10377 = vmatmul.mubr.msk.bf16.vlgmr.msra.gmra.mrb[28].mxu0 %vm245_vm4, %v887_v48  ;;  %v12824_v48 = vld [vmem:[#allocation4 + $0x18] sm:$0xff]  }
0x1108   :  { %10389 = vmatpush3.bf16.msra.mxu0 %v12558_v3  ;;  %10381 = vmatpush3.bf16.msra.mxu1 %v12617_v42  ;;  %v208_v3 = vadd.f32 %v12631_v49, %v12589_v14 }
0x1109   :  { %10390 = vmatprep.subr.bf16.mxu0 %v12404_v0  ;;  %10382 = vmatprep.subr.bf16.mxu1 %v12404_v0 }
0x110a   :  { %10392 = vmatprep.mubr.msk.bf16.mxu0 %vm12405_vm0, %v12404_v0  ;;  %10384 = vmatprep.mubr.msk.bf16.mxu1 %vm12405_vm0, %v12404_v0 }
0x110c   :  { %10391 = vmatpush3.bf16.msra.mxu0 %v12573_v10  ;;  %10383 = vmatpush3.bf16.msra.mxu1 %v12621_v44 }
0x110d   :  { %10396 = vmatprep.subr.bf16.mxu1 %v12404_v0  ;;  %10412 = vmatprep.subr.bf16.mxu0 %v12404_v0 }
0x11da   :  { %v967_v53 = vpop.f32.mrb[28].mxu0 }
0x11db   :  { %v973_v54 = vadd.f32 %v967_v53, %v208_v3  ;;  %v10378_v55 = vpop.f32.mrb[29].mxu0 }
0x11dc   :  { %v970_v56 = vpop.f32.mrb[30].mxu0 }
0x11dd   :  { %v974_v18 = vmul.f32 %v973_v54, %v12596_v21  ;;  %v10379_v57 = vpop.f32.mrb[31].mxu0 }
0x11df   :  { %11981 = vtanh.f32 %v974_v18 }
0x11e9   :  { %v11982_v58 = vpop.eup %11981 }
0x11ea   :  { %v976_v10 = vmul.f32 %v11982_v58, %v12596_v21 }
0x11ec   :  { %v977_v59 = vadd.f32 %v976_v10, %v12599_v29 }
0x11ee   :  { %980 = vrot.lane.b32.xlu0 %v977_v59, %s12408_s14  ;;  %v978_v49 = vmul.f32 %v977_v59, %v877_v41 }
0x1260   :  { %v981_v60 = vpop.permute.xlu0 %980 }
0x1261   :  { %v983_v61 = vmul.f32 %v981_v60, %v977_v59 }
0x1263   :  { %985 = vrot.lane.b32.xlu1 %v983_v61, %s12408_s14 }
0x12d5   :  { %v986_v62 = vpop.permute.xlu1 %985 }
0x12d6   :  { %v988_v63 = vadd.f32 %v986_v62, %v978_v49 }
0x12d8   :  { %11983 = vtanh.f32 %v988_v63 }
0x12e2   :  { %v11984_v1 = vpop.eup %11983 }
0x12e3   :  { %991 = vrot.lane.b32.xlu0 %v11984_v1, %s12408_s14 }
0x1355   :  { %v992_v2 = vpop.permute.xlu0 %991 }
0x1356   :  { %v994_v4 = vmul.f32 %v992_v2, %v977_v59 }
0x1358   :  { %v995_v5 = vpack.c.bf16 %v994_v4, %v994_v4 }
0x135a   :  { %997 = vrot.lane.b32.xlu1 %v995_v5, %s12395_s29 }
0x13cc   :  { %v998_v6 = vpop.permute.xlu1 %997 }
0x13cd   :  { %10385 = vmatmul.mubr.msk.bf16.vlgmr.msra.gmra.mrb[28].mxu1 %vm245_vm4, %v998_v6  ;;  %10393 = vmatmul.mubr.msk.bf16.vlgmr.msra.gmra.mrb[32].mxu0 %vm245_vm4, %v998_v6 }
0x13ce   :  { %10397 = vmatpush3.bf16.msra.mxu1 %v12617_v42  ;;  %10400 = vmatprep.mubr.msk.bf16.mxu1 %vm12405_vm0, %v12404_v0 }
0x13cf   :  { %10398 = vmatprep.subr.bf16.mxu1 %v12404_v0  ;;  %10416 = vmatprep.mubr.msk.bf16.mxu0 %vm12405_vm0, %v12404_v0 }
0x13d0   :  { %10413 = vmatpush3.bf16.msra.mxu0 %v12821_v47 }
0x13d1   :  { %10414 = vmatprep.subr.bf16.mxu0 %v12404_v0 }
0x13d2   :  { %10399 = vmatpush3.bf16.msra.mxu1 %v12621_v44 }
0x13d3   :  { %10404 = vmatprep.subr.bf16.mxu1 %v12404_v0 }
0x13d4   :  { %10415 = vmatpush3.bf16.msra.mxu0 %v12824_v48 }
0x13d5   :  { %10428 = vmatprep.subr.bf16.mxu0 %v12404_v0 }
0x14a0   :  { %v1078_v8 = vpop.f32.mrb[32].mxu0 }
0x14a1   :  { %v1084_v9 = vadd.f32 %v1078_v8, %v211_v7  ;;  %v10394_v13 = vpop.f32.mrb[33].mxu0 }
0x14a2   :  { %v1081_v16 = vpop.f32.mrb[34].mxu0 }
0x14a3   :  { %v1085_v42 = vmul.f32 %v1084_v9, %v12596_v21  ;;  %v10395_v17 = vpop.f32.mrb[35].mxu0 }
0x14a5   :  { %11985 = vtanh.f32 %v1085_v42 }
0x14af   :  { %v11986_v19 = vpop.eup %11985 }
0x14b0   :  { %v1087_v50 = vmul.f32 %v11986_v19, %v12596_v21 }
0x14b2   :  { %v1088_v20 = vadd.f32 %v1087_v50, %v12599_v29 }
0x14b4   :  { %1091 = vrot.lane.b32.xlu0 %v1088_v20, %s12408_s14  ;;  %v1089_v14 = vmul.f32 %v1088_v20, %v988_v63 }
0x1526   :  { %v1092_v44 = vpop.permute.xlu0 %1091 }
0x1527   :  { %v1094_v22 = vmul.f32 %v1092_v44, %v1088_v20 }
0x1529   :  { %1096 = vrot.lane.b32.xlu1 %v1094_v22, %s12408_s14 }
0x159b   :  { %v1097_v51 = vpop.permute.xlu1 %1096 }
0x159c   :  { %v1099_v23 = vadd.f32 %v1097_v51, %v1089_v14 }
0x159e   :  { %11987 = vtanh.f32 %v1099_v23 }
0x15a8   :  { %v11988_v24 = vpop.eup %11987 }
0x15a9   :  { %1102 = vrot.lane.b32.xlu0 %v11988_v24, %s12408_s14 }
0x161b   :  { %v1103_v25 = vpop.permute.xlu0 %1102 }
0x161c   :  { %v1105_v26 = vmul.f32 %v1103_v25, %v1088_v20 }
0x161e   :  { %v1106_v27 = vpack.c.bf16 %v1105_v26, %v1105_v26 }
0x1620   :  { %1108 = vrot.lane.b32.xlu1 %v1106_v27, %s12395_s29 }
0x1692   :  { %v1109_v30 = vpop.permute.xlu1 %1108 }
0x1693   :  { %10401 = vmatmul.mubr.msk.bf16.vlgmr.msra.gmra.mrb[32].mxu1 %vm245_vm4, %v1109_v30 }
0x1694   :  { %10405 = vmatpush3.bf16.msra.mxu1 %v12795_v28  ;;  %10408 = vmatprep.mubr.msk.bf16.mxu1 %vm12405_vm0, %v12404_v0 }
0x1695   :  { %10406 = vmatprep.subr.bf16.mxu1 %v12404_v0 }
0x1698   :  { %10407 = vmatpush3.bf16.msra.mxu1 %v12799_v31 }
0x1699   :  { %10420 = vmatprep.subr.bf16.mxu1 %v12404_v0 }
0x169b   :  { %10409 = vmatmul.mubr.bf16.vlgmr.msra.gmra.mrb[4].mxu1 %v12406_v11 }
0x169c   :  { %10421 = vmatpush3.bf16.msra.mxu1 %v12795_v28  ;;  %10424 = vmatprep.mubr.msk.bf16.mxu1 %vm12405_vm0, %v12404_v0 }
0x169d   :  { %10422 = vmatprep.subr.bf16.mxu1 %v12404_v0 }
0x16a0   :  { %10423 = vmatpush3.bf16.msra.mxu1 %v12799_v31 }
0x16a1   :  { %10436 = vmatprep.subr.bf16.mxu1 %v12404_v0 }
0x176e   :  { %v1213_v32 = vpop.f32.mrb[4].mxu1 }
0x176f   :  { %v11512_v33 = vadd.f32 %v12813_v15, %v1213_v32  ;;  %v10410_v34 = vpop.f32.mrb[5].mxu1 }
0x1770   :  { %v1216_v35 = vpop.f32.mrb[6].mxu1 }
0x1771   :  { %v1220_v36 = vmul.f32 %v11512_v33, %v12596_v21  ;;  %v10411_v37 = vpop.f32.mrb[7].mxu1 }
0x1773   :  { %11989 = vtanh.f32 %v1220_v36 }
0x177d   :  { %v11990_v38 = vpop.eup %11989 }
0x177e   :  { %v1222_v39 = vmul.f32 %v11990_v38, %v12596_v21 }
0x1780   :  { %v1223_v52 = vadd.f32 %v1222_v39, %v12599_v29 }
0x1782   :  { %1226 = vrot.lane.b32.xlu0 %v1223_v52, %s12408_s14  ;;  %v1224_v43 = vmul.f32 0.0, %v1223_v52 }
0x17f4   :  { %v1227_v40 = vpop.permute.xlu0 %1226 }
0x17f5   :  { %v1229_v41 = vmul.f32 %v1227_v40, %v1223_v52 }
0x17f7   :  { %1231 = vrot.lane.b32.xlu1 %v1229_v41, %s12408_s14 }
0x1869   :  { %v1232_v45 = vpop.permute.xlu1 %1231 }
0x186a   :  { %v1234_v46 = vadd.f32 %v1232_v45, %v1224_v43 }
0x186c   :  { %11991 = vtanh.f32 %v1234_v46 }
0x1876   :  { %v11992_v3 = vpop.eup %11991 }
0x1877   :  { %1237 = vrot.lane.b32.xlu0 %v11992_v3, %s12408_s14 }
0x18e9   :  { %v1238_v53 = vpop.permute.xlu0 %1237 }
0x18ea   :  { %v1240_v54 = vmul.f32 %v1238_v53, %v1223_v52 }
0x18ec   :  { %v1241_v55 = vpack.c.bf16 %v1240_v54, %v1240_v54 }
0x18ee   :  { %1249 = vrot.lane.b32.xlu1 %v1241_v55, %s12395_s29 }
0x1960   :  { %v1250_v56 = vpop.permute.xlu1 %1249 }
0x1961   :  { %10417 = vmatmul.mubr.msk.bf16.vlgmr.msra.gmra.mrb[36].mxu0 %vm245_vm4, %v1250_v56  ;;  %10425 = vmatmul.mubr.msk.bf16.vlgmr.msra.gmra.mrb[8].mxu1 %vm245_vm4, %v1250_v56 }
0x1962   :  { %10437 = vmatpush3.bf16.msra.mxu1 %v12795_v28  ;;  %10429 = vmatpush3.bf16.msra.mxu0 %v12821_v47 }
0x1963   :  { %10438 = vmatprep.subr.bf16.mxu1 %v12404_v0  ;;  %10430 = vmatprep.subr.bf16.mxu0 %v12404_v0 }
0x1964   :  { %10432 = vmatprep.mubr.msk.bf16.mxu0 %vm12405_vm0, %v12404_v0  ;;  %10440 = vmatprep.mubr.msk.bf16.mxu1 %vm12405_vm0, %v12404_v0 }
0x1966   :  { %10439 = vmatpush3.bf16.msra.mxu1 %v12799_v31  ;;  %10431 = vmatpush3.bf16.msra.mxu0 %v12824_v48 }
0x1967   :  { %10452 = vmatprep.subr.bf16.mxu1 %v12404_v0  ;;  %10444 = vmatprep.subr.bf16.mxu0 %v12404_v0 }
0x1a34   :  { %v1342_v18 = vpop.f32.mrb[8].mxu1 }
0x1a35   :  { %v11513_v57 = vadd.f32 %v12813_v15, %v1342_v18  ;;  %v10426_v58 = vpop.f32.mrb[9].mxu1 }
0x1a36   :  { %v1345_v10 = vpop.f32.mrb[10].mxu1 }
0x1a37   :  { %v1349_v59 = vmul.f32 %v11513_v57, %v12596_v21  ;;  %v10427_v60 = vpop.f32.mrb[11].mxu1 }
0x1a39   :  { %11993 = vtanh.f32 %v1349_v59 }
0x1a43   :  { %v11994_v61 = vpop.eup %11993 }
0x1a44   :  { %v1351_v49 = vmul.f32 %v11994_v61, %v12596_v21 }
0x1a46   :  { %v1352_v62 = vadd.f32 %v1351_v49, %v12599_v29 }
0x1a48   :  { %1355 = vrot.lane.b32.xlu0 %v1352_v62, %s12408_s14  ;;  %v1353_v2 = vmul.f32 %v1352_v62, %v1234_v46 }
0x1aba   :  { %v1356_v63 = vpop.permute.xlu0 %1355 }
0x1abb   :  { %v1358_v1 = vmul.f32 %v1356_v63, %v1352_v62 }
0x1abd   :  { %1360 = vrot.lane.b32.xlu1 %v1358_v1, %s12408_s14 }
0x1b2f   :  { %v1361_v4 = vpop.permute.xlu1 %1360 }
0x1b30   :  { %v1363_v5 = vadd.f32 %v1361_v4, %v1353_v2 }
0x1b32   :  { %11995 = vtanh.f32 %v1363_v5 }
0x1b3c   :  { %v11996_v6 = vpop.eup %11995 }
0x1b3d   :  { %1366 = vrot.lane.b32.xlu0 %v11996_v6, %s12408_s14 }
0x1baf   :  { %v1367_v7 = vpop.permute.xlu0 %1366 }
0x1bb0   :  { %v1369_v8 = vmul.f32 %v1367_v7, %v1352_v62 }
0x1bb2   :  { %v1370_v9 = vpack.c.bf16 %v1369_v8, %v1369_v8 }
0x1bb4   :  { %1372 = vrot.lane.b32.xlu1 %v1370_v9, %s12395_s29 }
0x1c26   :  { %v1373_v13 = vpop.permute.xlu1 %1372 }
0x1c27   :  { %10433 = vmatmul.mubr.msk.bf16.vlgmr.msra.gmra.mrb[40].mxu0 %vm245_vm4, %v1373_v13  ;;  %10441 = vmatmul.mubr.msk.bf16.vlgmr.msra.gmra.mrb[12].mxu1 %vm245_vm4, %v1373_v13 }
0x1c28   :  { %10453 = vmatpush3.bf16.msra.mxu1 %v12795_v28  ;;  %10445 = vmatpush3.bf16.msra.mxu0 %v12821_v47 }
0x1c29   :  { %10454 = vmatprep.subr.bf16.mxu1 %v12404_v0  ;;  %10446 = vmatprep.subr.bf16.mxu0 %v12404_v0 }
0x1c2a   :  { %10448 = vmatprep.mubr.msk.bf16.mxu0 %vm12405_vm0, %v12404_v0  ;;  %10456 = vmatprep.mubr.msk.bf16.mxu1 %vm12405_vm0, %v12404_v0 }
0x1c2c   :  { %10455 = vmatpush3.bf16.msra.mxu1 %v12799_v31  ;;  %10447 = vmatpush3.bf16.msra.mxu0 %v12824_v48 }
0x1c2d   :  { %10468 = vmatprep.subr.bf16.mxu1 %v12404_v0  ;;  %10460 = vmatprep.subr.bf16.mxu0 %v12404_v0 }
0x1cfa   :  { %v1453_v16 = vpop.f32.mrb[12].mxu1 }
0x1cfb   :  { %v11514_v42 = vadd.f32 %v12813_v15, %v1453_v16  ;;  %v10442_v17 = vpop.f32.mrb[13].mxu1 }
0x1cfc   :  { %v1456_v19 = vpop.f32.mrb[14].mxu1 }
0x1cfd   :  { %v1460_v50 = vmul.f32 %v11514_v42, %v12596_v21  ;;  %v10443_v20 = vpop.f32.mrb[15].mxu1 }
0x1cff   :  { %11997 = vtanh.f32 %v1460_v50 }
0x1d09   :  { %v11998_v44 = vpop.eup %11997 }
0x1d0a   :  { %v1462_v22 = vmul.f32 %v11998_v44, %v12596_v21 }
0x1d0c   :  { %v1463_v14 = vadd.f32 %v1462_v22, %v12599_v29 }
0x1d0e   :  { %1466 = vrot.lane.b32.xlu0 %v1463_v14, %s12408_s14  ;;  %v1464_v24 = vmul.f32 %v1463_v14, %v1363_v5 }
0x1d80   :  { %v1467_v51 = vpop.permute.xlu0 %1466 }
0x1d81   :  { %v1469_v23 = vmul.f32 %v1467_v51, %v1463_v14 }
0x1d83   :  { %1471 = vrot.lane.b32.xlu1 %v1469_v23, %s12408_s14 }
0x1df5   :  { %v1472_v25 = vpop.permute.xlu1 %1471 }
0x1df6   :  { %v1474_v26 = vadd.f32 %v1472_v25, %v1464_v24 }
0x1df8   :  { %11999 = vtanh.f32 %v1474_v26 }
0x1e02   :  { %v12000_v27 = vpop.eup %11999 }
0x1e03   :  { %1477 = vrot.lane.b32.xlu0 %v12000_v27, %s12408_s14 }
0x1e75   :  { %v1478_v30 = vpop.permute.xlu0 %1477 }
0x1e76   :  { %v1480_v32 = vmul.f32 %v1478_v30, %v1463_v14 }
0x1e78   :  { %v1481_v33 = vpack.c.bf16 %v1480_v32, %v1480_v32 }
0x1e7a   :  { %1483 = vrot.lane.b32.xlu1 %v1481_v33, %s12395_s29 }
0x1eec   :  { %v1484_v34 = vpop.permute.xlu1 %1483 }
0x1eed   :  { %10449 = vmatmul.mubr.msk.bf16.vlgmr.msra.gmra.mrb[44].mxu0 %vm245_vm4, %v1484_v34  ;;  %10457 = vmatmul.mubr.msk.bf16.vlgmr.msra.gmra.mrb[16].mxu1 %vm245_vm4, %v1484_v34 }
0x1eee   :  { %10469 = vmatpush3.bf16.msra.mxu1 %v12795_v28  ;;  %10461 = vmatpush3.bf16.msra.mxu0 %v12821_v47 }
0x1eef   :  { %10470 = vmatprep.subr.bf16.mxu1 %v12404_v0  ;;  %10462 = vmatprep.subr.bf16.mxu0 %v12404_v0 }
0x1ef0   :  { %10464 = vmatprep.mubr.msk.bf16.mxu0 %vm12405_vm0, %v12404_v0  ;;  %10472 = vmatprep.mubr.msk.bf16.mxu1 %vm12405_vm0, %v12404_v0 }
0x1ef2   :  { %10471 = vmatpush3.bf16.msra.mxu1 %v12799_v31  ;;  %10463 = vmatpush3.bf16.msra.mxu0 %v12824_v48 }
0x1ef3   :  { %10484 = vmatprep.subr.bf16.mxu1 %v12404_v0  ;;  %10476 = vmatprep.subr.bf16.mxu0 %v12404_v0 }
0x1fc0   :  { %v1564_v35 = vpop.f32.mrb[16].mxu1 }
0x1fc1   :  { %v11515_v36 = vadd.f32 %v12813_v15, %v1564_v35  ;;  %v10458_v37 = vpop.f32.mrb[17].mxu1 }
0x1fc2   :  { %v1567_v38 = vpop.f32.mrb[18].mxu1 }
0x1fc3   :  { %v1571_v39 = vmul.f32 %v11515_v36, %v12596_v21  ;;  %v10459_v52 = vpop.f32.mrb[19].mxu1 }
0x1fc5   :  { %12001 = vtanh.f32 %v1571_v39 }
0x1fcf   :  { %v12002_v40 = vpop.eup %12001 }
0x1fd0   :  { %v1573_v41 = vmul.f32 %v12002_v40, %v12596_v21 }
0x1fd2   :  { %v1574_v43 = vadd.f32 %v1573_v41, %v12599_v29 }
0x1fd4   :  { %1577 = vrot.lane.b32.xlu0 %v1574_v43, %s12408_s14  ;;  %v1575_v3 = vmul.f32 %v1574_v43, %v1474_v26 }
0x2046   :  { %v1578_v45 = vpop.permute.xlu0 %1577 }
0x2047   :  { %v1580_v46 = vmul.f32 %v1578_v45, %v1574_v43 }
0x2049   :  { %1582 = vrot.lane.b32.xlu1 %v1580_v46, %s12408_s14 }
0x20bb   :  { %v1583_v53 = vpop.permute.xlu1 %1582 }
0x20bc   :  { %v1585_v54 = vadd.f32 %v1583_v53, %v1575_v3 }
0x20be   :  { %12003 = vtanh.f32 %v1585_v54 }
0x20c8   :  { %v12004_v55 = vpop.eup %12003 }
0x20c9   :  { %1588 = vrot.lane.b32.xlu0 %v12004_v55, %s12408_s14 }
0x213b   :  { %v1589_v56 = vpop.permute.xlu0 %1588 }
0x213c   :  { %v1591_v18 = vmul.f32 %v1589_v56, %v1574_v43 }
0x213e   :  { %v1592_v57 = vpack.c.bf16 %v1591_v18, %v1591_v18 }
0x2140   :  { %1594 = vrot.lane.b32.xlu1 %v1592_v57, %s12395_s29 }
0x21b2   :  { %v1595_v58 = vpop.permute.xlu1 %1594 }
0x21b3   :  { %10465 = vmatmul.mubr.msk.bf16.vlgmr.msra.gmra.mrb[48].mxu0 %vm245_vm4, %v1595_v58  ;;  %10473 = vmatmul.mubr.msk.bf16.vlgmr.msra.gmra.mrb[20].mxu1 %vm245_vm4, %v1595_v58 }
0x21b4   :  { %10485 = vmatpush3.bf16.msra.mxu1 %v12795_v28  ;;  %10477 = vmatpush3.bf16.msra.mxu0 %v12821_v47 }
0x21b5   :  { %10486 = vmatprep.subr.bf16.mxu1 %v12404_v0  ;;  %10478 = vmatprep.subr.bf16.mxu0 %v12404_v0 }
0x21b6   :  { %10480 = vmatprep.mubr.msk.bf16.mxu0 %vm12405_vm0, %v12404_v0  ;;  %10488 = vmatprep.mubr.msk.bf16.mxu1 %vm12405_vm0, %v12404_v0 }
0x21b8   :  { %10487 = vmatpush3.bf16.msra.mxu1 %v12799_v31  ;;  %10479 = vmatpush3.bf16.msra.mxu0 %v12824_v48 }
0x21b9   :  { %10500 = vmatprep.subr.bf16.mxu1 %v12404_v0  ;;  %10492 = vmatprep.subr.bf16.mxu0 %v12404_v0 }
0x2286   :  { %v1675_v10 = vpop.f32.mrb[20].mxu1 }
0x2287   :  { %v11516_v59 = vadd.f32 %v12813_v15, %v1675_v10  ;;  %v10474_v60 = vpop.f32.mrb[21].mxu1 }
0x2288   :  { %v1678_v61 = vpop.f32.mrb[22].mxu1 }
0x2289   :  { %v1682_v49 = vmul.f32 %v11516_v59, %v12596_v21  ;;  %v10475_v62 = vpop.f32.mrb[23].mxu1 }
0x228b   :  { %12005 = vtanh.f32 %v1682_v49 }
0x2295   :  { %v12006_v63 = vpop.eup %12005 }
0x2296   :  { %v1684_v1 = vmul.f32 %v12006_v63, %v12596_v21 }
0x2298   :  { %v1685_v2 = vadd.f32 %v1684_v1, %v12599_v29 }
0x229a   :  { %1688 = vrot.lane.b32.xlu0 %v1685_v2, %s12408_s14  ;;  %v1686_v6 = vmul.f32 %v1685_v2, %v1585_v54 }
0x230c   :  { %v1689_v4 = vpop.permute.xlu0 %1688 }
0x230d   :  { %v1691_v5 = vmul.f32 %v1689_v4, %v1685_v2 }
0x230f   :  { %1693 = vrot.lane.b32.xlu1 %v1691_v5, %s12408_s14 }
0x2381   :  { %v1694_v7 = vpop.permute.xlu1 %1693 }
0x2382   :  { %v1696_v8 = vadd.f32 %v1694_v7, %v1686_v6 }
0x2384   :  { %12007 = vtanh.f32 %v1696_v8 }
0x238e   :  { %v12008_v9 = vpop.eup %12007 }
0x238f   :  { %1699 = vrot.lane.b32.xlu0 %v12008_v9, %s12408_s14 }
0x2401   :  { %v1700_v13 = vpop.permute.xlu0 %1699 }
0x2402   :  { %v1702_v16 = vmul.f32 %v1700_v13, %v1685_v2 }
0x2404   :  { %v1703_v42 = vpack.c.bf16 %v1702_v16, %v1702_v16  ;;  %v12981_v16 = vld [vmem:[#allocation6 + $0x20] sm:$0xff]  }
0x2406   :  { %1705 = vrot.lane.b32.xlu1 %v1703_v42, %s12395_s29 }
0x2478   :  { %v1706_v17 = vpop.permute.xlu1 %1705 }
0x2479   :  { %10481 = vmatmul.mubr.msk.bf16.vlgmr.msra.gmra.mrb[52].mxu0 %vm245_vm4, %v1706_v17  ;;  %10489 = vmatmul.mubr.msk.bf16.vlgmr.msra.gmra.mrb[24].mxu1 %vm245_vm4, %v1706_v17  ;;  %v12985_v17 = vld [vmem:[#allocation6 + $0x28] sm:$0xff]  }
0x247a   :  { %10501 = vmatpush3.bf16.msra.mxu1 %v12795_v28  ;;  %10493 = vmatpush3.bf16.msra.mxu0 %v12821_v47 }
0x247b   :  { %10502 = vmatprep.subr.bf16.mxu1 %v12404_v0  ;;  %10494 = vmatprep.subr.bf16.mxu0 %v12404_v0 }
0x247c   :  { %10496 = vmatprep.mubr.msk.bf16.mxu0 %vm12405_vm0, %v12404_v0  ;;  %10504 = vmatprep.mubr.msk.bf16.mxu1 %vm12405_vm0, %v12404_v0 }
0x247e   :  { %10503 = vmatpush3.bf16.msra.mxu1 %v12799_v31  ;;  %10495 = vmatpush3.bf16.msra.mxu0 %v12824_v48 }
0x247f   :  { %10516 = vmatprep.subr.bf16.mxu1 %v12404_v0  ;;  %10508 = vmatprep.subr.bf16.mxu0 %v12404_v0 }
0x254c   :  { %v1786_v19 = vpop.f32.mrb[24].mxu1 }
0x254d   :  { %v11517_v50 = vadd.f32 %v12813_v15, %v1786_v19  ;;  %v10490_v20 = vpop.f32.mrb[25].mxu1  ;;  %v12999_v19 = vld [vmem:[#allocation8 + $0x2] ss:$0 sm:$0xff] }
0x254e   :  { %v1789_v44 = vpop.f32.mrb[26].mxu1 }
0x254f   :  { %v1793_v22 = vmul.f32 %v11517_v50, %v12596_v21  ;;  %v10491_v14 = vpop.f32.mrb[27].mxu1 }
0x2551   :  { %12009 = vtanh.f32 %v1793_v22 }
0x255b   :  { %v12010_v51 = vpop.eup %12009 }
0x255c   :  { %v1795_v23 = vmul.f32 %v12010_v51, %v12596_v21 }
0x255e   :  { %v1796_v24 = vadd.f32 %v1795_v23, %v12599_v29 }
0x2560   :  { %1799 = vrot.lane.b32.xlu0 %v1796_v24, %s12408_s14  ;;  %v1797_v27 = vmul.f32 %v1796_v24, %v1696_v8 }
0x25d2   :  { %v1800_v25 = vpop.permute.xlu0 %1799 }
0x25d3   :  { %v1802_v26 = vmul.f32 %v1800_v25, %v1796_v24 }
0x25d5   :  { %1804 = vrot.lane.b32.xlu1 %v1802_v26, %s12408_s14 }
0x2647   :  { %v1805_v30 = vpop.permute.xlu1 %1804 }
0x2648   :  { %v1807_v32 = vadd.f32 %v1805_v30, %v1797_v27 }
0x264a   :  { %12011 = vtanh.f32 %v1807_v32 }
0x2654   :  { %v12012_v33 = vpop.eup %12011 }
0x2655   :  { %1810 = vrot.lane.b32.xlu0 %v12012_v33, %s12408_s14 }
0x26c7   :  { %v1811_v34 = vpop.permute.xlu0 %1810 }
0x26c8   :  { %v1813_v35 = vmul.f32 %v1811_v34, %v1796_v24  ;;  %v13007_v34 = vld [vmem:[#allocation4 + $0x20] sm:$0xff]  }
0x26ca   :  { %v1814_v36 = vpack.c.bf16 %v1813_v35, %v1813_v35  ;;  %v13010_v35 = vld [vmem:[#allocation4 + $0x28] sm:$0xff]  }
0x26cc   :  { %1816 = vrot.lane.b32.xlu1 %v1814_v36, %s12395_s29 }
0x273e   :  { %v1817_v37 = vpop.permute.xlu1 %1816 }
0x273f   :  { %10497 = vmatmul.mubr.msk.bf16.vlgmr.msra.gmra.mrb[56].mxu0 %vm245_vm4, %v1817_v37  ;;  %10505 = vmatmul.mubr.msk.bf16.vlgmr.msra.gmra.mrb[28].mxu1 %vm245_vm4, %v1817_v37 }
0x2740   :  { %10517 = vmatpush3.bf16.msra.mxu1 %v12795_v28  ;;  %10509 = vmatpush3.bf16.msra.mxu0 %v12821_v47 }
0x2741   :  { %10518 = vmatprep.subr.bf16.mxu1 %v12404_v0  ;;  %10510 = vmatprep.subr.bf16.mxu0 %v12404_v0 }
0x2742   :  { %10512 = vmatprep.mubr.msk.bf16.mxu0 %vm12405_vm0, %v12404_v0  ;;  %10520 = vmatprep.mubr.msk.bf16.mxu1 %vm12405_vm0, %v12404_v0 }
0x2744   :  { %10519 = vmatpush3.bf16.msra.mxu1 %v12799_v31  ;;  %10511 = vmatpush3.bf16.msra.mxu0 %v12824_v48 }
0x2745   :  { %10524 = vmatprep.subr.bf16.mxu0 %v12404_v0  ;;  %10540 = vmatprep.subr.bf16.mxu1 %v12404_v0 }
0x2812   :  { %v1897_v28 = vpop.f32.mrb[28].mxu1 }
0x2813   :  { %v11518_v38 = vadd.f32 %v12813_v15, %v1897_v28  ;;  %v10506_v39 = vpop.f32.mrb[29].mxu1 }
0x2814   :  { %v1900_v52 = vpop.f32.mrb[30].mxu1 }
0x2815   :  { %v1904_v40 = vmul.f32 %v11518_v38, %v12596_v21  ;;  %v10507_v41 = vpop.f32.mrb[31].mxu1 }
0x2817   :  { %12013 = vtanh.f32 %v1904_v40 }
0x2821   :  { %v12014_v43 = vpop.eup %12013 }
0x2822   :  { %v1906_v45 = vmul.f32 %v12014_v43, %v12596_v21 }
0x2824   :  { %v1907_v31 = vadd.f32 %v1906_v45, %v12599_v29 }
0x2826   :  { %1910 = vrot.lane.b32.xlu0 %v1907_v31, %s12408_s14  ;;  %v1908_v53 = vmul.f32 %v1907_v31, %v1807_v32 }
0x2898   :  { %v1911_v46 = vpop.permute.xlu0 %1910 }
0x2899   :  { %v1913_v3 = vmul.f32 %v1911_v46, %v1907_v31 }
0x289b   :  { %1915 = vrot.lane.b32.xlu1 %v1913_v3, %s12408_s14 }
0x290d   :  { %v1916_v54 = vpop.permute.xlu1 %1915 }
0x290e   :  { %v1918_v55 = vadd.f32 %v1916_v54, %v1908_v53 }
0x2910   :  { %12015 = vtanh.f32 %v1918_v55 }
0x291a   :  { %v12016_v56 = vpop.eup %12015 }
0x291b   :  { %1921 = vrot.lane.b32.xlu0 %v12016_v56, %s12408_s14 }
0x298d   :  { %v1922_v18 = vpop.permute.xlu0 %1921 }
0x298e   :  { %v1924_v57 = vmul.f32 %v1922_v18, %v1907_v31 }
0x2990   :  { %v1925_v58 = vpack.c.bf16 %v1924_v57, %v1924_v57 }
0x2992   :  { %1927 = vrot.lane.b32.xlu1 %v1925_v58, %s12395_s29 }
0x2a04   :  { %v1928_v10 = vpop.permute.xlu1 %1927 }
0x2a05   :  { %10513 = vmatmul.mubr.msk.bf16.vlgmr.msra.gmra.mrb[60].mxu0 %vm245_vm4, %v1928_v10  ;;  %10521 = vmatmul.mubr.msk.bf16.vlgmr.msra.gmra.mrb[32].mxu1 %vm245_vm4, %v1928_v10 }
0x2a06   :  { %10525 = vmatpush3.bf16.msra.mxu0 %v12821_v47  ;;  %10528 = vmatprep.mubr.msk.bf16.mxu0 %vm12405_vm0, %v12404_v0 }
0x2a07   :  { %10526 = vmatprep.subr.bf16.mxu0 %v12404_v0  ;;  %10544 = vmatprep.mubr.msk.bf16.mxu1 %vm12405_vm0, %v12404_v0 }
0x2a08   :  { %10541 = vmatpush3.bf16.msra.mxu1 %v13007_v34 }
0x2a09   :  { %10542 = vmatprep.subr.bf16.mxu1 %v12404_v0 }
0x2a0a   :  { %10527 = vmatpush3.bf16.msra.mxu0 %v12824_v48 }
0x2a0b   :  { %10532 = vmatprep.subr.bf16.mxu0 %v12404_v0 }
0x2a0c   :  { %10543 = vmatpush3.bf16.msra.mxu1 %v13010_v35 }
0x2a0d   :  { %10556 = vmatprep.subr.bf16.mxu1 %v12404_v0 }
0x2ad8   :  { %v2008_v59 = vpop.f32.mrb[32].mxu1 }
0x2ad9   :  { %v11519_v60 = vadd.f32 %v12813_v15, %v2008_v59  ;;  %v10522_v61 = vpop.f32.mrb[33].mxu1 }
0x2ada   :  { %v2011_v49 = vpop.f32.mrb[34].mxu1 }
0x2adb   :  { %v2015_v62 = vmul.f32 %v11519_v60, %v12596_v21  ;;  %v10523_v47 = vpop.f32.mrb[35].mxu1 }
0x2add   :  { %12017 = vtanh.f32 %v2015_v62 }
0x2ae7   :  { %v12018_v63 = vpop.eup %12017 }
0x2ae8   :  { %v2017_v1 = vmul.f32 %v12018_v63, %v12596_v21 }
0x2aea   :  { %v2018_v2 = vadd.f32 %v2017_v1, %v12599_v29 }
0x2aec   :  { %2021 = vrot.lane.b32.xlu0 %v2018_v2, %s12408_s14  ;;  %v2019_v5 = vmul.f32 %v2018_v2, %v1918_v55 }
0x2b5e   :  { %v2022_v4 = vpop.permute.xlu0 %2021 }
0x2b5f   :  { %v2024_v48 = vmul.f32 %v2022_v4, %v2018_v2 }
0x2b61   :  { %2026 = vrot.lane.b32.xlu1 %v2024_v48, %s12408_s14 }
0x2bd3   :  { %v2027_v6 = vpop.permute.xlu1 %2026 }
0x2bd4   :  { %v2029_v15 = vadd.f32 %v2027_v6, %v2019_v5 }
0x2bd6   :  { %12019 = vtanh.f32 %v2029_v15 }
0x2be0   :  { %v12020_v7 = vpop.eup %12019 }
0x2be1   :  { %2032 = vrot.lane.b32.xlu0 %v12020_v7, %s12408_s14 }
0x2c53   :  { %v2033_v8 = vpop.permute.xlu0 %2032 }
0x2c54   :  { %v2035_v9 = vmul.f32 %v2033_v8, %v2018_v2 }
0x2c56   :  { %v2036_v13 = vpack.c.bf16 %v2035_v9, %v2035_v9 }
0x2c58   :  { %2038 = vrot.lane.b32.xlu1 %v2036_v13, %s12395_s29 }
0x2cca   :  { %v2039_v42 = vpop.permute.xlu1 %2038 }
0x2ccb   :  { %10529 = vmatmul.mubr.msk.bf16.vlgmr.msra.gmra.mrb[64].mxu0 %vm245_vm4, %v2039_v42 }
0x2ccc   :  { %10533 = vmatpush3.bf16.msra.mxu0 %v12981_v16  ;;  %10536 = vmatprep.mubr.msk.bf16.mxu0 %vm12405_vm0, %v12404_v0 }
0x2ccd   :  { %10534 = vmatprep.subr.bf16.mxu0 %v12404_v0 }
0x2cd0   :  { %10535 = vmatpush3.bf16.msra.mxu0 %v12985_v17 }
0x2cd1   :  { %10548 = vmatprep.subr.bf16.mxu0 %v12404_v0 }
0x2cd3   :  { %10537 = vmatmul.mubr.bf16.vlgmr.msra.gmra.mrb[36].mxu0 %v12406_v11 }
0x2cd4   :  { %10549 = vmatpush3.bf16.msra.mxu0 %v12981_v16  ;;  %10552 = vmatprep.mubr.msk.bf16.mxu0 %vm12405_vm0, %v12404_v0 }
0x2cd5   :  { %10550 = vmatprep.subr.bf16.mxu0 %v12404_v0 }
0x2cd8   :  { %10551 = vmatpush3.bf16.msra.mxu0 %v12985_v17 }
0x2cd9   :  { %10564 = vmatprep.subr.bf16.mxu0 %v12404_v0 }
0x2da6   :  { %v2143_v50 = vpop.f32.mrb[36].mxu0 }
0x2da7   :  { %v11520_v20 = vadd.f32 %v12999_v19, %v2143_v50  ;;  %v10538_v44 = vpop.f32.mrb[37].mxu0 }
0x2da8   :  { %v2146_v22 = vpop.f32.mrb[38].mxu0 }
0x2da9   :  { %v2150_v14 = vmul.f32 %v11520_v20, %v12596_v21  ;;  %v10539_v51 = vpop.f32.mrb[39].mxu0 }
0x2dab   :  { %12021 = vtanh.f32 %v2150_v14 }
0x2db5   :  { %v12022_v23 = vpop.eup %12021 }
0x2db6   :  { %v2152_v24 = vmul.f32 %v12022_v23, %v12596_v21 }
0x2db8   :  { %v2153_v25 = vadd.f32 %v2152_v24, %v12599_v29 }
0x2dba   :  { %2156 = vrot.lane.b32.xlu0 %v2153_v25, %s12408_s14  ;;  %v2154_v30 = vmul.f32 0.0, %v2153_v25 }
0x2e2c   :  { %v2157_v26 = vpop.permute.xlu0 %2156 }
0x2e2d   :  { %v2159_v27 = vmul.f32 %v2157_v26, %v2153_v25 }
0x2e2f   :  { %2161 = vrot.lane.b32.xlu1 %v2159_v27, %s12408_s14 }
0x2ea1   :  { %v2162_v32 = vpop.permute.xlu1 %2161 }
0x2ea2   :  { %v2164_v33 = vadd.f32 %v2162_v32, %v2154_v30 }
0x2ea4   :  { %12023 = vtanh.f32 %v2164_v33 }
0x2eae   :  { %v12024_v36 = vpop.eup %12023 }
0x2eaf   :  { %2167 = vrot.lane.b32.xlu0 %v12024_v36, %s12408_s14 }
0x2f21   :  { %v2168_v37 = vpop.permute.xlu0 %2167 }
0x2f22   :  { %v2170_v28 = vmul.f32 %v2168_v37, %v2153_v25 }
0x2f24   :  { %v2171_v38 = vpack.c.bf16 %v2170_v28, %v2170_v28 }
0x2f26   :  { %2179 = vrot.lane.b32.xlu1 %v2171_v38, %s12395_s29 }
0x2f98   :  { %v2180_v39 = vpop.permute.xlu1 %2179 }
0x2f99   :  { %10545 = vmatmul.mubr.msk.bf16.vlgmr.msra.gmra.mrb[36].mxu1 %vm245_vm4, %v2180_v39  ;;  %10553 = vmatmul.mubr.msk.bf16.vlgmr.msra.gmra.mrb[40].mxu0 %vm245_vm4, %v2180_v39 }
0x2f9a   :  { %10565 = vmatpush3.bf16.msra.mxu0 %v12981_v16  ;;  %10557 = vmatpush3.bf16.msra.mxu1 %v13007_v34 }
0x2f9b   :  { %10566 = vmatprep.subr.bf16.mxu0 %v12404_v0  ;;  %10558 = vmatprep.subr.bf16.mxu1 %v12404_v0 }
0x2f9c   :  { %10560 = vmatprep.mubr.msk.bf16.mxu1 %vm12405_vm0, %v12404_v0  ;;  %10568 = vmatprep.mubr.msk.bf16.mxu0 %vm12405_vm0, %v12404_v0 }
0x2f9e   :  { %10567 = vmatpush3.bf16.msra.mxu0 %v12985_v17  ;;  %10559 = vmatpush3.bf16.msra.mxu1 %v13010_v35 }
0x2f9f   :  { %10580 = vmatprep.subr.bf16.mxu0 %v12404_v0  ;;  %10572 = vmatprep.subr.bf16.mxu1 %v12404_v0 }
0x306c   :  { %v2272_v52 = vpop.f32.mrb[40].mxu0 }
0x306d   :  { %v11521_v40 = vadd.f32 %v12999_v19, %v2272_v52  ;;  %v10554_v41 = vpop.f32.mrb[41].mxu0 }
0x306e   :  { %v2275_v43 = vpop.f32.mrb[42].mxu0 }
0x306f   :  { %v2279_v45 = vmul.f32 %v11521_v40, %v12596_v21  ;;  %v10555_v31 = vpop.f32.mrb[43].mxu0 }
0x3071   :  { %12025 = vtanh.f32 %v2279_v45 }
0x307b   :  { %v12026_v46 = vpop.eup %12025 }
0x307c   :  { %v2281_v3 = vmul.f32 %v12026_v46, %v12596_v21 }
0x307e   :  { %v2282_v53 = vadd.f32 %v2281_v3, %v12599_v29 }
0x3080   :  { %2285 = vrot.lane.b32.xlu0 %v2282_v53, %s12408_s14  ;;  %v2283_v56 = vmul.f32 %v2282_v53, %v2164_v33 }
0x30f2   :  { %v2286_v54 = vpop.permute.xlu0 %2285 }
0x30f3   :  { %v2288_v55 = vmul.f32 %v2286_v54, %v2282_v53 }
0x30f5   :  { %2290 = vrot.lane.b32.xlu1 %v2288_v55, %s12408_s14 }
0x3167   :  { %v2291_v18 = vpop.permute.xlu1 %2290 }
0x3168   :  { %v2293_v57 = vadd.f32 %v2291_v18, %v2283_v56 }
0x316a   :  { %12027 = vtanh.f32 %v2293_v57 }
0x3174   :  { %v12028_v58 = vpop.eup %12027 }
0x3175   :  { %2296 = vrot.lane.b32.xlu0 %v12028_v58, %s12408_s14 }
0x31e7   :  { %v2297_v10 = vpop.permute.xlu0 %2296 }
0x31e8   :  { %v2299_v59 = vmul.f32 %v2297_v10, %v2282_v53 }
0x31ea   :  { %v2300_v60 = vpack.c.bf16 %v2299_v59, %v2299_v59 }
0x31ec   :  { %2302 = vrot.lane.b32.xlu1 %v2300_v60, %s12395_s29 }
0x325e   :  { %v2303_v61 = vpop.permute.xlu1 %2302 }
0x325f   :  { %10561 = vmatmul.mubr.msk.bf16.vlgmr.msra.gmra.mrb[40].mxu1 %vm245_vm4, %v2303_v61  ;;  %10569 = vmatmul.mubr.msk.bf16.vlgmr.msra.gmra.mrb[44].mxu0 %vm245_vm4, %v2303_v61 }
0x3260   :  { %10581 = vmatpush3.bf16.msra.mxu0 %v12981_v16  ;;  %10573 = vmatpush3.bf16.msra.mxu1 %v13007_v34 }
0x3261   :  { %10582 = vmatprep.subr.bf16.mxu0 %v12404_v0  ;;  %10574 = vmatprep.subr.bf16.mxu1 %v12404_v0 }
0x3262   :  { %10576 = vmatprep.mubr.msk.bf16.mxu1 %vm12405_vm0, %v12404_v0  ;;  %10584 = vmatprep.mubr.msk.bf16.mxu0 %vm12405_vm0, %v12404_v0 }
0x3264   :  { %10583 = vmatpush3.bf16.msra.mxu0 %v12985_v17  ;;  %10575 = vmatpush3.bf16.msra.mxu1 %v13010_v35 }
0x3265   :  { %10596 = vmatprep.subr.bf16.mxu0 %v12404_v0  ;;  %10588 = vmatprep.subr.bf16.mxu1 %v12404_v0 }
0x3332   :  { %v2383_v49 = vpop.f32.mrb[44].mxu0 }
0x3333   :  { %v11522_v62 = vadd.f32 %v12999_v19, %v2383_v49  ;;  %v10570_v47 = vpop.f32.mrb[45].mxu0 }
0x3334   :  { %v2386_v63 = vpop.f32.mrb[46].mxu0 }
0x3335   :  { %v2390_v1 = vmul.f32 %v11522_v62, %v12596_v21  ;;  %v10571_v2 = vpop.f32.mrb[47].mxu0 }
0x3337   :  { %12029 = vtanh.f32 %v2390_v1 }
0x3341   :  { %v12030_v4 = vpop.eup %12029 }
0x3342   :  { %v2392_v48 = vmul.f32 %v12030_v4, %v12596_v21 }
0x3344   :  { %v2393_v5 = vadd.f32 %v2392_v48, %v12599_v29 }
0x3346   :  { %2396 = vrot.lane.b32.xlu0 %v2393_v5, %s12408_s14  ;;  %v2394_v7 = vmul.f32 %v2393_v5, %v2293_v57 }
0x33b8   :  { %v2397_v6 = vpop.permute.xlu0 %2396 }
0x33b9   :  { %v2399_v15 = vmul.f32 %v2397_v6, %v2393_v5 }
0x33bb   :  { %2401 = vrot.lane.b32.xlu1 %v2399_v15, %s12408_s14 }
0x342d   :  { %v2402_v8 = vpop.permute.xlu1 %2401 }
0x342e   :  { %v2404_v9 = vadd.f32 %v2402_v8, %v2394_v7 }
0x3430   :  { %12031 = vtanh.f32 %v2404_v9 }
0x343a   :  { %v12032_v13 = vpop.eup %12031 }
0x343b   :  { %2407 = vrot.lane.b32.xlu0 %v12032_v13, %s12408_s14 }
0x34ad   :  { %v2408_v42 = vpop.permute.xlu0 %2407 }
0x34ae   :  { %v2410_v50 = vmul.f32 %v2408_v42, %v2393_v5 }
0x34b0   :  { %v2411_v20 = vpack.c.bf16 %v2410_v50, %v2410_v50 }
0x34b2   :  { %2413 = vrot.lane.b32.xlu1 %v2411_v20, %s12395_s29 }
0x3524   :  { %v2414_v44 = vpop.permute.xlu1 %2413 }
0x3525   :  { %10577 = vmatmul.mubr.msk.bf16.vlgmr.msra.gmra.mrb[44].mxu1 %vm245_vm4, %v2414_v44  ;;  %10585 = vmatmul.mubr.msk.bf16.vlgmr.msra.gmra.mrb[48].mxu0 %vm245_vm4, %v2414_v44 }
0x3526   :  { %10597 = vmatpush3.bf16.msra.mxu0 %v12981_v16  ;;  %10589 = vmatpush3.bf16.msra.mxu1 %v13007_v34 }
0x3527   :  { %10598 = vmatprep.subr.bf16.mxu0 %v12404_v0  ;;  %10590 = vmatprep.subr.bf16.mxu1 %v12404_v0 }
0x3528   :  { %10592 = vmatprep.mubr.msk.bf16.mxu1 %vm12405_vm0, %v12404_v0  ;;  %10600 = vmatprep.mubr.msk.bf16.mxu0 %vm12405_vm0, %v12404_v0 }
0x352a   :  { %10599 = vmatpush3.bf16.msra.mxu0 %v12985_v17  ;;  %10591 = vmatpush3.bf16.msra.mxu1 %v13010_v35 }
0x352b   :  { %10612 = vmatprep.subr.bf16.mxu0 %v12404_v0  ;;  %10604 = vmatprep.subr.bf16.mxu1 %v12404_v0 }
0x35f8   :  { %v2494_v22 = vpop.f32.mrb[48].mxu0 }
0x35f9   :  { %v11523_v14 = vadd.f32 %v12999_v19, %v2494_v22  ;;  %v10586_v51 = vpop.f32.mrb[49].mxu0 }
0x35fa   :  { %v2497_v23 = vpop.f32.mrb[50].mxu0 }
0x35fb   :  { %v2501_v24 = vmul.f32 %v11523_v14, %v12596_v21  ;;  %v10587_v25 = vpop.f32.mrb[51].mxu0 }
0x35fd   :  { %12033 = vtanh.f32 %v2501_v24 }
0x3607   :  { %v12034_v26 = vpop.eup %12033 }
0x3608   :  { %v2503_v27 = vmul.f32 %v12034_v26, %v12596_v21 }
0x360a   :  { %v2504_v30 = vadd.f32 %v2503_v27, %v12599_v29 }
0x360c   :  { %2507 = vrot.lane.b32.xlu0 %v2504_v30, %s12408_s14  ;;  %v2505_v36 = vmul.f32 %v2504_v30, %v2404_v9 }
0x367e   :  { %v2508_v32 = vpop.permute.xlu0 %2507 }
0x367f   :  { %v2510_v33 = vmul.f32 %v2508_v32, %v2504_v30 }
0x3681   :  { %2512 = vrot.lane.b32.xlu1 %v2510_v33, %s12408_s14 }
0x36f3   :  { %v2513_v37 = vpop.permute.xlu1 %2512 }
0x36f4   :  { %v2515_v28 = vadd.f32 %v2513_v37, %v2505_v36 }
0x36f6   :  { %12035 = vtanh.f32 %v2515_v28 }
0x3700   :  { %v12036_v38 = vpop.eup %12035 }
0x3701   :  { %2518 = vrot.lane.b32.xlu0 %v12036_v38, %s12408_s14 }
0x3773   :  { %v2519_v39 = vpop.permute.xlu0 %2518 }
0x3774   :  { %v2521_v52 = vmul.f32 %v2519_v39, %v2504_v30 }
0x3776   :  { %v2522_v40 = vpack.c.bf16 %v2521_v52, %v2521_v52 }
0x3778   :  { %2524 = vrot.lane.b32.xlu1 %v2522_v40, %s12395_s29 }
0x37ea   :  { %v2525_v41 = vpop.permute.xlu1 %2524 }
0x37eb   :  { %10593 = vmatmul.mubr.msk.bf16.vlgmr.msra.gmra.mrb[48].mxu1 %vm245_vm4, %v2525_v41  ;;  %10601 = vmatmul.mubr.msk.bf16.vlgmr.msra.gmra.mrb[52].mxu0 %vm245_vm4, %v2525_v41 }
0x37ec   :  { %10613 = vmatpush3.bf16.msra.mxu0 %v12981_v16  ;;  %10605 = vmatpush3.bf16.msra.mxu1 %v13007_v34 }
0x37ed   :  { %10614 = vmatprep.subr.bf16.mxu0 %v12404_v0  ;;  %10606 = vmatprep.subr.bf16.mxu1 %v12404_v0 }
0x37ee   :  { %10608 = vmatprep.mubr.msk.bf16.mxu1 %vm12405_vm0, %v12404_v0  ;;  %10616 = vmatprep.mubr.msk.bf16.mxu0 %vm12405_vm0, %v12404_v0 }
0x37f0   :  { %10615 = vmatpush3.bf16.msra.mxu0 %v12985_v17  ;;  %10607 = vmatpush3.bf16.msra.mxu1 %v13010_v35 }
0x37f1   :  { %10628 = vmatprep.subr.bf16.mxu0 %v12404_v0  ;;  %10620 = vmatprep.subr.bf16.mxu1 %v12404_v0 }
0x38be   :  { %v2605_v43 = vpop.f32.mrb[52].mxu0 }
0x38bf   :  { %v11524_v45 = vadd.f32 %v12999_v19, %v2605_v43  ;;  %v10602_v31 = vpop.f32.mrb[53].mxu0 }
0x38c0   :  { %v2608_v46 = vpop.f32.mrb[54].mxu0 }
0x38c1   :  { %v2612_v3 = vmul.f32 %v11524_v45, %v12596_v21  ;;  %v10603_v53 = vpop.f32.mrb[55].mxu0 }
0x38c3   :  { %12037 = vtanh.f32 %v2612_v3 }
0x38cd   :  { %v12038_v54 = vpop.eup %12037 }
0x38ce   :  { %v2614_v55 = vmul.f32 %v12038_v54, %v12596_v21 }
0x38d0   :  { %v2615_v56 = vadd.f32 %v2614_v55, %v12599_v29 }
0x38d2   :  { %2618 = vrot.lane.b32.xlu0 %v2615_v56, %s12408_s14  ;;  %v2616_v58 = vmul.f32 %v2615_v56, %v2515_v28 }
0x3944   :  { %v2619_v18 = vpop.permute.xlu0 %2618 }
0x3945   :  { %v2621_v57 = vmul.f32 %v2619_v18, %v2615_v56 }
0x3947   :  { %2623 = vrot.lane.b32.xlu1 %v2621_v57, %s12408_s14 }
0x39b9   :  { %v2624_v10 = vpop.permute.xlu1 %2623 }
0x39ba   :  { %v2626_v59 = vadd.f32 %v2624_v10, %v2616_v58 }
0x39bc   :  { %12039 = vtanh.f32 %v2626_v59 }
0x39c6   :  { %v12040_v60 = vpop.eup %12039 }
0x39c7   :  { %2629 = vrot.lane.b32.xlu0 %v12040_v60, %s12408_s14 }
0x3a39   :  { %v2630_v61 = vpop.permute.xlu0 %2629 }
0x3a3a   :  { %v2632_v49 = vmul.f32 %v2630_v61, %v2615_v56 }
0x3a3c   :  { %v2633_v62 = vpack.c.bf16 %v2632_v49, %v2632_v49  ;;  %v13167_v49 = vld [vmem:[#allocation6 + $0x30] sm:$0xff]  }
0x3a3e   :  { %2635 = vrot.lane.b32.xlu1 %v2633_v62, %s12395_s29 }
0x3ab0   :  { %v2636_v47 = vpop.permute.xlu1 %2635 }
0x3ab1   :  { %10609 = vmatmul.mubr.msk.bf16.vlgmr.msra.gmra.mrb[52].mxu1 %vm245_vm4, %v2636_v47  ;;  %10617 = vmatmul.mubr.msk.bf16.vlgmr.msra.gmra.mrb[56].mxu0 %vm245_vm4, %v2636_v47  ;;  %v13171_v47 = vld [vmem:[#allocation6 + $0x38] sm:$0xff]  }
0x3ab2   :  { %10629 = vmatpush3.bf16.msra.mxu0 %v12981_v16  ;;  %10621 = vmatpush3.bf16.msra.mxu1 %v13007_v34 }
0x3ab3   :  { %10630 = vmatprep.subr.bf16.mxu0 %v12404_v0  ;;  %10622 = vmatprep.subr.bf16.mxu1 %v12404_v0 }
0x3ab4   :  { %10624 = vmatprep.mubr.msk.bf16.mxu1 %vm12405_vm0, %v12404_v0  ;;  %10632 = vmatprep.mubr.msk.bf16.mxu0 %vm12405_vm0, %v12404_v0 }
0x3ab6   :  { %10631 = vmatpush3.bf16.msra.mxu0 %v12985_v17  ;;  %10623 = vmatpush3.bf16.msra.mxu1 %v13010_v35 }
0x3ab7   :  { %10644 = vmatprep.subr.bf16.mxu0 %v12404_v0  ;;  %10636 = vmatprep.subr.bf16.mxu1 %v12404_v0 }
0x3b84   :  { %v2716_v63 = vpop.f32.mrb[56].mxu0 }
0x3b85   :  { %v11525_v1 = vadd.f32 %v12999_v19, %v2716_v63  ;;  %v10618_v2 = vpop.f32.mrb[57].mxu0  ;;  %v13185_v63 = vld [vmem:[#allocation8 + $0x3] ss:$0 sm:$0xff] }
0x3b86   :  { %v2719_v4 = vpop.f32.mrb[58].mxu0 }
0x3b87   :  { %v2723_v48 = vmul.f32 %v11525_v1, %v12596_v21  ;;  %v10619_v5 = vpop.f32.mrb[59].mxu0 }
0x3b89   :  { %12041 = vtanh.f32 %v2723_v48 }
0x3b93   :  { %v12042_v6 = vpop.eup %12041 }
0x3b94   :  { %v2725_v15 = vmul.f32 %v12042_v6, %v12596_v21 }
0x3b96   :  { %v2726_v7 = vadd.f32 %v2725_v15, %v12599_v29 }
0x3b98   :  { %2729 = vrot.lane.b32.xlu0 %v2726_v7, %s12408_s14  ;;  %v2727_v13 = vmul.f32 %v2726_v7, %v2626_v59 }
0x3c0a   :  { %v2730_v8 = vpop.permute.xlu0 %2729 }
0x3c0b   :  { %v2732_v9 = vmul.f32 %v2730_v8, %v2726_v7 }
0x3c0d   :  { %2734 = vrot.lane.b32.xlu1 %v2732_v9, %s12408_s14 }
0x3c7f   :  { %v2735_v42 = vpop.permute.xlu1 %2734 }
0x3c80   :  { %v2737_v50 = vadd.f32 %v2735_v42, %v2727_v13 }
0x3c82   :  { %12043 = vtanh.f32 %v2737_v50 }
0x3c8c   :  { %v12044_v20 = vpop.eup %12043 }
0x3c8d   :  { %2740 = vrot.lane.b32.xlu0 %v12044_v20, %s12408_s14 }
0x3cff   :  { %v2741_v44 = vpop.permute.xlu0 %2740 }
0x3d00   :  { %v2743_v22 = vmul.f32 %v2741_v44, %v2726_v7  ;;  %v13193_v44 = vld [vmem:[#allocation4 + $0x30] sm:$0xff]  }
0x3d02   :  { %v2744_v14 = vpack.c.bf16 %v2743_v22, %v2743_v22  ;;  %v13196_v22 = vld [vmem:[#allocation4 + $0x38] sm:$0xff]  }
0x3d04   :  { %2746 = vrot.lane.b32.xlu1 %v2744_v14, %s12395_s29 }
0x3d76   :  { %v2747_v51 = vpop.permute.xlu1 %2746 }
0x3d77   :  { %10625 = vmatmul.mubr.msk.bf16.vlgmr.msra.gmra.mrb[56].mxu1 %vm245_vm4, %v2747_v51  ;;  %10633 = vmatmul.mubr.msk.bf16.vlgmr.msra.gmra.mrb[60].mxu0 %vm245_vm4, %v2747_v51 }
0x3d78   :  { %10645 = vmatpush3.bf16.msra.mxu0 %v12981_v16  ;;  %10637 = vmatpush3.bf16.msra.mxu1 %v13007_v34 }
0x3d79   :  { %10646 = vmatprep.subr.bf16.mxu0 %v12404_v0  ;;  %10638 = vmatprep.subr.bf16.mxu1 %v12404_v0 }
0x3d7a   :  { %10640 = vmatprep.mubr.msk.bf16.mxu1 %vm12405_vm0, %v12404_v0  ;;  %10648 = vmatprep.mubr.msk.bf16.mxu0 %vm12405_vm0, %v12404_v0 }
0x3d7c   :  { %10647 = vmatpush3.bf16.msra.mxu0 %v12985_v17  ;;  %10639 = vmatpush3.bf16.msra.mxu1 %v13010_v35 }
0x3d7d   :  { %10652 = vmatprep.subr.bf16.mxu1 %v12404_v0  ;;  %10668 = vmatprep.subr.bf16.mxu0 %v12404_v0 }
0x3e4a   :  { %v2827_v16 = vpop.f32.mrb[60].mxu0 }
0x3e4b   :  { %v11526_v23 = vadd.f32 %v12999_v19, %v2827_v16  ;;  %v10634_v24 = vpop.f32.mrb[61].mxu0 }
0x3e4c   :  { %v2830_v25 = vpop.f32.mrb[62].mxu0 }
0x3e4d   :  { %v2834_v26 = vmul.f32 %v11526_v23, %v12596_v21  ;;  %v10635_v27 = vpop.f32.mrb[63].mxu0 }
0x3e4f   :  { %12045 = vtanh.f32 %v2834_v26 }
0x3e59   :  { %v12046_v30 = vpop.eup %12045 }
0x3e5a   :  { %v2836_v32 = vmul.f32 %v12046_v30, %v12596_v21 }
0x3e5c   :  { %v2837_v17 = vadd.f32 %v2836_v32, %v12599_v29 }
0x3e5e   :  { %2840 = vrot.lane.b32.xlu0 %v2837_v17, %s12408_s14  ;;  %v2838_v37 = vmul.f32 %v2837_v17, %v2737_v50 }
0x3ed0   :  { %v2841_v33 = vpop.permute.xlu0 %2840 }
0x3ed1   :  { %v2843_v36 = vmul.f32 %v2841_v33, %v2837_v17 }
0x3ed3   :  { %2845 = vrot.lane.b32.xlu1 %v2843_v36, %s12408_s14 }
0x3f45   :  { %v2846_v28 = vpop.permute.xlu1 %2845 }
0x3f46   :  { %v2848_v38 = vadd.f32 %v2846_v28, %v2838_v37 }
0x3f48   :  { %12047 = vtanh.f32 %v2848_v38 }
0x3f52   :  { %v12048_v39 = vpop.eup %12047 }
0x3f53   :  { %2851 = vrot.lane.b32.xlu0 %v12048_v39, %s12408_s14 }
0x3fc5   :  { %v2852_v52 = vpop.permute.xlu0 %2851 }
0x3fc6   :  { %v2854_v40 = vmul.f32 %v2852_v52, %v2837_v17 }
0x3fc8   :  { %v2855_v41 = vpack.c.bf16 %v2854_v40, %v2854_v40 }
0x3fca   :  { %2857 = vrot.lane.b32.xlu1 %v2855_v41, %s12395_s29 }
0x403c   :  { %v2858_v43 = vpop.permute.xlu1 %2857 }
0x403d   :  { %10641 = vmatmul.mubr.msk.bf16.vlgmr.msra.gmra.mrb[60].mxu1 %vm245_vm4, %v2858_v43  ;;  %10649 = vmatmul.mubr.msk.bf16.vlgmr.msra.gmra.mrb[64].mxu0 %vm245_vm4, %v2858_v43 }
0x403e   :  { %10653 = vmatpush3.bf16.msra.mxu1 %v13007_v34  ;;  %10656 = vmatprep.mubr.msk.bf16.mxu1 %vm12405_vm0, %v12404_v0 }
0x403f   :  { %10654 = vmatprep.subr.bf16.mxu1 %v12404_v0  ;;  %10672 = vmatprep.mubr.msk.bf16.mxu0 %vm12405_vm0, %v12404_v0 }
0x4040   :  { %10669 = vmatpush3.bf16.msra.mxu0 %v13193_v44 }
0x4041   :  { %10670 = vmatprep.subr.bf16.mxu0 %v12404_v0 }
0x4042   :  { %10655 = vmatpush3.bf16.msra.mxu1 %v13010_v35 }
0x4043   :  { %10660 = vmatprep.subr.bf16.mxu1 %v12404_v0 }
0x4044   :  { %10671 = vmatpush3.bf16.msra.mxu0 %v13196_v22 }
0x4045   :  { %10684 = vmatprep.subr.bf16.mxu0 %v12404_v0 }
0x4110   :  { %v2938_v45 = vpop.f32.mrb[64].mxu0 }
0x4111   :  { %v11527_v31 = vadd.f32 %v12999_v19, %v2938_v45  ;;  %v10650_v46 = vpop.f32.mrb[65].mxu0 }
0x4112   :  { %v2941_v3 = vpop.f32.mrb[66].mxu0 }
0x4113   :  { %v2945_v53 = vmul.f32 %v11527_v31, %v12596_v21  ;;  %v10651_v34 = vpop.f32.mrb[67].mxu0 }
0x4115   :  { %12049 = vtanh.f32 %v2945_v53 }
0x411f   :  { %v12050_v54 = vpop.eup %12049 }
0x4120   :  { %v2947_v55 = vmul.f32 %v12050_v54, %v12596_v21 }
0x4122   :  { %v2948_v56 = vadd.f32 %v2947_v55, %v12599_v29 }
0x4124   :  { %2951 = vrot.lane.b32.xlu0 %v2948_v56, %s12408_s14  ;;  %v2949_v57 = vmul.f32 %v2948_v56, %v2848_v38 }
0x4196   :  { %v2952_v18 = vpop.permute.xlu0 %2951 }
0x4197   :  { %v2954_v35 = vmul.f32 %v2952_v18, %v2948_v56 }
0x4199   :  { %2956 = vrot.lane.b32.xlu1 %v2954_v35, %s12408_s14 }
0x420b   :  { %v2957_v58 = vpop.permute.xlu1 %2956 }
0x420c   :  { %v2959_v19 = vadd.f32 %v2957_v58, %v2949_v57 }
0x420e   :  { %12051 = vtanh.f32 %v2959_v19 }
0x4218   :  { %v12052_v10 = vpop.eup %12051 }
0x4219   :  { %2962 = vrot.lane.b32.xlu0 %v12052_v10, %s12408_s14 }
0x428b   :  { %v2963_v59 = vpop.permute.xlu0 %2962 }
0x428c   :  { %v2965_v60 = vmul.f32 %v2963_v59, %v2948_v56 }
0x428e   :  { %v2966_v61 = vpack.c.bf16 %v2965_v60, %v2965_v60 }
0x4290   :  { %2968 = vrot.lane.b32.xlu1 %v2966_v61, %s12395_s29 }
0x4302   :  { %v2969_v62 = vpop.permute.xlu1 %2968 }
0x4303   :  { %10657 = vmatmul.mubr.msk.bf16.vlgmr.msra.gmra.mrb[64].mxu1 %vm245_vm4, %v2969_v62 }
0x4304   :  { %10661 = vmatpush3.bf16.msra.mxu1 %v13167_v49  ;;  %10664 = vmatprep.mubr.msk.bf16.mxu1 %vm12405_vm0, %v12404_v0 }
0x4305   :  { %10662 = vmatprep.subr.bf16.mxu1 %v12404_v0 }
0x4308   :  { %10663 = vmatpush3.bf16.msra.mxu1 %v13171_v47 }
0x4309   :  { %10676 = vmatprep.subr.bf16.mxu1 %v12404_v0 }
0x430b   :  { %10665 = vmatmul.mubr.bf16.vlgmr.msra.gmra.mrb[36].mxu1 %v12406_v11 }
0x430c   :  { %10677 = vmatpush3.bf16.msra.mxu1 %v13167_v49  ;;  %10680 = vmatprep.mubr.msk.bf16.mxu1 %vm12405_vm0, %v12404_v0 }
0x430d   :  { %10678 = vmatprep.subr.bf16.mxu1 %v12404_v0 }
0x4310   :  { %10679 = vmatpush3.bf16.msra.mxu1 %v13171_v47 }
0x4311   :  { %10692 = vmatprep.subr.bf16.mxu1 %v12404_v0 }
0x43de   :  { %v3073_v1 = vpop.f32.mrb[36].mxu1 }
0x43df   :  { %v11528_v2 = vadd.f32 %v13185_v63, %v3073_v1  ;;  %v10666_v4 = vpop.f32.mrb[37].mxu1 }
0x43e0   :  { %v3076_v48 = vpop.f32.mrb[38].mxu1 }
0x43e1   :  { %v3080_v5 = vmul.f32 %v11528_v2, %v12596_v21  ;;  %v10667_v6 = vpop.f32.mrb[39].mxu1 }
0x43e3   :  { %12053 = vtanh.f32 %v3080_v5 }
0x43ed   :  { %v12054_v15 = vpop.eup %12053 }
0x43ee   :  { %v3082_v7 = vmul.f32 %v12054_v15, %v12596_v21 }
0x43f0   :  { %v3083_v8 = vadd.f32 %v3082_v7, %v12599_v29 }
0x43f2   :  { %3086 = vrot.lane.b32.xlu0 %v3083_v8, %s12408_s14  ;;  %v3084_v42 = vmul.f32 0.0, %v3083_v8 }
0x4464   :  { %v3087_v9 = vpop.permute.xlu0 %3086 }
0x4465   :  { %v3089_v13 = vmul.f32 %v3087_v9, %v3083_v8 }
0x4467   :  { %3091 = vrot.lane.b32.xlu1 %v3089_v13, %s12408_s14 }
0x44d9   :  { %v3092_v50 = vpop.permute.xlu1 %3091 }
0x44da   :  { %v3094_v20 = vadd.f32 %v3092_v50, %v3084_v42 }
0x44dc   :  { %12055 = vtanh.f32 %v3094_v20 }
0x44e6   :  { %v12056_v14 = vpop.eup %12055 }
0x44e7   :  { %3097 = vrot.lane.b32.xlu0 %v12056_v14, %s12408_s14 }
0x4559   :  { %v3098_v51 = vpop.permute.xlu0 %3097 }
0x455a   :  { %v3100_v16 = vmul.f32 %v3098_v51, %v3083_v8 }
0x455c   :  { %v3101_v23 = vpack.c.bf16 %v3100_v16, %v3100_v16 }
0x455e   :  { %3109 = vrot.lane.b32.xlu1 %v3101_v23, %s12395_s29 }
0x45d0   :  { %v3110_v24 = vpop.permute.xlu1 %3109 }
0x45d1   :  { %10673 = vmatmul.mubr.msk.bf16.vlgmr.msra.gmra.mrb[68].mxu0 %vm245_vm4, %v3110_v24  ;;  %10681 = vmatmul.mubr.msk.bf16.vlgmr.msra.gmra.mrb[40].mxu1 %vm245_vm4, %v3110_v24 }
0x45d2   :  { %10693 = vmatpush3.bf16.msra.mxu1 %v13167_v49  ;;  %10685 = vmatpush3.bf16.msra.mxu0 %v13193_v44 }
0x45d3   :  { %10694 = vmatprep.subr.bf16.mxu1 %v12404_v0  ;;  %10686 = vmatprep.subr.bf16.mxu0 %v12404_v0 }
0x45d4   :  { %10688 = vmatprep.mubr.msk.bf16.mxu0 %vm12405_vm0, %v12404_v0  ;;  %10696 = vmatprep.mubr.msk.bf16.mxu1 %vm12405_vm0, %v12404_v0 }
0x45d6   :  { %10695 = vmatpush3.bf16.msra.mxu1 %v13171_v47  ;;  %10687 = vmatpush3.bf16.msra.mxu0 %v13196_v22 }
0x45d7   :  { %10708 = vmatprep.subr.bf16.mxu1 %v12404_v0  ;;  %10700 = vmatprep.subr.bf16.mxu0 %v12404_v0 }
0x46a4   :  { %v3202_v25 = vpop.f32.mrb[40].mxu1 }
0x46a5   :  { %v11529_v26 = vadd.f32 %v13185_v63, %v3202_v25  ;;  %v10682_v27 = vpop.f32.mrb[41].mxu1 }
0x46a6   :  { %v3205_v30 = vpop.f32.mrb[42].mxu1 }
0x46a7   :  { %v3209_v32 = vmul.f32 %v11529_v26, %v12596_v21  ;;  %v10683_v17 = vpop.f32.mrb[43].mxu1 }
0x46a9   :  { %12057 = vtanh.f32 %v3209_v32 }
0x46b3   :  { %v12058_v33 = vpop.eup %12057 }
0x46b4   :  { %v3211_v36 = vmul.f32 %v12058_v33, %v12596_v21 }
0x46b6   :  { %v3212_v37 = vadd.f32 %v3211_v36, %v12599_v29 }
0x46b8   :  { %3215 = vrot.lane.b32.xlu0 %v3212_v37, %s12408_s14  ;;  %v3213_v39 = vmul.f32 %v3212_v37, %v3094_v20 }
0x472a   :  { %v3216_v28 = vpop.permute.xlu0 %3215 }
0x472b   :  { %v3218_v38 = vmul.f32 %v3216_v28, %v3212_v37 }
0x472d   :  { %3220 = vrot.lane.b32.xlu1 %v3218_v38, %s12408_s14 }
0x479f   :  { %v3221_v52 = vpop.permute.xlu1 %3220 }
0x47a0   :  { %v3223_v40 = vadd.f32 %v3221_v52, %v3213_v39 }
0x47a2   :  { %12059 = vtanh.f32 %v3223_v40 }
0x47ac   :  { %v12060_v41 = vpop.eup %12059 }
0x47ad   :  { %3226 = vrot.lane.b32.xlu0 %v12060_v41, %s12408_s14 }
0x481f   :  { %v3227_v43 = vpop.permute.xlu0 %3226 }
0x4820   :  { %v3229_v45 = vmul.f32 %v3227_v43, %v3212_v37 }
0x4822   :  { %v3230_v31 = vpack.c.bf16 %v3229_v45, %v3229_v45 }
0x4824   :  { %3232 = vrot.lane.b32.xlu1 %v3230_v31, %s12395_s29 }
0x4896   :  { %v3233_v46 = vpop.permute.xlu1 %3232 }
0x4897   :  { %10689 = vmatmul.mubr.msk.bf16.vlgmr.msra.gmra.mrb[72].mxu0 %vm245_vm4, %v3233_v46  ;;  %10697 = vmatmul.mubr.msk.bf16.vlgmr.msra.gmra.mrb[44].mxu1 %vm245_vm4, %v3233_v46 }
0x4898   :  { %10709 = vmatpush3.bf16.msra.mxu1 %v13167_v49  ;;  %10701 = vmatpush3.bf16.msra.mxu0 %v13193_v44 }
0x4899   :  { %10710 = vmatprep.subr.bf16.mxu1 %v12404_v0  ;;  %10702 = vmatprep.subr.bf16.mxu0 %v12404_v0 }
0x489a   :  { %10704 = vmatprep.mubr.msk.bf16.mxu0 %vm12405_vm0, %v12404_v0  ;;  %10712 = vmatprep.mubr.msk.bf16.mxu1 %vm12405_vm0, %v12404_v0 }
0x489c   :  { %10711 = vmatpush3.bf16.msra.mxu1 %v13171_v47  ;;  %10703 = vmatpush3.bf16.msra.mxu0 %v13196_v22 }
0x489d   :  { %10724 = vmatprep.subr.bf16.mxu1 %v12404_v0  ;;  %10716 = vmatprep.subr.bf16.mxu0 %v12404_v0 }
0x496a   :  { %v3313_v3 = vpop.f32.mrb[44].mxu1 }
0x496b   :  { %v11530_v53 = vadd.f32 %v13185_v63, %v3313_v3  ;;  %v10698_v34 = vpop.f32.mrb[45].mxu1 }
0x496c   :  { %v3316_v54 = vpop.f32.mrb[46].mxu1 }
0x496d   :  { %v3320_v55 = vmul.f32 %v11530_v53, %v12596_v21  ;;  %v10699_v56 = vpop.f32.mrb[47].mxu1 }
0x496f   :  { %12061 = vtanh.f32 %v3320_v55 }
0x4979   :  { %v12062_v18 = vpop.eup %12061 }
0x497a   :  { %v3322_v35 = vmul.f32 %v12062_v18, %v12596_v21 }
0x497c   :  { %v3323_v57 = vadd.f32 %v3322_v35, %v12599_v29 }
0x497e   :  { %3326 = vrot.lane.b32.xlu0 %v3323_v57, %s12408_s14  ;;  %v3324_v10 = vmul.f32 %v3323_v57, %v3223_v40 }
0x49f0   :  { %v3327_v58 = vpop.permute.xlu0 %3326 }
0x49f1   :  { %v3329_v19 = vmul.f32 %v3327_v58, %v3323_v57 }
0x49f3   :  { %3331 = vrot.lane.b32.xlu1 %v3329_v19, %s12408_s14 }
0x4a65   :  { %v3332_v59 = vpop.permute.xlu1 %3331 }
0x4a66   :  { %v3334_v60 = vadd.f32 %v3332_v59, %v3324_v10 }
0x4a68   :  { %12063 = vtanh.f32 %v3334_v60 }
0x4a72   :  { %v12064_v61 = vpop.eup %12063 }
0x4a73   :  { %3337 = vrot.lane.b32.xlu0 %v12064_v61, %s12408_s14 }
0x4ae5   :  { %v3338_v62 = vpop.permute.xlu0 %3337 }
0x4ae6   :  { %v3340_v1 = vmul.f32 %v3338_v62, %v3323_v57 }
0x4ae8   :  { %v3341_v2 = vpack.c.bf16 %v3340_v1, %v3340_v1 }
0x4aea   :  { %3343 = vrot.lane.b32.xlu1 %v3341_v2, %s12395_s29 }
0x4b5c   :  { %v3344_v4 = vpop.permute.xlu1 %3343 }
0x4b5d   :  { %10705 = vmatmul.mubr.msk.bf16.vlgmr.msra.gmra.mrb[76].mxu0 %vm245_vm4, %v3344_v4  ;;  %10713 = vmatmul.mubr.msk.bf16.vlgmr.msra.gmra.mrb[48].mxu1 %vm245_vm4, %v3344_v4 }
0x4b5e   :  { %10725 = vmatpush3.bf16.msra.mxu1 %v13167_v49  ;;  %10717 = vmatpush3.bf16.msra.mxu0 %v13193_v44 }
0x4b5f   :  { %10726 = vmatprep.subr.bf16.mxu1 %v12404_v0  ;;  %10718 = vmatprep.subr.bf16.mxu0 %v12404_v0 }
0x4b60   :  { %10720 = vmatprep.mubr.msk.bf16.mxu0 %vm12405_vm0, %v12404_v0  ;;  %10728 = vmatprep.mubr.msk.bf16.mxu1 %vm12405_vm0, %v12404_v0 }
0x4b62   :  { %10727 = vmatpush3.bf16.msra.mxu1 %v13171_v47  ;;  %10719 = vmatpush3.bf16.msra.mxu0 %v13196_v22 }
0x4b63   :  { %10740 = vmatprep.subr.bf16.mxu1 %v12404_v0  ;;  %10732 = vmatprep.subr.bf16.mxu0 %v12404_v0 }
0x4c30   :  { %v3424_v48 = vpop.f32.mrb[48].mxu1 }
0x4c31   :  { %v11531_v5 = vadd.f32 %v13185_v63, %v3424_v48  ;;  %v10714_v6 = vpop.f32.mrb[49].mxu1 }
0x4c32   :  { %v3427_v15 = vpop.f32.mrb[50].mxu1 }
0x4c33   :  { %v3431_v7 = vmul.f32 %v11531_v5, %v12596_v21  ;;  %v10715_v8 = vpop.f32.mrb[51].mxu1 }
0x4c35   :  { %12065 = vtanh.f32 %v3431_v7 }
0x4c3f   :  { %v12066_v9 = vpop.eup %12065 }
0x4c40   :  { %v3433_v13 = vmul.f32 %v12066_v9, %v12596_v21 }
0x4c42   :  { %v3434_v42 = vadd.f32 %v3433_v13, %v12599_v29 }
0x4c44   :  { %3437 = vrot.lane.b32.xlu0 %v3434_v42, %s12408_s14  ;;  %v3435_v14 = vmul.f32 %v3434_v42, %v3334_v60 }
0x4cb6   :  { %v3438_v50 = vpop.permute.xlu0 %3437 }
0x4cb7   :  { %v3440_v20 = vmul.f32 %v3438_v50, %v3434_v42 }
0x4cb9   :  { %3442 = vrot.lane.b32.xlu1 %v3440_v20, %s12408_s14 }
0x4d2b   :  { %v3443_v51 = vpop.permute.xlu1 %3442 }
0x4d2c   :  { %v3445_v16 = vadd.f32 %v3443_v51, %v3435_v14 }
0x4d2e   :  { %12067 = vtanh.f32 %v3445_v16 }
0x4d38   :  { %v12068_v23 = vpop.eup %12067 }
0x4d39   :  { %3448 = vrot.lane.b32.xlu0 %v12068_v23, %s12408_s14 }
0x4dab   :  { %v3449_v24 = vpop.permute.xlu0 %3448 }
0x4dac   :  { %v3451_v25 = vmul.f32 %v3449_v24, %v3434_v42 }
0x4dae   :  { %v3452_v26 = vpack.c.bf16 %v3451_v25, %v3451_v25 }
0x4db0   :  { %3454 = vrot.lane.b32.xlu1 %v3452_v26, %s12395_s29 }
0x4e22   :  { %v3455_v27 = vpop.permute.xlu1 %3454 }
0x4e23   :  { %10721 = vmatmul.mubr.msk.bf16.vlgmr.msra.gmra.mrb[80].mxu0 %vm245_vm4, %v3455_v27  ;;  %10729 = vmatmul.mubr.msk.bf16.vlgmr.msra.gmra.mrb[52].mxu1 %vm245_vm4, %v3455_v27 }
0x4e24   :  { %10741 = vmatpush3.bf16.msra.mxu1 %v13167_v49  ;;  %10733 = vmatpush3.bf16.msra.mxu0 %v13193_v44 }
0x4e25   :  { %10742 = vmatprep.subr.bf16.mxu1 %v12404_v0  ;;  %10734 = vmatprep.subr.bf16.mxu0 %v12404_v0 }
0x4e26   :  { %10736 = vmatprep.mubr.msk.bf16.mxu0 %vm12405_vm0, %v12404_v0  ;;  %10744 = vmatprep.mubr.msk.bf16.mxu1 %vm12405_vm0, %v12404_v0 }
0x4e28   :  { %10743 = vmatpush3.bf16.msra.mxu1 %v13171_v47  ;;  %10735 = vmatpush3.bf16.msra.mxu0 %v13196_v22 }
0x4e29   :  { %10756 = vmatprep.subr.bf16.mxu1 %v12404_v0  ;;  %10748 = vmatprep.subr.bf16.mxu0 %v12404_v0 }
0x4ef6   :  { %v3535_v30 = vpop.f32.mrb[52].mxu1 }
0x4ef7   :  { %v11532_v32 = vadd.f32 %v13185_v63, %v3535_v30  ;;  %v10730_v17 = vpop.f32.mrb[53].mxu1 }
0x4ef8   :  { %v3538_v33 = vpop.f32.mrb[54].mxu1 }
0x4ef9   :  { %v3542_v36 = vmul.f32 %v11532_v32, %v12596_v21  ;;  %v10731_v37 = vpop.f32.mrb[55].mxu1 }
0x4efb   :  { %12069 = vtanh.f32 %v3542_v36 }
0x4f05   :  { %v12070_v28 = vpop.eup %12069 }
0x4f06   :  { %v3544_v38 = vmul.f32 %v12070_v28, %v12596_v21 }
0x4f08   :  { %v3545_v39 = vadd.f32 %v3544_v38, %v12599_v29 }
0x4f0a   :  { %3548 = vrot.lane.b32.xlu0 %v3545_v39, %s12408_s14  ;;  %v3546_v41 = vmul.f32 %v3545_v39, %v3445_v16 }
0x4f7c   :  { %v3549_v52 = vpop.permute.xlu0 %3548 }
0x4f7d   :  { %v3551_v40 = vmul.f32 %v3549_v52, %v3545_v39 }
0x4f7f   :  { %3553 = vrot.lane.b32.xlu1 %v3551_v40, %s12408_s14 }
0x4ff1   :  { %v3554_v43 = vpop.permute.xlu1 %3553 }
0x4ff2   :  { %v3556_v45 = vadd.f32 %v3554_v43, %v3546_v41 }
0x4ff4   :  { %12071 = vtanh.f32 %v3556_v45 }
0x4ffe   :  { %v12072_v31 = vpop.eup %12071 }
0x4fff   :  { %3559 = vrot.lane.b32.xlu0 %v12072_v31, %s12408_s14 }
0x5071   :  { %v3560_v46 = vpop.permute.xlu0 %3559 }
0x5072   :  { %v3562_v3 = vmul.f32 %v3560_v46, %v3545_v39 }
0x5074   :  { %v3563_v53 = vpack.c.bf16 %v3562_v3, %v3562_v3  ;;  %v13353_v3 = vld [vmem:[#allocation6 + $0x40] sm:$0xff]  }
0x5076   :  { %3565 = vrot.lane.b32.xlu1 %v3563_v53, %s12395_s29 }
0x50e8   :  { %v3566_v34 = vpop.permute.xlu1 %3565 }
0x50e9   :  { %10737 = vmatmul.mubr.msk.bf16.vlgmr.msra.gmra.mrb[84].mxu0 %vm245_vm4, %v3566_v34  ;;  %10745 = vmatmul.mubr.msk.bf16.vlgmr.msra.gmra.mrb[56].mxu1 %vm245_vm4, %v3566_v34  ;;  %v13357_v34 = vld [vmem:[#allocation6 + $0x48] sm:$0xff]  }
0x50ea   :  { %10757 = vmatpush3.bf16.msra.mxu1 %v13167_v49  ;;  %10749 = vmatpush3.bf16.msra.mxu0 %v13193_v44 }
0x50eb   :  { %10758 = vmatprep.subr.bf16.mxu1 %v12404_v0  ;;  %10750 = vmatprep.subr.bf16.mxu0 %v12404_v0 }
0x50ec   :  { %10752 = vmatprep.mubr.msk.bf16.mxu0 %vm12405_vm0, %v12404_v0  ;;  %10760 = vmatprep.mubr.msk.bf16.mxu1 %vm12405_vm0, %v12404_v0 }
0x50ee   :  { %10759 = vmatpush3.bf16.msra.mxu1 %v13171_v47  ;;  %10751 = vmatpush3.bf16.msra.mxu0 %v13196_v22 }
0x50ef   :  { %10772 = vmatprep.subr.bf16.mxu1 %v12404_v0  ;;  %10764 = vmatprep.subr.bf16.mxu0 %v12404_v0 }
0x51bc   :  { %v3646_v54 = vpop.f32.mrb[56].mxu1 }
0x51bd   :  { %v11533_v55 = vadd.f32 %v13185_v63, %v3646_v54  ;;  %v10746_v56 = vpop.f32.mrb[57].mxu1  ;;  %v13371_v54 = vld [vmem:[#allocation8 + $0x4] ss:$0 sm:$0xff] }
0x51be   :  { %v3649_v18 = vpop.f32.mrb[58].mxu1 }
0x51bf   :  { %v3653_v35 = vmul.f32 %v11533_v55, %v12596_v21  ;;  %v10747_v57 = vpop.f32.mrb[59].mxu1 }
0x51c1   :  { %12073 = vtanh.f32 %v3653_v35 }
0x51cb   :  { %v12074_v58 = vpop.eup %12073 }
0x51cc   :  { %v3655_v19 = vmul.f32 %v12074_v58, %v12596_v21 }
0x51ce   :  { %v3656_v10 = vadd.f32 %v3655_v19, %v12599_v29 }
0x51d0   :  { %3659 = vrot.lane.b32.xlu0 %v3656_v10, %s12408_s14  ;;  %v3657_v61 = vmul.f32 %v3656_v10, %v3556_v45 }
0x5242   :  { %v3660_v59 = vpop.permute.xlu0 %3659 }
0x5243   :  { %v3662_v60 = vmul.f32 %v3660_v59, %v3656_v10 }
0x5245   :  { %3664 = vrot.lane.b32.xlu1 %v3662_v60, %s12408_s14 }
0x52b7   :  { %v3665_v62 = vpop.permute.xlu1 %3664 }
0x52b8   :  { %v3667_v1 = vadd.f32 %v3665_v62, %v3657_v61 }
0x52ba   :  { %12075 = vtanh.f32 %v3667_v1 }
0x52c4   :  { %v12076_v2 = vpop.eup %12075 }
0x52c5   :  { %3670 = vrot.lane.b32.xlu0 %v12076_v2, %s12408_s14 }
0x5337   :  { %v3671_v4 = vpop.permute.xlu0 %3670 }
0x5338   :  { %v3673_v48 = vmul.f32 %v3671_v4, %v3656_v10  ;;  %v13379_v4 = vld [vmem:[#allocation4 + $0x40] sm:$0xff]  }
0x533a   :  { %v3674_v5 = vpack.c.bf16 %v3673_v48, %v3673_v48  ;;  %v13382_v48 = vld [vmem:[#allocation4 + $0x48] sm:$0xff]  }
0x533c   :  { %3676 = vrot.lane.b32.xlu1 %v3674_v5, %s12395_s29 }
0x53ae   :  { %v3677_v6 = vpop.permute.xlu1 %3676 }
0x53af   :  { %10753 = vmatmul.mubr.msk.bf16.vlgmr.msra.gmra.mrb[88].mxu0 %vm245_vm4, %v3677_v6  ;;  %10761 = vmatmul.mubr.msk.bf16.vlgmr.msra.gmra.mrb[60].mxu1 %vm245_vm4, %v3677_v6 }
0x53b0   :  { %10773 = vmatpush3.bf16.msra.mxu1 %v13167_v49  ;;  %10765 = vmatpush3.bf16.msra.mxu0 %v13193_v44 }
0x53b1   :  { %10774 = vmatprep.subr.bf16.mxu1 %v12404_v0  ;;  %10766 = vmatprep.subr.bf16.mxu0 %v12404_v0 }
0x53b2   :  { %10768 = vmatprep.mubr.msk.bf16.mxu0 %vm12405_vm0, %v12404_v0  ;;  %10776 = vmatprep.mubr.msk.bf16.mxu1 %vm12405_vm0, %v12404_v0 }
0x53b4   :  { %10775 = vmatpush3.bf16.msra.mxu1 %v13171_v47  ;;  %10767 = vmatpush3.bf16.msra.mxu0 %v13196_v22 }
0x53b5   :  { %10780 = vmatprep.subr.bf16.mxu0 %v12404_v0  ;;  %10796 = vmatprep.subr.bf16.mxu1 %v12404_v0 }
0x5482   :  { %v3757_v49 = vpop.f32.mrb[60].mxu1 }
0x5483   :  { %v11534_v15 = vadd.f32 %v13185_v63, %v3757_v49  ;;  %v10762_v7 = vpop.f32.mrb[61].mxu1 }
0x5484   :  { %v3760_v8 = vpop.f32.mrb[62].mxu1 }
0x5485   :  { %v3764_v9 = vmul.f32 %v11534_v15, %v12596_v21  ;;  %v10763_v13 = vpop.f32.mrb[63].mxu1 }
0x5487   :  { %12077 = vtanh.f32 %v3764_v9 }
0x5491   :  { %v12078_v42 = vpop.eup %12077 }
0x5492   :  { %v3766_v50 = vmul.f32 %v12078_v42, %v12596_v21 }
0x5494   :  { %v3767_v47 = vadd.f32 %v3766_v50, %v12599_v29 }
0x5496   :  { %3770 = vrot.lane.b32.xlu0 %v3767_v47, %s12408_s14  ;;  %v3768_v51 = vmul.f32 %v3767_v47, %v3667_v1 }
0x5508   :  { %v3771_v20 = vpop.permute.xlu0 %3770 }
0x5509   :  { %v3773_v14 = vmul.f32 %v3771_v20, %v3767_v47 }
0x550b   :  { %3775 = vrot.lane.b32.xlu1 %v3773_v14, %s12408_s14 }
0x557d   :  { %v3776_v16 = vpop.permute.xlu1 %3775 }
0x557e   :  { %v3778_v23 = vadd.f32 %v3776_v16, %v3768_v51 }
0x5580   :  { %12079 = vtanh.f32 %v3778_v23 }
0x558a   :  { %v12080_v24 = vpop.eup %12079 }
0x558b   :  { %3781 = vrot.lane.b32.xlu0 %v12080_v24, %s12408_s14 }
0x55fd   :  { %v3782_v25 = vpop.permute.xlu0 %3781 }
0x55fe   :  { %v3784_v26 = vmul.f32 %v3782_v25, %v3767_v47 }
0x5600   :  { %v3785_v27 = vpack.c.bf16 %v3784_v26, %v3784_v26 }
0x5602   :  { %3787 = vrot.lane.b32.xlu1 %v3785_v27, %s12395_s29 }
0x5674   :  { %v3788_v30 = vpop.permute.xlu1 %3787 }
0x5675   :  { %10769 = vmatmul.mubr.msk.bf16.vlgmr.msra.gmra.mrb[92].mxu0 %vm245_vm4, %v3788_v30  ;;  %10777 = vmatmul.mubr.msk.bf16.vlgmr.msra.gmra.mrb[64].mxu1 %vm245_vm4, %v3788_v30 }
0x5676   :  { %10781 = vmatpush3.bf16.msra.mxu0 %v13193_v44  ;;  %10784 = vmatprep.mubr.msk.bf16.mxu0 %vm12405_vm0, %v12404_v0 }
0x5677   :  { %10782 = vmatprep.subr.bf16.mxu0 %v12404_v0  ;;  %10800 = vmatprep.mubr.msk.bf16.mxu1 %vm12405_vm0, %v12404_v0 }
0x5678   :  { %10797 = vmatpush3.bf16.msra.mxu1 %v13379_v4 }
0x5679   :  { %10798 = vmatprep.subr.bf16.mxu1 %v12404_v0 }
0x567a   :  { %10783 = vmatpush3.bf16.msra.mxu0 %v13196_v22 }
0x567b   :  { %10788 = vmatprep.subr.bf16.mxu0 %v12404_v0 }
0x567c   :  { %10799 = vmatpush3.bf16.msra.mxu1 %v13382_v48 }
0x567d   :  { %10812 = vmatprep.subr.bf16.mxu1 %v12404_v0 }
0x5748   :  { %v3868_v32 = vpop.f32.mrb[64].mxu1 }
0x5749   :  { %v11535_v17 = vadd.f32 %v13185_v63, %v3868_v32  ;;  %v10778_v33 = vpop.f32.mrb[65].mxu1 }
0x574a   :  { %v3871_v36 = vpop.f32.mrb[66].mxu1 }
0x574b   :  { %v3875_v37 = vmul.f32 %v11535_v17, %v12596_v21  ;;  %v10779_v44 = vpop.f32.mrb[67].mxu1 }
0x574d   :  { %12081 = vtanh.f32 %v3875_v37 }
0x5757   :  { %v12082_v28 = vpop.eup %12081 }
0x5758   :  { %v3877_v38 = vmul.f32 %v12082_v28, %v12596_v21 }
0x575a   :  { %v3878_v39 = vadd.f32 %v3877_v38, %v12599_v29 }
0x575c   :  { %3881 = vrot.lane.b32.xlu0 %v3878_v39, %s12408_s14  ;;  %v3879_v40 = vmul.f32 %v3878_v39, %v3778_v23 }
0x57ce   :  { %v3882_v52 = vpop.permute.xlu0 %3881 }
0x57cf   :  { %v3884_v22 = vmul.f32 %v3882_v52, %v3878_v39 }
0x57d1   :  { %3886 = vrot.lane.b32.xlu1 %v3884_v22, %s12408_s14 }
0x5843   :  { %v3887_v41 = vpop.permute.xlu1 %3886 }
0x5844   :  { %v3889_v63 = vadd.f32 %v3887_v41, %v3879_v40 }
0x5846   :  { %12083 = vtanh.f32 %v3889_v63 }
0x5850   :  { %v12084_v43 = vpop.eup %12083 }
0x5851   :  { %3892 = vrot.lane.b32.xlu0 %v12084_v43, %s12408_s14 }
0x58c3   :  { %v3893_v45 = vpop.permute.xlu0 %3892 }
0x58c4   :  { %v3895_v31 = vmul.f32 %v3893_v45, %v3878_v39 }
0x58c6   :  { %v3896_v46 = vpack.c.bf16 %v3895_v31, %v3895_v31 }
0x58c8   :  { %3898 = vrot.lane.b32.xlu1 %v3896_v46, %s12395_s29 }
0x593a   :  { %v3899_v53 = vpop.permute.xlu1 %3898 }
0x593b   :  { %10785 = vmatmul.mubr.msk.bf16.vlgmr.msra.gmra.mrb[96].mxu0 %vm245_vm4, %v3899_v53 }
0x593c   :  { %10789 = vmatpush3.bf16.msra.mxu0 %v13353_v3  ;;  %10792 = vmatprep.mubr.msk.bf16.mxu0 %vm12405_vm0, %v12404_v0 }
0x593d   :  { %10790 = vmatprep.subr.bf16.mxu0 %v12404_v0 }
0x5940   :  { %10791 = vmatpush3.bf16.msra.mxu0 %v13357_v34 }
0x5941   :  { %10804 = vmatprep.subr.bf16.mxu0 %v12404_v0 }
0x5943   :  { %10793 = vmatmul.mubr.bf16.vlgmr.msra.gmra.mrb[68].mxu0 %v12406_v11 }
0x5944   :  { %10805 = vmatpush3.bf16.msra.mxu0 %v13353_v3  ;;  %10808 = vmatprep.mubr.msk.bf16.mxu0 %vm12405_vm0, %v12404_v0 }
0x5945   :  { %10806 = vmatprep.subr.bf16.mxu0 %v12404_v0 }
0x5948   :  { %10807 = vmatpush3.bf16.msra.mxu0 %v13357_v34 }
0x5949   :  { %10820 = vmatprep.subr.bf16.mxu0 %v12404_v0 }
0x5a16   :  { %v4003_v55 = vpop.f32.mrb[68].mxu0 }
0x5a17   :  { %v11536_v56 = vadd.f32 %v13371_v54, %v4003_v55  ;;  %v10794_v18 = vpop.f32.mrb[69].mxu0 }
0x5a18   :  { %v4006_v35 = vpop.f32.mrb[70].mxu0 }
0x5a19   :  { %v4010_v57 = vmul.f32 %v11536_v56, %v12596_v21  ;;  %v10795_v58 = vpop.f32.mrb[71].mxu0 }
0x5a1b   :  { %12085 = vtanh.f32 %v4010_v57 }
0x5a25   :  { %v12086_v19 = vpop.eup %12085 }
0x5a26   :  { %v4012_v10 = vmul.f32 %v12086_v19, %v12596_v21 }
0x5a28   :  { %v4013_v59 = vadd.f32 %v4012_v10, %v12599_v29 }
0x5a2a   :  { %4016 = vrot.lane.b32.xlu0 %v4013_v59, %s12408_s14  ;;  %v4014_v62 = vmul.f32 0.0, %v4013_v59 }
0x5a9c   :  { %v4017_v60 = vpop.permute.xlu0 %4016 }
0x5a9d   :  { %v4019_v61 = vmul.f32 %v4017_v60, %v4013_v59 }
0x5a9f   :  { %4021 = vrot.lane.b32.xlu1 %v4019_v61, %s12408_s14 }
0x5b11   :  { %v4022_v1 = vpop.permute.xlu1 %4021 }
0x5b12   :  { %v4024_v2 = vadd.f32 %v4022_v1, %v4014_v62 }
0x5b14   :  { %12087 = vtanh.f32 %v4024_v2 }
0x5b1e   :  { %v12088_v5 = vpop.eup %12087 }
0x5b1f   :  { %4027 = vrot.lane.b32.xlu0 %v12088_v5, %s12408_s14 }
0x5b91   :  { %v4028_v6 = vpop.permute.xlu0 %4027 }
0x5b92   :  { %v4030_v49 = vmul.f32 %v4028_v6, %v4013_v59 }
0x5b94   :  { %v4031_v15 = vpack.c.bf16 %v4030_v49, %v4030_v49 }
0x5b96   :  { %4039 = vrot.lane.b32.xlu1 %v4031_v15, %s12395_s29 }
0x5c08   :  { %v4040_v7 = vpop.permute.xlu1 %4039 }
0x5c09   :  { %10801 = vmatmul.mubr.msk.bf16.vlgmr.msra.gmra.mrb[68].mxu1 %vm245_vm4, %v4040_v7  ;;  %10809 = vmatmul.mubr.msk.bf16.vlgmr.msra.gmra.mrb[72].mxu0 %vm245_vm4, %v4040_v7 }
0x5c0a   :  { %10821 = vmatpush3.bf16.msra.mxu0 %v13353_v3  ;;  %10813 = vmatpush3.bf16.msra.mxu1 %v13379_v4 }
0x5c0b   :  { %10822 = vmatprep.subr.bf16.mxu0 %v12404_v0  ;;  %10814 = vmatprep.subr.bf16.mxu1 %v12404_v0 }
0x5c0c   :  { %10816 = vmatprep.mubr.msk.bf16.mxu1 %vm12405_vm0, %v12404_v0  ;;  %10824 = vmatprep.mubr.msk.bf16.mxu0 %vm12405_vm0, %v12404_v0 }
0x5c0e   :  { %10823 = vmatpush3.bf16.msra.mxu0 %v13357_v34  ;;  %10815 = vmatpush3.bf16.msra.mxu1 %v13382_v48 }
0x5c0f   :  { %10836 = vmatprep.subr.bf16.mxu0 %v12404_v0  ;;  %10828 = vmatprep.subr.bf16.mxu1 %v12404_v0 }
0x5cdc   :  { %v4132_v8 = vpop.f32.mrb[72].mxu0 }
0x5cdd   :  { %v11537_v9 = vadd.f32 %v13371_v54, %v4132_v8  ;;  %v10810_v13 = vpop.f32.mrb[73].mxu0 }
0x5cde   :  { %v4135_v42 = vpop.f32.mrb[74].mxu0 }
0x5cdf   :  { %v4139_v50 = vmul.f32 %v11537_v9, %v12596_v21  ;;  %v10811_v47 = vpop.f32.mrb[75].mxu0 }
0x5ce1   :  { %12089 = vtanh.f32 %v4139_v50 }
0x5ceb   :  { %v12090_v20 = vpop.eup %12089 }
0x5cec   :  { %v4141_v14 = vmul.f32 %v12090_v20, %v12596_v21 }
0x5cee   :  { %v4142_v51 = vadd.f32 %v4141_v14, %v12599_v29 }
0x5cf0   :  { %4145 = vrot.lane.b32.xlu0 %v4142_v51, %s12408_s14  ;;  %v4143_v24 = vmul.f32 %v4142_v51, %v4024_v2 }
0x5d62   :  { %v4146_v16 = vpop.permute.xlu0 %4145 }
0x5d63   :  { %v4148_v23 = vmul.f32 %v4146_v16, %v4142_v51 }
0x5d65   :  { %4150 = vrot.lane.b32.xlu1 %v4148_v23, %s12408_s14 }
0x5dd7   :  { %v4151_v25 = vpop.permute.xlu1 %4150 }
0x5dd8   :  { %v4153_v26 = vadd.f32 %v4151_v25, %v4143_v24 }
0x5dda   :  { %12091 = vtanh.f32 %v4153_v26 }
0x5de4   :  { %v12092_v27 = vpop.eup %12091 }
0x5de5   :  { %4156 = vrot.lane.b32.xlu0 %v12092_v27, %s12408_s14 }
0x5e57   :  { %v4157_v30 = vpop.permute.xlu0 %4156 }
0x5e58   :  { %v4159_v32 = vmul.f32 %v4157_v30, %v4142_v51 }
0x5e5a   :  { %v4160_v17 = vpack.c.bf16 %v4159_v32, %v4159_v32 }
0x5e5c   :  { %4162 = vrot.lane.b32.xlu1 %v4160_v17, %s12395_s29 }
0x5ece   :  { %v4163_v33 = vpop.permute.xlu1 %4162 }
0x5ecf   :  { %10817 = vmatmul.mubr.msk.bf16.vlgmr.msra.gmra.mrb[72].mxu1 %vm245_vm4, %v4163_v33  ;;  %10825 = vmatmul.mubr.msk.bf16.vlgmr.msra.gmra.mrb[76].mxu0 %vm245_vm4, %v4163_v33 }
0x5ed0   :  { %10837 = vmatpush3.bf16.msra.mxu0 %v13353_v3  ;;  %10829 = vmatpush3.bf16.msra.mxu1 %v13379_v4 }
0x5ed1   :  { %10838 = vmatprep.subr.bf16.mxu0 %v12404_v0  ;;  %10830 = vmatprep.subr.bf16.mxu1 %v12404_v0 }
0x5ed2   :  { %10832 = vmatprep.mubr.msk.bf16.mxu1 %vm12405_vm0, %v12404_v0  ;;  %10840 = vmatprep.mubr.msk.bf16.mxu0 %vm12405_vm0, %v12404_v0 }
0x5ed4   :  { %10839 = vmatpush3.bf16.msra.mxu0 %v13357_v34  ;;  %10831 = vmatpush3.bf16.msra.mxu1 %v13382_v48 }
0x5ed5   :  { %10852 = vmatprep.subr.bf16.mxu0 %v12404_v0  ;;  %10844 = vmatprep.subr.bf16.mxu1 %v12404_v0 }
0x5fa2   :  { %v4243_v36 = vpop.f32.mrb[76].mxu0 }
0x5fa3   :  { %v11538_v37 = vadd.f32 %v13371_v54, %v4243_v36  ;;  %v10826_v44 = vpop.f32.mrb[77].mxu0 }
0x5fa4   :  { %v4246_v28 = vpop.f32.mrb[78].mxu0 }
0x5fa5   :  { %v4250_v38 = vmul.f32 %v11538_v37, %v12596_v21  ;;  %v10827_v39 = vpop.f32.mrb[79].mxu0 }
0x5fa7   :  { %12093 = vtanh.f32 %v4250_v38 }
0x5fb1   :  { %v12094_v52 = vpop.eup %12093 }
0x5fb2   :  { %v4252_v22 = vmul.f32 %v12094_v52, %v12596_v21 }
0x5fb4   :  { %v4253_v40 = vadd.f32 %v4252_v22, %v12599_v29 }
0x5fb6   :  { %4256 = vrot.lane.b32.xlu0 %v4253_v40, %s12408_s14  ;;  %v4254_v43 = vmul.f32 %v4253_v40, %v4153_v26 }
0x6028   :  { %v4257_v41 = vpop.permute.xlu0 %4256 }
0x6029   :  { %v4259_v63 = vmul.f32 %v4257_v41, %v4253_v40 }
0x602b   :  { %4261 = vrot.lane.b32.xlu1 %v4259_v63, %s12408_s14 }
0x609d   :  { %v4262_v45 = vpop.permute.xlu1 %4261 }
0x609e   :  { %v4264_v31 = vadd.f32 %v4262_v45, %v4254_v43 }
0x60a0   :  { %12095 = vtanh.f32 %v4264_v31 }
0x60aa   :  { %v12096_v46 = vpop.eup %12095 }
0x60ab   :  { %4267 = vrot.lane.b32.xlu0 %v12096_v46, %s12408_s14 }
0x611d   :  { %v4268_v53 = vpop.permute.xlu0 %4267 }
0x611e   :  { %v4270_v55 = vmul.f32 %v4268_v53, %v4253_v40 }
0x6120   :  { %v4271_v56 = vpack.c.bf16 %v4270_v55, %v4270_v55 }
0x6122   :  { %4273 = vrot.lane.b32.xlu1 %v4271_v56, %s12395_s29 }
0x6194   :  { %v4274_v18 = vpop.permute.xlu1 %4273 }
0x6195   :  { %10833 = vmatmul.mubr.msk.bf16.vlgmr.msra.gmra.mrb[76].mxu1 %vm245_vm4, %v4274_v18  ;;  %10841 = vmatmul.mubr.msk.bf16.vlgmr.msra.gmra.mrb[80].mxu0 %vm245_vm4, %v4274_v18 }
0x6196   :  { %10853 = vmatpush3.bf16.msra.mxu0 %v13353_v3  ;;  %10845 = vmatpush3.bf16.msra.mxu1 %v13379_v4 }
0x6197   :  { %10854 = vmatprep.subr.bf16.mxu0 %v12404_v0  ;;  %10846 = vmatprep.subr.bf16.mxu1 %v12404_v0 }
0x6198   :  { %10848 = vmatprep.mubr.msk.bf16.mxu1 %vm12405_vm0, %v12404_v0  ;;  %10856 = vmatprep.mubr.msk.bf16.mxu0 %vm12405_vm0, %v12404_v0 }
0x619a   :  { %10855 = vmatpush3.bf16.msra.mxu0 %v13357_v34  ;;  %10847 = vmatpush3.bf16.msra.mxu1 %v13382_v48 }
0x619b   :  { %10868 = vmatprep.subr.bf16.mxu0 %v12404_v0  ;;  %10860 = vmatprep.subr.bf16.mxu1 %v12404_v0 }
0x6268   :  { %v4354_v35 = vpop.f32.mrb[80].mxu0 }
0x6269   :  { %v11539_v57 = vadd.f32 %v13371_v54, %v4354_v35  ;;  %v10842_v58 = vpop.f32.mrb[81].mxu0 }
0x626a   :  { %v4357_v19 = vpop.f32.mrb[82].mxu0 }
0x626b   :  { %v4361_v10 = vmul.f32 %v11539_v57, %v12596_v21  ;;  %v10843_v59 = vpop.f32.mrb[83].mxu0 }
0x626d   :  { %12097 = vtanh.f32 %v4361_v10 }
0x6277   :  { %v12098_v60 = vpop.eup %12097 }
0x6278   :  { %v4363_v61 = vmul.f32 %v12098_v60, %v12596_v21 }
0x627a   :  { %v4364_v62 = vadd.f32 %v4363_v61, %v12599_v29 }
0x627c   :  { %4367 = vrot.lane.b32.xlu0 %v4364_v62, %s12408_s14  ;;  %v4365_v5 = vmul.f32 %v4364_v62, %v4264_v31 }
0x62ee   :  { %v4368_v1 = vpop.permute.xlu0 %4367 }
0x62ef   :  { %v4370_v2 = vmul.f32 %v4368_v1, %v4364_v62 }
0x62f1   :  { %4372 = vrot.lane.b32.xlu1 %v4370_v2, %s12408_s14 }
0x6363   :  { %v4373_v6 = vpop.permute.xlu1 %4372 }
0x6364   :  { %v4375_v49 = vadd.f32 %v4373_v6, %v4365_v5 }
0x6366   :  { %12099 = vtanh.f32 %v4375_v49 }
0x6370   :  { %v12100_v15 = vpop.eup %12099 }
0x6371   :  { %4378 = vrot.lane.b32.xlu0 %v12100_v15, %s12408_s14 }
0x63e3   :  { %v4379_v7 = vpop.permute.xlu0 %4378 }
0x63e4   :  { %v4381_v8 = vmul.f32 %v4379_v7, %v4364_v62 }
0x63e6   :  { %v4382_v9 = vpack.c.bf16 %v4381_v8, %v4381_v8 }
0x63e8   :  { %4384 = vrot.lane.b32.xlu1 %v4382_v9, %s12395_s29 }
0x645a   :  { %v4385_v13 = vpop.permute.xlu1 %4384 }
0x645b   :  { %10849 = vmatmul.mubr.msk.bf16.vlgmr.msra.gmra.mrb[80].mxu1 %vm245_vm4, %v4385_v13  ;;  %10857 = vmatmul.mubr.msk.bf16.vlgmr.msra.gmra.mrb[84].mxu0 %vm245_vm4, %v4385_v13 }
0x645c   :  { %10869 = vmatpush3.bf16.msra.mxu0 %v13353_v3  ;;  %10861 = vmatpush3.bf16.msra.mxu1 %v13379_v4 }
0x645d   :  { %10870 = vmatprep.subr.bf16.mxu0 %v12404_v0  ;;  %10862 = vmatprep.subr.bf16.mxu1 %v12404_v0 }
0x645e   :  { %10864 = vmatprep.mubr.msk.bf16.mxu1 %vm12405_vm0, %v12404_v0  ;;  %10872 = vmatprep.mubr.msk.bf16.mxu0 %vm12405_vm0, %v12404_v0 }
0x6460   :  { %10871 = vmatpush3.bf16.msra.mxu0 %v13357_v34  ;;  %10863 = vmatpush3.bf16.msra.mxu1 %v13382_v48 }
0x6461   :  { %10884 = vmatprep.subr.bf16.mxu0 %v12404_v0  ;;  %10876 = vmatprep.subr.bf16.mxu1 %v12404_v0 }
0x652e   :  { %v4465_v42 = vpop.f32.mrb[84].mxu0 }
0x652f   :  { %v11540_v50 = vadd.f32 %v13371_v54, %v4465_v42  ;;  %v10858_v47 = vpop.f32.mrb[85].mxu0 }
0x6530   :  { %v4468_v20 = vpop.f32.mrb[86].mxu0 }
0x6531   :  { %v4472_v14 = vmul.f32 %v11540_v50, %v12596_v21  ;;  %v10859_v51 = vpop.f32.mrb[87].mxu0 }
0x6533   :  { %12101 = vtanh.f32 %v4472_v14 }
0x653d   :  { %v12102_v16 = vpop.eup %12101 }
0x653e   :  { %v4474_v23 = vmul.f32 %v12102_v16, %v12596_v21 }
0x6540   :  { %v4475_v24 = vadd.f32 %v4474_v23, %v12599_v29 }
0x6542   :  { %4478 = vrot.lane.b32.xlu0 %v4475_v24, %s12408_s14  ;;  %v4476_v27 = vmul.f32 %v4475_v24, %v4375_v49 }
0x65b4   :  { %v4479_v25 = vpop.permute.xlu0 %4478 }
0x65b5   :  { %v4481_v26 = vmul.f32 %v4479_v25, %v4475_v24 }
0x65b7   :  { %4483 = vrot.lane.b32.xlu1 %v4481_v26, %s12408_s14 }
0x6629   :  { %v4484_v30 = vpop.permute.xlu1 %4483 }
0x662a   :  { %v4486_v32 = vadd.f32 %v4484_v30, %v4476_v27 }
0x662c   :  { %12103 = vtanh.f32 %v4486_v32 }
0x6636   :  { %v12104_v17 = vpop.eup %12103 }
0x6637   :  { %4489 = vrot.lane.b32.xlu0 %v12104_v17, %s12408_s14 }
0x66a9   :  { %v4490_v33 = vpop.permute.xlu0 %4489 }
0x66aa   :  { %v4492_v36 = vmul.f32 %v4490_v33, %v4475_v24 }
0x66ac   :  { %v4493_v37 = vpack.c.bf16 %v4492_v36, %v4492_v36  ;;  %v13539_v36 = vld [vmem:[#allocation6 + $0x50] sm:$0xff]  }
0x66ae   :  { %4495 = vrot.lane.b32.xlu1 %v4493_v37, %s12395_s29 }
0x6720   :  { %v4496_v44 = vpop.permute.xlu1 %4495 }
0x6721   :  { %10865 = vmatmul.mubr.msk.bf16.vlgmr.msra.gmra.mrb[84].mxu1 %vm245_vm4, %v4496_v44  ;;  %10873 = vmatmul.mubr.msk.bf16.vlgmr.msra.gmra.mrb[88].mxu0 %vm245_vm4, %v4496_v44  ;;  %v13543_v44 = vld [vmem:[#allocation6 + $0x58] sm:$0xff]  }
0x6722   :  { %10885 = vmatpush3.bf16.msra.mxu0 %v13353_v3  ;;  %10877 = vmatpush3.bf16.msra.mxu1 %v13379_v4 }
0x6723   :  { %10886 = vmatprep.subr.bf16.mxu0 %v12404_v0  ;;  %10878 = vmatprep.subr.bf16.mxu1 %v12404_v0 }
0x6724   :  { %10880 = vmatprep.mubr.msk.bf16.mxu1 %vm12405_vm0, %v12404_v0  ;;  %10888 = vmatprep.mubr.msk.bf16.mxu0 %vm12405_vm0, %v12404_v0 }
0x6726   :  { %10887 = vmatpush3.bf16.msra.mxu0 %v13357_v34  ;;  %10879 = vmatpush3.bf16.msra.mxu1 %v13382_v48 }
0x6727   :  { %10900 = vmatprep.subr.bf16.mxu0 %v12404_v0  ;;  %10892 = vmatprep.subr.bf16.mxu1 %v12404_v0 }
0x67f4   :  { %v4576_v28 = vpop.f32.mrb[88].mxu0 }
0x67f5   :  { %v11541_v38 = vadd.f32 %v13371_v54, %v4576_v28  ;;  %v10874_v39 = vpop.f32.mrb[89].mxu0  ;;  %v13557_v28 = vld [vmem:[#allocation8 + $0x5] ss:$0 sm:$0xff] }
0x67f6   :  { %v4579_v52 = vpop.f32.mrb[90].mxu0 }
0x67f7   :  { %v4583_v22 = vmul.f32 %v11541_v38, %v12596_v21  ;;  %v10875_v40 = vpop.f32.mrb[91].mxu0 }
0x67f9   :  { %12105 = vtanh.f32 %v4583_v22 }
0x6803   :  { %v12106_v41 = vpop.eup %12105 }
0x6804   :  { %v4585_v63 = vmul.f32 %v12106_v41, %v12596_v21 }
0x6806   :  { %v4586_v43 = vadd.f32 %v4585_v63, %v12599_v29 }
0x6808   :  { %4589 = vrot.lane.b32.xlu0 %v4586_v43, %s12408_s14  ;;  %v4587_v46 = vmul.f32 %v4586_v43, %v4486_v32 }
0x687a   :  { %v4590_v45 = vpop.permute.xlu0 %4589 }
0x687b   :  { %v4592_v31 = vmul.f32 %v4590_v45, %v4586_v43 }
0x687d   :  { %4594 = vrot.lane.b32.xlu1 %v4592_v31, %s12408_s14 }
0x68ef   :  { %v4595_v53 = vpop.permute.xlu1 %4594 }
0x68f0   :  { %v4597_v55 = vadd.f32 %v4595_v53, %v4587_v46 }
0x68f2   :  { %12107 = vtanh.f32 %v4597_v55 }
0x68fc   :  { %v12108_v56 = vpop.eup %12107 }
0x68fd   :  { %4600 = vrot.lane.b32.xlu0 %v12108_v56, %s12408_s14 }
0x696f   :  { %v4601_v18 = vpop.permute.xlu0 %4600 }
0x6970   :  { %v4603_v35 = vmul.f32 %v4601_v18, %v4586_v43  ;;  %v13565_v18 = vld [vmem:[#allocation4 + $0x50] sm:$0xff]  }
0x6972   :  { %v4604_v57 = vpack.c.bf16 %v4603_v35, %v4603_v35  ;;  %v13568_v35 = vld [vmem:[#allocation4 + $0x58] sm:$0xff]  }
0x6974   :  { %4606 = vrot.lane.b32.xlu1 %v4604_v57, %s12395_s29 }
0x69e6   :  { %v4607_v58 = vpop.permute.xlu1 %4606 }
0x69e7   :  { %10881 = vmatmul.mubr.msk.bf16.vlgmr.msra.gmra.mrb[88].mxu1 %vm245_vm4, %v4607_v58  ;;  %10889 = vmatmul.mubr.msk.bf16.vlgmr.msra.gmra.mrb[92].mxu0 %vm245_vm4, %v4607_v58 }
0x69e8   :  { %10901 = vmatpush3.bf16.msra.mxu0 %v13353_v3  ;;  %10893 = vmatpush3.bf16.msra.mxu1 %v13379_v4 }
0x69e9   :  { %10902 = vmatprep.subr.bf16.mxu0 %v12404_v0  ;;  %10894 = vmatprep.subr.bf16.mxu1 %v12404_v0 }
0x69ea   :  { %10896 = vmatprep.mubr.msk.bf16.mxu1 %vm12405_vm0, %v12404_v0  ;;  %10904 = vmatprep.mubr.msk.bf16.mxu0 %vm12405_vm0, %v12404_v0 }
0x69ec   :  { %10903 = vmatpush3.bf16.msra.mxu0 %v13357_v34  ;;  %10895 = vmatpush3.bf16.msra.mxu1 %v13382_v48 }
0x69ed   :  { %10908 = vmatprep.subr.bf16.mxu1 %v12404_v0  ;;  %10924 = vmatprep.subr.bf16.mxu0 %v12404_v0 }
0x6aba   :  { %v4687_v3 = vpop.f32.mrb[92].mxu0 }
0x6abb   :  { %v11542_v19 = vadd.f32 %v13371_v54, %v4687_v3  ;;  %v10890_v10 = vpop.f32.mrb[93].mxu0 }
0x6abc   :  { %v4690_v59 = vpop.f32.mrb[94].mxu0 }
0x6abd   :  { %v4694_v60 = vmul.f32 %v11542_v19, %v12596_v21  ;;  %v10891_v61 = vpop.f32.mrb[95].mxu0 }
0x6abf   :  { %12109 = vtanh.f32 %v4694_v60 }
0x6ac9   :  { %v12110_v62 = vpop.eup %12109 }
0x6aca   :  { %v4696_v1 = vmul.f32 %v12110_v62, %v12596_v21 }
0x6acc   :  { %v4697_v34 = vadd.f32 %v4696_v1, %v12599_v29 }
0x6ace   :  { %4700 = vrot.lane.b32.xlu0 %v4697_v34, %s12408_s14  ;;  %v4698_v6 = vmul.f32 %v4697_v34, %v4597_v55 }
0x6b40   :  { %v4701_v2 = vpop.permute.xlu0 %4700 }
0x6b41   :  { %v4703_v5 = vmul.f32 %v4701_v2, %v4697_v34 }
0x6b43   :  { %4705 = vrot.lane.b32.xlu1 %v4703_v5, %s12408_s14 }
0x6bb5   :  { %v4706_v49 = vpop.permute.xlu1 %4705 }
0x6bb6   :  { %v4708_v15 = vadd.f32 %v4706_v49, %v4698_v6 }
0x6bb8   :  { %12111 = vtanh.f32 %v4708_v15 }
0x6bc2   :  { %v12112_v7 = vpop.eup %12111 }
0x6bc3   :  { %4711 = vrot.lane.b32.xlu0 %v12112_v7, %s12408_s14 }
0x6c35   :  { %v4712_v8 = vpop.permute.xlu0 %4711 }
0x6c36   :  { %v4714_v9 = vmul.f32 %v4712_v8, %v4697_v34 }
0x6c38   :  { %v4715_v13 = vpack.c.bf16 %v4714_v9, %v4714_v9 }
0x6c3a   :  { %4717 = vrot.lane.b32.xlu1 %v4715_v13, %s12395_s29 }
0x6cac   :  { %v4718_v42 = vpop.permute.xlu1 %4717 }
0x6cad   :  { %10897 = vmatmul.mubr.msk.bf16.vlgmr.msra.gmra.mrb[92].mxu1 %vm245_vm4, %v4718_v42  ;;  %10905 = vmatmul.mubr.msk.bf16.vlgmr.msra.gmra.mrb[96].mxu0 %vm245_vm4, %v4718_v42 }
0x6cae   :  { %10909 = vmatpush3.bf16.msra.mxu1 %v13379_v4  ;;  %10912 = vmatprep.mubr.msk.bf16.mxu1 %vm12405_vm0, %v12404_v0 }
0x6caf   :  { %10910 = vmatprep.subr.bf16.mxu1 %v12404_v0  ;;  %10928 = vmatprep.mubr.msk.bf16.mxu0 %vm12405_vm0, %v12404_v0 }
0x6cb0   :  { %10925 = vmatpush3.bf16.msra.mxu0 %v13565_v18 }
0x6cb1   :  { %10926 = vmatprep.subr.bf16.mxu0 %v12404_v0 }
0x6cb2   :  { %10911 = vmatpush3.bf16.msra.mxu1 %v13382_v48 }
0x6cb3   :  { %10916 = vmatprep.subr.bf16.mxu1 %v12404_v0 }
0x6cb4   :  { %10927 = vmatpush3.bf16.msra.mxu0 %v13568_v35 }
0x6cb5   :  { %10940 = vmatprep.subr.bf16.mxu0 %v12404_v0 }
0x6d80   :  { %v4798_v50 = vpop.f32.mrb[96].mxu0 }
0x6d81   :  { %v11543_v47 = vadd.f32 %v13371_v54, %v4798_v50  ;;  %v10906_v20 = vpop.f32.mrb[97].mxu0 }
0x6d82   :  { %v4801_v14 = vpop.f32.mrb[98].mxu0 }
0x6d83   :  { %v4805_v51 = vmul.f32 %v11543_v47, %v12596_v21  ;;  %v10907_v4 = vpop.f32.mrb[99].mxu0 }
0x6d85   :  { %12113 = vtanh.f32 %v4805_v51 }
0x6d8f   :  { %v12114_v16 = vpop.eup %12113 }
0x6d90   :  { %v4807_v23 = vmul.f32 %v12114_v16, %v12596_v21 }
0x6d92   :  { %v4808_v24 = vadd.f32 %v4807_v23, %v12599_v29 }
0x6d94   :  { %4811 = vrot.lane.b32.xlu0 %v4808_v24, %s12408_s14  ;;  %v4809_v26 = vmul.f32 %v4808_v24, %v4708_v15 }
0x6e06   :  { %v4812_v25 = vpop.permute.xlu0 %4811 }
0x6e07   :  { %v4814_v48 = vmul.f32 %v4812_v25, %v4808_v24 }
0x6e09   :  { %4816 = vrot.lane.b32.xlu1 %v4814_v48, %s12408_s14 }
0x6e7b   :  { %v4817_v27 = vpop.permute.xlu1 %4816 }
0x6e7c   :  { %v4819_v54 = vadd.f32 %v4817_v27, %v4809_v26 }
0x6e7e   :  { %12115 = vtanh.f32 %v4819_v54 }
0x6e88   :  { %v12116_v30 = vpop.eup %12115 }
0x6e89   :  { %4822 = vrot.lane.b32.xlu0 %v12116_v30, %s12408_s14 }
0x6efb   :  { %v4823_v32 = vpop.permute.xlu0 %4822 }
0x6efc   :  { %v4825_v17 = vmul.f32 %v4823_v32, %v4808_v24 }
0x6efe   :  { %v4826_v33 = vpack.c.bf16 %v4825_v17, %v4825_v17 }
0x6f00   :  { %4828 = vrot.lane.b32.xlu1 %v4826_v33, %s12395_s29 }
0x6f72   :  { %v4829_v37 = vpop.permute.xlu1 %4828 }
0x6f73   :  { %10913 = vmatmul.mubr.msk.bf16.vlgmr.msra.gmra.mrb[96].mxu1 %vm245_vm4, %v4829_v37 }
0x6f74   :  { %10917 = vmatpush3.bf16.msra.mxu1 %v13539_v36  ;;  %10920 = vmatprep.mubr.msk.bf16.mxu1 %vm12405_vm0, %v12404_v0 }
0x6f75   :  { %10918 = vmatprep.subr.bf16.mxu1 %v12404_v0 }
0x6f78   :  { %10919 = vmatpush3.bf16.msra.mxu1 %v13543_v44 }
0x6f79   :  { %10932 = vmatprep.subr.bf16.mxu1 %v12404_v0 }
0x6f7b   :  { %10921 = vmatmul.mubr.bf16.vlgmr.msra.gmra.mrb[68].mxu1 %v12406_v11 }
0x6f7c   :  { %10933 = vmatpush3.bf16.msra.mxu1 %v13539_v36  ;;  %10936 = vmatprep.mubr.msk.bf16.mxu1 %vm12405_vm0, %v12404_v0 }
0x6f7d   :  { %10934 = vmatprep.subr.bf16.mxu1 %v12404_v0 }
0x6f80   :  { %10935 = vmatpush3.bf16.msra.mxu1 %v13543_v44 }
0x6f81   :  { %10948 = vmatprep.subr.bf16.mxu1 %v12404_v0 }
0x704e   :  { %v4933_v38 = vpop.f32.mrb[68].mxu1 }
0x704f   :  { %v11544_v39 = vadd.f32 %v13557_v28, %v4933_v38  ;;  %v10922_v52 = vpop.f32.mrb[69].mxu1 }
0x7050   :  { %v4936_v22 = vpop.f32.mrb[70].mxu1 }
0x7051   :  { %v4940_v40 = vmul.f32 %v11544_v39, %v12596_v21  ;;  %v10923_v41 = vpop.f32.mrb[71].mxu1 }
0x7053   :  { %12117 = vtanh.f32 %v4940_v40 }
0x705d   :  { %v12118_v63 = vpop.eup %12117 }
0x705e   :  { %v4942_v43 = vmul.f32 %v12118_v63, %v12596_v21 }
0x7060   :  { %v4943_v45 = vadd.f32 %v4942_v43, %v12599_v29 }
0x7062   :  { %4946 = vrot.lane.b32.xlu0 %v4943_v45, %s12408_s14  ;;  %v4944_v53 = vmul.f32 0.0, %v4943_v45 }
0x70d4   :  { %v4947_v31 = vpop.permute.xlu0 %4946 }
0x70d5   :  { %v4949_v46 = vmul.f32 %v4947_v31, %v4943_v45 }
0x70d7   :  { %4951 = vrot.lane.b32.xlu1 %v4949_v46, %s12408_s14 }
0x7149   :  { %v4952_v55 = vpop.permute.xlu1 %4951 }
0x714a   :  { %v4954_v56 = vadd.f32 %v4952_v55, %v4944_v53 }
0x714c   :  { %12119 = vtanh.f32 %v4954_v56 }
0x7156   :  { %v12120_v57 = vpop.eup %12119 }
0x7157   :  { %4957 = vrot.lane.b32.xlu0 %v12120_v57, %s12408_s14 }
0x71c9   :  { %v4958_v58 = vpop.permute.xlu0 %4957 }
0x71ca   :  { %v4960_v3 = vmul.f32 %v4958_v58, %v4943_v45 }
0x71cc   :  { %v4961_v19 = vpack.c.bf16 %v4960_v3, %v4960_v3 }
0x71ce   :  { %4969 = vrot.lane.b32.xlu1 %v4961_v19, %s12395_s29 }
0x7240   :  { %v4970_v10 = vpop.permute.xlu1 %4969 }
0x7241   :  { %10929 = vmatmul.mubr.msk.bf16.vlgmr.msra.gmra.mrb[100].mxu0 %vm245_vm4, %v4970_v10  ;;  %10937 = vmatmul.mubr.msk.bf16.vlgmr.msra.gmra.mrb[72].mxu1 %vm245_vm4, %v4970_v10 }
0x7242   :  { %10949 = vmatpush3.bf16.msra.mxu1 %v13539_v36  ;;  %10941 = vmatpush3.bf16.msra.mxu0 %v13565_v18 }
0x7243   :  { %10950 = vmatprep.subr.bf16.mxu1 %v12404_v0  ;;  %10942 = vmatprep.subr.bf16.mxu0 %v12404_v0 }
0x7244   :  { %10944 = vmatprep.mubr.msk.bf16.mxu0 %vm12405_vm0, %v12404_v0  ;;  %10952 = vmatprep.mubr.msk.bf16.mxu1 %vm12405_vm0, %v12404_v0 }
0x7246   :  { %10951 = vmatpush3.bf16.msra.mxu1 %v13543_v44  ;;  %10943 = vmatpush3.bf16.msra.mxu0 %v13568_v35 }
0x7247   :  { %10964 = vmatprep.subr.bf16.mxu1 %v12404_v0  ;;  %10956 = vmatprep.subr.bf16.mxu0 %v12404_v0 }
0x7314   :  { %v5062_v59 = vpop.f32.mrb[72].mxu1 }
0x7315   :  { %v11545_v60 = vadd.f32 %v13557_v28, %v5062_v59  ;;  %v10938_v61 = vpop.f32.mrb[73].mxu1 }
0x7316   :  { %v5065_v62 = vpop.f32.mrb[74].mxu1 }
0x7317   :  { %v5069_v1 = vmul.f32 %v11545_v60, %v12596_v21  ;;  %v10939_v34 = vpop.f32.mrb[75].mxu1 }
0x7319   :  { %12121 = vtanh.f32 %v5069_v1 }
0x7323   :  { %v12122_v2 = vpop.eup %12121 }
0x7324   :  { %v5071_v5 = vmul.f32 %v12122_v2, %v12596_v21 }
0x7326   :  { %v5072_v6 = vadd.f32 %v5071_v5, %v12599_v29 }
0x7328   :  { %5075 = vrot.lane.b32.xlu0 %v5072_v6, %s12408_s14  ;;  %v5073_v7 = vmul.f32 %v5072_v6, %v4954_v56 }
0x739a   :  { %v5076_v49 = vpop.permute.xlu0 %5075 }
0x739b   :  { %v5078_v15 = vmul.f32 %v5076_v49, %v5072_v6 }
0x739d   :  { %5080 = vrot.lane.b32.xlu1 %v5078_v15, %s12408_s14 }
0x740f   :  { %v5081_v8 = vpop.permute.xlu1 %5080 }
0x7410   :  { %v5083_v9 = vadd.f32 %v5081_v8, %v5073_v7 }
0x7412   :  { %12123 = vtanh.f32 %v5083_v9 }
0x741c   :  { %v12124_v13 = vpop.eup %12123 }
0x741d   :  { %5086 = vrot.lane.b32.xlu0 %v12124_v13, %s12408_s14 }
0x748f   :  { %v5087_v42 = vpop.permute.xlu0 %5086 }
0x7490   :  { %v5089_v50 = vmul.f32 %v5087_v42, %v5072_v6 }
0x7492   :  { %v5090_v47 = vpack.c.bf16 %v5089_v50, %v5089_v50 }
0x7494   :  { %5092 = vrot.lane.b32.xlu1 %v5090_v47, %s12395_s29 }
0x7506   :  { %v5093_v20 = vpop.permute.xlu1 %5092 }
0x7507   :  { %10945 = vmatmul.mubr.msk.bf16.vlgmr.msra.gmra.mrb[104].mxu0 %vm245_vm4, %v5093_v20  ;;  %10953 = vmatmul.mubr.msk.bf16.vlgmr.msra.gmra.mrb[76].mxu1 %vm245_vm4, %v5093_v20 }
0x7508   :  { %10965 = vmatpush3.bf16.msra.mxu1 %v13539_v36  ;;  %10957 = vmatpush3.bf16.msra.mxu0 %v13565_v18 }
0x7509   :  { %10966 = vmatprep.subr.bf16.mxu1 %v12404_v0  ;;  %10958 = vmatprep.subr.bf16.mxu0 %v12404_v0 }
0x750a   :  { %10960 = vmatprep.mubr.msk.bf16.mxu0 %vm12405_vm0, %v12404_v0  ;;  %10968 = vmatprep.mubr.msk.bf16.mxu1 %vm12405_vm0, %v12404_v0 }
0x750c   :  { %10967 = vmatpush3.bf16.msra.mxu1 %v13543_v44  ;;  %10959 = vmatpush3.bf16.msra.mxu0 %v13568_v35 }
0x750d   :  { %10980 = vmatprep.subr.bf16.mxu1 %v12404_v0  ;;  %10972 = vmatprep.subr.bf16.mxu0 %v12404_v0 }
0x75da   :  { %v5173_v14 = vpop.f32.mrb[76].mxu1 }
0x75db   :  { %v11546_v51 = vadd.f32 %v13557_v28, %v5173_v14  ;;  %v10954_v4 = vpop.f32.mrb[77].mxu1 }
0x75dc   :  { %v5176_v16 = vpop.f32.mrb[78].mxu1 }
0x75dd   :  { %v5180_v23 = vmul.f32 %v11546_v51, %v12596_v21  ;;  %v10955_v24 = vpop.f32.mrb[79].mxu1 }
0x75df   :  { %12125 = vtanh.f32 %v5180_v23 }
0x75e9   :  { %v12126_v25 = vpop.eup %12125 }
0x75ea   :  { %v5182_v48 = vmul.f32 %v12126_v25, %v12596_v21 }
0x75ec   :  { %v5183_v26 = vadd.f32 %v5182_v48, %v12599_v29 }
0x75ee   :  { %5186 = vrot.lane.b32.xlu0 %v5183_v26, %s12408_s14  ;;  %v5184_v30 = vmul.f32 %v5183_v26, %v5083_v9 }
0x7660   :  { %v5187_v27 = vpop.permute.xlu0 %5186 }
0x7661   :  { %v5189_v54 = vmul.f32 %v5187_v27, %v5183_v26 }
0x7663   :  { %5191 = vrot.lane.b32.xlu1 %v5189_v54, %s12408_s14 }
0x76d5   :  { %v5192_v32 = vpop.permute.xlu1 %5191 }
0x76d6   :  { %v5194_v17 = vadd.f32 %v5192_v32, %v5184_v30 }
0x76d8   :  { %12127 = vtanh.f32 %v5194_v17 }
0x76e2   :  { %v12128_v33 = vpop.eup %12127 }
0x76e3   :  { %5197 = vrot.lane.b32.xlu0 %v12128_v33, %s12408_s14 }
0x7755   :  { %v5198_v37 = vpop.permute.xlu0 %5197 }
0x7756   :  { %v5200_v38 = vmul.f32 %v5198_v37, %v5183_v26 }
0x7758   :  { %v5201_v39 = vpack.c.bf16 %v5200_v38, %v5200_v38 }
0x775a   :  { %5203 = vrot.lane.b32.xlu1 %v5201_v39, %s12395_s29 }
0x77cc   :  { %v5204_v52 = vpop.permute.xlu1 %5203 }
0x77cd   :  { %10961 = vmatmul.mubr.msk.bf16.vlgmr.msra.gmra.mrb[108].mxu0 %vm245_vm4, %v5204_v52  ;;  %10969 = vmatmul.mubr.msk.bf16.vlgmr.msra.gmra.mrb[80].mxu1 %vm245_vm4, %v5204_v52 }
0x77ce   :  { %10981 = vmatpush3.bf16.msra.mxu1 %v13539_v36  ;;  %10973 = vmatpush3.bf16.msra.mxu0 %v13565_v18 }
0x77cf   :  { %10982 = vmatprep.subr.bf16.mxu1 %v12404_v0  ;;  %10974 = vmatprep.subr.bf16.mxu0 %v12404_v0 }
0x77d0   :  { %10976 = vmatprep.mubr.msk.bf16.mxu0 %vm12405_vm0, %v12404_v0  ;;  %10984 = vmatprep.mubr.msk.bf16.mxu1 %vm12405_vm0, %v12404_v0 }
0x77d2   :  { %10983 = vmatpush3.bf16.msra.mxu1 %v13543_v44  ;;  %10975 = vmatpush3.bf16.msra.mxu0 %v13568_v35 }
0x77d3   :  { %10996 = vmatprep.subr.bf16.mxu1 %v12404_v0  ;;  %10988 = vmatprep.subr.bf16.mxu0 %v12404_v0 }
0x78a0   :  { %v5284_v22 = vpop.f32.mrb[80].mxu1 }
0x78a1   :  { %v11547_v40 = vadd.f32 %v13557_v28, %v5284_v22  ;;  %v10970_v41 = vpop.f32.mrb[81].mxu1 }
0x78a2   :  { %v5287_v63 = vpop.f32.mrb[82].mxu1 }
0x78a3   :  { %v5291_v43 = vmul.f32 %v11547_v40, %v12596_v21  ;;  %v10971_v45 = vpop.f32.mrb[83].mxu1 }
0x78a5   :  { %12129 = vtanh.f32 %v5291_v43 }
0x78af   :  { %v12130_v31 = vpop.eup %12129 }
0x78b0   :  { %v5293_v46 = vmul.f32 %v12130_v31, %v12596_v21 }
0x78b2   :  { %v5294_v53 = vadd.f32 %v5293_v46, %v12599_v29 }
0x78b4   :  { %5297 = vrot.lane.b32.xlu0 %v5294_v53, %s12408_s14  ;;  %v5295_v57 = vmul.f32 %v5294_v53, %v5194_v17 }
0x7926   :  { %v5298_v55 = vpop.permute.xlu0 %5297 }
0x7927   :  { %v5300_v56 = vmul.f32 %v5298_v55, %v5294_v53 }
0x7929   :  { %5302 = vrot.lane.b32.xlu1 %v5300_v56, %s12408_s14 }
0x799b   :  { %v5303_v58 = vpop.permute.xlu1 %5302 }
0x799c   :  { %v5305_v3 = vadd.f32 %v5303_v58, %v5295_v57 }
0x799e   :  { %12131 = vtanh.f32 %v5305_v3 }
0x79a8   :  { %v12132_v19 = vpop.eup %12131 }
0x79a9   :  { %5308 = vrot.lane.b32.xlu0 %v12132_v19, %s12408_s14 }
0x7a1b   :  { %v5309_v10 = vpop.permute.xlu0 %5308 }
0x7a1c   :  { %v5311_v59 = vmul.f32 %v5309_v10, %v5294_v53 }
0x7a1e   :  { %v5312_v60 = vpack.c.bf16 %v5311_v59, %v5311_v59 }
0x7a20   :  { %5314 = vrot.lane.b32.xlu1 %v5312_v60, %s12395_s29 }
0x7a92   :  { %v5315_v61 = vpop.permute.xlu1 %5314 }
0x7a93   :  { %10977 = vmatmul.mubr.msk.bf16.vlgmr.msra.gmra.mrb[112].mxu0 %vm245_vm4, %v5315_v61  ;;  %10985 = vmatmul.mubr.msk.bf16.vlgmr.msra.gmra.mrb[84].mxu1 %vm245_vm4, %v5315_v61 }
0x7a94   :  { %10997 = vmatpush3.bf16.msra.mxu1 %v13539_v36  ;;  %10989 = vmatpush3.bf16.msra.mxu0 %v13565_v18 }
0x7a95   :  { %10998 = vmatprep.subr.bf16.mxu1 %v12404_v0  ;;  %10990 = vmatprep.subr.bf16.mxu0 %v12404_v0 }
0x7a96   :  { %10992 = vmatprep.mubr.msk.bf16.mxu0 %vm12405_vm0, %v12404_v0  ;;  %11000 = vmatprep.mubr.msk.bf16.mxu1 %vm12405_vm0, %v12404_v0 }
0x7a98   :  { %10999 = vmatpush3.bf16.msra.mxu1 %v13543_v44  ;;  %10991 = vmatpush3.bf16.msra.mxu0 %v13568_v35 }
0x7a99   :  { %11012 = vmatprep.subr.bf16.mxu1 %v12404_v0  ;;  %11004 = vmatprep.subr.bf16.mxu0 %v12404_v0 }
0x7b66   :  { %v5395_v62 = vpop.f32.mrb[84].mxu1 }
0x7b67   :  { %v11548_v1 = vadd.f32 %v13557_v28, %v5395_v62  ;;  %v10986_v34 = vpop.f32.mrb[85].mxu1 }
0x7b68   :  { %v5398_v2 = vpop.f32.mrb[86].mxu1 }
0x7b69   :  { %v5402_v5 = vmul.f32 %v11548_v1, %v12596_v21  ;;  %v10987_v6 = vpop.f32.mrb[87].mxu1 }
0x7b6b   :  { %12133 = vtanh.f32 %v5402_v5 }
0x7b75   :  { %v12134_v49 = vpop.eup %12133 }
0x7b76   :  { %v5404_v15 = vmul.f32 %v12134_v49, %v12596_v21 }
0x7b78   :  { %v5405_v7 = vadd.f32 %v5404_v15, %v12599_v29 }
0x7b7a   :  { %5408 = vrot.lane.b32.xlu0 %v5405_v7, %s12408_s14  ;;  %v5406_v13 = vmul.f32 %v5405_v7, %v5305_v3 }
0x7bec   :  { %v5409_v8 = vpop.permute.xlu0 %5408 }
0x7bed   :  { %v5411_v9 = vmul.f32 %v5409_v8, %v5405_v7 }
0x7bef   :  { %5413 = vrot.lane.b32.xlu1 %v5411_v9, %s12408_s14 }
0x7c61   :  { %v5414_v42 = vpop.permute.xlu1 %5413 }
0x7c62   :  { %v5416_v50 = vadd.f32 %v5414_v42, %v5406_v13 }
0x7c64   :  { %12135 = vtanh.f32 %v5416_v50 }
0x7c6e   :  { %v12136_v47 = vpop.eup %12135 }
0x7c6f   :  { %5419 = vrot.lane.b32.xlu0 %v12136_v47, %s12408_s14 }
0x7ce1   :  { %v5420_v20 = vpop.permute.xlu0 %5419 }
0x7ce2   :  { %v5422_v14 = vmul.f32 %v5420_v20, %v5405_v7 }
0x7ce4   :  { %v5423_v51 = vpack.c.bf16 %v5422_v14, %v5422_v14  ;;  %v13725_v14 = vld [vmem:[#allocation6 + $0x60] sm:$0xff]  }
0x7ce6   :  { %5425 = vrot.lane.b32.xlu1 %v5423_v51, %s12395_s29 }
0x7d58   :  { %v5426_v4 = vpop.permute.xlu1 %5425 }
0x7d59   :  { %10993 = vmatmul.mubr.msk.bf16.vlgmr.msra.gmra.mrb[116].mxu0 %vm245_vm4, %v5426_v4  ;;  %11001 = vmatmul.mubr.msk.bf16.vlgmr.msra.gmra.mrb[88].mxu1 %vm245_vm4, %v5426_v4  ;;  %v13729_v4 = vld [vmem:[#allocation6 + $0x68] sm:$0xff]  }
0x7d5a   :  { %11013 = vmatpush3.bf16.msra.mxu1 %v13539_v36  ;;  %11005 = vmatpush3.bf16.msra.mxu0 %v13565_v18 }
0x7d5b   :  { %11014 = vmatprep.subr.bf16.mxu1 %v12404_v0  ;;  %11006 = vmatprep.subr.bf16.mxu0 %v12404_v0 }
0x7d5c   :  { %11008 = vmatprep.mubr.msk.bf16.mxu0 %vm12405_vm0, %v12404_v0  ;;  %11016 = vmatprep.mubr.msk.bf16.mxu1 %vm12405_vm0, %v12404_v0 }
0x7d5e   :  { %11015 = vmatpush3.bf16.msra.mxu1 %v13543_v44  ;;  %11007 = vmatpush3.bf16.msra.mxu0 %v13568_v35 }
0x7d5f   :  { %11028 = vmatprep.subr.bf16.mxu1 %v12404_v0  ;;  %11020 = vmatprep.subr.bf16.mxu0 %v12404_v0 }
0x7e2c   :  { %v5506_v16 = vpop.f32.mrb[88].mxu1 }
0x7e2d   :  { %v11549_v23 = vadd.f32 %v13557_v28, %v5506_v16  ;;  %v11002_v24 = vpop.f32.mrb[89].mxu1  ;;  %v13743_v16 = vld [vmem:[#allocation8 + $0x6] ss:$0 sm:$0xff] }
0x7e2e   :  { %v5509_v25 = vpop.f32.mrb[90].mxu1 }
0x7e2f   :  { %v5513_v48 = vmul.f32 %v11549_v23, %v12596_v21  ;;  %v11003_v26 = vpop.f32.mrb[91].mxu1 }
0x7e31   :  { %12137 = vtanh.f32 %v5513_v48 }
0x7e3b   :  { %v12138_v27 = vpop.eup %12137 }
0x7e3c   :  { %v5515_v54 = vmul.f32 %v12138_v27, %v12596_v21 }
0x7e3e   :  { %v5516_v30 = vadd.f32 %v5515_v54, %v12599_v29 }
0x7e40   :  { %5519 = vrot.lane.b32.xlu0 %v5516_v30, %s12408_s14  ;;  %v5517_v33 = vmul.f32 %v5516_v30, %v5416_v50 }
0x7eb2   :  { %v5520_v32 = vpop.permute.xlu0 %5519 }
0x7eb3   :  { %v5522_v17 = vmul.f32 %v5520_v32, %v5516_v30 }
0x7eb5   :  { %5524 = vrot.lane.b32.xlu1 %v5522_v17, %s12408_s14 }
0x7f27   :  { %v5525_v37 = vpop.permute.xlu1 %5524 }
0x7f28   :  { %v5527_v38 = vadd.f32 %v5525_v37, %v5517_v33 }
0x7f2a   :  { %12139 = vtanh.f32 %v5527_v38 }
0x7f34   :  { %v12140_v39 = vpop.eup %12139 }
0x7f35   :  { %5530 = vrot.lane.b32.xlu0 %v12140_v39, %s12408_s14 }
0x7fa7   :  { %v5531_v52 = vpop.permute.xlu0 %5530 }
0x7fa8   :  { %v5533_v22 = vmul.f32 %v5531_v52, %v5516_v30  ;;  %v13751_v52 = vld [vmem:[#allocation4 + $0x60] sm:$0xff]  }
0x7faa   :  { %v5534_v40 = vpack.c.bf16 %v5533_v22, %v5533_v22  ;;  %v13754_v22 = vld [vmem:[#allocation4 + $0x68] sm:$0xff]  }
0x7fac   :  { %5536 = vrot.lane.b32.xlu1 %v5534_v40, %s12395_s29 }
0x801e   :  { %v5537_v41 = vpop.permute.xlu1 %5536 }
0x801f   :  { %11009 = vmatmul.mubr.msk.bf16.vlgmr.msra.gmra.mrb[120].mxu0 %vm245_vm4, %v5537_v41  ;;  %11017 = vmatmul.mubr.msk.bf16.vlgmr.msra.gmra.mrb[92].mxu1 %vm245_vm4, %v5537_v41 }
0x8020   :  { %11029 = vmatpush3.bf16.msra.mxu1 %v13539_v36  ;;  %11021 = vmatpush3.bf16.msra.mxu0 %v13565_v18 }
0x8021   :  { %11030 = vmatprep.subr.bf16.mxu1 %v12404_v0  ;;  %11022 = vmatprep.subr.bf16.mxu0 %v12404_v0 }
0x8022   :  { %11024 = vmatprep.mubr.msk.bf16.mxu0 %vm12405_vm0, %v12404_v0  ;;  %11032 = vmatprep.mubr.msk.bf16.mxu1 %vm12405_vm0, %v12404_v0 }
0x8024   :  { %11031 = vmatpush3.bf16.msra.mxu1 %v13543_v44  ;;  %11023 = vmatpush3.bf16.msra.mxu0 %v13568_v35 }
0x8025   :  { %11036 = vmatprep.subr.bf16.mxu0 %v12404_v0  ;;  %11052 = vmatprep.subr.bf16.mxu1 %v12404_v0 }
0x80f2   :  { %v5617_v36 = vpop.f32.mrb[92].mxu1 }
0x80f3   :  { %v11550_v63 = vadd.f32 %v13557_v28, %v5617_v36  ;;  %v11018_v43 = vpop.f32.mrb[93].mxu1 }
0x80f4   :  { %v5620_v45 = vpop.f32.mrb[94].mxu1 }
0x80f5   :  { %v5624_v31 = vmul.f32 %v11550_v63, %v12596_v21  ;;  %v11019_v46 = vpop.f32.mrb[95].mxu1 }
0x80f7   :  { %12141 = vtanh.f32 %v5624_v31 }
0x8101   :  { %v12142_v53 = vpop.eup %12141 }
0x8102   :  { %v5626_v55 = vmul.f32 %v12142_v53, %v12596_v21 }
0x8104   :  { %v5627_v44 = vadd.f32 %v5626_v55, %v12599_v29 }
0x8106   :  { %5630 = vrot.lane.b32.xlu0 %v5627_v44, %s12408_s14  ;;  %v5628_v58 = vmul.f32 %v5627_v44, %v5527_v38 }
0x8178   :  { %v5631_v56 = vpop.permute.xlu0 %5630 }
0x8179   :  { %v5633_v57 = vmul.f32 %v5631_v56, %v5627_v44 }
0x817b   :  { %5635 = vrot.lane.b32.xlu1 %v5633_v57, %s12408_s14 }
0x81ed   :  { %v5636_v3 = vpop.permute.xlu1 %5635 }
0x81ee   :  { %v5638_v19 = vadd.f32 %v5636_v3, %v5628_v58 }
0x81f0   :  { %12143 = vtanh.f32 %v5638_v19 }
0x81fa   :  { %v12144_v10 = vpop.eup %12143 }
0x81fb   :  { %5641 = vrot.lane.b32.xlu0 %v12144_v10, %s12408_s14 }
0x826d   :  { %v5642_v59 = vpop.permute.xlu0 %5641 }
0x826e   :  { %v5644_v60 = vmul.f32 %v5642_v59, %v5627_v44 }
0x8270   :  { %v5645_v61 = vpack.c.bf16 %v5644_v60, %v5644_v60 }
0x8272   :  { %5647 = vrot.lane.b32.xlu1 %v5645_v61, %s12395_s29 }
0x82e4   :  { %v5648_v62 = vpop.permute.xlu1 %5647 }
0x82e5   :  { %11025 = vmatmul.mubr.msk.bf16.vlgmr.msra.gmra.mrb[124].mxu0 %vm245_vm4, %v5648_v62  ;;  %11033 = vmatmul.mubr.msk.bf16.vlgmr.msra.gmra.mrb[96].mxu1 %vm245_vm4, %v5648_v62 }
0x82e6   :  { %11037 = vmatpush3.bf16.msra.mxu0 %v13565_v18  ;;  %11040 = vmatprep.mubr.msk.bf16.mxu0 %vm12405_vm0, %v12404_v0 }
0x82e7   :  { %11038 = vmatprep.subr.bf16.mxu0 %v12404_v0  ;;  %11056 = vmatprep.mubr.msk.bf16.mxu1 %vm12405_vm0, %v12404_v0 }
0x82e8   :  { %11053 = vmatpush3.bf16.msra.mxu1 %v13751_v52 }
0x82e9   :  { %11054 = vmatprep.subr.bf16.mxu1 %v12404_v0 }
0x82ea   :  { %11039 = vmatpush3.bf16.msra.mxu0 %v13568_v35 }
0x82eb   :  { %11044 = vmatprep.subr.bf16.mxu0 %v12404_v0 }
0x82ec   :  { %11055 = vmatpush3.bf16.msra.mxu1 %v13754_v22 }
0x82ed   :  { %11068 = vmatprep.subr.bf16.mxu1 %v12404_v0 }
0x83b8   :  { %v5728_v1 = vpop.f32.mrb[96].mxu1 }
0x83b9   :  { %v11551_v34 = vadd.f32 %v13557_v28, %v5728_v1  ;;  %v11034_v2 = vpop.f32.mrb[97].mxu1 }
0x83ba   :  { %v5731_v5 = vpop.f32.mrb[98].mxu1 }
0x83bb   :  { %v5735_v6 = vmul.f32 %v11551_v34, %v12596_v21  ;;  %v11035_v18 = vpop.f32.mrb[99].mxu1 }
0x83bd   :  { %12145 = vtanh.f32 %v5735_v6 }
0x83c7   :  { %v12146_v49 = vpop.eup %12145 }
0x83c8   :  { %v5737_v15 = vmul.f32 %v12146_v49, %v12596_v21 }
0x83ca   :  { %v5738_v7 = vadd.f32 %v5737_v15, %v12599_v29 }
0x83cc   :  { %5741 = vrot.lane.b32.xlu0 %v5738_v7, %s12408_s14  ;;  %v5739_v9 = vmul.f32 %v5738_v7, %v5638_v19 }
0x843e   :  { %v5742_v8 = vpop.permute.xlu0 %5741 }
0x843f   :  { %v5744_v35 = vmul.f32 %v5742_v8, %v5738_v7 }
0x8441   :  { %5746 = vrot.lane.b32.xlu1 %v5744_v35, %s12408_s14 }
0x84b3   :  { %v5747_v13 = vpop.permute.xlu1 %5746 }
0x84b4   :  { %v5749_v28 = vadd.f32 %v5747_v13, %v5739_v9 }
0x84b6   :  { %12147 = vtanh.f32 %v5749_v28 }
0x84c0   :  { %v12148_v42 = vpop.eup %12147 }
0x84c1   :  { %5752 = vrot.lane.b32.xlu0 %v12148_v42, %s12408_s14 }
0x8533   :  { %v5753_v50 = vpop.permute.xlu0 %5752 }
0x8534   :  { %v5755_v47 = vmul.f32 %v5753_v50, %v5738_v7 }
0x8536   :  { %v5756_v20 = vpack.c.bf16 %v5755_v47, %v5755_v47 }
0x8538   :  { %5758 = vrot.lane.b32.xlu1 %v5756_v20, %s12395_s29 }
0x85aa   :  { %v5759_v51 = vpop.permute.xlu1 %5758 }
0x85ab   :  { %11041 = vmatmul.mubr.msk.bf16.vlgmr.msra.gmra.mrb[128].mxu0 %vm245_vm4, %v5759_v51 }
0x85ac   :  { %11045 = vmatpush3.bf16.msra.mxu0 %v13725_v14  ;;  %11048 = vmatprep.mubr.msk.bf16.mxu0 %vm12405_vm0, %v12404_v0 }
0x85ad   :  { %11046 = vmatprep.subr.bf16.mxu0 %v12404_v0 }
0x85b0   :  { %11047 = vmatpush3.bf16.msra.mxu0 %v13729_v4 }
0x85b1   :  { %11060 = vmatprep.subr.bf16.mxu0 %v12404_v0 }
0x85b3   :  { %11049 = vmatmul.mubr.bf16.vlgmr.msra.gmra.mrb[100].mxu0 %v12406_v11 }
0x85b4   :  { %11061 = vmatpush3.bf16.msra.mxu0 %v13725_v14  ;;  %11064 = vmatprep.mubr.msk.bf16.mxu0 %vm12405_vm0, %v12404_v0 }
0x85b5   :  { %11062 = vmatprep.subr.bf16.mxu0 %v12404_v0 }
0x85b8   :  { %11063 = vmatpush3.bf16.msra.mxu0 %v13729_v4 }
0x85b9   :  { %11076 = vmatprep.subr.bf16.mxu0 %v12404_v0 }
0x8686   :  { %v5863_v23 = vpop.f32.mrb[100].mxu0 }
0x8687   :  { %v11552_v24 = vadd.f32 %v13743_v16, %v5863_v23  ;;  %v11050_v25 = vpop.f32.mrb[101].mxu0 }
0x8688   :  { %v5866_v48 = vpop.f32.mrb[102].mxu0 }
0x8689   :  { %v5870_v26 = vmul.f32 %v11552_v24, %v12596_v21  ;;  %v11051_v27 = vpop.f32.mrb[103].mxu0 }
0x868b   :  { %12149 = vtanh.f32 %v5870_v26 }
0x8695   :  { %v12150_v54 = vpop.eup %12149 }
0x8696   :  { %v5872_v30 = vmul.f32 %v12150_v54, %v12596_v21 }
0x8698   :  { %v5873_v32 = vadd.f32 %v5872_v30, %v12599_v29 }
0x869a   :  { %5876 = vrot.lane.b32.xlu0 %v5873_v32, %s12408_s14  ;;  %v5874_v37 = vmul.f32 0.0, %v5873_v32 }
0x870c   :  { %v5877_v17 = vpop.permute.xlu0 %5876 }
0x870d   :  { %v5879_v33 = vmul.f32 %v5877_v17, %v5873_v32 }
0x870f   :  { %5881 = vrot.lane.b32.xlu1 %v5879_v33, %s12408_s14 }
0x8781   :  { %v5882_v38 = vpop.permute.xlu1 %5881 }
0x8782   :  { %v5884_v39 = vadd.f32 %v5882_v38, %v5874_v37 }
0x8784   :  { %12151 = vtanh.f32 %v5884_v39 }
0x878e   :  { %v12152_v40 = vpop.eup %12151 }
0x878f   :  { %5887 = vrot.lane.b32.xlu0 %v12152_v40, %s12408_s14 }
0x8801   :  { %v5888_v41 = vpop.permute.xlu0 %5887 }
0x8802   :  { %v5890_v36 = vmul.f32 %v5888_v41, %v5873_v32 }
0x8804   :  { %v5891_v63 = vpack.c.bf16 %v5890_v36, %v5890_v36 }
0x8806   :  { %5899 = vrot.lane.b32.xlu1 %v5891_v63, %s12395_s29 }
0x8878   :  { %v5900_v43 = vpop.permute.xlu1 %5899 }
0x8879   :  { %11057 = vmatmul.mubr.msk.bf16.vlgmr.msra.gmra.mrb[100].mxu1 %vm245_vm4, %v5900_v43  ;;  %11065 = vmatmul.mubr.msk.bf16.vlgmr.msra.gmra.mrb[104].mxu0 %vm245_vm4, %v5900_v43 }
0x887a   :  { %11077 = vmatpush3.bf16.msra.mxu0 %v13725_v14  ;;  %11069 = vmatpush3.bf16.msra.mxu1 %v13751_v52 }
0x887b   :  { %11078 = vmatprep.subr.bf16.mxu0 %v12404_v0  ;;  %11070 = vmatprep.subr.bf16.mxu1 %v12404_v0 }
0x887c   :  { %11072 = vmatprep.mubr.msk.bf16.mxu1 %vm12405_vm0, %v12404_v0  ;;  %11080 = vmatprep.mubr.msk.bf16.mxu0 %vm12405_vm0, %v12404_v0 }
0x887e   :  { %11079 = vmatpush3.bf16.msra.mxu0 %v13729_v4  ;;  %11071 = vmatpush3.bf16.msra.mxu1 %v13754_v22 }
0x887f   :  { %11092 = vmatprep.subr.bf16.mxu0 %v12404_v0  ;;  %11084 = vmatprep.subr.bf16.mxu1 %v12404_v0 }
0x894c   :  { %v5992_v45 = vpop.f32.mrb[104].mxu0 }
0x894d   :  { %v11553_v31 = vadd.f32 %v13743_v16, %v5992_v45  ;;  %v11066_v46 = vpop.f32.mrb[105].mxu0 }
0x894e   :  { %v5995_v53 = vpop.f32.mrb[106].mxu0 }
0x894f   :  { %v5999_v55 = vmul.f32 %v11553_v31, %v12596_v21  ;;  %v11067_v44 = vpop.f32.mrb[107].mxu0 }
0x8951   :  { %12153 = vtanh.f32 %v5999_v55 }
0x895b   :  { %v12154_v56 = vpop.eup %12153 }
0x895c   :  { %v6001_v57 = vmul.f32 %v12154_v56, %v12596_v21 }
0x895e   :  { %v6002_v58 = vadd.f32 %v6001_v57, %v12599_v29 }
0x8960   :  { %6005 = vrot.lane.b32.xlu0 %v6002_v58, %s12408_s14  ;;  %v6003_v10 = vmul.f32 %v6002_v58, %v5884_v39 }
0x89d2   :  { %v6006_v3 = vpop.permute.xlu0 %6005 }
0x89d3   :  { %v6008_v19 = vmul.f32 %v6006_v3, %v6002_v58 }
0x89d5   :  { %6010 = vrot.lane.b32.xlu1 %v6008_v19, %s12408_s14 }
0x8a47   :  { %v6011_v59 = vpop.permute.xlu1 %6010 }
0x8a48   :  { %v6013_v60 = vadd.f32 %v6011_v59, %v6003_v10 }
0x8a4a   :  { %12155 = vtanh.f32 %v6013_v60 }
0x8a54   :  { %v12156_v61 = vpop.eup %12155 }
0x8a55   :  { %6016 = vrot.lane.b32.xlu0 %v12156_v61, %s12408_s14 }
0x8ac7   :  { %v6017_v62 = vpop.permute.xlu0 %6016 }
0x8ac8   :  { %v6019_v1 = vmul.f32 %v6017_v62, %v6002_v58 }
0x8aca   :  { %v6020_v34 = vpack.c.bf16 %v6019_v1, %v6019_v1 }
0x8acc   :  { %6022 = vrot.lane.b32.xlu1 %v6020_v34, %s12395_s29 }
0x8b3e   :  { %v6023_v2 = vpop.permute.xlu1 %6022 }
0x8b3f   :  { %11073 = vmatmul.mubr.msk.bf16.vlgmr.msra.gmra.mrb[104].mxu1 %vm245_vm4, %v6023_v2  ;;  %11081 = vmatmul.mubr.msk.bf16.vlgmr.msra.gmra.mrb[108].mxu0 %vm245_vm4, %v6023_v2 }
0x8b40   :  { %11093 = vmatpush3.bf16.msra.mxu0 %v13725_v14  ;;  %11085 = vmatpush3.bf16.msra.mxu1 %v13751_v52 }
0x8b41   :  { %11094 = vmatprep.subr.bf16.mxu0 %v12404_v0  ;;  %11086 = vmatprep.subr.bf16.mxu1 %v12404_v0 }
0x8b42   :  { %11088 = vmatprep.mubr.msk.bf16.mxu1 %vm12405_vm0, %v12404_v0  ;;  %11096 = vmatprep.mubr.msk.bf16.mxu0 %vm12405_vm0, %v12404_v0 }
0x8b44   :  { %11095 = vmatpush3.bf16.msra.mxu0 %v13729_v4  ;;  %11087 = vmatpush3.bf16.msra.mxu1 %v13754_v22 }
0x8b45   :  { %11108 = vmatprep.subr.bf16.mxu0 %v12404_v0  ;;  %11100 = vmatprep.subr.bf16.mxu1 %v12404_v0 }
0x8c12   :  { %v6103_v5 = vpop.f32.mrb[108].mxu0 }
0x8c13   :  { %v11554_v6 = vadd.f32 %v13743_v16, %v6103_v5  ;;  %v11082_v18 = vpop.f32.mrb[109].mxu0 }
0x8c14   :  { %v6106_v49 = vpop.f32.mrb[110].mxu0 }
0x8c15   :  { %v6110_v15 = vmul.f32 %v11554_v6, %v12596_v21  ;;  %v11083_v7 = vpop.f32.mrb[111].mxu0 }
0x8c17   :  { %12157 = vtanh.f32 %v6110_v15 }
0x8c21   :  { %v12158_v8 = vpop.eup %12157 }
0x8c22   :  { %v6112_v35 = vmul.f32 %v12158_v8, %v12596_v21 }
0x8c24   :  { %v6113_v9 = vadd.f32 %v6112_v35, %v12599_v29 }
0x8c26   :  { %6116 = vrot.lane.b32.xlu0 %v6113_v9, %s12408_s14  ;;  %v6114_v42 = vmul.f32 %v6113_v9, %v6013_v60 }
0x8c98   :  { %v6117_v13 = vpop.permute.xlu0 %6116 }
0x8c99   :  { %v6119_v28 = vmul.f32 %v6117_v13, %v6113_v9 }
0x8c9b   :  { %6121 = vrot.lane.b32.xlu1 %v6119_v28, %s12408_s14 }
0x8d0d   :  { %v6122_v50 = vpop.permute.xlu1 %6121 }
0x8d0e   :  { %v6124_v47 = vadd.f32 %v6122_v50, %v6114_v42 }
0x8d10   :  { %12159 = vtanh.f32 %v6124_v47 }
0x8d1a   :  { %v12160_v20 = vpop.eup %12159 }
0x8d1b   :  { %6127 = vrot.lane.b32.xlu0 %v12160_v20, %s12408_s14 }
0x8d8d   :  { %v6128_v51 = vpop.permute.xlu0 %6127 }
0x8d8e   :  { %v6130_v23 = vmul.f32 %v6128_v51, %v6113_v9 }
0x8d90   :  { %v6131_v24 = vpack.c.bf16 %v6130_v23, %v6130_v23 }
0x8d92   :  { %6133 = vrot.lane.b32.xlu1 %v6131_v24, %s12395_s29 }
0x8e04   :  { %v6134_v25 = vpop.permute.xlu1 %6133 }
0x8e05   :  { %11089 = vmatmul.mubr.msk.bf16.vlgmr.msra.gmra.mrb[108].mxu1 %vm245_vm4, %v6134_v25  ;;  %11097 = vmatmul.mubr.msk.bf16.vlgmr.msra.gmra.mrb[112].mxu0 %vm245_vm4, %v6134_v25 }
0x8e06   :  { %11109 = vmatpush3.bf16.msra.mxu0 %v13725_v14  ;;  %11101 = vmatpush3.bf16.msra.mxu1 %v13751_v52 }
0x8e07   :  { %11110 = vmatprep.subr.bf16.mxu0 %v12404_v0  ;;  %11102 = vmatprep.subr.bf16.mxu1 %v12404_v0 }
0x8e08   :  { %11104 = vmatprep.mubr.msk.bf16.mxu1 %vm12405_vm0, %v12404_v0  ;;  %11112 = vmatprep.mubr.msk.bf16.mxu0 %vm12405_vm0, %v12404_v0 }
0x8e0a   :  { %11111 = vmatpush3.bf16.msra.mxu0 %v13729_v4  ;;  %11103 = vmatpush3.bf16.msra.mxu1 %v13754_v22 }
0x8e0b   :  { %11124 = vmatprep.subr.bf16.mxu0 %v12404_v0  ;;  %11116 = vmatprep.subr.bf16.mxu1 %v12404_v0 }
0x8ed8   :  { %v6214_v48 = vpop.f32.mrb[112].mxu0 }
0x8ed9   :  { %v11555_v26 = vadd.f32 %v13743_v16, %v6214_v48  ;;  %v11098_v27 = vpop.f32.mrb[113].mxu0 }
0x8eda   :  { %v6217_v54 = vpop.f32.mrb[114].mxu0 }
0x8edb   :  { %v6221_v30 = vmul.f32 %v11555_v26, %v12596_v21  ;;  %v11099_v32 = vpop.f32.mrb[115].mxu0 }
0x8edd   :  { %12161 = vtanh.f32 %v6221_v30 }
0x8ee7   :  { %v12162_v17 = vpop.eup %12161 }
0x8ee8   :  { %v6223_v33 = vmul.f32 %v12162_v17, %v12596_v21 }
0x8eea   :  { %v6224_v37 = vadd.f32 %v6223_v33, %v12599_v29 }
0x8eec   :  { %6227 = vrot.lane.b32.xlu0 %v6224_v37, %s12408_s14  ;;  %v6225_v40 = vmul.f32 %v6224_v37, %v6124_v47 }
0x8f5e   :  { %v6228_v38 = vpop.permute.xlu0 %6227 }
0x8f5f   :  { %v6230_v39 = vmul.f32 %v6228_v38, %v6224_v37 }
0x8f61   :  { %6232 = vrot.lane.b32.xlu1 %v6230_v39, %s12408_s14 }
0x8fd3   :  { %v6233_v41 = vpop.permute.xlu1 %6232 }
0x8fd4   :  { %v6235_v36 = vadd.f32 %v6233_v41, %v6225_v40 }
0x8fd6   :  { %12163 = vtanh.f32 %v6235_v36 }
0x8fe0   :  { %v12164_v63 = vpop.eup %12163 }
0x8fe1   :  { %6238 = vrot.lane.b32.xlu0 %v12164_v63, %s12408_s14 }
0x9053   :  { %v6239_v43 = vpop.permute.xlu0 %6238 }
0x9054   :  { %v6241_v45 = vmul.f32 %v6239_v43, %v6224_v37 }
0x9056   :  { %v6242_v31 = vpack.c.bf16 %v6241_v45, %v6241_v45 }
0x9058   :  { %6244 = vrot.lane.b32.xlu1 %v6242_v31, %s12395_s29 }
0x90ca   :  { %v6245_v46 = vpop.permute.xlu1 %6244 }
0x90cb   :  { %11105 = vmatmul.mubr.msk.bf16.vlgmr.msra.gmra.mrb[112].mxu1 %vm245_vm4, %v6245_v46  ;;  %11113 = vmatmul.mubr.msk.bf16.vlgmr.msra.gmra.mrb[116].mxu0 %vm245_vm4, %v6245_v46 }
0x90cc   :  { %11125 = vmatpush3.bf16.msra.mxu0 %v13725_v14  ;;  %11117 = vmatpush3.bf16.msra.mxu1 %v13751_v52 }
0x90cd   :  { %11126 = vmatprep.subr.bf16.mxu0 %v12404_v0  ;;  %11118 = vmatprep.subr.bf16.mxu1 %v12404_v0 }
0x90ce   :  { %11120 = vmatprep.mubr.msk.bf16.mxu1 %vm12405_vm0, %v12404_v0  ;;  %11128 = vmatprep.mubr.msk.bf16.mxu0 %vm12405_vm0, %v12404_v0 }
0x90d0   :  { %11127 = vmatpush3.bf16.msra.mxu0 %v13729_v4  ;;  %11119 = vmatpush3.bf16.msra.mxu1 %v13754_v22 }
0x90d1   :  { %11140 = vmatprep.subr.bf16.mxu0 %v12404_v0  ;;  %11132 = vmatprep.subr.bf16.mxu1 %v12404_v0 }
0x919e   :  { %v6325_v53 = vpop.f32.mrb[116].mxu0 }
0x919f   :  { %v11556_v55 = vadd.f32 %v13743_v16, %v6325_v53  ;;  %v11114_v44 = vpop.f32.mrb[117].mxu0 }
0x91a0   :  { %v6328_v56 = vpop.f32.mrb[118].mxu0 }
0x91a1   :  { %v6332_v57 = vmul.f32 %v11556_v55, %v12596_v21  ;;  %v11115_v58 = vpop.f32.mrb[119].mxu0 }
0x91a3   :  { %12165 = vtanh.f32 %v6332_v57 }
0x91ad   :  { %v12166_v3 = vpop.eup %12165 }
0x91ae   :  { %v6334_v19 = vmul.f32 %v12166_v3, %v12596_v21 }
0x91b0   :  { %v6335_v10 = vadd.f32 %v6334_v19, %v12599_v29 }
0x91b2   :  { %6338 = vrot.lane.b32.xlu0 %v6335_v10, %s12408_s14  ;;  %v6336_v61 = vmul.f32 %v6335_v10, %v6235_v36 }
0x9224   :  { %v6339_v59 = vpop.permute.xlu0 %6338 }
0x9225   :  { %v6341_v60 = vmul.f32 %v6339_v59, %v6335_v10 }
0x9227   :  { %6343 = vrot.lane.b32.xlu1 %v6341_v60, %s12408_s14 }
0x9299   :  { %v6344_v62 = vpop.permute.xlu1 %6343 }
0x929a   :  { %v6346_v1 = vadd.f32 %v6344_v62, %v6336_v61 }
0x929c   :  { %12167 = vtanh.f32 %v6346_v1 }
0x92a6   :  { %v12168_v34 = vpop.eup %12167 }
0x92a7   :  { %6349 = vrot.lane.b32.xlu0 %v12168_v34, %s12408_s14 }
0x9319   :  { %v6350_v2 = vpop.permute.xlu0 %6349 }
0x931a   :  { %v6352_v5 = vmul.f32 %v6350_v2, %v6335_v10 }
0x931c   :  { %v6353_v6 = vpack.c.bf16 %v6352_v5, %v6352_v5  ;;  %v13911_v5 = vld [vmem:[#allocation6 + $0x70] sm:$0xff]  }
0x931e   :  { %6355 = vrot.lane.b32.xlu1 %v6353_v6, %s12395_s29 }
0x9390   :  { %v6356_v18 = vpop.permute.xlu1 %6355 }
0x9391   :  { %11121 = vmatmul.mubr.msk.bf16.vlgmr.msra.gmra.mrb[116].mxu1 %vm245_vm4, %v6356_v18  ;;  %11129 = vmatmul.mubr.msk.bf16.vlgmr.msra.gmra.mrb[120].mxu0 %vm245_vm4, %v6356_v18  ;;  %v13915_v18 = vld [vmem:[#allocation6 + $0x78] sm:$0xff]  }
0x9392   :  { %11141 = vmatpush3.bf16.msra.mxu0 %v13725_v14  ;;  %11133 = vmatpush3.bf16.msra.mxu1 %v13751_v52 }
0x9393   :  { %11142 = vmatprep.subr.bf16.mxu0 %v12404_v0  ;;  %11134 = vmatprep.subr.bf16.mxu1 %v12404_v0 }
0x9394   :  { %11136 = vmatprep.mubr.msk.bf16.mxu1 %vm12405_vm0, %v12404_v0  ;;  %11144 = vmatprep.mubr.msk.bf16.mxu0 %vm12405_vm0, %v12404_v0 }
0x9396   :  { %11143 = vmatpush3.bf16.msra.mxu0 %v13729_v4  ;;  %11135 = vmatpush3.bf16.msra.mxu1 %v13754_v22 }
0x9397   :  { %11156 = vmatprep.subr.bf16.mxu0 %v12404_v0  ;;  %11148 = vmatprep.subr.bf16.mxu1 %v12404_v0 }
0x9464   :  { %v6436_v49 = vpop.f32.mrb[120].mxu0 }
0x9465   :  { %v11557_v15 = vadd.f32 %v13743_v16, %v6436_v49  ;;  %v11130_v7 = vpop.f32.mrb[121].mxu0  ;;  %v13929_v49 = vld [vmem:[#allocation8 + $0x7] ss:$0 sm:$0xff] }
0x9466   :  { %v6439_v8 = vpop.f32.mrb[122].mxu0 }
0x9467   :  { %v6443_v35 = vmul.f32 %v11557_v15, %v12596_v21  ;;  %v11131_v9 = vpop.f32.mrb[123].mxu0 }
0x9469   :  { %12169 = vtanh.f32 %v6443_v35 }
0x9473   :  { %v12170_v13 = vpop.eup %12169 }
0x9474   :  { %v6445_v28 = vmul.f32 %v12170_v13, %v12596_v21 }
0x9476   :  { %v6446_v42 = vadd.f32 %v6445_v28, %v12599_v29 }
0x9478   :  { %6449 = vrot.lane.b32.xlu0 %v6446_v42, %s12408_s14  ;;  %v6447_v20 = vmul.f32 %v6446_v42, %v6346_v1 }
0x94ea   :  { %v6450_v50 = vpop.permute.xlu0 %6449 }
0x94eb   :  { %v6452_v47 = vmul.f32 %v6450_v50, %v6446_v42 }
0x94ed   :  { %6454 = vrot.lane.b32.xlu1 %v6452_v47, %s12408_s14 }
0x955f   :  { %v6455_v51 = vpop.permute.xlu1 %6454 }
0x9560   :  { %v6457_v23 = vadd.f32 %v6455_v51, %v6447_v20 }
0x9562   :  { %12171 = vtanh.f32 %v6457_v23 }
0x956c   :  { %v12172_v24 = vpop.eup %12171 }
0x956d   :  { %6460 = vrot.lane.b32.xlu0 %v12172_v24, %s12408_s14 }
0x95df   :  { %v6461_v25 = vpop.permute.xlu0 %6460 }
0x95e0   :  { %v6463_v48 = vmul.f32 %v6461_v25, %v6446_v42  ;;  %v13937_v25 = vld [vmem:[#allocation4 + $0x70] sm:$0xff]  }
0x95e2   :  { %v6464_v26 = vpack.c.bf16 %v6463_v48, %v6463_v48  ;;  %v13940_v48 = vld [vmem:[#allocation4 + $0x78] sm:$0xff]  }
0x95e4   :  { %6466 = vrot.lane.b32.xlu1 %v6464_v26, %s12395_s29 }
0x9656   :  { %v6467_v27 = vpop.permute.xlu1 %6466 }
0x9657   :  { %11137 = vmatmul.mubr.msk.bf16.vlgmr.msra.gmra.mrb[120].mxu1 %vm245_vm4, %v6467_v27  ;;  %11145 = vmatmul.mubr.msk.bf16.vlgmr.msra.gmra.mrb[124].mxu0 %vm245_vm4, %v6467_v27 }
0x9658   :  { %11157 = vmatpush3.bf16.msra.mxu0 %v13725_v14  ;;  %11149 = vmatpush3.bf16.msra.mxu1 %v13751_v52 }
0x9659   :  { %11158 = vmatprep.subr.bf16.mxu0 %v12404_v0  ;;  %11150 = vmatprep.subr.bf16.mxu1 %v12404_v0 }
0x965a   :  { %11152 = vmatprep.mubr.msk.bf16.mxu1 %vm12405_vm0, %v12404_v0  ;;  %11160 = vmatprep.mubr.msk.bf16.mxu0 %vm12405_vm0, %v12404_v0 }
0x965c   :  { %11159 = vmatpush3.bf16.msra.mxu0 %v13729_v4  ;;  %11151 = vmatpush3.bf16.msra.mxu1 %v13754_v22 }
0x965d   :  { %11164 = vmatprep.subr.bf16.mxu1 %v12404_v0  ;;  %11180 = vmatprep.subr.bf16.mxu0 %v12404_v0 }
0x972a   :  { %v6547_v14 = vpop.f32.mrb[124].mxu0 }
0x972b   :  { %v11558_v54 = vadd.f32 %v13743_v16, %v6547_v14  ;;  %v11146_v30 = vpop.f32.mrb[125].mxu0 }
0x972c   :  { %v6550_v32 = vpop.f32.mrb[126].mxu0 }
0x972d   :  { %v6554_v17 = vmul.f32 %v11558_v54, %v12596_v21  ;;  %v11147_v33 = vpop.f32.mrb[127].mxu0 }
0x972f   :  { %12173 = vtanh.f32 %v6554_v17 }
0x9739   :  { %v12174_v37 = vpop.eup %12173 }
0x973a   :  { %v6556_v38 = vmul.f32 %v12174_v37, %v12596_v21 }
0x973c   :  { %v6557_v4 = vadd.f32 %v6556_v38, %v12599_v29 }
0x973e   :  { %6560 = vrot.lane.b32.xlu0 %v6557_v4, %s12408_s14  ;;  %v6558_v41 = vmul.f32 %v6557_v4, %v6457_v23 }
0x97b0   :  { %v6561_v39 = vpop.permute.xlu0 %6560 }
0x97b1   :  { %v6563_v40 = vmul.f32 %v6561_v39, %v6557_v4 }
0x97b3   :  { %6565 = vrot.lane.b32.xlu1 %v6563_v40, %s12408_s14 }
0x9825   :  { %v6566_v36 = vpop.permute.xlu1 %6565 }
0x9826   :  { %v6568_v63 = vadd.f32 %v6566_v36, %v6558_v41 }
0x9828   :  { %12175 = vtanh.f32 %v6568_v63 }
0x9832   :  { %v12176_v43 = vpop.eup %12175 }
0x9833   :  { %6571 = vrot.lane.b32.xlu0 %v12176_v43, %s12408_s14 }
0x98a5   :  { %v6572_v45 = vpop.permute.xlu0 %6571 }
0x98a6   :  { %v6574_v31 = vmul.f32 %v6572_v45, %v6557_v4 }
0x98a8   :  { %v6575_v46 = vpack.c.bf16 %v6574_v31, %v6574_v31 }
0x98aa   :  { %6577 = vrot.lane.b32.xlu1 %v6575_v46, %s12395_s29 }
0x991c   :  { %v6578_v53 = vpop.permute.xlu1 %6577 }
0x991d   :  { %11153 = vmatmul.mubr.msk.bf16.vlgmr.msra.gmra.mrb[124].mxu1 %vm245_vm4, %v6578_v53  ;;  %11161 = vmatmul.mubr.msk.bf16.vlgmr.msra.gmra.mrb[128].mxu0 %vm245_vm4, %v6578_v53 }
0x991e   :  { %11165 = vmatpush3.bf16.msra.mxu1 %v13751_v52  ;;  %11168 = vmatprep.mubr.msk.bf16.mxu1 %vm12405_vm0, %v12404_v0 }
0x991f   :  { %11166 = vmatprep.subr.bf16.mxu1 %v12404_v0  ;;  %11184 = vmatprep.mubr.msk.bf16.mxu0 %vm12405_vm0, %v12404_v0 }
0x9920   :  { %11181 = vmatpush3.bf16.msra.mxu0 %v13937_v25 }
0x9921   :  { %11182 = vmatprep.subr.bf16.mxu0 %v12404_v0 }
0x9922   :  { %11167 = vmatpush3.bf16.msra.mxu1 %v13754_v22 }
0x9923   :  { %11172 = vmatprep.subr.bf16.mxu1 %v12404_v0 }
0x9924   :  { %11183 = vmatpush3.bf16.msra.mxu0 %v13940_v48 }
0x9925   :  { %11196 = vmatprep.subr.bf16.mxu0 %v12404_v0 }
0x99f0   :  { %v6658_v55 = vpop.f32.mrb[128].mxu0 }
0x99f1   :  { %v11559_v44 = vadd.f32 %v13743_v16, %v6658_v55  ;;  %v11162_v56 = vpop.f32.mrb[129].mxu0 }
0x99f2   :  { %v6661_v57 = vpop.f32.mrb[130].mxu0 }
0x99f3   :  { %v6665_v58 = vmul.f32 %v11559_v44, %v12596_v21  ;;  %v11163_v52 = vpop.f32.mrb[131].mxu0 }
0x99f5   :  { %12177 = vtanh.f32 %v6665_v58 }
0x99ff   :  { %v12178_v3 = vpop.eup %12177 }
0x9a00   :  { %v6667_v19 = vmul.f32 %v12178_v3, %v12596_v21 }
0x9a02   :  { %v6668_v10 = vadd.f32 %v6667_v19, %v12599_v29 }
0x9a04   :  { %6671 = vrot.lane.b32.xlu0 %v6668_v10, %s12408_s14  ;;  %v6669_v60 = vmul.f32 %v6668_v10, %v6568_v63 }
0x9a76   :  { %v6672_v59 = vpop.permute.xlu0 %6671 }
0x9a77   :  { %v6674_v22 = vmul.f32 %v6672_v59, %v6668_v10 }
0x9a79   :  { %6676 = vrot.lane.b32.xlu1 %v6674_v22, %s12408_s14 }
0x9aeb   :  { %v6677_v61 = vpop.permute.xlu1 %6676 }
0x9aec   :  { %v6679_v16 = vadd.f32 %v6677_v61, %v6669_v60 }
0x9aee   :  { %12179 = vtanh.f32 %v6679_v16 }
0x9af8   :  { %v12180_v62 = vpop.eup %12179 }
0x9af9   :  { %6682 = vrot.lane.b32.xlu0 %v12180_v62, %s12408_s14 }
0x9b6b   :  { %v6683_v1 = vpop.permute.xlu0 %6682 }
0x9b6c   :  { %v6685_v34 = vmul.f32 %v6683_v1, %v6668_v10 }
0x9b6e   :  { %v6686_v2 = vpack.c.bf16 %v6685_v34, %v6685_v34 }
0x9b70   :  { %6688 = vrot.lane.b32.xlu1 %v6686_v2, %s12395_s29 }
0x9be2   :  { %v6689_v6 = vpop.permute.xlu1 %6688 }
0x9be3   :  { %11169 = vmatmul.mubr.msk.bf16.vlgmr.msra.gmra.mrb[128].mxu1 %vm245_vm4, %v6689_v6 }
0x9be4   :  { %11173 = vmatpush3.bf16.msra.mxu1 %v13911_v5  ;;  %11176 = vmatprep.mubr.msk.bf16.mxu1 %vm12405_vm0, %v12404_v0 }
0x9be5   :  { %11174 = vmatprep.subr.bf16.mxu1 %v12404_v0 }
0x9be8   :  { %11175 = vmatpush3.bf16.msra.mxu1 %v13915_v18 }
0x9be9   :  { %11188 = vmatprep.subr.bf16.mxu1 %v12404_v0 }
0x9beb   :  { %11177 = vmatmul.mubr.bf16.vlgmr.msra.gmra.mrb[100].mxu1 %v12406_v11 }
0x9bec   :  { %11189 = vmatpush3.bf16.msra.mxu1 %v13911_v5  ;;  %11192 = vmatprep.mubr.msk.bf16.mxu1 %vm12405_vm0, %v12404_v0 }
0x9bed   :  { %11190 = vmatprep.subr.bf16.mxu1 %v12404_v0 }
0x9bf0   :  { %11191 = vmatpush3.bf16.msra.mxu1 %v13915_v18 }
0x9bf1   :  { %11204 = vmatprep.subr.bf16.mxu1 %v12404_v0 }
0x9cbe   :  { %v6793_v15 = vpop.f32.mrb[100].mxu1 }
0x9cbf   :  { %v11560_v7 = vadd.f32 %v13929_v49, %v6793_v15  ;;  %v11178_v8 = vpop.f32.mrb[101].mxu1 }
0x9cc0   :  { %v6796_v35 = vpop.f32.mrb[102].mxu1 }
0x9cc1   :  { %v6800_v9 = vmul.f32 %v11560_v7, %v12596_v21  ;;  %v11179_v13 = vpop.f32.mrb[103].mxu1 }
0x9cc3   :  { %12181 = vtanh.f32 %v6800_v9 }
0x9ccd   :  { %v12182_v28 = vpop.eup %12181 }
0x9cce   :  { %v6802_v42 = vmul.f32 %v12182_v28, %v12596_v21 }
0x9cd0   :  { %v6803_v50 = vadd.f32 %v6802_v42, %v12599_v29 }
0x9cd2   :  { %6806 = vrot.lane.b32.xlu0 %v6803_v50, %s12408_s14  ;;  %v6804_v51 = vmul.f32 0.0, %v6803_v50 }
0x9d44   :  { %v6807_v47 = vpop.permute.xlu0 %6806 }
0x9d45   :  { %v6809_v20 = vmul.f32 %v6807_v47, %v6803_v50 }
0x9d47   :  { %6811 = vrot.lane.b32.xlu1 %v6809_v20, %s12408_s14 }
0x9db9   :  { %v6812_v23 = vpop.permute.xlu1 %6811 }
0x9dba   :  { %v6814_v24 = vadd.f32 %v6812_v23, %v6804_v51 }
0x9dbc   :  { %12183 = vtanh.f32 %v6814_v24 }
0x9dc6   :  { %v12184_v26 = vpop.eup %12183 }
0x9dc7   :  { %6817 = vrot.lane.b32.xlu0 %v12184_v26, %s12408_s14 }
0x9e39   :  { %v6818_v27 = vpop.permute.xlu0 %6817 }
0x9e3a   :  { %v6820_v14 = vmul.f32 %v6818_v27, %v6803_v50 }
0x9e3c   :  { %v6821_v54 = vpack.c.bf16 %v6820_v14, %v6820_v14 }
0x9e3e   :  { %6829 = vrot.lane.b32.xlu1 %v6821_v54, %s12395_s29 }
0x9eb0   :  { %v6830_v30 = vpop.permute.xlu1 %6829 }
0x9eb1   :  { %11185 = vmatmul.mubr.msk.bf16.vlgmr.msra.gmra.mrb[132].mxu0 %vm245_vm4, %v6830_v30  ;;  %11193 = vmatmul.mubr.msk.bf16.vlgmr.msra.gmra.mrb[104].mxu1 %vm245_vm4, %v6830_v30 }
0x9eb2   :  { %11205 = vmatpush3.bf16.msra.mxu1 %v13911_v5  ;;  %11197 = vmatpush3.bf16.msra.mxu0 %v13937_v25 }
0x9eb3   :  { %11206 = vmatprep.subr.bf16.mxu1 %v12404_v0  ;;  %11198 = vmatprep.subr.bf16.mxu0 %v12404_v0 }
0x9eb4   :  { %11200 = vmatprep.mubr.msk.bf16.mxu0 %vm12405_vm0, %v12404_v0  ;;  %11208 = vmatprep.mubr.msk.bf16.mxu1 %vm12405_vm0, %v12404_v0 }
0x9eb6   :  { %11207 = vmatpush3.bf16.msra.mxu1 %v13915_v18  ;;  %11199 = vmatpush3.bf16.msra.mxu0 %v13940_v48 }
0x9eb7   :  { %11220 = vmatprep.subr.bf16.mxu1 %v12404_v0  ;;  %11212 = vmatprep.subr.bf16.mxu0 %v12404_v0 }
0x9f84   :  { %v6922_v32 = vpop.f32.mrb[104].mxu1 }
0x9f85   :  { %v11561_v17 = vadd.f32 %v13929_v49, %v6922_v32  ;;  %v11194_v33 = vpop.f32.mrb[105].mxu1 }
0x9f86   :  { %v6925_v37 = vpop.f32.mrb[106].mxu1 }
0x9f87   :  { %v6929_v38 = vmul.f32 %v11561_v17, %v12596_v21  ;;  %v11195_v4 = vpop.f32.mrb[107].mxu1 }
0x9f89   :  { %12185 = vtanh.f32 %v6929_v38 }
0x9f93   :  { %v12186_v39 = vpop.eup %12185 }
0x9f94   :  { %v6931_v40 = vmul.f32 %v12186_v39, %v12596_v21 }
0x9f96   :  { %v6932_v41 = vadd.f32 %v6931_v40, %v12599_v29 }
0x9f98   :  { %6935 = vrot.lane.b32.xlu0 %v6932_v41, %s12408_s14  ;;  %v6933_v43 = vmul.f32 %v6932_v41, %v6814_v24 }
0xa00a   :  { %v6936_v36 = vpop.permute.xlu0 %6935 }
0xa00b   :  { %v6938_v63 = vmul.f32 %v6936_v36, %v6932_v41 }
0xa00d   :  { %6940 = vrot.lane.b32.xlu1 %v6938_v63, %s12408_s14 }
0xa07f   :  { %v6941_v45 = vpop.permute.xlu1 %6940 }
0xa080   :  { %v6943_v31 = vadd.f32 %v6941_v45, %v6933_v43 }
0xa082   :  { %12187 = vtanh.f32 %v6943_v31 }
0xa08c   :  { %v12188_v46 = vpop.eup %12187 }
0xa08d   :  { %6946 = vrot.lane.b32.xlu0 %v12188_v46, %s12408_s14 }
0xa0ff   :  { %v6947_v53 = vpop.permute.xlu0 %6946 }
0xa100   :  { %v6949_v55 = vmul.f32 %v6947_v53, %v6932_v41 }
0xa102   :  { %v6950_v44 = vpack.c.bf16 %v6949_v55, %v6949_v55 }
0xa104   :  { %6952 = vrot.lane.b32.xlu1 %v6950_v44, %s12395_s29 }
0xa176   :  { %v6953_v56 = vpop.permute.xlu1 %6952 }
0xa177   :  { %11201 = vmatmul.mubr.msk.bf16.vlgmr.msra.gmra.mrb[136].mxu0 %vm245_vm4, %v6953_v56  ;;  %11209 = vmatmul.mubr.msk.bf16.vlgmr.msra.gmra.mrb[108].mxu1 %vm245_vm4, %v6953_v56 }
0xa178   :  { %11221 = vmatpush3.bf16.msra.mxu1 %v13911_v5  ;;  %11213 = vmatpush3.bf16.msra.mxu0 %v13937_v25 }
0xa179   :  { %11222 = vmatprep.subr.bf16.mxu1 %v12404_v0  ;;  %11214 = vmatprep.subr.bf16.mxu0 %v12404_v0 }
0xa17a   :  { %11216 = vmatprep.mubr.msk.bf16.mxu0 %vm12405_vm0, %v12404_v0  ;;  %11224 = vmatprep.mubr.msk.bf16.mxu1 %vm12405_vm0, %v12404_v0 }
0xa17c   :  { %11223 = vmatpush3.bf16.msra.mxu1 %v13915_v18  ;;  %11215 = vmatpush3.bf16.msra.mxu0 %v13940_v48 }
0xa17d   :  { %11236 = vmatprep.subr.bf16.mxu1 %v12404_v0  ;;  %11228 = vmatprep.subr.bf16.mxu0 %v12404_v0 }
0xa24a   :  { %v7033_v57 = vpop.f32.mrb[108].mxu1 }
0xa24b   :  { %v11562_v58 = vadd.f32 %v13929_v49, %v7033_v57  ;;  %v11210_v52 = vpop.f32.mrb[109].mxu1 }
0xa24c   :  { %v7036_v3 = vpop.f32.mrb[110].mxu1 }
0xa24d   :  { %v7040_v19 = vmul.f32 %v11562_v58, %v12596_v21  ;;  %v11211_v10 = vpop.f32.mrb[111].mxu1 }
0xa24f   :  { %12189 = vtanh.f32 %v7040_v19 }
0xa259   :  { %v12190_v59 = vpop.eup %12189 }
0xa25a   :  { %v7042_v22 = vmul.f32 %v12190_v59, %v12596_v21 }
0xa25c   :  { %v7043_v60 = vadd.f32 %v7042_v22, %v12599_v29 }
0xa25e   :  { %7046 = vrot.lane.b32.xlu0 %v7043_v60, %s12408_s14  ;;  %v7044_v62 = vmul.f32 %v7043_v60, %v6943_v31 }
0xa2d0   :  { %v7047_v61 = vpop.permute.xlu0 %7046 }
0xa2d1   :  { %v7049_v16 = vmul.f32 %v7047_v61, %v7043_v60 }
0xa2d3   :  { %7051 = vrot.lane.b32.xlu1 %v7049_v16, %s12408_s14 }
0xa345   :  { %v7052_v1 = vpop.permute.xlu1 %7051 }
0xa346   :  { %v7054_v34 = vadd.f32 %v7052_v1, %v7044_v62 }
0xa348   :  { %12191 = vtanh.f32 %v7054_v34 }
0xa352   :  { %v12192_v2 = vpop.eup %12191 }
0xa353   :  { %7057 = vrot.lane.b32.xlu0 %v12192_v2, %s12408_s14 }
0xa3c5   :  { %v7058_v6 = vpop.permute.xlu0 %7057 }
0xa3c6   :  { %v7060_v15 = vmul.f32 %v7058_v6, %v7043_v60 }
0xa3c8   :  { %v7061_v7 = vpack.c.bf16 %v7060_v15, %v7060_v15 }
0xa3ca   :  { %7063 = vrot.lane.b32.xlu1 %v7061_v7, %s12395_s29 }
0xa43c   :  { %v7064_v8 = vpop.permute.xlu1 %7063 }
0xa43d   :  { %11217 = vmatmul.mubr.msk.bf16.vlgmr.msra.gmra.mrb[140].mxu0 %vm245_vm4, %v7064_v8  ;;  %11225 = vmatmul.mubr.msk.bf16.vlgmr.msra.gmra.mrb[112].mxu1 %vm245_vm4, %v7064_v8 }
0xa43e   :  { %11237 = vmatpush3.bf16.msra.mxu1 %v13911_v5  ;;  %11229 = vmatpush3.bf16.msra.mxu0 %v13937_v25 }
0xa43f   :  { %11238 = vmatprep.subr.bf16.mxu1 %v12404_v0  ;;  %11230 = vmatprep.subr.bf16.mxu0 %v12404_v0 }
0xa440   :  { %11232 = vmatprep.mubr.msk.bf16.mxu0 %vm12405_vm0, %v12404_v0  ;;  %11240 = vmatprep.mubr.msk.bf16.mxu1 %vm12405_vm0, %v12404_v0 }
0xa442   :  { %11239 = vmatpush3.bf16.msra.mxu1 %v13915_v18  ;;  %11231 = vmatpush3.bf16.msra.mxu0 %v13940_v48 }
0xa443   :  { %11252 = vmatprep.subr.bf16.mxu1 %v12404_v0  ;;  %11244 = vmatprep.subr.bf16.mxu0 %v12404_v0 }
0xa510   :  { %v7144_v35 = vpop.f32.mrb[112].mxu1 }
0xa511   :  { %v11563_v9 = vadd.f32 %v13929_v49, %v7144_v35  ;;  %v11226_v13 = vpop.f32.mrb[113].mxu1 }
0xa512   :  { %v7147_v28 = vpop.f32.mrb[114].mxu1 }
0xa513   :  { %v7151_v42 = vmul.f32 %v11563_v9, %v12596_v21  ;;  %v11227_v50 = vpop.f32.mrb[115].mxu1 }
0xa515   :  { %12193 = vtanh.f32 %v7151_v42 }
0xa51f   :  { %v12194_v47 = vpop.eup %12193 }
0xa520   :  { %v7153_v20 = vmul.f32 %v12194_v47, %v12596_v21 }
0xa522   :  { %v7154_v51 = vadd.f32 %v7153_v20, %v12599_v29 }
0xa524   :  { %7157 = vrot.lane.b32.xlu0 %v7154_v51, %s12408_s14  ;;  %v7155_v26 = vmul.f32 %v7154_v51, %v7054_v34 }
0xa596   :  { %v7158_v23 = vpop.permute.xlu0 %7157 }
0xa597   :  { %v7160_v24 = vmul.f32 %v7158_v23, %v7154_v51 }
0xa599   :  { %7162 = vrot.lane.b32.xlu1 %v7160_v24, %s12408_s14 }
0xa60b   :  { %v7163_v27 = vpop.permute.xlu1 %7162 }
0xa60c   :  { %v7165_v14 = vadd.f32 %v7163_v27, %v7155_v26 }
0xa60e   :  { %12195 = vtanh.f32 %v7165_v14 }
0xa618   :  { %v12196_v54 = vpop.eup %12195 }
0xa619   :  { %7168 = vrot.lane.b32.xlu0 %v12196_v54, %s12408_s14 }
0xa68b   :  { %v7169_v30 = vpop.permute.xlu0 %7168 }
0xa68c   :  { %v7171_v32 = vmul.f32 %v7169_v30, %v7154_v51 }
0xa68e   :  { %v7172_v17 = vpack.c.bf16 %v7171_v32, %v7171_v32 }
0xa690   :  { %7174 = vrot.lane.b32.xlu1 %v7172_v17, %s12395_s29 }
0xa702   :  { %v7175_v33 = vpop.permute.xlu1 %7174 }
0xa703   :  { %11233 = vmatmul.mubr.msk.bf16.vlgmr.msra.gmra.mrb[144].mxu0 %vm245_vm4, %v7175_v33  ;;  %11241 = vmatmul.mubr.msk.bf16.vlgmr.msra.gmra.mrb[116].mxu1 %vm245_vm4, %v7175_v33 }
0xa704   :  { %11253 = vmatpush3.bf16.msra.mxu1 %v13911_v5  ;;  %11245 = vmatpush3.bf16.msra.mxu0 %v13937_v25 }
0xa705   :  { %11254 = vmatprep.subr.bf16.mxu1 %v12404_v0  ;;  %11246 = vmatprep.subr.bf16.mxu0 %v12404_v0 }
0xa706   :  { %11248 = vmatprep.mubr.msk.bf16.mxu0 %vm12405_vm0, %v12404_v0  ;;  %11256 = vmatprep.mubr.msk.bf16.mxu1 %vm12405_vm0, %v12404_v0 }
0xa708   :  { %11255 = vmatpush3.bf16.msra.mxu1 %v13915_v18  ;;  %11247 = vmatpush3.bf16.msra.mxu0 %v13940_v48 }
0xa709   :  { %11268 = vmatprep.subr.bf16.mxu1 %v12404_v0  ;;  %11260 = vmatprep.subr.bf16.mxu0 %v12404_v0 }
0xa7d6   :  { %v7255_v37 = vpop.f32.mrb[116].mxu1 }
0xa7d7   :  { %v11564_v38 = vadd.f32 %v13929_v49, %v7255_v37  ;;  %v11242_v4 = vpop.f32.mrb[117].mxu1 }
0xa7d8   :  { %v7258_v39 = vpop.f32.mrb[118].mxu1 }
0xa7d9   :  { %v7262_v40 = vmul.f32 %v11564_v38, %v12596_v21  ;;  %v11243_v41 = vpop.f32.mrb[119].mxu1 }
0xa7db   :  { %12197 = vtanh.f32 %v7262_v40 }
0xa7e5   :  { %v12198_v36 = vpop.eup %12197 }
0xa7e6   :  { %v7264_v63 = vmul.f32 %v12198_v36, %v12596_v21 }
0xa7e8   :  { %v7265_v43 = vadd.f32 %v7264_v63, %v12599_v29 }
0xa7ea   :  { %7268 = vrot.lane.b32.xlu0 %v7265_v43, %s12408_s14  ;;  %v7266_v46 = vmul.f32 %v7265_v43, %v7165_v14 }
0xa85c   :  { %v7269_v45 = vpop.permute.xlu0 %7268 }
0xa85d   :  { %v7271_v31 = vmul.f32 %v7269_v45, %v7265_v43 }
0xa85f   :  { %7273 = vrot.lane.b32.xlu1 %v7271_v31, %s12408_s14 }
0xa8d1   :  { %v7274_v53 = vpop.permute.xlu1 %7273 }
0xa8d2   :  { %v7276_v55 = vadd.f32 %v7274_v53, %v7266_v46 }
0xa8d4   :  { %12199 = vtanh.f32 %v7276_v55 }
0xa8de   :  { %v12200_v44 = vpop.eup %12199 }
0xa8df   :  { %7279 = vrot.lane.b32.xlu0 %v12200_v44, %s12408_s14 }
0xa951   :  { %v7280_v56 = vpop.permute.xlu0 %7279 }
0xa952   :  { %v7282_v57 = vmul.f32 %v7280_v56, %v7265_v43 }
0xa954   :  { %v7283_v58 = vpack.c.bf16 %v7282_v57, %v7282_v57  ;;  %v14097_v57 = vld [vmem:[#allocation6 + $0x80] sm:$0xff]  }
0xa956   :  { %7285 = vrot.lane.b32.xlu1 %v7283_v58, %s12395_s29 }
0xa9c8   :  { %v7286_v52 = vpop.permute.xlu1 %7285 }
0xa9c9   :  { %11249 = vmatmul.mubr.msk.bf16.vlgmr.msra.gmra.mrb[148].mxu0 %vm245_vm4, %v7286_v52  ;;  %11257 = vmatmul.mubr.msk.bf16.vlgmr.msra.gmra.mrb[120].mxu1 %vm245_vm4, %v7286_v52  ;;  %v14101_v52 = vld [vmem:[#allocation6 + $0x88] sm:$0xff]  }
0xa9ca   :  { %11269 = vmatpush3.bf16.msra.mxu1 %v13911_v5  ;;  %11261 = vmatpush3.bf16.msra.mxu0 %v13937_v25 }
0xa9cb   :  { %11270 = vmatprep.subr.bf16.mxu1 %v12404_v0  ;;  %11262 = vmatprep.subr.bf16.mxu0 %v12404_v0 }
0xa9cc   :  { %11264 = vmatprep.mubr.msk.bf16.mxu0 %vm12405_vm0, %v12404_v0  ;;  %11272 = vmatprep.mubr.msk.bf16.mxu1 %vm12405_vm0, %v12404_v0 }
0xa9ce   :  { %11271 = vmatpush3.bf16.msra.mxu1 %v13915_v18  ;;  %11263 = vmatpush3.bf16.msra.mxu0 %v13940_v48 }
0xa9cf   :  { %11284 = vmatprep.subr.bf16.mxu1 %v12404_v0  ;;  %11276 = vmatprep.subr.bf16.mxu0 %v12404_v0 }
0xaa9c   :  { %v7366_v3 = vpop.f32.mrb[120].mxu1 }
0xaa9d   :  { %v11565_v19 = vadd.f32 %v13929_v49, %v7366_v3  ;;  %v11258_v10 = vpop.f32.mrb[121].mxu1  ;;  %v14115_v3 = vld [vmem:[#allocation8 + $0x8] ss:$0 sm:$0xff] }
0xaa9e   :  { %v7369_v59 = vpop.f32.mrb[122].mxu1 }
0xaa9f   :  { %v7373_v22 = vmul.f32 %v11565_v19, %v12596_v21  ;;  %v11259_v60 = vpop.f32.mrb[123].mxu1 }
0xaaa1   :  { %12201 = vtanh.f32 %v7373_v22 }
0xaaab   :  { %v12202_v61 = vpop.eup %12201 }
0xaaac   :  { %v7375_v16 = vmul.f32 %v12202_v61, %v12596_v21 }
0xaaae   :  { %v7376_v62 = vadd.f32 %v7375_v16, %v12599_v29 }
0xaab0   :  { %7379 = vrot.lane.b32.xlu0 %v7376_v62, %s12408_s14  ;;  %v7377_v2 = vmul.f32 %v7376_v62, %v7276_v55 }
0xab22   :  { %v7380_v1 = vpop.permute.xlu0 %7379 }
0xab23   :  { %v7382_v34 = vmul.f32 %v7380_v1, %v7376_v62 }
0xab25   :  { %7384 = vrot.lane.b32.xlu1 %v7382_v34, %s12408_s14 }
0xab97   :  { %v7385_v6 = vpop.permute.xlu1 %7384 }
0xab98   :  { %v7387_v15 = vadd.f32 %v7385_v6, %v7377_v2 }
0xab9a   :  { %12203 = vtanh.f32 %v7387_v15 }
0xaba4   :  { %v12204_v7 = vpop.eup %12203 }
0xaba5   :  { %7390 = vrot.lane.b32.xlu0 %v12204_v7, %s12408_s14 }
0xac17   :  { %v7391_v8 = vpop.permute.xlu0 %7390 }
0xac18   :  { %v7393_v35 = vmul.f32 %v7391_v8, %v7376_v62  ;;  %v14123_v8 = vld [vmem:[#allocation4 + $0x80] sm:$0xff]  }
0xac1a   :  { %v7394_v9 = vpack.c.bf16 %v7393_v35, %v7393_v35  ;;  %v14126_v35 = vld [vmem:[#allocation4 + $0x88] sm:$0xff]  }
0xac1c   :  { %7396 = vrot.lane.b32.xlu1 %v7394_v9, %s12395_s29 }
0xac8e   :  { %v7397_v13 = vpop.permute.xlu1 %7396 }
0xac8f   :  { %11265 = vmatmul.mubr.msk.bf16.vlgmr.msra.gmra.mrb[152].mxu0 %vm245_vm4, %v7397_v13  ;;  %11273 = vmatmul.mubr.msk.bf16.vlgmr.msra.gmra.mrb[124].mxu1 %vm245_vm4, %v7397_v13 }
0xac90   :  { %11285 = vmatpush3.bf16.msra.mxu1 %v13911_v5  ;;  %11277 = vmatpush3.bf16.msra.mxu0 %v13937_v25 }
0xac91   :  { %11286 = vmatprep.subr.bf16.mxu1 %v12404_v0  ;;  %11278 = vmatprep.subr.bf16.mxu0 %v12404_v0 }
0xac92   :  { %11280 = vmatprep.mubr.msk.bf16.mxu0 %vm12405_vm0, %v12404_v0  ;;  %11288 = vmatprep.mubr.msk.bf16.mxu1 %vm12405_vm0, %v12404_v0 }
0xac94   :  { %11287 = vmatpush3.bf16.msra.mxu1 %v13915_v18  ;;  %11279 = vmatpush3.bf16.msra.mxu0 %v13940_v48 }
0xac95   :  { %11292 = vmatprep.subr.bf16.mxu0 %v12404_v0  ;;  %11308 = vmatprep.subr.bf16.mxu1 %v12404_v0 }
0xad62   :  { %v7477_v5 = vpop.f32.mrb[124].mxu1 }
0xad63   :  { %v11566_v28 = vadd.f32 %v13929_v49, %v7477_v5  ;;  %v11274_v42 = vpop.f32.mrb[125].mxu1 }
0xad64   :  { %v7480_v50 = vpop.f32.mrb[126].mxu1 }
0xad65   :  { %v7484_v47 = vmul.f32 %v11566_v28, %v12596_v21  ;;  %v11275_v20 = vpop.f32.mrb[127].mxu1 }
0xad67   :  { %12205 = vtanh.f32 %v7484_v47 }
0xad71   :  { %v12206_v51 = vpop.eup %12205 }
0xad72   :  { %v7486_v23 = vmul.f32 %v12206_v51, %v12596_v21 }
0xad74   :  { %v7487_v18 = vadd.f32 %v7486_v23, %v12599_v29 }
0xad76   :  { %7490 = vrot.lane.b32.xlu0 %v7487_v18, %s12408_s14  ;;  %v7488_v27 = vmul.f32 %v7487_v18, %v7387_v15 }
0xade8   :  { %v7491_v24 = vpop.permute.xlu0 %7490 }
0xade9   :  { %v7493_v26 = vmul.f32 %v7491_v24, %v7487_v18 }
0xadeb   :  { %7495 = vrot.lane.b32.xlu1 %v7493_v26, %s12408_s14 }
0xae5d   :  { %v7496_v14 = vpop.permute.xlu1 %7495 }
0xae5e   :  { %v7498_v54 = vadd.f32 %v7496_v14, %v7488_v27 }
0xae60   :  { %12207 = vtanh.f32 %v7498_v54 }
0xae6a   :  { %v12208_v30 = vpop.eup %12207 }
0xae6b   :  { %7501 = vrot.lane.b32.xlu0 %v12208_v30, %s12408_s14 }
0xaedd   :  { %v7502_v32 = vpop.permute.xlu0 %7501 }
0xaede   :  { %v7504_v17 = vmul.f32 %v7502_v32, %v7487_v18 }
0xaee0   :  { %v7505_v33 = vpack.c.bf16 %v7504_v17, %v7504_v17 }
0xaee2   :  { %7507 = vrot.lane.b32.xlu1 %v7505_v33, %s12395_s29 }
0xaf54   :  { %v7508_v37 = vpop.permute.xlu1 %7507 }
0xaf55   :  { %11281 = vmatmul.mubr.msk.bf16.vlgmr.msra.gmra.mrb[156].mxu0 %vm245_vm4, %v7508_v37  ;;  %11289 = vmatmul.mubr.msk.bf16.vlgmr.msra.gmra.mrb[128].mxu1 %vm245_vm4, %v7508_v37 }
0xaf56   :  { %11293 = vmatpush3.bf16.msra.mxu0 %v13937_v25  ;;  %11296 = vmatprep.mubr.msk.bf16.mxu0 %vm12405_vm0, %v12404_v0 }
0xaf57   :  { %11294 = vmatprep.subr.bf16.mxu0 %v12404_v0  ;;  %11312 = vmatprep.mubr.msk.bf16.mxu1 %vm12405_vm0, %v12404_v0 }
0xaf58   :  { %11309 = vmatpush3.bf16.msra.mxu1 %v14123_v8 }
0xaf59   :  { %11310 = vmatprep.subr.bf16.mxu1 %v12404_v0 }
0xaf5a   :  { %11295 = vmatpush3.bf16.msra.mxu0 %v13940_v48 }
0xaf5b   :  { %11300 = vmatprep.subr.bf16.mxu0 %v12404_v0 }
0xaf5c   :  { %11311 = vmatpush3.bf16.msra.mxu1 %v14126_v35 }
0xaf5d   :  { %11324 = vmatprep.subr.bf16.mxu1 %v12404_v0 }
0xb028   :  { %v7588_v38 = vpop.f32.mrb[128].mxu1 }
0xb029   :  { %v11567_v4 = vadd.f32 %v13929_v49, %v7588_v38  ;;  %v11290_v39 = vpop.f32.mrb[129].mxu1 }
0xb02a   :  { %v7591_v40 = vpop.f32.mrb[130].mxu1 }
0xb02b   :  { %v7595_v41 = vmul.f32 %v11567_v4, %v12596_v21  ;;  %v11291_v25 = vpop.f32.mrb[131].mxu1 }
0xb02d   :  { %12209 = vtanh.f32 %v7595_v41 }
0xb037   :  { %v12210_v36 = vpop.eup %12209 }
0xb038   :  { %v7597_v63 = vmul.f32 %v12210_v36, %v12596_v21 }
0xb03a   :  { %v7598_v43 = vadd.f32 %v7597_v63, %v12599_v29 }
0xb03c   :  { %7601 = vrot.lane.b32.xlu0 %v7598_v43, %s12408_s14  ;;  %v7599_v31 = vmul.f32 %v7598_v43, %v7498_v54 }
0xb0ae   :  { %v7602_v45 = vpop.permute.xlu0 %7601 }
0xb0af   :  { %v7604_v48 = vmul.f32 %v7602_v45, %v7598_v43 }
0xb0b1   :  { %7606 = vrot.lane.b32.xlu1 %v7604_v48, %s12408_s14 }
0xb123   :  { %v7607_v46 = vpop.permute.xlu1 %7606 }
0xb124   :  { %v7609_v49 = vadd.f32 %v7607_v46, %v7599_v31 }
0xb126   :  { %12211 = vtanh.f32 %v7609_v49 }
0xb130   :  { %v12212_v53 = vpop.eup %12211 }
0xb131   :  { %7612 = vrot.lane.b32.xlu0 %v12212_v53, %s12408_s14 }
0xb1a3   :  { %v7613_v55 = vpop.permute.xlu0 %7612 }
0xb1a4   :  { %v7615_v44 = vmul.f32 %v7613_v55, %v7598_v43 }
0xb1a6   :  { %v7616_v56 = vpack.c.bf16 %v7615_v44, %v7615_v44 }
0xb1a8   :  { %7618 = vrot.lane.b32.xlu1 %v7616_v56, %s12395_s29 }
0xb21a   :  { %v7619_v58 = vpop.permute.xlu1 %7618 }
0xb21b   :  { %11297 = vmatmul.mubr.msk.bf16.vlgmr.msra.gmra.mrb[160].mxu0 %vm245_vm4, %v7619_v58 }
0xb21c   :  { %11301 = vmatpush3.bf16.msra.mxu0 %v14097_v57  ;;  %11304 = vmatprep.mubr.msk.bf16.mxu0 %vm12405_vm0, %v12404_v0 }
0xb21d   :  { %11302 = vmatprep.subr.bf16.mxu0 %v12404_v0 }
0xb220   :  { %11303 = vmatpush3.bf16.msra.mxu0 %v14101_v52 }
0xb221   :  { %11316 = vmatprep.subr.bf16.mxu0 %v12404_v0 }
0xb223   :  { %11305 = vmatmul.mubr.bf16.vlgmr.msra.gmra.mrb[132].mxu0 %v12406_v11 }
0xb224   :  { %11317 = vmatpush3.bf16.msra.mxu0 %v14097_v57  ;;  %11320 = vmatprep.mubr.msk.bf16.mxu0 %vm12405_vm0, %v12404_v0 }
0xb225   :  { %11318 = vmatprep.subr.bf16.mxu0 %v12404_v0 }
0xb228   :  { %11319 = vmatpush3.bf16.msra.mxu0 %v14101_v52 }
0xb229   :  { %11332 = vmatprep.subr.bf16.mxu0 %v12404_v0 }
0xb2f6   :  { %v7723_v19 = vpop.f32.mrb[132].mxu0 }
0xb2f7   :  { %v11568_v10 = vadd.f32 %v14115_v3, %v7723_v19  ;;  %v11306_v59 = vpop.f32.mrb[133].mxu0 }
0xb2f8   :  { %v7726_v22 = vpop.f32.mrb[134].mxu0 }
0xb2f9   :  { %v7730_v60 = vmul.f32 %v11568_v10, %v12596_v21  ;;  %v11307_v61 = vpop.f32.mrb[135].mxu0 }
0xb2fb   :  { %12213 = vtanh.f32 %v7730_v60 }
0xb305   :  { %v12214_v16 = vpop.eup %12213 }
0xb306   :  { %v7732_v62 = vmul.f32 %v12214_v16, %v12596_v21 }
0xb308   :  { %v7733_v1 = vadd.f32 %v7732_v62, %v12599_v29 }
0xb30a   :  { %7736 = vrot.lane.b32.xlu0 %v7733_v1, %s12408_s14  ;;  %v7734_v6 = vmul.f32 0.0, %v7733_v1 }
0xb37c   :  { %v7737_v34 = vpop.permute.xlu0 %7736 }
0xb37d   :  { %v7739_v2 = vmul.f32 %v7737_v34, %v7733_v1 }
0xb37f   :  { %7741 = vrot.lane.b32.xlu1 %v7739_v2, %s12408_s14 }
0xb3f1   :  { %v7742_v15 = vpop.permute.xlu1 %7741 }
0xb3f2   :  { %v7744_v7 = vadd.f32 %v7742_v15, %v7734_v6 }
0xb3f4   :  { %12215 = vtanh.f32 %v7744_v7 }
0xb3fe   :  { %v12216_v9 = vpop.eup %12215 }
0xb3ff   :  { %7747 = vrot.lane.b32.xlu0 %v12216_v9, %s12408_s14 }
0xb471   :  { %v7748_v13 = vpop.permute.xlu0 %7747 }
0xb472   :  { %v7750_v5 = vmul.f32 %v7748_v13, %v7733_v1 }
0xb474   :  { %v7751_v28 = vpack.c.bf16 %v7750_v5, %v7750_v5 }
0xb476   :  { %7759 = vrot.lane.b32.xlu1 %v7751_v28, %s12395_s29 }
0xb4e8   :  { %v7760_v42 = vpop.permute.xlu1 %7759 }
0xb4e9   :  { %11313 = vmatmul.mubr.msk.bf16.vlgmr.msra.gmra.mrb[132].mxu1 %vm245_vm4, %v7760_v42  ;;  %11321 = vmatmul.mubr.msk.bf16.vlgmr.msra.gmra.mrb[136].mxu0 %vm245_vm4, %v7760_v42 }
0xb4ea   :  { %11333 = vmatpush3.bf16.msra.mxu0 %v14097_v57  ;;  %11325 = vmatpush3.bf16.msra.mxu1 %v14123_v8 }
0xb4eb   :  { %11334 = vmatprep.subr.bf16.mxu0 %v12404_v0  ;;  %11326 = vmatprep.subr.bf16.mxu1 %v12404_v0 }
0xb4ec   :  { %11328 = vmatprep.mubr.msk.bf16.mxu1 %vm12405_vm0, %v12404_v0  ;;  %11336 = vmatprep.mubr.msk.bf16.mxu0 %vm12405_vm0, %v12404_v0 }
0xb4ee   :  { %11335 = vmatpush3.bf16.msra.mxu0 %v14101_v52  ;;  %11327 = vmatpush3.bf16.msra.mxu1 %v14126_v35 }
0xb4ef   :  { %11348 = vmatprep.subr.bf16.mxu0 %v12404_v0  ;;  %11340 = vmatprep.subr.bf16.mxu1 %v12404_v0 }
0xb5bc   :  { %v7852_v50 = vpop.f32.mrb[136].mxu0 }
0xb5bd   :  { %v11569_v47 = vadd.f32 %v14115_v3, %v7852_v50  ;;  %v11322_v20 = vpop.f32.mrb[137].mxu0 }
0xb5be   :  { %v7855_v51 = vpop.f32.mrb[138].mxu0 }
0xb5bf   :  { %v7859_v23 = vmul.f32 %v11569_v47, %v12596_v21  ;;  %v11323_v18 = vpop.f32.mrb[139].mxu0 }
0xb5c1   :  { %12217 = vtanh.f32 %v7859_v23 }
0xb5cb   :  { %v12218_v24 = vpop.eup %12217 }
0xb5cc   :  { %v7861_v26 = vmul.f32 %v12218_v24, %v12596_v21 }
0xb5ce   :  { %v7862_v27 = vadd.f32 %v7861_v26, %v12599_v29 }
0xb5d0   :  { %7865 = vrot.lane.b32.xlu0 %v7862_v27, %s12408_s14  ;;  %v7863_v30 = vmul.f32 %v7862_v27, %v7744_v7 }
0xb642   :  { %v7866_v14 = vpop.permute.xlu0 %7865 }
0xb643   :  { %v7868_v54 = vmul.f32 %v7866_v14, %v7862_v27 }
0xb645   :  { %7870 = vrot.lane.b32.xlu1 %v7868_v54, %s12408_s14 }
0xb6b7   :  { %v7871_v32 = vpop.permute.xlu1 %7870 }
0xb6b8   :  { %v7873_v17 = vadd.f32 %v7871_v32, %v7863_v30 }
0xb6ba   :  { %12219 = vtanh.f32 %v7873_v17 }
0xb6c4   :  { %v12220_v33 = vpop.eup %12219 }
0xb6c5   :  { %7876 = vrot.lane.b32.xlu0 %v12220_v33, %s12408_s14 }
0xb737   :  { %v7877_v37 = vpop.permute.xlu0 %7876 }
0xb738   :  { %v7879_v38 = vmul.f32 %v7877_v37, %v7862_v27 }
0xb73a   :  { %v7880_v4 = vpack.c.bf16 %v7879_v38, %v7879_v38 }
0xb73c   :  { %7882 = vrot.lane.b32.xlu1 %v7880_v4, %s12395_s29 }
0xb7ae   :  { %v7883_v39 = vpop.permute.xlu1 %7882 }
0xb7af   :  { %11329 = vmatmul.mubr.msk.bf16.vlgmr.msra.gmra.mrb[136].mxu1 %vm245_vm4, %v7883_v39  ;;  %11337 = vmatmul.mubr.msk.bf16.vlgmr.msra.gmra.mrb[140].mxu0 %vm245_vm4, %v7883_v39 }
0xb7b0   :  { %11349 = vmatpush3.bf16.msra.mxu0 %v14097_v57  ;;  %11341 = vmatpush3.bf16.msra.mxu1 %v14123_v8 }
0xb7b1   :  { %11350 = vmatprep.subr.bf16.mxu0 %v12404_v0  ;;  %11342 = vmatprep.subr.bf16.mxu1 %v12404_v0 }
0xb7b2   :  { %11344 = vmatprep.mubr.msk.bf16.mxu1 %vm12405_vm0, %v12404_v0  ;;  %11352 = vmatprep.mubr.msk.bf16.mxu0 %vm12405_vm0, %v12404_v0 }
0xb7b4   :  { %11351 = vmatpush3.bf16.msra.mxu0 %v14101_v52  ;;  %11343 = vmatpush3.bf16.msra.mxu1 %v14126_v35 }
0xb7b5   :  { %11364 = vmatprep.subr.bf16.mxu0 %v12404_v0  ;;  %11356 = vmatprep.subr.bf16.mxu1 %v12404_v0 }
0xb882   :  { %v7963_v40 = vpop.f32.mrb[140].mxu0 }
0xb883   :  { %v11570_v41 = vadd.f32 %v14115_v3, %v7963_v40  ;;  %v11338_v25 = vpop.f32.mrb[141].mxu0 }
0xb884   :  { %v7966_v36 = vpop.f32.mrb[142].mxu0 }
0xb885   :  { %v7970_v63 = vmul.f32 %v11570_v41, %v12596_v21  ;;  %v11339_v43 = vpop.f32.mrb[143].mxu0 }
0xb887   :  { %12221 = vtanh.f32 %v7970_v63 }
0xb891   :  { %v12222_v45 = vpop.eup %12221 }
0xb892   :  { %v7972_v48 = vmul.f32 %v12222_v45, %v12596_v21 }
0xb894   :  { %v7973_v31 = vadd.f32 %v7972_v48, %v12599_v29 }
0xb896   :  { %7976 = vrot.lane.b32.xlu0 %v7973_v31, %s12408_s14  ;;  %v7974_v53 = vmul.f32 %v7973_v31, %v7873_v17 }
0xb908   :  { %v7977_v46 = vpop.permute.xlu0 %7976 }
0xb909   :  { %v7979_v49 = vmul.f32 %v7977_v46, %v7973_v31 }
0xb90b   :  { %7981 = vrot.lane.b32.xlu1 %v7979_v49, %s12408_s14 }
0xb97d   :  { %v7982_v55 = vpop.permute.xlu1 %7981 }
0xb97e   :  { %v7984_v44 = vadd.f32 %v7982_v55, %v7974_v53 }
0xb980   :  { %12223 = vtanh.f32 %v7984_v44 }
0xb98a   :  { %v12224_v56 = vpop.eup %12223 }
0xb98b   :  { %7987 = vrot.lane.b32.xlu0 %v12224_v56, %s12408_s14 }
0xb9fd   :  { %v7988_v58 = vpop.permute.xlu0 %7987 }
0xb9fe   :  { %v7990_v19 = vmul.f32 %v7988_v58, %v7973_v31 }
0xba00   :  { %v7991_v10 = vpack.c.bf16 %v7990_v19, %v7990_v19 }
0xba02   :  { %7993 = vrot.lane.b32.xlu1 %v7991_v10, %s12395_s29 }
0xba74   :  { %v7994_v59 = vpop.permute.xlu1 %7993 }
0xba75   :  { %11345 = vmatmul.mubr.msk.bf16.vlgmr.msra.gmra.mrb[140].mxu1 %vm245_vm4, %v7994_v59  ;;  %11353 = vmatmul.mubr.msk.bf16.vlgmr.msra.gmra.mrb[144].mxu0 %vm245_vm4, %v7994_v59 }
0xba76   :  { %11365 = vmatpush3.bf16.msra.mxu0 %v14097_v57  ;;  %11357 = vmatpush3.bf16.msra.mxu1 %v14123_v8 }
0xba77   :  { %11366 = vmatprep.subr.bf16.mxu0 %v12404_v0  ;;  %11358 = vmatprep.subr.bf16.mxu1 %v12404_v0 }
0xba78   :  { %11360 = vmatprep.mubr.msk.bf16.mxu1 %vm12405_vm0, %v12404_v0  ;;  %11368 = vmatprep.mubr.msk.bf16.mxu0 %vm12405_vm0, %v12404_v0 }
0xba7a   :  { %11367 = vmatpush3.bf16.msra.mxu0 %v14101_v52  ;;  %11359 = vmatpush3.bf16.msra.mxu1 %v14126_v35 }
0xba7b   :  { %11380 = vmatprep.subr.bf16.mxu0 %v12404_v0  ;;  %11372 = vmatprep.subr.bf16.mxu1 %v12404_v0 }
0xbb48   :  { %v8074_v22 = vpop.f32.mrb[144].mxu0 }
0xbb49   :  { %v11571_v60 = vadd.f32 %v14115_v3, %v8074_v22  ;;  %v11354_v61 = vpop.f32.mrb[145].mxu0 }
0xbb4a   :  { %v8077_v16 = vpop.f32.mrb[146].mxu0 }
0xbb4b   :  { %v8081_v62 = vmul.f32 %v11571_v60, %v12596_v21  ;;  %v11355_v1 = vpop.f32.mrb[147].mxu0 }
0xbb4d   :  { %12225 = vtanh.f32 %v8081_v62 }
0xbb57   :  { %v12226_v34 = vpop.eup %12225 }
0xbb58   :  { %v8083_v2 = vmul.f32 %v12226_v34, %v12596_v21 }
0xbb5a   :  { %v8084_v6 = vadd.f32 %v8083_v2, %v12599_v29 }
0xbb5c   :  { %8087 = vrot.lane.b32.xlu0 %v8084_v6, %s12408_s14  ;;  %v8085_v9 = vmul.f32 %v8084_v6, %v7984_v44 }
0xbbce   :  { %v8088_v15 = vpop.permute.xlu0 %8087 }
0xbbcf   :  { %v8090_v7 = vmul.f32 %v8088_v15, %v8084_v6 }
0xbbd1   :  { %8092 = vrot.lane.b32.xlu1 %v8090_v7, %s12408_s14 }
0xbc43   :  { %v8093_v13 = vpop.permute.xlu1 %8092 }
0xbc44   :  { %v8095_v5 = vadd.f32 %v8093_v13, %v8085_v9 }
0xbc46   :  { %12227 = vtanh.f32 %v8095_v5 }
0xbc50   :  { %v12228_v28 = vpop.eup %12227 }
0xbc51   :  { %8098 = vrot.lane.b32.xlu0 %v12228_v28, %s12408_s14 }
0xbcc3   :  { %v8099_v42 = vpop.permute.xlu0 %8098 }
0xbcc4   :  { %v8101_v50 = vmul.f32 %v8099_v42, %v8084_v6 }
0xbcc6   :  { %v8102_v47 = vpack.c.bf16 %v8101_v50, %v8101_v50 }
0xbcc8   :  { %8104 = vrot.lane.b32.xlu1 %v8102_v47, %s12395_s29 }
0xbd3a   :  { %v8105_v20 = vpop.permute.xlu1 %8104 }
0xbd3b   :  { %11361 = vmatmul.mubr.msk.bf16.vlgmr.msra.gmra.mrb[144].mxu1 %vm245_vm4, %v8105_v20  ;;  %11369 = vmatmul.mubr.msk.bf16.vlgmr.msra.gmra.mrb[148].mxu0 %vm245_vm4, %v8105_v20 }
0xbd3c   :  { %11381 = vmatpush3.bf16.msra.mxu0 %v14097_v57  ;;  %11373 = vmatpush3.bf16.msra.mxu1 %v14123_v8 }
0xbd3d   :  { %11382 = vmatprep.subr.bf16.mxu0 %v12404_v0  ;;  %11374 = vmatprep.subr.bf16.mxu1 %v12404_v0 }
0xbd3e   :  { %11376 = vmatprep.mubr.msk.bf16.mxu1 %vm12405_vm0, %v12404_v0  ;;  %11384 = vmatprep.mubr.msk.bf16.mxu0 %vm12405_vm0, %v12404_v0 }
0xbd40   :  { %11383 = vmatpush3.bf16.msra.mxu0 %v14101_v52  ;;  %11375 = vmatpush3.bf16.msra.mxu1 %v14126_v35 }
0xbd41   :  { %11396 = vmatprep.subr.bf16.mxu0 %v12404_v0  ;;  %11388 = vmatprep.subr.bf16.mxu1 %v12404_v0 }
0xbe0e   :  { %v8185_v51 = vpop.f32.mrb[148].mxu0 }
0xbe0f   :  { %v11572_v23 = vadd.f32 %v14115_v3, %v8185_v51  ;;  %v11370_v18 = vpop.f32.mrb[149].mxu0 }
0xbe10   :  { %v8188_v24 = vpop.f32.mrb[150].mxu0 }
0xbe11   :  { %v8192_v26 = vmul.f32 %v11572_v23, %v12596_v21  ;;  %v11371_v27 = vpop.f32.mrb[151].mxu0 }
0xbe13   :  { %12229 = vtanh.f32 %v8192_v26 }
0xbe1d   :  { %v12230_v14 = vpop.eup %12229 }
0xbe1e   :  { %v8194_v54 = vmul.f32 %v12230_v14, %v12596_v21 }
0xbe20   :  { %v8195_v30 = vadd.f32 %v8194_v54, %v12599_v29 }
0xbe22   :  { %8198 = vrot.lane.b32.xlu0 %v8195_v30, %s12408_s14  ;;  %v8196_v33 = vmul.f32 %v8195_v30, %v8095_v5 }
0xbe94   :  { %v8199_v32 = vpop.permute.xlu0 %8198 }
0xbe95   :  { %v8201_v17 = vmul.f32 %v8199_v32, %v8195_v30 }
0xbe97   :  { %8203 = vrot.lane.b32.xlu1 %v8201_v17, %s12408_s14 }
0xbf09   :  { %v8204_v37 = vpop.permute.xlu1 %8203 }
0xbf0a   :  { %v8206_v38 = vadd.f32 %v8204_v37, %v8196_v33 }
0xbf0c   :  { %12231 = vtanh.f32 %v8206_v38 }
0xbf16   :  { %v12232_v4 = vpop.eup %12231 }
0xbf17   :  { %8209 = vrot.lane.b32.xlu0 %v12232_v4, %s12408_s14 }
0xbf89   :  { %v8210_v39 = vpop.permute.xlu0 %8209 }
0xbf8a   :  { %v8212_v40 = vmul.f32 %v8210_v39, %v8195_v30 }
0xbf8c   :  { %v8213_v41 = vpack.c.bf16 %v8212_v40, %v8212_v40  ;;  %v14281_v40 = vld [vmem:[#allocation6 + $0x90] sm:$0xff]  }
0xbf8e   :  { %8215 = vrot.lane.b32.xlu1 %v8213_v41, %s12395_s29 }
0xc000   :  { %v8216_v25 = vpop.permute.xlu1 %8215 }
0xc001   :  { %11377 = vmatmul.mubr.msk.bf16.vlgmr.msra.gmra.mrb[148].mxu1 %vm245_vm4, %v8216_v25  ;;  %11385 = vmatmul.mubr.msk.bf16.vlgmr.msra.gmra.mrb[152].mxu0 %vm245_vm4, %v8216_v25  ;;  %v14285_v25 = vld [vmem:[#allocation6 + $0x98] sm:$0xff]  }
0xc002   :  { %11397 = vmatpush3.bf16.msra.mxu0 %v14097_v57  ;;  %11389 = vmatpush3.bf16.msra.mxu1 %v14123_v8 }
0xc003   :  { %11398 = vmatprep.subr.bf16.mxu0 %v12404_v0  ;;  %11390 = vmatprep.subr.bf16.mxu1 %v12404_v0 }
0xc004   :  { %11392 = vmatprep.mubr.msk.bf16.mxu1 %vm12405_vm0, %v12404_v0  ;;  %11400 = vmatprep.mubr.msk.bf16.mxu0 %vm12405_vm0, %v12404_v0 }
0xc006   :  { %11399 = vmatpush3.bf16.msra.mxu0 %v14101_v52  ;;  %11391 = vmatpush3.bf16.msra.mxu1 %v14126_v35 }
0xc007   :  { %11412 = vmatprep.subr.bf16.mxu0 %v12404_v0  ;;  %11404 = vmatprep.subr.bf16.mxu1 %v12404_v0 }
0xc0d4   :  { %v8296_v36 = vpop.f32.mrb[152].mxu0 }
0xc0d5   :  { %v11573_v63 = vadd.f32 %v14115_v3, %v8296_v36  ;;  %v11386_v43 = vpop.f32.mrb[153].mxu0  ;;  %v14299_v36 = vld [vmem:[#allocation8 + $0x9] ss:$0 sm:$0xff] }
0xc0d6   :  { %v8299_v45 = vpop.f32.mrb[154].mxu0 }
0xc0d7   :  { %v8303_v48 = vmul.f32 %v11573_v63, %v12596_v21  ;;  %v11387_v31 = vpop.f32.mrb[155].mxu0 }
0xc0d9   :  { %12233 = vtanh.f32 %v8303_v48 }
0xc0e3   :  { %v12234_v46 = vpop.eup %12233 }
0xc0e4   :  { %v8305_v49 = vmul.f32 %v12234_v46, %v12596_v21 }
0xc0e6   :  { %v8306_v53 = vadd.f32 %v8305_v49, %v12599_v29 }
0xc0e8   :  { %8309 = vrot.lane.b32.xlu0 %v8306_v53, %s12408_s14  ;;  %v8307_v56 = vmul.f32 %v8306_v53, %v8206_v38 }
0xc15a   :  { %v8310_v55 = vpop.permute.xlu0 %8309 }
0xc15b   :  { %v8312_v44 = vmul.f32 %v8310_v55, %v8306_v53 }
0xc15d   :  { %8314 = vrot.lane.b32.xlu1 %v8312_v44, %s12408_s14 }
0xc1cf   :  { %v8315_v58 = vpop.permute.xlu1 %8314 }
0xc1d0   :  { %v8317_v19 = vadd.f32 %v8315_v58, %v8307_v56 }
0xc1d2   :  { %12235 = vtanh.f32 %v8317_v19 }
0xc1dc   :  { %v12236_v10 = vpop.eup %12235 }
0xc1dd   :  { %8320 = vrot.lane.b32.xlu0 %v12236_v10, %s12408_s14 }
0xc24f   :  { %v8321_v59 = vpop.permute.xlu0 %8320 }
0xc250   :  { %v8323_v22 = vmul.f32 %v8321_v59, %v8306_v53 }
0xc252   :  { %v8324_v60 = vpack.c.bf16 %v8323_v22, %v8323_v22 }
0xc254   :  { %8326 = vrot.lane.b32.xlu1 %v8324_v60, %s12395_s29 }
0xc2c6   :  { %v8327_v61 = vpop.permute.xlu1 %8326 }
0xc2c7   :  { %11393 = vmatmul.mubr.msk.bf16.vlgmr.msra.gmra.mrb[152].mxu1 %vm245_vm4, %v8327_v61  ;;  %11401 = vmatmul.mubr.msk.bf16.vlgmr.msra.gmra.mrb[156].mxu0 %vm245_vm4, %v8327_v61 }
0xc2c8   :  { %11413 = vmatpush3.bf16.msra.mxu0 %v14097_v57  ;;  %11405 = vmatpush3.bf16.msra.mxu1 %v14123_v8 }
0xc2c9   :  { %11414 = vmatprep.subr.bf16.mxu0 %v12404_v0  ;;  %11406 = vmatprep.subr.bf16.mxu1 %v12404_v0 }
0xc2ca   :  { %11408 = vmatprep.mubr.msk.bf16.mxu1 %vm12405_vm0, %v12404_v0  ;;  %11416 = vmatprep.mubr.msk.bf16.mxu0 %vm12405_vm0, %v12404_v0 }
0xc2cc   :  { %11415 = vmatpush3.bf16.msra.mxu0 %v14101_v52  ;;  %11407 = vmatpush3.bf16.msra.mxu1 %v14126_v35 }
0xc2cd   :  { %11420 = vmatprep.subr.bf16.mxu1 %v12404_v0 }
0xc39a   :  { %v8407_v16 = vpop.f32.mrb[156].mxu0 }
0xc39b   :  { %v11574_v57 = vadd.f32 %v14115_v3, %v8407_v16  ;;  %v11402_v62 = vpop.f32.mrb[157].mxu0 }
0xc39c   :  { %v8410_v1 = vpop.f32.mrb[158].mxu0 }
0xc39d   :  { %v8414_v34 = vmul.f32 %v11574_v57, %v12596_v21  ;;  %v11403_v2 = vpop.f32.mrb[159].mxu0 }
0xc39f   :  { %12237 = vtanh.f32 %v8414_v34 }
0xc3a9   :  { %v12238_v6 = vpop.eup %12237 }
0xc3aa   :  { %v8416_v15 = vmul.f32 %v12238_v6, %v12596_v21 }
0xc3ac   :  { %v8417_v7 = vadd.f32 %v8416_v15, %v12599_v29 }
0xc3ae   :  { %8420 = vrot.lane.b32.xlu0 %v8417_v7, %s12408_s14  ;;  %v8418_v13 = vmul.f32 %v8417_v7, %v8317_v19 }
0xc420   :  { %v8421_v52 = vpop.permute.xlu0 %8420 }
0xc421   :  { %v8423_v9 = vmul.f32 %v8421_v52, %v8417_v7 }
0xc423   :  { %8425 = vrot.lane.b32.xlu1 %v8423_v9, %s12408_s14 }
0xc495   :  { %v8426_v5 = vpop.permute.xlu1 %8425 }
0xc496   :  { %v8428_v28 = vadd.f32 %v8426_v5, %v8418_v13 }
0xc498   :  { %12239 = vtanh.f32 %v8428_v28 }
0xc4a2   :  { %v12240_v42 = vpop.eup %12239 }
0xc4a3   :  { %8431 = vrot.lane.b32.xlu0 %v12240_v42, %s12408_s14 }
0xc515   :  { %v8432_v50 = vpop.permute.xlu0 %8431 }
0xc516   :  { %v8434_v47 = vmul.f32 %v8432_v50, %v8417_v7 }
0xc518   :  { %v8435_v20 = vpack.c.bf16 %v8434_v47, %v8434_v47 }
0xc51a   :  { %8437 = vrot.lane.b32.xlu1 %v8435_v20, %s12395_s29 }
0xc58c   :  { %v8438_v51 = vpop.permute.xlu1 %8437 }
0xc58d   :  { %11409 = vmatmul.mubr.msk.bf16.vlgmr.msra.gmra.mrb[156].mxu1 %vm245_vm4, %v8438_v51  ;;  %11417 = vmatmul.mubr.msk.bf16.vlgmr.msra.gmra.mrb[160].mxu0 %vm245_vm4, %v8438_v51 }
0xc58e   :  { %11421 = vmatpush3.bf16.msra.mxu1 %v14123_v8  ;;  %11424 = vmatprep.mubr.msk.bf16.mxu1 %vm12405_vm0, %v12404_v0 }
0xc58f   :  { %11422 = vmatprep.subr.bf16.mxu1 %v12404_v0  ;;  %9240 = vmatprep.mubr.bf16.mxu0 %v12406_v11 }
0xc592   :  { %11423 = vmatpush3.bf16.msra.mxu1 %v14126_v35 }
0xc593   :  { %11428 = vmatprep.subr.bf16.mxu1 %v12404_v0 }
0xc660   :  { %v8518_v23 = vpop.f32.mrb[160].mxu0 }
0xc661   :  { %v11575_v18 = vadd.f32 %v14115_v3, %v8518_v23  ;;  %v11418_v24 = vpop.f32.mrb[161].mxu0 }
0xc662   :  { %v8521_v26 = vpop.f32.mrb[162].mxu0 }
0xc663   :  { %v8525_v27 = vmul.f32 %v11575_v18, %v12596_v21  ;;  %v11419_v14 = vpop.f32.mrb[163].mxu0 }
0xc665   :  { %12241 = vtanh.f32 %v8525_v27 }
0xc66f   :  { %v12242_v8 = vpop.eup %12241 }
0xc670   :  { %v8527_v54 = vmul.f32 %v12242_v8, %v12596_v21 }
0xc672   :  { %v8528_v30 = vadd.f32 %v8527_v54, %v12599_v29 }
0xc674   :  { %8531 = vrot.lane.b32.xlu0 %v8528_v30, %s12408_s14  ;;  %v8529_v17 = vmul.f32 %v8528_v30, %v8428_v28 }
0xc6e6   :  { %v8532_v32 = vpop.permute.xlu0 %8531 }
0xc6e7   :  { %v8534_v35 = vmul.f32 %v8532_v32, %v8528_v30 }
0xc6e9   :  { %8536 = vrot.lane.b32.xlu1 %v8534_v35, %s12408_s14 }
0xc75b   :  { %v8537_v33 = vpop.permute.xlu1 %8536 }
0xc75c   :  { %v8539_v3 = vadd.f32 %v8537_v33, %v8529_v17 }
0xc75e   :  { %12243 = vtanh.f32 %v8539_v3 }
0xc768   :  { %v12244_v37 = vpop.eup %12243 }
0xc769   :  { %8542 = vrot.lane.b32.xlu0 %v12244_v37, %s12408_s14 }
0xc7db   :  { %v8543_v38 = vpop.permute.xlu0 %8542 }
0xc7dc   :  { %v8545_v4 = vmul.f32 %v8543_v38, %v8528_v30 }
0xc7de   :  { %v8546_v39 = vpack.c.bf16 %v8545_v4, %v8545_v4 }
0xc7e0   :  { %8548 = vrot.lane.b32.xlu1 %v8546_v39, %s12395_s29 }
0xc852   :  { %v8549_v41 = vpop.permute.xlu1 %8548 }
0xc853   :  { %11425 = vmatmul.mubr.msk.bf16.vlgmr.msra.gmra.mrb[160].mxu1 %vm245_vm4, %v8549_v41 }
0xc854   :  { %11429 = vmatpush3.bf16.msra.mxu1 %v14281_v40  ;;  %11432 = vmatprep.mubr.msk.bf16.mxu1 %vm12405_vm0, %v12404_v0 }
0xc855   :  { %11430 = vmatprep.subr.bf16.mxu1 %v12404_v0 }
0xc858   :  { %11431 = vmatpush3.bf16.msra.mxu1 %v14285_v25 }
0xc859   :  { %11436 = vmatprep.subr.bf16.mxu1 %v12404_v0 }
0xc85b   :  { %11433 = vmatmul.mubr.bf16.vlgmr.msra.gmra.mrb[132].mxu1 %v12406_v11 }
0xc85c   :  { %11437 = vmatpush3.bf16.msra.mxu1 %v14281_v40  ;;  %11440 = vmatprep.mubr.msk.bf16.mxu1 %vm12405_vm0, %v12404_v0 }
0xc85d   :  { %11438 = vmatprep.subr.bf16.mxu1 %v12404_v0 }
0xc860   :  { %11439 = vmatpush3.bf16.msra.mxu1 %v14285_v25 }
0xc861   :  { %11444 = vmatprep.subr.bf16.mxu1 %v12404_v0 }
0xc92e   :  { %v8646_v63 = vpop.f32.mrb[132].mxu1 }
0xc92f   :  { %v11576_v43 = vadd.f32 %v14299_v36, %v8646_v63  ;;  %v11434_v45 = vpop.f32.mrb[133].mxu1 }
0xc930   :  { %v8649_v48 = vpop.f32.mrb[134].mxu1 }
0xc931   :  { %v8653_v11 = vmul.f32 %v11576_v43, %v12596_v21  ;;  %v11435_v31 = vpop.f32.mrb[135].mxu1 }
0xc933   :  { %12245 = vtanh.f32 %v8653_v11 }
0xc93d   :  { %v12246_v46 = vpop.eup %12245 }
0xc93e   :  { %v8655_v49 = vmul.f32 %v12246_v46, %v12596_v21 }
0xc940   :  { %v8656_v53 = vadd.f32 %v8655_v49, %v12599_v29 }
0xc942   :  { %8659 = vrot.lane.b32.xlu0 %v8656_v53, %s12408_s14  ;;  %v8657_v56 = vmul.f32 0.0, %v8656_v53 }
0xc9b4   :  { %v8660_v55 = vpop.permute.xlu0 %8659 }
0xc9b5   :  { %v8662_v44 = vmul.f32 %v8660_v55, %v8656_v53 }
0xc9b7   :  { %8664 = vrot.lane.b32.xlu1 %v8662_v44, %s12408_s14 }
0xca29   :  { %v8665_v58 = vpop.permute.xlu1 %8664 }
0xca2a   :  { %v8667_v19 = vadd.f32 %v8665_v58, %v8657_v56 }
0xca2c   :  { %12247 = vtanh.f32 %v8667_v19 }
0xca36   :  { %v12248_v10 = vpop.eup %12247 }
0xca37   :  { %8670 = vrot.lane.b32.xlu0 %v12248_v10, %s12408_s14 }
0xcaa9   :  { %v8671_v59 = vpop.permute.xlu0 %8670 }
0xcaaa   :  { %v8673_v22 = vmul.f32 %v8671_v59, %v8656_v53 }
0xcaac   :  { %v8675_v60 = vpack.c.bf16 %v8673_v22, %v8673_v22 }
0xcaae   :  { %8677 = vrot.lane.b32.xlu1 %v8675_v60, %s12395_s29 }
0xcb20   :  { %v8678_v61 = vpop.permute.xlu1 %8677 }
0xcb21   :  { %11441 = vmatmul.mubr.msk.bf16.vlgmr.msra.gmra.mrb[136].mxu1 %vm245_vm4, %v8678_v61 }
0xcb22   :  { %11445 = vmatpush3.bf16.msra.mxu1 %v14281_v40  ;;  %11448 = vmatprep.mubr.msk.bf16.mxu1 %vm12405_vm0, %v12404_v0 }
0xcb23   :  { %11446 = vmatprep.subr.bf16.mxu1 %v12404_v0 }
0xcb26   :  { %11447 = vmatpush3.bf16.msra.mxu1 %v14285_v25 }
0xcb27   :  { %11452 = vmatprep.subr.bf16.mxu1 %v12404_v0 }
0xcbf4   :  { %v8716_v16 = vpop.f32.mrb[136].mxu1 }
0xcbf5   :  { %v11577_v57 = vadd.f32 %v14299_v36, %v8716_v16  ;;  %v11442_v62 = vpop.f32.mrb[137].mxu1 }
0xcbf6   :  { %v8719_v1 = vpop.f32.mrb[138].mxu1 }
0xcbf7   :  { %v8723_v34 = vmul.f32 %v11577_v57, %v12596_v21  ;;  %v11443_v2 = vpop.f32.mrb[139].mxu1 }
0xcbf9   :  { %12249 = vtanh.f32 %v8723_v34 }
0xcc03   :  { %v12250_v6 = vpop.eup %12249 }
0xcc04   :  { %v8725_v15 = vmul.f32 %v12250_v6, %v12596_v21 }
0xcc06   :  { %v8726_v7 = vadd.f32 %v8725_v15, %v12599_v29 }
0xcc08   :  { %8729 = vrot.lane.b32.xlu0 %v8726_v7, %s12408_s14  ;;  %v8727_v13 = vmul.f32 %v8726_v7, %v8667_v19 }
0xcc7a   :  { %v8730_v52 = vpop.permute.xlu0 %8729 }
0xcc7b   :  { %v8732_v9 = vmul.f32 %v8730_v52, %v8726_v7 }
0xcc7d   :  { %8734 = vrot.lane.b32.xlu1 %v8732_v9, %s12408_s14 }
0xccef   :  { %v8735_v5 = vpop.permute.xlu1 %8734 }
0xccf0   :  { %v8737_v28 = vadd.f32 %v8735_v5, %v8727_v13 }
0xccf2   :  { %12251 = vtanh.f32 %v8737_v28 }
0xccfc   :  { %v12252_v42 = vpop.eup %12251 }
0xccfd   :  { %8740 = vrot.lane.b32.xlu0 %v12252_v42, %s12408_s14 }
0xcd6f   :  { %v8741_v50 = vpop.permute.xlu0 %8740 }
0xcd70   :  { %v8743_v47 = vmul.f32 %v8741_v50, %v8726_v7 }
0xcd72   :  { %v8745_v20 = vpack.c.bf16 %v8743_v47, %v8743_v47 }
0xcd74   :  { %8747 = vrot.lane.b32.xlu1 %v8745_v20, %s12395_s29 }
0xcde6   :  { %v8748_v51 = vpop.permute.xlu1 %8747 }
0xcde7   :  { %11449 = vmatmul.mubr.msk.bf16.vlgmr.msra.gmra.mrb[140].mxu1 %vm245_vm4, %v8748_v51 }
0xcde8   :  { %11453 = vmatpush3.bf16.msra.mxu1 %v14281_v40  ;;  %11456 = vmatprep.mubr.msk.bf16.mxu1 %vm12405_vm0, %v12404_v0 }
0xcde9   :  { %11454 = vmatprep.subr.bf16.mxu1 %v12404_v0 }
0xcdec   :  { %11455 = vmatpush3.bf16.msra.mxu1 %v14285_v25 }
0xcded   :  { %11460 = vmatprep.subr.bf16.mxu1 %v12404_v0 }
0xceba   :  { %v8786_v23 = vpop.f32.mrb[140].mxu1 }
0xcebb   :  { %v11578_v18 = vadd.f32 %v14299_v36, %v8786_v23  ;;  %v11450_v24 = vpop.f32.mrb[141].mxu1 }
0xcebc   :  { %v8789_v26 = vpop.f32.mrb[142].mxu1 }
0xcebd   :  { %v8793_v27 = vmul.f32 %v11578_v18, %v12596_v21  ;;  %v11451_v14 = vpop.f32.mrb[143].mxu1 }
0xcebf   :  { %12253 = vtanh.f32 %v8793_v27 }
0xcec9   :  { %v12254_v8 = vpop.eup %12253 }
0xceca   :  { %v8795_v54 = vmul.f32 %v12254_v8, %v12596_v21 }
0xcecc   :  { %v8796_v30 = vadd.f32 %v8795_v54, %v12599_v29 }
0xcece   :  { %8799 = vrot.lane.b32.xlu0 %v8796_v30, %s12408_s14  ;;  %v8797_v17 = vmul.f32 %v8796_v30, %v8737_v28 }
0xcf40   :  { %v8800_v32 = vpop.permute.xlu0 %8799 }
0xcf41   :  { %v8802_v35 = vmul.f32 %v8800_v32, %v8796_v30 }
0xcf43   :  { %8804 = vrot.lane.b32.xlu1 %v8802_v35, %s12408_s14 }
0xcfb5   :  { %v8805_v33 = vpop.permute.xlu1 %8804 }
0xcfb6   :  { %v8807_v3 = vadd.f32 %v8805_v33, %v8797_v17 }
0xcfb8   :  { %12255 = vtanh.f32 %v8807_v3 }
0xcfc2   :  { %v12256_v37 = vpop.eup %12255 }
0xcfc3   :  { %8810 = vrot.lane.b32.xlu0 %v12256_v37, %s12408_s14 }
0xd035   :  { %v8811_v38 = vpop.permute.xlu0 %8810 }
0xd036   :  { %v8813_v4 = vmul.f32 %v8811_v38, %v8796_v30 }
0xd038   :  { %v8815_v39 = vpack.c.bf16 %v8813_v4, %v8813_v4 }
0xd03a   :  { %8817 = vrot.lane.b32.xlu1 %v8815_v39, %s12395_s29 }
0xd0ac   :  { %v8818_v41 = vpop.permute.xlu1 %8817 }
0xd0ad   :  { %11457 = vmatmul.mubr.msk.bf16.vlgmr.msra.gmra.mrb[144].mxu1 %vm245_vm4, %v8818_v41 }
0xd0ae   :  { %11461 = vmatpush3.bf16.msra.mxu1 %v14281_v40  ;;  %11464 = vmatprep.mubr.msk.bf16.mxu1 %vm12405_vm0, %v12404_v0 }
0xd0af   :  { %11462 = vmatprep.subr.bf16.mxu1 %v12404_v0 }
0xd0b2   :  { %11463 = vmatpush3.bf16.msra.mxu1 %v14285_v25 }
0xd0b3   :  { %11468 = vmatprep.subr.bf16.mxu1 %v12404_v0 }
0xd180   :  { %v8856_v63 = vpop.f32.mrb[144].mxu1 }
0xd181   :  { %v11579_v43 = vadd.f32 %v14299_v36, %v8856_v63  ;;  %v11458_v45 = vpop.f32.mrb[145].mxu1 }
0xd182   :  { %v8859_v48 = vpop.f32.mrb[146].mxu1 }
0xd183   :  { %v8863_v11 = vmul.f32 %v11579_v43, %v12596_v21  ;;  %v11459_v31 = vpop.f32.mrb[147].mxu1 }
0xd185   :  { %12257 = vtanh.f32 %v8863_v11 }
0xd18f   :  { %v12258_v46 = vpop.eup %12257 }
0xd190   :  { %v8865_v49 = vmul.f32 %v12258_v46, %v12596_v21 }
0xd192   :  { %v8866_v53 = vadd.f32 %v8865_v49, %v12599_v29 }
0xd194   :  { %8869 = vrot.lane.b32.xlu0 %v8866_v53, %s12408_s14  ;;  %v8867_v56 = vmul.f32 %v8866_v53, %v8807_v3 }
0xd206   :  { %v8870_v55 = vpop.permute.xlu0 %8869 }
0xd207   :  { %v8872_v44 = vmul.f32 %v8870_v55, %v8866_v53 }
0xd209   :  { %8874 = vrot.lane.b32.xlu1 %v8872_v44, %s12408_s14 }
0xd27b   :  { %v8875_v58 = vpop.permute.xlu1 %8874 }
0xd27c   :  { %v8877_v19 = vadd.f32 %v8875_v58, %v8867_v56 }
0xd27e   :  { %12259 = vtanh.f32 %v8877_v19 }
0xd288   :  { %v12260_v10 = vpop.eup %12259 }
0xd289   :  { %8880 = vrot.lane.b32.xlu0 %v12260_v10, %s12408_s14 }
0xd2fb   :  { %v8881_v59 = vpop.permute.xlu0 %8880 }
0xd2fc   :  { %v8883_v22 = vmul.f32 %v8881_v59, %v8866_v53 }
0xd2fe   :  { %v8885_v60 = vpack.c.bf16 %v8883_v22, %v8883_v22 }
0xd300   :  { %8887 = vrot.lane.b32.xlu1 %v8885_v60, %s12395_s29 }
0xd372   :  { %v8888_v61 = vpop.permute.xlu1 %8887 }
0xd373   :  { %11465 = vmatmul.mubr.msk.bf16.vlgmr.msra.gmra.mrb[148].mxu1 %vm245_vm4, %v8888_v61 }
0xd374   :  { %11469 = vmatpush3.bf16.msra.mxu1 %v14281_v40  ;;  %11472 = vmatprep.mubr.msk.bf16.mxu1 %vm12405_vm0, %v12404_v0 }
0xd375   :  { %11470 = vmatprep.subr.bf16.mxu1 %v12404_v0 }
0xd378   :  { %11471 = vmatpush3.bf16.msra.mxu1 %v14285_v25 }
0xd379   :  { %11476 = vmatprep.subr.bf16.mxu1 %v12404_v0 }
0xd446   :  { %v8926_v16 = vpop.f32.mrb[148].mxu1 }
0xd447   :  { %v11580_v57 = vadd.f32 %v14299_v36, %v8926_v16  ;;  %v11466_v62 = vpop.f32.mrb[149].mxu1 }
0xd448   :  { %v8929_v1 = vpop.f32.mrb[150].mxu1 }
0xd449   :  { %v8933_v34 = vmul.f32 %v11580_v57, %v12596_v21  ;;  %v11467_v2 = vpop.f32.mrb[151].mxu1 }
0xd44b   :  { %12261 = vtanh.f32 %v8933_v34 }
0xd455   :  { %v12262_v6 = vpop.eup %12261 }
0xd456   :  { %v8935_v15 = vmul.f32 %v12262_v6, %v12596_v21 }
0xd458   :  { %v8936_v7 = vadd.f32 %v8935_v15, %v12599_v29 }
0xd45a   :  { %8939 = vrot.lane.b32.xlu0 %v8936_v7, %s12408_s14  ;;  %v8937_v13 = vmul.f32 %v8936_v7, %v8877_v19 }
0xd4cc   :  { %v8940_v52 = vpop.permute.xlu0 %8939 }
0xd4cd   :  { %v8942_v9 = vmul.f32 %v8940_v52, %v8936_v7 }
0xd4cf   :  { %8944 = vrot.lane.b32.xlu1 %v8942_v9, %s12408_s14 }
0xd541   :  { %v8945_v5 = vpop.permute.xlu1 %8944 }
0xd542   :  { %v8947_v28 = vadd.f32 %v8945_v5, %v8937_v13  ;;  %v11927_v13 = vld [vmem:[#allocation9] ss:$8 sps:$4 sm:$0xff]   ;;  %v11929_v5 = vld [vmem:[#allocation9 + $0x4] ss:$8 sps:$4 sm:$0xff]  }
0xd543   :  { %9208 = vmatprep.subr.bf16.mxu0 %v11929_v5 }
0xd544   :  { %12263 = vtanh.f32 %v8947_v28  ;;  %9209 = vmatpush1.bf16.msra.mxu0 %v11927_v13 }
0xd54e   :  { %v12264_v42 = vpop.eup %12263 }
0xd54f   :  { %8950 = vrot.lane.b32.xlu0 %v12264_v42, %s12408_s14  ;;  %v11930_v42 = vld [vmem:[#allocation9 + $0x10] ss:$8 sps:$4 sm:$0xff]  }
0xd5c1   :  { %v8951_v50 = vpop.permute.xlu0 %8950 }
0xd5c2   :  { %v8953_v47 = vmul.f32 %v8951_v50, %v8936_v7 }
0xd5c4   :  { %v8955_v20 = vpack.c.bf16 %v8953_v47, %v8953_v47 }
0xd5c6   :  { %8957 = vrot.lane.b32.xlu1 %v8955_v20, %s12395_s29 }
0xd638   :  { %v8958_v51 = vpop.permute.xlu1 %8957 }
0xd639   :  { %11473 = vmatmul.mubr.msk.bf16.vlgmr.msra.gmra.mrb[152].mxu1 %vm245_vm4, %v8958_v51 }
0xd63a   :  { %11477 = vmatpush3.bf16.msra.mxu1 %v14281_v40  ;;  %11480 = vmatprep.mubr.msk.bf16.mxu1 %vm12405_vm0, %v12404_v0 }
0xd63b   :  { %11478 = vmatprep.subr.bf16.mxu1 %v12404_v0 }
0xd63e   :  { %11479 = vmatpush3.bf16.msra.mxu1 %v14285_v25 }
0xd63f   :  { %11484 = vmatprep.subr.bf16.mxu1 %v12404_v0 }
0xd70c   :  { %v8996_v23 = vpop.f32.mrb[152].mxu1 }
0xd70d   :  { %v11581_v18 = vadd.f32 %v14299_v36, %v8996_v23  ;;  %v11474_v24 = vpop.f32.mrb[153].mxu1  ;;  %v11934_v23 = vld [vmem:[%s14486_s7] sm:$0xff]  }
0xd70e   :  { %v8999_v26 = vpop.f32.mrb[154].mxu1 }
0xd70f   :  { %v9003_v27 = vmul.f32 %v11581_v18, %v12596_v21  ;;  %v11475_v14 = vpop.f32.mrb[155].mxu1  ;;  %v11935_v18 = vld [vmem:[%s14486_s7 + $0x48] sm:$0xff]  }
0xd710   :  { %v11936_v26 = vld [vmem:[%s14486_s7 + $0x8] sm:$0xff]   ;;  %v11938_v14 = vld [vmem:[%s14486_s7 + $0x10] sm:$0xff]  }
0xd711   :  { %12265 = vtanh.f32 %v9003_v27  ;;  %v11937_v27 = vld [vmem:[%s14486_s7 + $0x50] sm:$0xff]  }
0xd71b   :  { %v12266_v8 = vpop.eup %12265 }
0xd71c   :  { %v9005_v54 = vmul.f32 %v12266_v8, %v12596_v21  ;;  %v11939_v8 = vld [vmem:[%s14486_s7 + $0x58] sm:$0xff]  }
0xd71e   :  { %v9006_v30 = vadd.f32 %v9005_v54, %v12599_v29  ;;  %v11940_v54 = vld [vmem:[%s14486_s7 + $0x18] sm:$0xff]  }
0xd720   :  { %9009 = vrot.lane.b32.xlu0 %v9006_v30, %s12408_s14  ;;  %v9007_v17 = vmul.f32 %v9006_v30, %v8947_v28  ;;  %v11932_v28 = vld [vmem:[#allocation9 + $0x14] ss:$8 sps:$4 sm:$0xff]  }
0xd721   :  { %9210 = vmatprep.subr.bf16.mxu0 %v11932_v28 }
0xd722   :  { %9211 = vmatpush1.bf16.msra.mxu0 %v11930_v42 }
0xd792   :  { %v9010_v32 = vpop.permute.xlu0 %9009 }
0xd793   :  { %v9012_v35 = vmul.f32 %v9010_v32, %v9006_v30  ;;  %v11942_v32 = vld [vmem:[%s14486_s7 + $0x20] sm:$0xff]  }
0xd795   :  { %9014 = vrot.lane.b32.xlu1 %v9012_v35, %s12408_s14  ;;  %v11943_v35 = vld [vmem:[%s14486_s7 + $0x68] sm:$0xff]  }
0xd807   :  { %v9015_v33 = vpop.permute.xlu1 %9014 }
0xd808   :  { %v9017_v3 = vadd.f32 %v9015_v33, %v9007_v17  ;;  %v11944_v17 = vld [vmem:[%s14486_s7 + $0x28] sm:$0xff]   ;;  %v11945_v33 = vld [vmem:[%s14486_s7 + $0x70] sm:$0xff]  }
0xd80a   :  { %12267 = vtanh.f32 %v9017_v3 }
0xd814   :  { %v12268_v37 = vpop.eup %12267 }
0xd815   :  { %9020 = vrot.lane.b32.xlu0 %v12268_v37, %s12408_s14  ;;  %v11947_v37 = vld [vmem:[%s14486_s7 + $0x78] sm:$0xff]  }
0xd887   :  { %v9021_v38 = vpop.permute.xlu0 %9020 }
0xd888   :  { %v9023_v4 = vmul.f32 %v9021_v38, %v9006_v30  ;;  %v11941_v30 = vld [vmem:[%s14486_s7 + $0x60] sm:$0xff]   ;;  %v11948_v38 = vld [vmem:[%s14486_s7 + $0x38] sm:$0xff]  }
0xd88a   :  { %v9025_v39 = vpack.c.bf16 %v9023_v4, %v9023_v4  ;;  %v9173_v4 = vshrl.u32 %v107_v12, 7  ;;  %v11950_v12 = vld [vmem:[#allocation11 + $0x8] sm:$0xff]  }
0xd88c   :  { %9027 = vrot.lane.b32.xlu1 %v9025_v39, %s12395_s29  ;;  %v9174_v39 = vsub.s32 0, %v9173_v4 }
0xd8fe   :  { %v9028_v41 = vpop.permute.xlu1 %9027 }
0xd8ff   :  { %11481 = vmatmul.mubr.msk.bf16.vlgmr.msra.gmra.mrb[156].mxu1 %vm245_vm4, %v9028_v41  ;;  %v9170_v41 = vld [vmem:[%s14485_s6] sm:$0x3] }
0xd900   :  { %11485 = vmatpush3.bf16.msra.mxu1 %v14281_v40  ;;  %11488 = vmatprep.mubr.msk.bf16.mxu1 %vm12405_vm0, %v12404_v0 }
0xd901   :  { %11486 = vmatprep.subr.bf16.mxu1 %v12404_v0 }
0xd904   :  { %11487 = vmatpush3.bf16.msra.mxu1 %v14285_v25 }
0xd9d2   :  { %v9066_v63 = vpop.f32.mrb[156].mxu1 }
0xd9d3   :  { %v11582_v43 = vadd.f32 %v14299_v36, %v9066_v63  ;;  %v11482_v45 = vpop.f32.mrb[157].mxu1  ;;  %v9178_v63 = vsub.s32 1, %v9173_v4 }
0xd9d4   :  { %v9069_v48 = vpop.f32.mrb[158].mxu1 }
0xd9d5   :  { %v9073_v11 = vmul.f32 %v11582_v43, %v12596_v21  ;;  %v11483_v31 = vpop.f32.mrb[159].mxu1  ;;  %v9175_v43 = vrot.slane %v9170_v41, %v9174_v39  ;;  %v9179_v45 = vrot.slane %v9170_v41, %v9178_v63 }
0xd9d7   :  { %12269 = vtanh.f32 %v9073_v11 }
0xd9e1   :  { %v12270_v46 = vpop.eup %12269 }
0xd9e2   :  { %v9075_v49 = vmul.f32 %v12270_v46, %v12596_v21 }
0xd9e4   :  { %v9076_v40 = vadd.f32 %v9075_v49, %v12599_v29 }
0xd9e6   :  { %9079 = vrot.lane.b32.xlu0 %v9076_v40, %s12408_s14  ;;  %v9077_v25 = vmul.f32 %v9076_v40, %v9017_v3  ;;  %v11946_v3 = vld [vmem:[%s14486_s7 + $0x30] sm:$0xff]  }
0xda58   :  { %v9080_v53 = vpop.permute.xlu0 %9079 }
0xda59   :  { %v9082_v55 = vmul.f32 %v9080_v53, %v9076_v40 }
0xda5b   :  { %9084 = vrot.lane.b32.xlu1 %v9082_v55, %s12408_s14 }
0xdacd   :  { %v9085_v44 = vpop.permute.xlu1 %9084 }
0xdace   :  { %v9087_v56 = vadd.f32 %v9085_v44, %v9077_v25  ;;  %v11949_v44 = vld [vmem:[#allocation11] sm:$0xff]  }
0xdad0   :  { %12271 = vtanh.f32 %v9087_v56 }
0xdada   :  { %v12272_v58 = vpop.eup %12271 }
0xdadb   :  { %9090 = vrot.lane.b32.xlu0 %v12272_v58, %s12408_s14  ;;  %v11951_v58 = vld [vmem:[#allocation11 + $0x10] sm:$0xff]  }
0xdb4d   :  { %v9091_v19 = vpop.permute.xlu0 %9090 }
0xdb4e   :  { %v9093_v10 = vmul.f32 %v9091_v19, %v9076_v40  ;;  %v11952_v19 = vld [vmem:[#allocation11 + $0x18] sm:$0xff]  }
0xdb50   :  { %v9095_v59 = vpack.c.bf16 %v9093_v10, %v9093_v10  ;;  %v11953_v10 = vld [vmem:[#allocation11 + $0x20] sm:$0xff]  }
0xdb52   :  { %9097 = vrot.lane.b32.xlu1 %v9095_v59, %s12395_s29  ;;  %v11954_v59 = vld [vmem:[#allocation11 + $0x28] sm:$0xff]  }
0xdbc4   :  { %v9098_v22 = vpop.permute.xlu1 %9097 }
0xdbc5   :  { %11489 = vmatmul.mubr.msk.bf16.vlgmr.msra.gmra.mrb[160].mxu1 %vm245_vm4, %v9098_v22  ;;  %v11955_v22 = vld [vmem:[#allocation11 + $0x30] sm:$0xff]  }
0xdc98   :  { %v9136_v60 = vpop.f32.mrb[160].mxu1 }
0xdc99   :  { %v11583_v61 = vadd.f32 %v14299_v36, %v9136_v60  ;;  %v11490_v16 = vpop.f32.mrb[161].mxu1  ;;  %v11956_v60 = vld [vmem:[#allocation11 + $0x38] sm:$0xff]  }
0xdc9a   :  { %v9139_v57 = vpop.f32.mrb[162].mxu1  ;;  %v9748_v16 = vld [vmem:[%s14487_s8] ss:$0 sm:$0xff] }
0xdc9b   :  { %v9143_v62 = vmul.f32 %v11583_v61, %v12596_v21  ;;  %v11491_v1 = vpop.f32.mrb[163].mxu1 }
0xdc9d   :  { %12273 = vtanh.f32 %v9143_v62 }
0xdca7   :  { %v12274_v34 = vpop.eup %12273 }
0xdca8   :  { %v9145_v2 = vmul.f32 %v12274_v34, %v12596_v21 }
0xdcaa   :  { %v9146_v6 = vadd.f32 %v9145_v2, %v12599_v29  ;;  %v11933_v29 = vld [vmem:[%s14486_s7 + $0x40] sm:$0xff]  }
0xdcab   :  { %10235 = vmatprep.subr.bf16.mxu0 %v11933_v29 }
0xdcac   :  { %9149 = vrot.lane.b32.xlu0 %v9146_v6, %s12408_s14  ;;  %v9147_v52 = vmul.f32 %v9146_v6, %v9087_v56 }
0xdd1e   :  { %v9150_v15 = vpop.permute.xlu0 %9149 }
0xdd1f   :  { %v9152_v7 = vmul.f32 %v9150_v15, %v9146_v6 }
0xdd21   :  { %9154 = vrot.lane.b32.xlu1 %v9152_v7, %s12408_s14  ;;  %v9765_v7 = vld [vmem:[%s14489_s10] ss:$0 sm:$0xff] }
0xdd93   :  { %v9155_v9 = vpop.permute.xlu1 %9154 }
0xdd94   :  { %v9157_v36 = vadd.f32 %v9155_v9, %v9147_v52 }
0xdd96   :  { %12275 = vtanh.f32 %v9157_v36 }
0xdda0   :  { %v12276_v21 = vpop.eup %12275 }
0xdda1   :  { %9160 = vrot.lane.b32.xlu0 %v12276_v21, %s12408_s14 }
0xde13   :  { %v9161_v50 = vpop.permute.xlu0 %9160 }
0xde14   :  { %v9163_v47 = vmul.f32 %v9161_v50, %v9146_v6 }
0xde16   :  { %v9164_v20 = vmax.f32 %v9163_v47, 0.0 }
0xde18   :  { %v9165_v51 = vpack.c.bf16 %v9164_v20, %v9164_v20 }
0xde1a   :  { %9183 = vrot.lane.b32.xlu1 %v9165_v51, %s12395_s29 }
0xde8c   :  { %v9184_v24 = vpop.permute.xlu1 %9183 }
0xde8d   :  { %9747 = vmatmul.mubr.msk.bf16.vlgmr.msra.gmra.mrb[164].mxu0 %vm245_vm4, %v9184_v24 }
0xde8e   :  { %10236 = vmatpush3.bf16.msra.mxu0 %v11934_v23 }
0xde8f   :  { %10237 = vmatprep.subr.bf16.mxu0 %v11935_v18 }
0xde92   :  { %10238 = vmatpush3.bf16.msra.mxu0 %v11936_v26 }
0xde93   :  { %10239 = vmatprep.subr.bf16.mxu0 %v11937_v27 }
0xde96   :  { %10240 = vmatpush3.bf16.msra.mxu0 %v11938_v14 }
0xde97   :  { %10241 = vmatprep.subr.bf16.mxu0 %v11939_v8 }
0xde9a   :  { %10242 = vmatpush3.bf16.msra.mxu0 %v11940_v54 }
0xde9b   :  { %10243 = vmatprep.subr.bf16.mxu0 %v11941_v30 }
0xde9e   :  { %10244 = vmatpush3.bf16.msra.mxu0 %v11942_v32 }
0xde9f   :  { %10245 = vmatprep.subr.bf16.mxu0 %v11943_v35 }
0xdea2   :  { %10246 = vmatpush3.bf16.msra.mxu0 %v11944_v17 }
0xdea3   :  { %10247 = vmatprep.subr.bf16.mxu0 %v11945_v33 }
0xdea6   :  { %10248 = vmatpush3.bf16.msra.mxu0 %v11946_v3 }
0xdea7   :  { %10249 = vmatprep.subr.bf16.mxu0 %v11947_v37 }
0xdeaa   :  { %10250 = vmatpush3.bf16.msra.mxu0 %v11948_v38 }
0xdeab   :  { %11492 = vmatprep.subr.bf16.mxu0 %v12404_v0 }
0xdf60   :  { %v9242_v48 = vpop.f32.mrb[164].mxu0 }
0xdf61   :  { %v9243_v11 = vadd.f32 %v9242_v48, %v9175_v43  ;;  %v9244_v31 = vpop.f32.mrb[165].mxu0 }
0xdf62   :  { %v9245_v46 = vadd.f32 %v9244_v31, %v9179_v45  ;;  %v9246_v49 = vpop.f32.mrb[166].mxu0 }
0xdf63   :  { %v9249_v40 = vmax.f32 %v9243_v11, 0.0  ;;  %v9247_v53 = vpop.f32.mrb[167].mxu0 }
0xdf64   :  { %v9250_v55 = vmax.f32 %v9245_v46, 0.0 }
0xdf65   :  { %v9251_v56 = vpack.c.bf16 %v9249_v40, %v9249_v40 }
0xdf66   :  { %v9252_v25 = vpack.c.bf16 %v9250_v55, %v9250_v55 }
0xdf68   :  { %9420 = vmatprep.mubr.bf16.mxu0 %v9252_v25 }
0xdf69   :  { %9421 = vmatmul.mubr.bf16.vlgmr.msra.gmra.mrb[168].mxu0 %v9251_v56 }
0xdf6a   :  { %11493 = vmatpush3.bf16.msra.mxu0 %v11949_v44  ;;  %11508 = vmatprep.mubr.msk.bf16.mxu0 %vm12405_vm0, %v12404_v0 }
0xdf6b   :  { %11494 = vmatprep.subr.bf16.mxu0 %v12404_v0 }
0xdf6e   :  { %11495 = vmatpush3.bf16.msra.mxu0 %v11950_v12 }
0xdf6f   :  { %11496 = vmatprep.subr.bf16.mxu0 %v12404_v0 }
0xdf72   :  { %11497 = vmatpush3.bf16.msra.mxu0 %v11951_v58 }
0xdf73   :  { %11498 = vmatprep.subr.bf16.mxu0 %v12404_v0 }
0xdf76   :  { %11499 = vmatpush3.bf16.msra.mxu0 %v11952_v19 }
0xdf77   :  { %11500 = vmatprep.subr.bf16.mxu0 %v12404_v0 }
0xdf7a   :  { %11501 = vmatpush3.bf16.msra.mxu0 %v11953_v10 }
0xdf7b   :  { %11502 = vmatprep.subr.bf16.mxu0 %v12404_v0 }
0xdf7e   :  { %11503 = vmatpush3.bf16.msra.mxu0 %v11954_v59 }
0xdf7f   :  { %11504 = vmatprep.subr.bf16.mxu0 %v12404_v0 }
0xdf82   :  { %11505 = vmatpush3.bf16.msra.mxu0 %v11955_v22 }
0xdf83   :  { %11506 = vmatprep.subr.bf16.mxu0 %v12404_v0 }
0xdf86   :  { %11507 = vmatpush3.bf16.msra.mxu0 %v11956_v60 }
0xe03c   :  { %v10251_v61 = vpop.f32.mrb[168].mxu0 }
0xe03d   :  { %v10252_v57 = vpop.f32.mrb[169].mxu0 }
0xe03e   :  { %v10253_v62 = vadd.f32 %v10252_v57, %v10251_v61  ;;  %v10254_v1 = vpop.f32.mrb[170].mxu0 }
0xe03f   :  { %v10255_v34 = vpop.f32.mrb[171].mxu0 }
0xe040   :  { %v9423_v2 = vadd.f32 %v10253_v62, %v9748_v16 }
0xe042   :  { %v9428_v6 = vmax.f32 %v9423_v2, 0.0 }
0xe044   :  { %v9429_v15 = vpack.c.bf16 %v9428_v6, %v9428_v6 }
0xe046   :  { %11509 = vmatmul.mubr.bf16.vlgmr.msra.gmra.mrb[172].mxu0 %v9429_v15 }
0xe119   :  { %v9535_v0 = vpop.f32.mrb[172].mxu0 }
0xe11a   :  { %v9536_v52 = vadd.f32 %v9765_v7, %v9535_v0  ;;  %v11510_v9 = vpop.f32.mrb[173].mxu0 }
0xe11b   :  { %v9538_v36 = vpop.f32.mrb[174].mxu0 }
0xe11c   :  { %9541 = vst [vmem:[%s14490_s11] sm:$0xff] %v9536_v52  ;;  %v11511_v13 = vpop.f32.mrb[175].mxu0 }
0xe11d   :  { %9546 = vsyncpa [#allocation5], 1 }
0xe11e   :  { %9547 = vsyncpa [#allocation7], 1 }
0xe11f   :  { %9548 = vsyncpa [#allocation10], 1 }

</bundles_post_ra>
